<compile_context>
chip_gen: v7x
topology: tpu7x:2x2x1
jax: 0.10.0
libtpu: 0.0.40
codegen_flags: <defaults>
</compile_context>

<pallas_src>
import math
import functools

import jax
import jax.numpy as jnp
from jax.experimental import pallas as pl
from jax.experimental.pallas import tpu as pltpu

LATENT_DIM = 20
GEN_HIDDEN = 50
DIS_HIDDEN = 50
WINDOW_SIZE = 30
NUM_LAYERS = 20

H = 50                 # LSTM hidden size (generator and discriminator)
HP = 128               # hidden padded to one 128-lane slab (per gate, per dir)
GP = 4 * HP            # gate block per direction: [i|f|g|o] = 512 lanes
DIN_PAD = 2 * HP       # padded per-layer input width: [h_fwd(128) | h_bwd(128)]


# ----------------------------------------------------------------------------
# Fused kernel: one grid step == one bidirectional LSTM layer (both directions)
# ----------------------------------------------------------------------------
def _stacked_bilstm_head_kernel(x_ref, wih_ref, whhf_ref, whhb_ref, b_ref,
                                wfc_ref, bfc_ref, out_ref, act_ref, gx_ref,
                                *, T, B):
    """Stacked BiLSTM + fused fc(relu(out[:, -1, :])) head.

    x_ref    : (T*B, DIN_PAD)      layer-0 input, zero-padded on lanes (f32)
    wih_ref  : (1, DIN_PAD, 2*GP)  input->gates weights [fwd 512 | bwd 512] (bf16)
    whhf_ref : (1, HP, GP)         fwd recurrent weights, dense (bf16)
    whhb_ref : (1, HP, GP)         bwd recurrent weights, dense (bf16)
    b_ref    : (1, 1, 2*GP)        b_ih + b_hh (gate-padded, f32)
    wfc_ref  : (DIN_PAD, O)        FC head weights (rows padded like act, f32)
    bfc_ref  : (1, O)
    out_ref  : (B, O)              written on the last layer only
    act_ref  : (T*B, DIN_PAD)      persistent VMEM scratch: layer output /
                                   next-layer input, [h_fwd(128)|h_bwd(128)]
    gx_ref   : (T*B, 2*GP)         VMEM staging for the hoisted input projection
    """
    layer = pl.program_id(0)
    num_layers = pl.num_programs(0)

    # Layer 0 consumes the external input; later layers consume the previous
    # layer's output, which persists in the VMEM scratch across grid steps.
    @pl.when(layer == 0)
    def _():
        act_ref[...] = x_ref[...]

    # Input projection for all time steps & both directions, hoisted out of
    # the serial recurrence:  bf16 x bf16 MXU, f32 accumulate, staged in VMEM.
    act_bf = act_ref[...].astype(jnp.bfloat16)
    gx_ref[...] = (jnp.dot(act_bf, wih_ref[0],
                           preferred_element_type=jnp.float32)
                   + b_ref[0])                               # (T*B, 2*GP) f32

    def _sigmoid(v):
        # 1 / (1 + exp(-v)): exp + approx reciprocal both ride the EUP slot.
        return pl.reciprocal(1.0 + jnp.exp(-v), approx=True)

    def cell(gates, c_prev):
        # gates: (B, GP) with i/f/g/o each in its own 128-lane slab.
        i = _sigmoid(gates[:, 0 * HP:1 * HP])
        f = _sigmoid(gates[:, 1 * HP:2 * HP])
        g = jnp.tanh(gates[:, 2 * HP:3 * HP])
        o = _sigmoid(gates[:, 3 * HP:4 * HP])
        c = f * c_prev + i * g
        h = o * jnp.tanh(c)
        return h, c

    zeros = jnp.zeros((B, HP), jnp.float32)
    h_f, c_f, h_b, c_b = zeros, zeros, zeros, zeros

    for s in range(T):                                 # fully unrolled (T static)
        r0, r1 = s * B, (s + 1) * B                    # fwd reads/writes time s
        q0, q1 = (T - 1 - s) * B, (T - s) * B          # bwd reads/writes T-1-s
        # Per-direction recurrent matmuls (dense K=128 RHS each; no concat of
        # hidden state on the serial path).
        rec_f = jnp.dot(h_f.astype(jnp.bfloat16), whhf_ref[0],
                        preferred_element_type=jnp.float32)     # (B, GP)
        rec_b = jnp.dot(h_b.astype(jnp.bfloat16), whhb_ref[0],
                        preferred_element_type=jnp.float32)     # (B, GP)
        h_f, c_f = cell(gx_ref[r0:r1, 0:GP] + rec_f, c_f)
        h_b, c_b = cell(gx_ref[q0:q1, GP:2 * GP] + rec_b, c_b)
        # Lane- and sublane-dense (8, 128) stores of this layer's output.
        act_ref[r0:r1, 0:HP] = h_f
        act_ref[q0:q1, HP:2 * HP] = h_b

    # Fused head on the last layer:  fc(relu(out[:, -1, :])).
    # Rows (T-1)*B : T*B of act_ref hold [h_fwd(T-1) | h_bwd(T-1)].
    @pl.when(layer == num_layers - 1)
    def _():
        last = act_ref[(T - 1) * B:T * B, :]                     # (B, 256)
        last = jnp.maximum(last, 0.0)
        out_ref[...] = (jnp.dot(last, wfc_ref[...],
                                preferred_element_type=jnp.float32)
                        + bfc_ref[...])


# ----------------------------------------------------------------------------
# pallas_call wrapper
# ----------------------------------------------------------------------------
def stacked_bilstm_head(x_btd, lstm_packed, fc_packed):
    """out = fc(relu(BiLSTM_stack(x)[:, -1, :]));  x is batch-first (B, T, D)."""
    wih, whh_f, whh_b, b = lstm_packed
    wfc, bfc = fc_packed
    num_layers = wih.shape[0]
    bsz, t_len, din = x_btd.shape
    out_dim = wfc.shape[1]

    # Pad batch to a full sublane tile so all per-step stores are (8,128)
    # unmasked tiles and gate math runs at full sublane occupancy.
    b_pad = ((bsz + 7) // 8) * 8

    # time-major, batch- and lane-padded, flattened to (T*Bpad, DIN_PAD).
    x_tm = jnp.transpose(x_btd, (1, 0, 2))                       # (T, B, D)
    x_tm = jnp.pad(x_tm, ((0, 0), (0, b_pad - bsz), (0, DIN_PAD - din)))
    x_tm = x_tm.reshape(t_len * b_pad, DIN_PAD)

    kernel = functools.partial(_stacked_bilstm_head_kernel, T=t_len, B=b_pad)
    out = pl.pallas_call(
        kernel,
        grid=(num_layers,),
        out_shape=jax.ShapeDtypeStruct((b_pad, out_dim), jnp.float32),
        in_specs=[
            pl.BlockSpec((t_len * b_pad, DIN_PAD), lambda l: (0, 0)),
            pl.BlockSpec((1, DIN_PAD, 2 * GP), lambda l: (l, 0, 0)),
            pl.BlockSpec((1, HP, GP), lambda l: (l, 0, 0)),
            pl.BlockSpec((1, HP, GP), lambda l: (l, 0, 0)),
            pl.BlockSpec((1, 1, 2 * GP), lambda l: (l, 0, 0)),
            pl.BlockSpec((DIN_PAD, out_dim), lambda l: (0, 0)),
            pl.BlockSpec((1, out_dim), lambda l: (0, 0)),
        ],
        out_specs=pl.BlockSpec((b_pad, out_dim), lambda l: (0, 0)),
        scratch_shapes=[
            pltpu.VMEM((t_len * b_pad, DIN_PAD), jnp.float32),   # activations
            pltpu.VMEM((t_len * b_pad, 2 * GP), jnp.float32),    # gx staging
        ],
        compiler_params=pltpu.CompilerParams(
            dimension_semantics=("arbitrary",)),   # layers are sequential
    )(x_tm, wih, whh_f, whh_b, b, wfc, bfc)
    return out[:bsz]


# ----------------------------------------------------------------------------
# Parameter init (PyTorch-style uniform) packed into the fused/padded layout
# ----------------------------------------------------------------------------
def _gate_pad(w):
    """(rows, 4H) -> (rows, GP): each gate's H columns padded to a 128 slab."""
    parts = []
    for g in range(4):
        blk = w[:, g * H:(g + 1) * H]
        parts.append(jnp.pad(blk, ((0, 0), (0, HP - H))))
    return jnp.concatenate(parts, axis=-1)


def init_packed_bilstm(key, input_size, hidden_size, num_layers):
    """Returns (W_ih, W_hh_fwd, W_hh_bwd, b):
       W_ih     : (L, DIN_PAD, 2*GP) bf16  rows = padded layer-input features
       W_hh_fwd : (L, HP, GP)        bf16  dense per-direction recurrent weights
       W_hh_bwd : (L, HP, GP)        bf16
       b        : (L, 1, 2*GP)       f32   b_ih + b_hh, gate-padded."""
    assert hidden_size == H and H <= HP
    k = 1.0 / math.sqrt(hidden_size)
    wih_all, whhf_all, whhb_all, b_all = [], [], [], []
    for layer in range(num_layers):
        din = input_size if layer == 0 else 2 * hidden_size
        wih_l = jnp.zeros((DIN_PAD, 2 * GP), jnp.float32)
        b_l = jnp.zeros((1, 2 * GP), jnp.float32)
        whh_dirs = []
        for d in range(2):                                  # 0 = fwd, 1 = bwd
            key, k1, k2, k3, k4 = jax.random.split(key, 5)
            w_ih = jax.random.uniform(k1, (4 * H, din), jnp.float32, -k, k)
            w_hh = jax.random.uniform(k2, (4 * H, H), jnp.float32, -k, k)
            b_ih = jax.random.uniform(k3, (4 * H,), jnp.float32, -k, k)
            b_hh = jax.random.uniform(k4, (4 * H,), jnp.float32, -k, k)

            wih_g = _gate_pad(w_ih.T)                       # (din, GP)
            if layer == 0:
                wih_l = wih_l.at[:din, d * GP:(d + 1) * GP].set(wih_g)
            else:  # input features = [h_fwd (50 of 128) | h_bwd (50 of 128)]
                wih_l = wih_l.at[0:H, d * GP:(d + 1) * GP].set(wih_g[0:H])
                wih_l = wih_l.at[HP:HP + H, d * GP:(d + 1) * GP].set(
                    wih_g[H:2 * H])
            whh_d = jnp.zeros((HP, GP), jnp.float32)
            whh_d = whh_d.at[0:H, :].set(_gate_pad(w_hh.T))  # (H, GP)
            whh_dirs.append(whh_d)
            b_l = b_l.at[:, d * GP:(d + 1) * GP].set(
                _gate_pad((b_ih + b_hh)[None, :]))
        wih_all.append(wih_l)
        whhf_all.append(whh_dirs[0])
        whhb_all.append(whh_dirs[1])
        b_all.append(b_l)
    return key, (jnp.stack(wih_all).astype(jnp.bfloat16),
                 jnp.stack(whhf_all).astype(jnp.bfloat16),
                 jnp.stack(whhb_all).astype(jnp.bfloat16),
                 jnp.stack(b_all))


def init_packed_fc(key, hidden_size, out_features):
    in_features = 2 * hidden_size
    k = 1.0 / math.sqrt(in_features)
    key, k1, k2 = jax.random.split(key, 3)
    w = jax.random.uniform(k1, (out_features, in_features), jnp.float32, -k, k)
    b = jax.random.uniform(k2, (out_features,), jnp.float32, -k, k)
    wt = w.T                                                 # (2H, out)
    w_packed = jnp.zeros((DIN_PAD, out_features), jnp.float32)
    w_packed = w_packed.at[0:H, :].set(wt[0:H])              # fwd half
    w_packed = w_packed.at[HP:HP + H, :].set(wt[H:2 * H])    # bwd half
    return key, (w_packed, b.reshape(1, out_features))


def init_lstm_gan_params(key):
    key, gen_lstm = init_packed_bilstm(key, LATENT_DIM, GEN_HIDDEN, NUM_LAYERS)
    key, gen_fc = init_packed_fc(key, GEN_HIDDEN, WINDOW_SIZE)
    key, dis_lstm = init_packed_bilstm(key, WINDOW_SIZE, DIS_HIDDEN, NUM_LAYERS)
    key, dis_fc = init_packed_fc(key, DIS_HIDDEN, 1)
    return {"gen_lstm": gen_lstm, "gen_fc": gen_fc,
            "dis_lstm": dis_lstm, "dis_fc": dis_fc}


# ----------------------------------------------------------------------------
# Forward pass
# ----------------------------------------------------------------------------
def lstm_gan_forward(params, z, dropout_key):
    # Generator: 20-layer BiLSTM -> relu -> fc   (one fused pallas_call)
    generated_sequence = stacked_bilstm_head(
        z, params["gen_lstm"], params["gen_fc"])                     # (B, 30)

    # Dropout(p=0.5), training mode.  Mask drawn with jax.random (key is data,
    # so no recompiles); pltpu.prng_* is avoided (not lowerable under interpret).
    keep = jax.random.bernoulli(dropout_key, 0.5, generated_sequence.shape)
    masked_sequence = jnp.where(keep, generated_sequence * 2.0, 0.0)

    # TODO(synk): the PyTorch original feeds a 2-D tensor to the discriminator's
    # LSTM and then indexes out[:, -1, :], which raises IndexError; here the
    # masked sequence is treated as a length-1 sequence (B, 1, window_size).
    disc_in = masked_sequence[:, None, :]
    real_or_fake = stacked_bilstm_head(
        disc_in, params["dis_lstm"], params["dis_fc"])               # (B, 1)
    return generated_sequence, real_or_fake


# ----------------------------------------------------------------------------
if __name__ == "__main__":
    key = jax.random.PRNGKey(0)
    key, pkey, zkey, dkey = jax.random.split(key, 4)

    params = init_lstm_gan_params(pkey)

    B, T = 2, 8                              # small batch / latent sequence len
    z = jax.random.normal(zkey, (B, T, LATENT_DIM), dtype=jnp.float32)

    fwd = jax.jit(lstm_gan_forward)
    gen_seq, score = fwd(params, z, dkey)
    jax.block_until_ready((gen_seq, score))

    assert gen_seq.shape == (B, WINDOW_SIZE) and gen_seq.dtype == jnp.float32
    assert score.shape == (B, 1) and score.dtype == jnp.float32
    assert bool(jnp.all(jnp.isfinite(gen_seq))) and bool(jnp.all(jnp.isfinite(score)))
    print("KERNEL_OK")
</pallas_src>

<mosaic_0001>
module attributes {stable_mosaic.version = 11 : i64} {
  func.func @_stacked_bilstm_head_kernel(%arg0: i32, %arg1: memref<8x256xf32, #tpu.memory_space<vmem>>, %arg2: memref<1x256x1024xbf16, #tpu.memory_space<vmem>>, %arg3: memref<1x128x512xbf16, #tpu.memory_space<vmem>>, %arg4: memref<1x128x512xbf16, #tpu.memory_space<vmem>>, %arg5: memref<1x1x1024xf32, #tpu.memory_space<vmem>>, %arg6: memref<256x1xf32, #tpu.memory_space<vmem>>, %arg7: memref<1x1xf32, #tpu.memory_space<vmem>>, %arg8: memref<8x1xf32, #tpu.memory_space<vmem>>, %arg9: memref<8x256xf32, #tpu.memory_space<vmem>>, %arg10: memref<8x1024xf32, #tpu.memory_space<vmem>>) attributes {dimension_semantics = [#tpu.dimension_semantics<arbitrary>], iteration_bounds = array<i64: 20>, scalar_prefetch = 0 : i64, scratch_operands = 2 : i64, tpu.core_type = #tpu.core_type<tc>, window_params = [{pipeline_mode = #tpu.pipeline_mode<synchronous>, transform_indices = @transform_0, window_bounds = array<i64: 8, 256>}, {transform_indices = @transform_1, window_bounds = array<i64: 1, 256, 1024>}, {transform_indices = @transform_2, window_bounds = array<i64: 1, 128, 512>}, {transform_indices = @transform_3, window_bounds = array<i64: 1, 128, 512>}, {transform_indices = @transform_4, window_bounds = array<i64: 1, 1, 1024>}, {pipeline_mode = #tpu.pipeline_mode<synchronous>, transform_indices = @transform_5, window_bounds = array<i64: 256, 1>}, {pipeline_mode = #tpu.pipeline_mode<synchronous>, transform_indices = @transform_6, window_bounds = array<i64: 1, 1>}, {pipeline_mode = #tpu.pipeline_mode<synchronous>, transform_indices = @transform_7, window_bounds = array<i64: 8, 1>}]} {
    %c0_i32 = arith.constant 0 : i32
    %0 = arith.cmpi eq, %arg0, %c0_i32 : i32
    %1 = arith.extui %0 : i1 to i32
    %c0_i32_0 = arith.constant 0 : i32
    %2 = arith.cmpi ne, %1, %c0_i32_0 : i32
    scf.if %2 {
      %c0_38 = arith.constant 0 : index
      %c0_39 = arith.constant 0 : index
      %87 = vector.load %arg1[%c0_38, %c0_39] : memref<8x256xf32, #tpu.memory_space<vmem>>, vector<8x256xf32>
      %c0_40 = arith.constant 0 : index
      %c0_41 = arith.constant 0 : index
      %88 = vector.load %arg9[%c0_40, %c0_41] : memref<8x256xf32, #tpu.memory_space<vmem>>, vector<8x256xf32>
      tpu.vector_store %arg9[%c0_40, %c0_41], %87 {strides = array<i32>} : memref<8x256xf32, #tpu.memory_space<vmem>>, vector<8x256xf32>,
    } else {
    }
    %c0 = arith.constant 0 : index
    %c0_1 = arith.constant 0 : index
    %3 = vector.load %arg9[%c0, %c0_1] : memref<8x256xf32, #tpu.memory_space<vmem>>, vector<8x256xf32>
    %4 = arith.truncf %3 : vector<8x256xf32> to vector<8x256xbf16>
    %c0_2 = arith.constant 0 : index
    %c0_3 = arith.constant 0 : index
    %c0_4 = arith.constant 0 : index
    %5 = vector.load %arg2[%c0_2, %c0_3, %c0_4] : memref<1x256x1024xbf16, #tpu.memory_space<vmem>>, vector<1x256x1024xbf16>
    %6 = vector.shape_cast %5 : vector<1x256x1024xbf16> to vector<256x1024xbf16>
    %cst = arith.constant dense<0.000000e+00> : vector<8x1024xf32>
    %7 = tpu.matmul %4, %6, %cst {dimension_numbers = #tpu.dot_dimension_numbers<[1], [0], [0], [1], [0, 0, 1, 1], [], []>} : vector<8x256xbf16>, vector<256x1024xbf16>, vector<8x1024xf32> -> vector<8x1024xf32>
    %c0_5 = arith.constant 0 : index
    %c0_6 = arith.constant 0 : index
    %c0_7 = arith.constant 0 : index
    %8 = vector.load %arg5[%c0_5, %c0_6, %c0_7] : memref<1x1x1024xf32, #tpu.memory_space<vmem>>, vector<1x1x1024xf32>
    %9 = vector.shape_cast %8 : vector<1x1x1024xf32> to vector<1x1024xf32>
    %10 = vector.broadcast %9 : vector<1x1024xf32> to vector<8x1024xf32>
    %11 = arith.addf %7, %10 : vector<8x1024xf32>
    %c0_8 = arith.constant 0 : index
    %c0_9 = arith.constant 0 : index
    %12 = vector.load %arg10[%c0_8, %c0_9] : memref<8x1024xf32, #tpu.memory_space<vmem>>, vector<8x1024xf32>
    tpu.vector_store %arg10[%c0_8, %c0_9], %11 {strides = array<i32>} : memref<8x1024xf32, #tpu.memory_space<vmem>>, vector<8x1024xf32>,
    %cst_10 = arith.constant 0.000000e+00 : f32
    %13 = vector.broadcast %cst_10 : f32 to vector<8x128xf32>
    %14 = arith.truncf %13 : vector<8x128xf32> to vector<8x128xbf16>
    %c0_11 = arith.constant 0 : index
    %c0_12 = arith.constant 0 : index
    %c0_13 = arith.constant 0 : index
    %15 = vector.load %arg3[%c0_11, %c0_12, %c0_13] : memref<1x128x512xbf16, #tpu.memory_space<vmem>>, vector<1x128x512xbf16>
    %16 = vector.shape_cast %15 : vector<1x128x512xbf16> to vector<128x512xbf16>
    %cst_14 = arith.constant dense<0.000000e+00> : vector<8x512xf32>
    %17 = tpu.matmul %14, %16, %cst_14 {dimension_numbers = #tpu.dot_dimension_numbers<[1], [0], [0], [1], [0, 0, 1, 1], [], []>} : vector<8x128xbf16>, vector<128x512xbf16>, vector<8x512xf32> -> vector<8x512xf32>
    %18 = arith.truncf %13 : vector<8x128xf32> to vector<8x128xbf16>
    %c0_15 = arith.constant 0 : index
    %c0_16 = arith.constant 0 : index
    %c0_17 = arith.constant 0 : index
    %19 = vector.load %arg4[%c0_15, %c0_16, %c0_17] : memref<1x128x512xbf16, #tpu.memory_space<vmem>>, vector<1x128x512xbf16>
    %20 = vector.shape_cast %19 : vector<1x128x512xbf16> to vector<128x512xbf16>
    %cst_18 = arith.constant dense<0.000000e+00> : vector<8x512xf32>
    %21 = tpu.matmul %18, %20, %cst_18 {dimension_numbers = #tpu.dot_dimension_numbers<[1], [0], [0], [1], [0, 0, 1, 1], [], []>} : vector<8x128xbf16>, vector<128x512xbf16>, vector<8x512xf32> -> vector<8x512xf32>
    %c0_19 = arith.constant 0 : index
    %c0_20 = arith.constant 0 : index
    %22 = vector.load %arg10[%c0_19, %c0_20] : memref<8x1024xf32, #tpu.memory_space<vmem>>, vector<8x512xf32>
    %23 = arith.addf %22, %17 : vector<8x512xf32>
    %24 = vector.extract_strided_slice %23 {offsets = [0, 0], sizes = [8, 128], strides = [1, 1]} : vector<8x512xf32> to vector<8x128xf32>
    %cst_21 = arith.constant 0.000000e+00 : f32
    %25 = vector.broadcast %cst_21 : f32 to vector<8x128xf32>
    %26 = arith.subf %25, %24 : vector<8x128xf32>
    %27 = math.exp %26 : vector<8x128xf32>
    %cst_22 = arith.constant 1.000000e+00 : f32
    %28 = vector.broadcast %cst_22 : f32 to vector<8x128xf32>
    %29 = arith.addf %28, %27 : vector<8x128xf32>
    %30 = tpu.reciprocal %29 {approx = true} : vector<8x128xf32> -> vector<8x128xf32>
    %31 = vector.extract_strided_slice %23 {offsets = [0, 128], sizes = [8, 128], strides = [1, 1]} : vector<8x512xf32> to vector<8x128xf32>
    %cst_23 = arith.constant 0.000000e+00 : f32
    %32 = vector.broadcast %cst_23 : f32 to vector<8x128xf32>
    %33 = arith.subf %32, %31 : vector<8x128xf32>
    %34 = math.exp %33 : vector<8x128xf32>
    %cst_24 = arith.constant 1.000000e+00 : f32
    %35 = vector.broadcast %cst_24 : f32 to vector<8x128xf32>
    %36 = arith.addf %35, %34 : vector<8x128xf32>
    %37 = tpu.reciprocal %36 {approx = true} : vector<8x128xf32> -> vector<8x128xf32>
    %38 = vector.extract_strided_slice %23 {offsets = [0, 256], sizes = [8, 128], strides = [1, 1]} : vector<8x512xf32> to vector<8x128xf32>
    %39 = math.tanh %38 : vector<8x128xf32>
    %40 = vector.extract_strided_slice %23 {offsets = [0, 384], sizes = [8, 128], strides = [1, 1]} : vector<8x512xf32> to vector<8x128xf32>
    %cst_25 = arith.constant 0.000000e+00 : f32
    %41 = vector.broadcast %cst_25 : f32 to vector<8x128xf32>
    %42 = arith.subf %41, %40 : vector<8x128xf32>
    %43 = math.exp %42 : vector<8x128xf32>
    %cst_26 = arith.constant 1.000000e+00 : f32
    %44 = vector.broadcast %cst_26 : f32 to vector<8x128xf32>
    %45 = arith.addf %44, %43 : vector<8x128xf32>
    %46 = tpu.reciprocal %45 {approx = true} : vector<8x128xf32> -> vector<8x128xf32>
    %47 = arith.mulf %37, %13 : vector<8x128xf32>
    %48 = arith.mulf %30, %39 : vector<8x128xf32>
    %49 = arith.addf %47, %48 : vector<8x128xf32>
    %50 = math.tanh %49 : vector<8x128xf32>
    %51 = arith.mulf %46, %50 : vector<8x128xf32>
    %c0_27 = arith.constant 0 : index
    %c512 = arith.constant 512 : index
    %52 = vector.load %arg10[%c0_27, %c512] : memref<8x1024xf32, #tpu.memory_space<vmem>>, vector<8x512xf32>
    %53 = arith.addf %52, %21 : vector<8x512xf32>
    %54 = vector.extract_strided_slice %53 {offsets = [0, 0], sizes = [8, 128], strides = [1, 1]} : vector<8x512xf32> to vector<8x128xf32>
    %cst_28 = arith.constant 0.000000e+00 : f32
    %55 = vector.broadcast %cst_28 : f32 to vector<8x128xf32>
    %56 = arith.subf %55, %54 : vector<8x128xf32>
    %57 = math.exp %56 : vector<8x128xf32>
    %cst_29 = arith.constant 1.000000e+00 : f32
    %58 = vector.broadcast %cst_29 : f32 to vector<8x128xf32>
    %59 = arith.addf %58, %57 : vector<8x128xf32>
    %60 = tpu.reciprocal %59 {approx = true} : vector<8x128xf32> -> vector<8x128xf32>
    %61 = vector.extract_strided_slice %53 {offsets = [0, 128], sizes = [8, 128], strides = [1, 1]} : vector<8x512xf32> to vector<8x128xf32>
    %cst_30 = arith.constant 0.000000e+00 : f32
    %62 = vector.broadcast %cst_30 : f32 to vector<8x128xf32>
    %63 = arith.subf %62, %61 : vector<8x128xf32>
    %64 = math.exp %63 : vector<8x128xf32>
    %cst_31 = arith.constant 1.000000e+00 : f32
    %65 = vector.broadcast %cst_31 : f32 to vector<8x128xf32>
    %66 = arith.addf %65, %64 : vector<8x128xf32>
    %67 = tpu.reciprocal %66 {approx = true} : vector<8x128xf32> -> vector<8x128xf32>
    %68 = vector.extract_strided_slice %53 {offsets = [0, 256], sizes = [8, 128], strides = [1, 1]} : vector<8x512xf32> to vector<8x128xf32>
    %69 = math.tanh %68 : vector<8x128xf32>
    %70 = vector.extract_strided_slice %53 {offsets = [0, 384], sizes = [8, 128], strides = [1, 1]} : vector<8x512xf32> to vector<8x128xf32>
    %cst_32 = arith.constant 0.000000e+00 : f32
    %71 = vector.broadcast %cst_32 : f32 to vector<8x128xf32>
    %72 = arith.subf %71, %70 : vector<8x128xf32>
    %73 = math.exp %72 : vector<8x128xf32>
    %cst_33 = arith.constant 1.000000e+00 : f32
    %74 = vector.broadcast %cst_33 : f32 to vector<8x128xf32>
    %75 = arith.addf %74, %73 : vector<8x128xf32>
    %76 = tpu.reciprocal %75 {approx = true} : vector<8x128xf32> -> vector<8x128xf32>
    %77 = arith.mulf %67, %13 : vector<8x128xf32>
    %78 = arith.mulf %60, %69 : vector<8x128xf32>
    %79 = arith.addf %77, %78 : vector<8x128xf32>
    %80 = math.tanh %79 : vector<8x128xf32>
    %81 = arith.mulf %76, %80 : vector<8x128xf32>
    %c0_34 = arith.constant 0 : index
    %c0_35 = arith.constant 0 : index
    %82 = vector.load %arg9[%c0_34, %c0_35] : memref<8x256xf32, #tpu.memory_space<vmem>>, vector<8x128xf32>
    tpu.vector_store %arg9[%c0_34, %c0_35], %51 {strides = array<i32>} : memref<8x256xf32, #tpu.memory_space<vmem>>, vector<8x128xf32>,
    %c0_36 = arith.constant 0 : index
    %c128 = arith.constant 128 : index
    %83 = vector.load %arg9[%c0_36, %c128] : memref<8x256xf32, #tpu.memory_space<vmem>>, vector<8x128xf32>
    tpu.vector_store %arg9[%c0_36, %c128], %81 {strides = array<i32>} : memref<8x256xf32, #tpu.memory_space<vmem>>, vector<8x128xf32>,
    %c19_i32 = arith.constant 19 : i32
    %84 = arith.cmpi eq, %arg0, %c19_i32 : i32
    %85 = arith.extui %84 : i1 to i32
    %c0_i32_37 = arith.constant 0 : i32
    %86 = arith.cmpi ne, %85, %c0_i32_37 : i32
    scf.if %86 {
      %c0_38 = arith.constant 0 : index
      %c0_39 = arith.constant 0 : index
      %87 = vector.load %arg9[%c0_38, %c0_39] : memref<8x256xf32, #tpu.memory_space<vmem>>, vector<8x256xf32>
      %cst_40 = arith.constant 0.000000e+00 : f32
      %88 = vector.broadcast %cst_40 : f32 to vector<8x256xf32>
      %89 = arith.maximumf %87, %88 : vector<8x256xf32>
      %c0_41 = arith.constant 0 : index
      %c0_42 = arith.constant 0 : index
      %90 = vector.load %arg6[%c0_41, %c0_42] : memref<256x1xf32, #tpu.memory_space<vmem>>, vector<256x1xf32>
      %cst_43 = arith.constant dense<0.000000e+00> : vector<8x1xf32>
      %91 = tpu.matmul %89, %90, %cst_43 {dimension_numbers = #tpu.dot_dimension_numbers<[1], [0], [0], [1], [0, 0, 1, 1], [], []>} : vector<8x256xf32>, vector<256x1xf32>, vector<8x1xf32> -> vector<8x1xf32>
      %c0_44 = arith.constant 0 : index
      %c0_45 = arith.constant 0 : index
      %92 = vector.load %arg7[%c0_44, %c0_45] : memref<1x1xf32, #tpu.memory_space<vmem>>, vector<1x1xf32>
      %93 = vector.broadcast %92 : vector<1x1xf32> to vector<8x1xf32>
      %94 = arith.addf %91, %93 : vector<8x1xf32>
      %c0_46 = arith.constant 0 : index
      %c0_47 = arith.constant 0 : index
      %95 = vector.load %arg8[%c0_46, %c0_47] : memref<8x1xf32, #tpu.memory_space<vmem>>, vector<8x1xf32>
      tpu.vector_store %arg8[%c0_46, %c0_47], %94 {strides = array<i32>} : memref<8x1xf32, #tpu.memory_space<vmem>>, vector<8x1xf32>,
    } else {
    }
    return
  }
  func.func @transform_0(%arg0: i32) -> (i32, i32) {
    %c0_i32 = arith.constant 0 : i32
    %c0_i32_0 = arith.constant 0 : i32
    %c0_i32_1 = arith.constant 0 : i32
    return %c0_i32, %c0_i32_0 : i32, i32
  }
  func.func @transform_1(%arg0: i32) -> (i32, i32, i32) {
    %c0_i32 = arith.constant 0 : i32
    %c0_i32_0 = arith.constant 0 : i32
    %c0_i32_1 = arith.constant 0 : i32
    return %arg0, %c0_i32, %c0_i32_0 : i32, i32, i32
  }
  func.func @transform_2(%arg0: i32) -> (i32, i32, i32) {
    %c0_i32 = arith.constant 0 : i32
    %c0_i32_0 = arith.constant 0 : i32
    %c0_i32_1 = arith.constant 0 : i32
    return %arg0, %c0_i32, %c0_i32_0 : i32, i32, i32
  }
  func.func @transform_3(%arg0: i32) -> (i32, i32, i32) {
    %c0_i32 = arith.constant 0 : i32
    %c0_i32_0 = arith.constant 0 : i32
    %c0_i32_1 = arith.constant 0 : i32
    return %arg0, %c0_i32, %c0_i32_0 : i32, i32, i32
  }
  func.func @transform_4(%arg0: i32) -> (i32, i32, i32) {
    %c0_i32 = arith.constant 0 : i32
    %c0_i32_0 = arith.constant 0 : i32
    %c0_i32_1 = arith.constant 0 : i32
    return %arg0, %c0_i32, %c0_i32_0 : i32, i32, i32
  }
  func.func @transform_5(%arg0: i32) -> (i32, i32) {
    %c0_i32 = arith.constant 0 : i32
    %c0_i32_0 = arith.constant 0 : i32
    %c0_i32_1 = arith.constant 0 : i32
    return %c0_i32, %c0_i32_0 : i32, i32
  }
  func.func @transform_6(%arg0: i32) -> (i32, i32) {
    %c0_i32 = arith.constant 0 : i32
    %c0_i32_0 = arith.constant 0 : i32
    %c0_i32_1 = arith.constant 0 : i32
    return %c0_i32, %c0_i32_0 : i32, i32
  }
  func.func @transform_7(%arg0: i32) -> (i32, i32) {
    %c0_i32 = arith.constant 0 : i32
    %c0_i32_0 = arith.constant 0 : i32
    %c0_i32_1 = arith.constant 0 : i32
    return %c0_i32, %c0_i32_0 : i32, i32
  }
}

module attributes {stable_mosaic.version = 11 : i64} {
  func.func @_stacked_bilstm_head_kernel(%arg0: i32, %arg1: memref<64x256xf32, #tpu.memory_space<vmem>>, %arg2: memref<1x256x1024xbf16, #tpu.memory_space<vmem>>, %arg3: memref<1x128x512xbf16, #tpu.memory_space<vmem>>, %arg4: memref<1x128x512xbf16, #tpu.memory_space<vmem>>, %arg5: memref<1x1x1024xf32, #tpu.memory_space<vmem>>, %arg6: memref<256x30xf32, #tpu.memory_space<vmem>>, %arg7: memref<1x30xf32, #tpu.memory_space<vmem>>, %arg8: memref<8x30xf32, #tpu.memory_space<vmem>>, %arg9: memref<64x256xf32, #tpu.memory_space<vmem>>, %arg10: memref<64x1024xf32, #tpu.memory_space<vmem>>) attributes {dimension_semantics = [#tpu.dimension_semantics<arbitrary>], iteration_bounds = array<i64: 20>, scalar_prefetch = 0 : i64, scratch_operands = 2 : i64, tpu.core_type = #tpu.core_type<tc>, window_params = [{pipeline_mode = #tpu.pipeline_mode<synchronous>, transform_indices = @transform_0, window_bounds = array<i64: 64, 256>}, {transform_indices = @transform_1, window_bounds = array<i64: 1, 256, 1024>}, {transform_indices = @transform_2, window_bounds = array<i64: 1, 128, 512>}, {transform_indices = @transform_3, window_bounds = array<i64: 1, 128, 512>}, {transform_indices = @transform_4, window_bounds = array<i64: 1, 1, 1024>}, {pipeline_mode = #tpu.pipeline_mode<synchronous>, transform_indices = @transform_5, window_bounds = array<i64: 256, 30>}, {pipeline_mode = #tpu.pipeline_mode<synchronous>, transform_indices = @transform_6, window_bounds = array<i64: 1, 30>}, {pipeline_mode = #tpu.pipeline_mode<synchronous>, transform_indices = @transform_7, window_bounds = array<i64: 8, 30>}]} {
    %c0_i32 = arith.constant 0 : i32
    %0 = arith.cmpi eq, %arg0, %c0_i32 : i32
    %1 = arith.extui %0 : i1 to i32
    %c0_i32_0 = arith.constant 0 : i32
    %2 = arith.cmpi ne, %1, %c0_i32_0 : i32
    scf.if %2 {
      %c0_227 = arith.constant 0 : index
      %c0_228 = arith.constant 0 : index
      %577 = vector.load %arg1[%c0_227, %c0_228] : memref<64x256xf32, #tpu.memory_space<vmem>>, vector<64x256xf32>
      %c0_229 = arith.constant 0 : index
      %c0_230 = arith.constant 0 : index
      %578 = vector.load %arg9[%c0_229, %c0_230] : memref<64x256xf32, #tpu.memory_space<vmem>>, vector<64x256xf32>
      tpu.vector_store %arg9[%c0_229, %c0_230], %577 {strides = array<i32>} : memref<64x256xf32, #tpu.memory_space<vmem>>, vector<64x256xf32>,
    } else {
    }
    %c0 = arith.constant 0 : index
    %c0_1 = arith.constant 0 : index
    %3 = vector.load %arg9[%c0, %c0_1] : memref<64x256xf32, #tpu.memory_space<vmem>>, vector<64x256xf32>
    %4 = arith.truncf %3 : vector<64x256xf32> to vector<64x256xbf16>
    %c0_2 = arith.constant 0 : index
    %c0_3 = arith.constant 0 : index
    %c0_4 = arith.constant 0 : index
    %5 = vector.load %arg2[%c0_2, %c0_3, %c0_4] : memref<1x256x1024xbf16, #tpu.memory_space<vmem>>, vector<1x256x1024xbf16>
    %6 = vector.shape_cast %5 : vector<1x256x1024xbf16> to vector<256x1024xbf16>
    %cst = arith.constant dense<0.000000e+00> : vector<64x1024xf32>
    %7 = tpu.matmul %4, %6, %cst {dimension_numbers = #tpu.dot_dimension_numbers<[1], [0], [0], [1], [0, 0, 1, 1], [], []>} : vector<64x256xbf16>, vector<256x1024xbf16>, vector<64x1024xf32> -> vector<64x1024xf32>
    %c0_5 = arith.constant 0 : index
    %c0_6 = arith.constant 0 : index
    %c0_7 = arith.constant 0 : index
    %8 = vector.load %arg5[%c0_5, %c0_6, %c0_7] : memref<1x1x1024xf32, #tpu.memory_space<vmem>>, vector<1x1x1024xf32>
    %9 = vector.shape_cast %8 : vector<1x1x1024xf32> to vector<1x1024xf32>
    %10 = vector.broadcast %9 : vector<1x1024xf32> to vector<64x1024xf32>
    %11 = arith.addf %7, %10 : vector<64x1024xf32>
    %c0_8 = arith.constant 0 : index
    %c0_9 = arith.constant 0 : index
    %12 = vector.load %arg10[%c0_8, %c0_9] : memref<64x1024xf32, #tpu.memory_space<vmem>>, vector<64x1024xf32>
    tpu.vector_store %arg10[%c0_8, %c0_9], %11 {strides = array<i32>} : memref<64x1024xf32, #tpu.memory_space<vmem>>, vector<64x1024xf32>,
    %cst_10 = arith.constant 0.000000e+00 : f32
    %13 = vector.broadcast %cst_10 : f32 to vector<8x128xf32>
    %14 = arith.truncf %13 : vector<8x128xf32> to vector<8x128xbf16>
    %c0_11 = arith.constant 0 : index
    %c0_12 = arith.constant 0 : index
    %c0_13 = arith.constant 0 : index
    %15 = vector.load %arg3[%c0_11, %c0_12, %c0_13] : memref<1x128x512xbf16, #tpu.memory_space<vmem>>, vector<1x128x512xbf16>
    %16 = vector.shape_cast %15 : vector<1x128x512xbf16> to vector<128x512xbf16>
    %cst_14 = arith.constant dense<0.000000e+00> : vector<8x512xf32>
    %17 = tpu.matmul %14, %16, %cst_14 {dimension_numbers = #tpu.dot_dimension_numbers<[1], [0], [0], [1], [0, 0, 1, 1], [], []>} : vector<8x128xbf16>, vector<128x512xbf16>, vector<8x512xf32> -> vector<8x512xf32>
    %18 = arith.truncf %13 : vector<8x128xf32> to vector<8x128xbf16>
    %c0_15 = arith.constant 0 : index
    %c0_16 = arith.constant 0 : index
    %c0_17 = arith.constant 0 : index
    %19 = vector.load %arg4[%c0_15, %c0_16, %c0_17] : memref<1x128x512xbf16, #tpu.memory_space<vmem>>, vector<1x128x512xbf16>
    %20 = vector.shape_cast %19 : vector<1x128x512xbf16> to vector<128x512xbf16>
    %cst_18 = arith.constant dense<0.000000e+00> : vector<8x512xf32>
    %21 = tpu.matmul %18, %20, %cst_18 {dimension_numbers = #tpu.dot_dimension_numbers<[1], [0], [0], [1], [0, 0, 1, 1], [], []>} : vector<8x128xbf16>, vector<128x512xbf16>, vector<8x512xf32> -> vector<8x512xf32>
    %c0_19 = arith.constant 0 : index
    %c0_20 = arith.constant 0 : index
    %22 = vector.load %arg10[%c0_19, %c0_20] : memref<64x1024xf32, #tpu.memory_space<vmem>>, vector<8x512xf32>
    %23 = arith.addf %22, %17 : vector<8x512xf32>
    %24 = vector.extract_strided_slice %23 {offsets = [0, 0], sizes = [8, 128], strides = [1, 1]} : vector<8x512xf32> to vector<8x128xf32>
    %cst_21 = arith.constant 0.000000e+00 : f32
    %25 = vector.broadcast %cst_21 : f32 to vector<8x128xf32>
    %26 = arith.subf %25, %24 : vector<8x128xf32>
    %27 = math.exp %26 : vector<8x128xf32>
    %cst_22 = arith.constant 1.000000e+00 : f32
    %28 = vector.broadcast %cst_22 : f32 to vector<8x128xf32>
    %29 = arith.addf %28, %27 : vector<8x128xf32>
    %30 = tpu.reciprocal %29 {approx = true} : vector<8x128xf32> -> vector<8x128xf32>
    %31 = vector.extract_strided_slice %23 {offsets = [0, 128], sizes = [8, 128], strides = [1, 1]} : vector<8x512xf32> to vector<8x128xf32>
    %cst_23 = arith.constant 0.000000e+00 : f32
    %32 = vector.broadcast %cst_23 : f32 to vector<8x128xf32>
    %33 = arith.subf %32, %31 : vector<8x128xf32>
    %34 = math.exp %33 : vector<8x128xf32>
    %cst_24 = arith.constant 1.000000e+00 : f32
    %35 = vector.broadcast %cst_24 : f32 to vector<8x128xf32>
    %36 = arith.addf %35, %34 : vector<8x128xf32>
    %37 = tpu.reciprocal %36 {approx = true} : vector<8x128xf32> -> vector<8x128xf32>
    %38 = vector.extract_strided_slice %23 {offsets = [0, 256], sizes = [8, 128], strides = [1, 1]} : vector<8x512xf32> to vector<8x128xf32>
    %39 = math.tanh %38 : vector<8x128xf32>
    %40 = vector.extract_strided_slice %23 {offsets = [0, 384], sizes = [8, 128], strides = [1, 1]} : vector<8x512xf32> to vector<8x128xf32>
    %cst_25 = arith.constant 0.000000e+00 : f32
    %41 = vector.broadcast %cst_25 : f32 to vector<8x128xf32>
    %42 = arith.subf %41, %40 : vector<8x128xf32>
    %43 = math.exp %42 : vector<8x128xf32>
    %cst_26 = arith.constant 1.000000e+00 : f32
    %44 = vector.broadcast %cst_26 : f32 to vector<8x128xf32>
    %45 = arith.addf %44, %43 : vector<8x128xf32>
    %46 = tpu.reciprocal %45 {approx = true} : vector<8x128xf32> -> vector<8x128xf32>
    %47 = arith.mulf %37, %13 : vector<8x128xf32>
    %48 = arith.mulf %30, %39 : vector<8x128xf32>
    %49 = arith.addf %47, %48 : vector<8x128xf32>
    %50 = math.tanh %49 : vector<8x128xf32>
    %51 = arith.mulf %46, %50 : vector<8x128xf32>
    %c56 = arith.constant 56 : index
    %c512 = arith.constant 512 : index
    %52 = vector.load %arg10[%c56, %c512] : memref<64x1024xf32, #tpu.memory_space<vmem>>, vector<8x512xf32>
    %53 = arith.addf %52, %21 : vector<8x512xf32>
    %54 = vector.extract_strided_slice %53 {offsets = [0, 0], sizes = [8, 128], strides = [1, 1]} : vector<8x512xf32> to vector<8x128xf32>
    %cst_27 = arith.constant 0.000000e+00 : f32
    %55 = vector.broadcast %cst_27 : f32 to vector<8x128xf32>
    %56 = arith.subf %55, %54 : vector<8x128xf32>
    %57 = math.exp %56 : vector<8x128xf32>
    %cst_28 = arith.constant 1.000000e+00 : f32
    %58 = vector.broadcast %cst_28 : f32 to vector<8x128xf32>
    %59 = arith.addf %58, %57 : vector<8x128xf32>
    %60 = tpu.reciprocal %59 {approx = true} : vector<8x128xf32> -> vector<8x128xf32>
    %61 = vector.extract_strided_slice %53 {offsets = [0, 128], sizes = [8, 128], strides = [1, 1]} : vector<8x512xf32> to vector<8x128xf32>
    %cst_29 = arith.constant 0.000000e+00 : f32
    %62 = vector.broadcast %cst_29 : f32 to vector<8x128xf32>
    %63 = arith.subf %62, %61 : vector<8x128xf32>
    %64 = math.exp %63 : vector<8x128xf32>
    %cst_30 = arith.constant 1.000000e+00 : f32
    %65 = vector.broadcast %cst_30 : f32 to vector<8x128xf32>
    %66 = arith.addf %65, %64 : vector<8x128xf32>
    %67 = tpu.reciprocal %66 {approx = true} : vector<8x128xf32> -> vector<8x128xf32>
    %68 = vector.extract_strided_slice %53 {offsets = [0, 256], sizes = [8, 128], strides = [1, 1]} : vector<8x512xf32> to vector<8x128xf32>
    %69 = math.tanh %68 : vector<8x128xf32>
    %70 = vector.extract_strided_slice %53 {offsets = [0, 384], sizes = [8, 128], strides = [1, 1]} : vector<8x512xf32> to vector<8x128xf32>
    %cst_31 = arith.constant 0.000000e+00 : f32
    %71 = vector.broadcast %cst_31 : f32 to vector<8x128xf32>
    %72 = arith.subf %71, %70 : vector<8x128xf32>
    %73 = math.exp %72 : vector<8x128xf32>
    %cst_32 = arith.constant 1.000000e+00 : f32
    %74 = vector.broadcast %cst_32 : f32 to vector<8x128xf32>
    %75 = arith.addf %74, %73 : vector<8x128xf32>
    %76 = tpu.reciprocal %75 {approx = true} : vector<8x128xf32> -> vector<8x128xf32>
    %77 = arith.mulf %67, %13 : vector<8x128xf32>
    %78 = arith.mulf %60, %69 : vector<8x128xf32>
    %79 = arith.addf %77, %78 : vector<8x128xf32>
    %80 = math.tanh %79 : vector<8x128xf32>
    %81 = arith.mulf %76, %80 : vector<8x128xf32>
    %c0_33 = arith.constant 0 : index
    %c0_34 = arith.constant 0 : index
    %82 = vector.load %arg9[%c0_33, %c0_34] : memref<64x256xf32, #tpu.memory_space<vmem>>, vector<8x128xf32>
    tpu.vector_store %arg9[%c0_33, %c0_34], %51 {strides = array<i32>} : memref<64x256xf32, #tpu.memory_space<vmem>>, vector<8x128xf32>,
    %c56_35 = arith.constant 56 : index
    %c128 = arith.constant 128 : index
    %83 = vector.load %arg9[%c56_35, %c128] : memref<64x256xf32, #tpu.memory_space<vmem>>, vector<8x128xf32>
    tpu.vector_store %arg9[%c56_35, %c128], %81 {strides = array<i32>} : memref<64x256xf32, #tpu.memory_space<vmem>>, vector<8x128xf32>,
    %84 = arith.truncf %51 : vector<8x128xf32> to vector<8x128xbf16>
    %c0_36 = arith.constant 0 : index
    %c0_37 = arith.constant 0 : index
    %c0_38 = arith.constant 0 : index
    %85 = vector.load %arg3[%c0_36, %c0_37, %c0_38] : memref<1x128x512xbf16, #tpu.memory_space<vmem>>, vector<1x128x512xbf16>
    %86 = vector.shape_cast %85 : vector<1x128x512xbf16> to vector<128x512xbf16>
    %cst_39 = arith.constant dense<0.000000e+00> : vector<8x512xf32>
    %87 = tpu.matmul %84, %86, %cst_39 {dimension_numbers = #tpu.dot_dimension_numbers<[1], [0], [0], [1], [0, 0, 1, 1], [], []>} : vector<8x128xbf16>, vector<128x512xbf16>, vector<8x512xf32> -> vector<8x512xf32>
    %88 = arith.truncf %81 : vector<8x128xf32> to vector<8x128xbf16>
    %c0_40 = arith.constant 0 : index
    %c0_41 = arith.constant 0 : index
    %c0_42 = arith.constant 0 : index
    %89 = vector.load %arg4[%c0_40, %c0_41, %c0_42] : memref<1x128x512xbf16, #tpu.memory_space<vmem>>, vector<1x128x512xbf16>
    %90 = vector.shape_cast %89 : vector<1x128x512xbf16> to vector<128x512xbf16>
    %cst_43 = arith.constant dense<0.000000e+00> : vector<8x512xf32>
    %91 = tpu.matmul %88, %90, %cst_43 {dimension_numbers = #tpu.dot_dimension_numbers<[1], [0], [0], [1], [0, 0, 1, 1], [], []>} : vector<8x128xbf16>, vector<128x512xbf16>, vector<8x512xf32> -> vector<8x512xf32>
    %c8 = arith.constant 8 : index
    %c0_44 = arith.constant 0 : index
    %92 = vector.load %arg10[%c8, %c0_44] : memref<64x1024xf32, #tpu.memory_space<vmem>>, vector<8x512xf32>
    %93 = arith.addf %92, %87 : vector<8x512xf32>
    %94 = vector.extract_strided_slice %93 {offsets = [0, 0], sizes = [8, 128], strides = [1, 1]} : vector<8x512xf32> to vector<8x128xf32>
    %cst_45 = arith.constant 0.000000e+00 : f32
    %95 = vector.broadcast %cst_45 : f32 to vector<8x128xf32>
    %96 = arith.subf %95, %94 : vector<8x128xf32>
    %97 = math.exp %96 : vector<8x128xf32>
    %cst_46 = arith.constant 1.000000e+00 : f32
    %98 = vector.broadcast %cst_46 : f32 to vector<8x128xf32>
    %99 = arith.addf %98, %97 : vector<8x128xf32>
    %100 = tpu.reciprocal %99 {approx = true} : vector<8x128xf32> -> vector<8x128xf32>
    %101 = vector.extract_strided_slice %93 {offsets = [0, 128], sizes = [8, 128], strides = [1, 1]} : vector<8x512xf32> to vector<8x128xf32>
    %cst_47 = arith.constant 0.000000e+00 : f32
    %102 = vector.broadcast %cst_47 : f32 to vector<8x128xf32>
    %103 = arith.subf %102, %101 : vector<8x128xf32>
    %104 = math.exp %103 : vector<8x128xf32>
    %cst_48 = arith.constant 1.000000e+00 : f32
    %105 = vector.broadcast %cst_48 : f32 to vector<8x128xf32>
    %106 = arith.addf %105, %104 : vector<8x128xf32>
    %107 = tpu.reciprocal %106 {approx = true} : vector<8x128xf32> -> vector<8x128xf32>
    %108 = vector.extract_strided_slice %93 {offsets = [0, 256], sizes = [8, 128], strides = [1, 1]} : vector<8x512xf32> to vector<8x128xf32>
    %109 = math.tanh %108 : vector<8x128xf32>
    %110 = vector.extract_strided_slice %93 {offsets = [0, 384], sizes = [8, 128], strides = [1, 1]} : vector<8x512xf32> to vector<8x128xf32>
    %cst_49 = arith.constant 0.000000e+00 : f32
    %111 = vector.broadcast %cst_49 : f32 to vector<8x128xf32>
    %112 = arith.subf %111, %110 : vector<8x128xf32>
    %113 = math.exp %112 : vector<8x128xf32>
    %cst_50 = arith.constant 1.000000e+00 : f32
    %114 = vector.broadcast %cst_50 : f32 to vector<8x128xf32>
    %115 = arith.addf %114, %113 : vector<8x128xf32>
    %116 = tpu.reciprocal %115 {approx = true} : vector<8x128xf32> -> vector<8x128xf32>
    %117 = arith.mulf %107, %49 : vector<8x128xf32>
    %118 = arith.mulf %100, %109 : vector<8x128xf32>
    %119 = arith.addf %117, %118 : vector<8x128xf32>
    %120 = math.tanh %119 : vector<8x128xf32>
    %121 = arith.mulf %116, %120 : vector<8x128xf32>
    %c48 = arith.constant 48 : index
    %c512_51 = arith.constant 512 : index
    %122 = vector.load %arg10[%c48, %c512_51] : memref<64x1024xf32, #tpu.memory_space<vmem>>, vector<8x512xf32>
    %123 = arith.addf %122, %91 : vector<8x512xf32>
    %124 = vector.extract_strided_slice %123 {offsets = [0, 0], sizes = [8, 128], strides = [1, 1]} : vector<8x512xf32> to vector<8x128xf32>
    %cst_52 = arith.constant 0.000000e+00 : f32
    %125 = vector.broadcast %cst_52 : f32 to vector<8x128xf32>
    %126 = arith.subf %125, %124 : vector<8x128xf32>
    %127 = math.exp %126 : vector<8x128xf32>
    %cst_53 = arith.constant 1.000000e+00 : f32
    %128 = vector.broadcast %cst_53 : f32 to vector<8x128xf32>
    %129 = arith.addf %128, %127 : vector<8x128xf32>
    %130 = tpu.reciprocal %129 {approx = true} : vector<8x128xf32> -> vector<8x128xf32>
    %131 = vector.extract_strided_slice %123 {offsets = [0, 128], sizes = [8, 128], strides = [1, 1]} : vector<8x512xf32> to vector<8x128xf32>
    %cst_54 = arith.constant 0.000000e+00 : f32
    %132 = vector.broadcast %cst_54 : f32 to vector<8x128xf32>
    %133 = arith.subf %132, %131 : vector<8x128xf32>
    %134 = math.exp %133 : vector<8x128xf32>
    %cst_55 = arith.constant 1.000000e+00 : f32
    %135 = vector.broadcast %cst_55 : f32 to vector<8x128xf32>
    %136 = arith.addf %135, %134 : vector<8x128xf32>
    %137 = tpu.reciprocal %136 {approx = true} : vector<8x128xf32> -> vector<8x128xf32>
    %138 = vector.extract_strided_slice %123 {offsets = [0, 256], sizes = [8, 128], strides = [1, 1]} : vector<8x512xf32> to vector<8x128xf32>
    %139 = math.tanh %138 : vector<8x128xf32>
    %140 = vector.extract_strided_slice %123 {offsets = [0, 384], sizes = [8, 128], strides = [1, 1]} : vector<8x512xf32> to vector<8x128xf32>
    %cst_56 = arith.constant 0.000000e+00 : f32
    %141 = vector.broadcast %cst_56 : f32 to vector<8x128xf32>
    %142 = arith.subf %141, %140 : vector<8x128xf32>
    %143 = math.exp %142 : vector<8x128xf32>
    %cst_57 = arith.constant 1.000000e+00 : f32
    %144 = vector.broadcast %cst_57 : f32 to vector<8x128xf32>
    %145 = arith.addf %144, %143 : vector<8x128xf32>
    %146 = tpu.reciprocal %145 {approx = true} : vector<8x128xf32> -> vector<8x128xf32>
    %147 = arith.mulf %137, %79 : vector<8x128xf32>
    %148 = arith.mulf %130, %139 : vector<8x128xf32>
    %149 = arith.addf %147, %148 : vector<8x128xf32>
    %150 = math.tanh %149 : vector<8x128xf32>
    %151 = arith.mulf %146, %150 : vector<8x128xf32>
    %c8_58 = arith.constant 8 : index
    %c0_59 = arith.constant 0 : index
    %152 = vector.load %arg9[%c8_58, %c0_59] : memref<64x256xf32, #tpu.memory_space<vmem>>, vector<8x128xf32>
    tpu.vector_store %arg9[%c8_58, %c0_59], %121 {strides = array<i32>} : memref<64x256xf32, #tpu.memory_space<vmem>>, vector<8x128xf32>,
    %c48_60 = arith.constant 48 : index
    %c128_61 = arith.constant 128 : index
    %153 = vector.load %arg9[%c48_60, %c128_61] : memref<64x256xf32, #tpu.memory_space<vmem>>, vector<8x128xf32>
    tpu.vector_store %arg9[%c48_60, %c128_61], %151 {strides = array<i32>} : memref<64x256xf32, #tpu.memory_space<vmem>>, vector<8x128xf32>,
    %154 = arith.truncf %121 : vector<8x128xf32> to vector<8x128xbf16>
    %c0_62 = arith.constant 0 : index
    %c0_63 = arith.constant 0 : index
    %c0_64 = arith.constant 0 : index
    %155 = vector.load %arg3[%c0_62, %c0_63, %c0_64] : memref<1x128x512xbf16, #tpu.memory_space<vmem>>, vector<1x128x512xbf16>
    %156 = vector.shape_cast %155 : vector<1x128x512xbf16> to vector<128x512xbf16>
    %cst_65 = arith.constant dense<0.000000e+00> : vector<8x512xf32>
    %157 = tpu.matmul %154, %156, %cst_65 {dimension_numbers = #tpu.dot_dimension_numbers<[1], [0], [0], [1], [0, 0, 1, 1], [], []>} : vector<8x128xbf16>, vector<128x512xbf16>, vector<8x512xf32> -> vector<8x512xf32>
    %158 = arith.truncf %151 : vector<8x128xf32> to vector<8x128xbf16>
    %c0_66 = arith.constant 0 : index
    %c0_67 = arith.constant 0 : index
    %c0_68 = arith.constant 0 : index
    %159 = vector.load %arg4[%c0_66, %c0_67, %c0_68] : memref<1x128x512xbf16, #tpu.memory_space<vmem>>, vector<1x128x512xbf16>
    %160 = vector.shape_cast %159 : vector<1x128x512xbf16> to vector<128x512xbf16>
    %cst_69 = arith.constant dense<0.000000e+00> : vector<8x512xf32>
    %161 = tpu.matmul %158, %160, %cst_69 {dimension_numbers = #tpu.dot_dimension_numbers<[1], [0], [0], [1], [0, 0, 1, 1], [], []>} : vector<8x128xbf16>, vector<128x512xbf16>, vector<8x512xf32> -> vector<8x512xf32>
    %c16 = arith.constant 16 : index
    %c0_70 = arith.constant 0 : index
    %162 = vector.load %arg10[%c16, %c0_70] : memref<64x1024xf32, #tpu.memory_space<vmem>>, vector<8x512xf32>
    %163 = arith.addf %162, %157 : vector<8x512xf32>
    %164 = vector.extract_strided_slice %163 {offsets = [0, 0], sizes = [8, 128], strides = [1, 1]} : vector<8x512xf32> to vector<8x128xf32>
    %cst_71 = arith.constant 0.000000e+00 : f32
    %165 = vector.broadcast %cst_71 : f32 to vector<8x128xf32>
    %166 = arith.subf %165, %164 : vector<8x128xf32>
    %167 = math.exp %166 : vector<8x128xf32>
    %cst_72 = arith.constant 1.000000e+00 : f32
    %168 = vector.broadcast %cst_72 : f32 to vector<8x128xf32>
    %169 = arith.addf %168, %167 : vector<8x128xf32>
    %170 = tpu.reciprocal %169 {approx = true} : vector<8x128xf32> -> vector<8x128xf32>
    %171 = vector.extract_strided_slice %163 {offsets = [0, 128], sizes = [8, 128], strides = [1, 1]} : vector<8x512xf32> to vector<8x128xf32>
    %cst_73 = arith.constant 0.000000e+00 : f32
    %172 = vector.broadcast %cst_73 : f32 to vector<8x128xf32>
    %173 = arith.subf %172, %171 : vector<8x128xf32>
    %174 = math.exp %173 : vector<8x128xf32>
    %cst_74 = arith.constant 1.000000e+00 : f32
    %175 = vector.broadcast %cst_74 : f32 to vector<8x128xf32>
    %176 = arith.addf %175, %174 : vector<8x128xf32>
    %177 = tpu.reciprocal %176 {approx = true} : vector<8x128xf32> -> vector<8x128xf32>
    %178 = vector.extract_strided_slice %163 {offsets = [0, 256], sizes = [8, 128], strides = [1, 1]} : vector<8x512xf32> to vector<8x128xf32>
    %179 = math.tanh %178 : vector<8x128xf32>
    %180 = vector.extract_strided_slice %163 {offsets = [0, 384], sizes = [8, 128], strides = [1, 1]} : vector<8x512xf32> to vector<8x128xf32>
    %cst_75 = arith.constant 0.000000e+00 : f32
    %181 = vector.broadcast %cst_75 : f32 to vector<8x128xf32>
    %182 = arith.subf %181, %180 : vector<8x128xf32>
    %183 = math.exp %182 : vector<8x128xf32>
    %cst_76 = arith.constant 1.000000e+00 : f32
    %184 = vector.broadcast %cst_76 : f32 to vector<8x128xf32>
    %185 = arith.addf %184, %183 : vector<8x128xf32>
    %186 = tpu.reciprocal %185 {approx = true} : vector<8x128xf32> -> vector<8x128xf32>
    %187 = arith.mulf %177, %119 : vector<8x128xf32>
    %188 = arith.mulf %170, %179 : vector<8x128xf32>
    %189 = arith.addf %187, %188 : vector<8x128xf32>
    %190 = math.tanh %189 : vector<8x128xf32>
    %191 = arith.mulf %186, %190 : vector<8x128xf32>
    %c40 = arith.constant 40 : index
    %c512_77 = arith.constant 512 : index
    %192 = vector.load %arg10[%c40, %c512_77] : memref<64x1024xf32, #tpu.memory_space<vmem>>, vector<8x512xf32>
    %193 = arith.addf %192, %161 : vector<8x512xf32>
    %194 = vector.extract_strided_slice %193 {offsets = [0, 0], sizes = [8, 128], strides = [1, 1]} : vector<8x512xf32> to vector<8x128xf32>
    %cst_78 = arith.constant 0.000000e+00 : f32
    %195 = vector.broadcast %cst_78 : f32 to vector<8x128xf32>
    %196 = arith.subf %195, %194 : vector<8x128xf32>
    %197 = math.exp %196 : vector<8x128xf32>
    %cst_79 = arith.constant 1.000000e+00 : f32
    %198 = vector.broadcast %cst_79 : f32 to vector<8x128xf32>
    %199 = arith.addf %198, %197 : vector<8x128xf32>
    %200 = tpu.reciprocal %199 {approx = true} : vector<8x128xf32> -> vector<8x128xf32>
    %201 = vector.extract_strided_slice %193 {offsets = [0, 128], sizes = [8, 128], strides = [1, 1]} : vector<8x512xf32> to vector<8x128xf32>
    %cst_80 = arith.constant 0.000000e+00 : f32
    %202 = vector.broadcast %cst_80 : f32 to vector<8x128xf32>
    %203 = arith.subf %202, %201 : vector<8x128xf32>
    %204 = math.exp %203 : vector<8x128xf32>
    %cst_81 = arith.constant 1.000000e+00 : f32
    %205 = vector.broadcast %cst_81 : f32 to vector<8x128xf32>
    %206 = arith.addf %205, %204 : vector<8x128xf32>
    %207 = tpu.reciprocal %206 {approx = true} : vector<8x128xf32> -> vector<8x128xf32>
    %208 = vector.extract_strided_slice %193 {offsets = [0, 256], sizes = [8, 128], strides = [1, 1]} : vector<8x512xf32> to vector<8x128xf32>
    %209 = math.tanh %208 : vector<8x128xf32>
    %210 = vector.extract_strided_slice %193 {offsets = [0, 384], sizes = [8, 128], strides = [1, 1]} : vector<8x512xf32> to vector<8x128xf32>
    %cst_82 = arith.constant 0.000000e+00 : f32
    %211 = vector.broadcast %cst_82 : f32 to vector<8x128xf32>
    %212 = arith.subf %211, %210 : vector<8x128xf32>
    %213 = math.exp %212 : vector<8x128xf32>
    %cst_83 = arith.constant 1.000000e+00 : f32
    %214 = vector.broadcast %cst_83 : f32 to vector<8x128xf32>
    %215 = arith.addf %214, %213 : vector<8x128xf32>
    %216 = tpu.reciprocal %215 {approx = true} : vector<8x128xf32> -> vector<8x128xf32>
    %217 = arith.mulf %207, %149 : vector<8x128xf32>
    %218 = arith.mulf %200, %209 : vector<8x128xf32>
    %219 = arith.addf %217, %218 : vector<8x128xf32>
    %220 = math.tanh %219 : vector<8x128xf32>
    %221 = arith.mulf %216, %220 : vector<8x128xf32>
    %c16_84 = arith.constant 16 : index
    %c0_85 = arith.constant 0 : index
    %222 = vector.load %arg9[%c16_84, %c0_85] : memref<64x256xf32, #tpu.memory_space<vmem>>, vector<8x128xf32>
    tpu.vector_store %arg9[%c16_84, %c0_85], %191 {strides = array<i32>} : memref<64x256xf32, #tpu.memory_space<vmem>>, vector<8x128xf32>,
    %c40_86 = arith.constant 40 : index
    %c128_87 = arith.constant 128 : index
    %223 = vector.load %arg9[%c40_86, %c128_87] : memref<64x256xf32, #tpu.memory_space<vmem>>, vector<8x128xf32>
    tpu.vector_store %arg9[%c40_86, %c128_87], %221 {strides = array<i32>} : memref<64x256xf32, #tpu.memory_space<vmem>>, vector<8x128xf32>,
    %224 = arith.truncf %191 : vector<8x128xf32> to vector<8x128xbf16>
    %c0_88 = arith.constant 0 : index
    %c0_89 = arith.constant 0 : index
    %c0_90 = arith.constant 0 : index
    %225 = vector.load %arg3[%c0_88, %c0_89, %c0_90] : memref<1x128x512xbf16, #tpu.memory_space<vmem>>, vector<1x128x512xbf16>
    %226 = vector.shape_cast %225 : vector<1x128x512xbf16> to vector<128x512xbf16>
    %cst_91 = arith.constant dense<0.000000e+00> : vector<8x512xf32>
    %227 = tpu.matmul %224, %226, %cst_91 {dimension_numbers = #tpu.dot_dimension_numbers<[1], [0], [0], [1], [0, 0, 1, 1], [], []>} : vector<8x128xbf16>, vector<128x512xbf16>, vector<8x512xf32> -> vector<8x512xf32>
    %228 = arith.truncf %221 : vector<8x128xf32> to vector<8x128xbf16>
    %c0_92 = arith.constant 0 : index
    %c0_93 = arith.constant 0 : index
    %c0_94 = arith.constant 0 : index
    %229 = vector.load %arg4[%c0_92, %c0_93, %c0_94] : memref<1x128x512xbf16, #tpu.memory_space<vmem>>, vector<1x128x512xbf16>
    %230 = vector.shape_cast %229 : vector<1x128x512xbf16> to vector<128x512xbf16>
    %cst_95 = arith.constant dense<0.000000e+00> : vector<8x512xf32>
    %231 = tpu.matmul %228, %230, %cst_95 {dimension_numbers = #tpu.dot_dimension_numbers<[1], [0], [0], [1], [0, 0, 1, 1], [], []>} : vector<8x128xbf16>, vector<128x512xbf16>, vector<8x512xf32> -> vector<8x512xf32>
    %c24 = arith.constant 24 : index
    %c0_96 = arith.constant 0 : index
    %232 = vector.load %arg10[%c24, %c0_96] : memref<64x1024xf32, #tpu.memory_space<vmem>>, vector<8x512xf32>
    %233 = arith.addf %232, %227 : vector<8x512xf32>
    %234 = vector.extract_strided_slice %233 {offsets = [0, 0], sizes = [8, 128], strides = [1, 1]} : vector<8x512xf32> to vector<8x128xf32>
    %cst_97 = arith.constant 0.000000e+00 : f32
    %235 = vector.broadcast %cst_97 : f32 to vector<8x128xf32>
    %236 = arith.subf %235, %234 : vector<8x128xf32>
    %237 = math.exp %236 : vector<8x128xf32>
    %cst_98 = arith.constant 1.000000e+00 : f32
    %238 = vector.broadcast %cst_98 : f32 to vector<8x128xf32>
    %239 = arith.addf %238, %237 : vector<8x128xf32>
    %240 = tpu.reciprocal %239 {approx = true} : vector<8x128xf32> -> vector<8x128xf32>
    %241 = vector.extract_strided_slice %233 {offsets = [0, 128], sizes = [8, 128], strides = [1, 1]} : vector<8x512xf32> to vector<8x128xf32>
    %cst_99 = arith.constant 0.000000e+00 : f32
    %242 = vector.broadcast %cst_99 : f32 to vector<8x128xf32>
    %243 = arith.subf %242, %241 : vector<8x128xf32>
    %244 = math.exp %243 : vector<8x128xf32>
    %cst_100 = arith.constant 1.000000e+00 : f32
    %245 = vector.broadcast %cst_100 : f32 to vector<8x128xf32>
    %246 = arith.addf %245, %244 : vector<8x128xf32>
    %247 = tpu.reciprocal %246 {approx = true} : vector<8x128xf32> -> vector<8x128xf32>
    %248 = vector.extract_strided_slice %233 {offsets = [0, 256], sizes = [8, 128], strides = [1, 1]} : vector<8x512xf32> to vector<8x128xf32>
    %249 = math.tanh %248 : vector<8x128xf32>
    %250 = vector.extract_strided_slice %233 {offsets = [0, 384], sizes = [8, 128], strides = [1, 1]} : vector<8x512xf32> to vector<8x128xf32>
    %cst_101 = arith.constant 0.000000e+00 : f32
    %251 = vector.broadcast %cst_101 : f32 to vector<8x128xf32>
    %252 = arith.subf %251, %250 : vector<8x128xf32>
    %253 = math.exp %252 : vector<8x128xf32>
    %cst_102 = arith.constant 1.000000e+00 : f32
    %254 = vector.broadcast %cst_102 : f32 to vector<8x128xf32>
    %255 = arith.addf %254, %253 : vector<8x128xf32>
    %256 = tpu.reciprocal %255 {approx = true} : vector<8x128xf32> -> vector<8x128xf32>
    %257 = arith.mulf %247, %189 : vector<8x128xf32>
    %258 = arith.mulf %240, %249 : vector<8x128xf32>
    %259 = arith.addf %257, %258 : vector<8x128xf32>
    %260 = math.tanh %259 : vector<8x128xf32>
    %261 = arith.mulf %256, %260 : vector<8x128xf32>
    %c32 = arith.constant 32 : index
    %c512_103 = arith.constant 512 : index
    %262 = vector.load %arg10[%c32, %c512_103] : memref<64x1024xf32, #tpu.memory_space<vmem>>, vector<8x512xf32>
    %263 = arith.addf %262, %231 : vector<8x512xf32>
    %264 = vector.extract_strided_slice %263 {offsets = [0, 0], sizes = [8, 128], strides = [1, 1]} : vector<8x512xf32> to vector<8x128xf32>
    %cst_104 = arith.constant 0.000000e+00 : f32
    %265 = vector.broadcast %cst_104 : f32 to vector<8x128xf32>
    %266 = arith.subf %265, %264 : vector<8x128xf32>
    %267 = math.exp %266 : vector<8x128xf32>
    %cst_105 = arith.constant 1.000000e+00 : f32
    %268 = vector.broadcast %cst_105 : f32 to vector<8x128xf32>
    %269 = arith.addf %268, %267 : vector<8x128xf32>
    %270 = tpu.reciprocal %269 {approx = true} : vector<8x128xf32> -> vector<8x128xf32>
    %271 = vector.extract_strided_slice %263 {offsets = [0, 128], sizes = [8, 128], strides = [1, 1]} : vector<8x512xf32> to vector<8x128xf32>
    %cst_106 = arith.constant 0.000000e+00 : f32
    %272 = vector.broadcast %cst_106 : f32 to vector<8x128xf32>
    %273 = arith.subf %272, %271 : vector<8x128xf32>
    %274 = math.exp %273 : vector<8x128xf32>
    %cst_107 = arith.constant 1.000000e+00 : f32
    %275 = vector.broadcast %cst_107 : f32 to vector<8x128xf32>
    %276 = arith.addf %275, %274 : vector<8x128xf32>
    %277 = tpu.reciprocal %276 {approx = true} : vector<8x128xf32> -> vector<8x128xf32>
    %278 = vector.extract_strided_slice %263 {offsets = [0, 256], sizes = [8, 128], strides = [1, 1]} : vector<8x512xf32> to vector<8x128xf32>
    %279 = math.tanh %278 : vector<8x128xf32>
    %280 = vector.extract_strided_slice %263 {offsets = [0, 384], sizes = [8, 128], strides = [1, 1]} : vector<8x512xf32> to vector<8x128xf32>
    %cst_108 = arith.constant 0.000000e+00 : f32
    %281 = vector.broadcast %cst_108 : f32 to vector<8x128xf32>
    %282 = arith.subf %281, %280 : vector<8x128xf32>
    %283 = math.exp %282 : vector<8x128xf32>
    %cst_109 = arith.constant 1.000000e+00 : f32
    %284 = vector.broadcast %cst_109 : f32 to vector<8x128xf32>
    %285 = arith.addf %284, %283 : vector<8x128xf32>
    %286 = tpu.reciprocal %285 {approx = true} : vector<8x128xf32> -> vector<8x128xf32>
    %287 = arith.mulf %277, %219 : vector<8x128xf32>
    %288 = arith.mulf %270, %279 : vector<8x128xf32>
    %289 = arith.addf %287, %288 : vector<8x128xf32>
    %290 = math.tanh %289 : vector<8x128xf32>
    %291 = arith.mulf %286, %290 : vector<8x128xf32>
    %c24_110 = arith.constant 24 : index
    %c0_111 = arith.constant 0 : index
    %292 = vector.load %arg9[%c24_110, %c0_111] : memref<64x256xf32, #tpu.memory_space<vmem>>, vector<8x128xf32>
    tpu.vector_store %arg9[%c24_110, %c0_111], %261 {strides = array<i32>} : memref<64x256xf32, #tpu.memory_space<vmem>>, vector<8x128xf32>,
    %c32_112 = arith.constant 32 : index
    %c128_113 = arith.constant 128 : index
    %293 = vector.load %arg9[%c32_112, %c128_113] : memref<64x256xf32, #tpu.memory_space<vmem>>, vector<8x128xf32>
    tpu.vector_store %arg9[%c32_112, %c128_113], %291 {strides = array<i32>} : memref<64x256xf32, #tpu.memory_space<vmem>>, vector<8x128xf32>,
    %294 = arith.truncf %261 : vector<8x128xf32> to vector<8x128xbf16>
    %c0_114 = arith.constant 0 : index
    %c0_115 = arith.constant 0 : index
    %c0_116 = arith.constant 0 : index
    %295 = vector.load %arg3[%c0_114, %c0_115, %c0_116] : memref<1x128x512xbf16, #tpu.memory_space<vmem>>, vector<1x128x512xbf16>
    %296 = vector.shape_cast %295 : vector<1x128x512xbf16> to vector<128x512xbf16>
    %cst_117 = arith.constant dense<0.000000e+00> : vector<8x512xf32>
    %297 = tpu.matmul %294, %296, %cst_117 {dimension_numbers = #tpu.dot_dimension_numbers<[1], [0], [0], [1], [0, 0, 1, 1], [], []>} : vector<8x128xbf16>, vector<128x512xbf16>, vector<8x512xf32> -> vector<8x512xf32>
    %298 = arith.truncf %291 : vector<8x128xf32> to vector<8x128xbf16>
    %c0_118 = arith.constant 0 : index
    %c0_119 = arith.constant 0 : index
    %c0_120 = arith.constant 0 : index
    %299 = vector.load %arg4[%c0_118, %c0_119, %c0_120] : memref<1x128x512xbf16, #tpu.memory_space<vmem>>, vector<1x128x512xbf16>
    %300 = vector.shape_cast %299 : vector<1x128x512xbf16> to vector<128x512xbf16>
    %cst_121 = arith.constant dense<0.000000e+00> : vector<8x512xf32>
    %301 = tpu.matmul %298, %300, %cst_121 {dimension_numbers = #tpu.dot_dimension_numbers<[1], [0], [0], [1], [0, 0, 1, 1], [], []>} : vector<8x128xbf16>, vector<128x512xbf16>, vector<8x512xf32> -> vector<8x512xf32>
    %c32_122 = arith.constant 32 : index
    %c0_123 = arith.constant 0 : index
    %302 = vector.load %arg10[%c32_122, %c0_123] : memref<64x1024xf32, #tpu.memory_space<vmem>>, vector<8x512xf32>
    %303 = arith.addf %302, %297 : vector<8x512xf32>
    %304 = vector.extract_strided_slice %303 {offsets = [0, 0], sizes = [8, 128], strides = [1, 1]} : vector<8x512xf32> to vector<8x128xf32>
    %cst_124 = arith.constant 0.000000e+00 : f32
    %305 = vector.broadcast %cst_124 : f32 to vector<8x128xf32>
    %306 = arith.subf %305, %304 : vector<8x128xf32>
    %307 = math.exp %306 : vector<8x128xf32>
    %cst_125 = arith.constant 1.000000e+00 : f32
    %308 = vector.broadcast %cst_125 : f32 to vector<8x128xf32>
    %309 = arith.addf %308, %307 : vector<8x128xf32>
    %310 = tpu.reciprocal %309 {approx = true} : vector<8x128xf32> -> vector<8x128xf32>
    %311 = vector.extract_strided_slice %303 {offsets = [0, 128], sizes = [8, 128], strides = [1, 1]} : vector<8x512xf32> to vector<8x128xf32>
    %cst_126 = arith.constant 0.000000e+00 : f32
    %312 = vector.broadcast %cst_126 : f32 to vector<8x128xf32>
    %313 = arith.subf %312, %311 : vector<8x128xf32>
    %314 = math.exp %313 : vector<8x128xf32>
    %cst_127 = arith.constant 1.000000e+00 : f32
    %315 = vector.broadcast %cst_127 : f32 to vector<8x128xf32>
    %316 = arith.addf %315, %314 : vector<8x128xf32>
    %317 = tpu.reciprocal %316 {approx = true} : vector<8x128xf32> -> vector<8x128xf32>
    %318 = vector.extract_strided_slice %303 {offsets = [0, 256], sizes = [8, 128], strides = [1, 1]} : vector<8x512xf32> to vector<8x128xf32>
    %319 = math.tanh %318 : vector<8x128xf32>
    %320 = vector.extract_strided_slice %303 {offsets = [0, 384], sizes = [8, 128], strides = [1, 1]} : vector<8x512xf32> to vector<8x128xf32>
    %cst_128 = arith.constant 0.000000e+00 : f32
    %321 = vector.broadcast %cst_128 : f32 to vector<8x128xf32>
    %322 = arith.subf %321, %320 : vector<8x128xf32>
    %323 = math.exp %322 : vector<8x128xf32>
    %cst_129 = arith.constant 1.000000e+00 : f32
    %324 = vector.broadcast %cst_129 : f32 to vector<8x128xf32>
    %325 = arith.addf %324, %323 : vector<8x128xf32>
    %326 = tpu.reciprocal %325 {approx = true} : vector<8x128xf32> -> vector<8x128xf32>
    %327 = arith.mulf %317, %259 : vector<8x128xf32>
    %328 = arith.mulf %310, %319 : vector<8x128xf32>
    %329 = arith.addf %327, %328 : vector<8x128xf32>
    %330 = math.tanh %329 : vector<8x128xf32>
    %331 = arith.mulf %326, %330 : vector<8x128xf32>
    %c24_130 = arith.constant 24 : index
    %c512_131 = arith.constant 512 : index
    %332 = vector.load %arg10[%c24_130, %c512_131] : memref<64x1024xf32, #tpu.memory_space<vmem>>, vector<8x512xf32>
    %333 = arith.addf %332, %301 : vector<8x512xf32>
    %334 = vector.extract_strided_slice %333 {offsets = [0, 0], sizes = [8, 128], strides = [1, 1]} : vector<8x512xf32> to vector<8x128xf32>
    %cst_132 = arith.constant 0.000000e+00 : f32
    %335 = vector.broadcast %cst_132 : f32 to vector<8x128xf32>
    %336 = arith.subf %335, %334 : vector<8x128xf32>
    %337 = math.exp %336 : vector<8x128xf32>
    %cst_133 = arith.constant 1.000000e+00 : f32
    %338 = vector.broadcast %cst_133 : f32 to vector<8x128xf32>
    %339 = arith.addf %338, %337 : vector<8x128xf32>
    %340 = tpu.reciprocal %339 {approx = true} : vector<8x128xf32> -> vector<8x128xf32>
    %341 = vector.extract_strided_slice %333 {offsets = [0, 128], sizes = [8, 128], strides = [1, 1]} : vector<8x512xf32> to vector<8x128xf32>
    %cst_134 = arith.constant 0.000000e+00 : f32
    %342 = vector.broadcast %cst_134 : f32 to vector<8x128xf32>
    %343 = arith.subf %342, %341 : vector<8x128xf32>
    %344 = math.exp %343 : vector<8x128xf32>
    %cst_135 = arith.constant 1.000000e+00 : f32
    %345 = vector.broadcast %cst_135 : f32 to vector<8x128xf32>
    %346 = arith.addf %345, %344 : vector<8x128xf32>
    %347 = tpu.reciprocal %346 {approx = true} : vector<8x128xf32> -> vector<8x128xf32>
    %348 = vector.extract_strided_slice %333 {offsets = [0, 256], sizes = [8, 128], strides = [1, 1]} : vector<8x512xf32> to vector<8x128xf32>
    %349 = math.tanh %348 : vector<8x128xf32>
    %350 = vector.extract_strided_slice %333 {offsets = [0, 384], sizes = [8, 128], strides = [1, 1]} : vector<8x512xf32> to vector<8x128xf32>
    %cst_136 = arith.constant 0.000000e+00 : f32
    %351 = vector.broadcast %cst_136 : f32 to vector<8x128xf32>
    %352 = arith.subf %351, %350 : vector<8x128xf32>
    %353 = math.exp %352 : vector<8x128xf32>
    %cst_137 = arith.constant 1.000000e+00 : f32
    %354 = vector.broadcast %cst_137 : f32 to vector<8x128xf32>
    %355 = arith.addf %354, %353 : vector<8x128xf32>
    %356 = tpu.reciprocal %355 {approx = true} : vector<8x128xf32> -> vector<8x128xf32>
    %357 = arith.mulf %347, %289 : vector<8x128xf32>
    %358 = arith.mulf %340, %349 : vector<8x128xf32>
    %359 = arith.addf %357, %358 : vector<8x128xf32>
    %360 = math.tanh %359 : vector<8x128xf32>
    %361 = arith.mulf %356, %360 : vector<8x128xf32>
    %c32_138 = arith.constant 32 : index
    %c0_139 = arith.constant 0 : index
    %362 = vector.load %arg9[%c32_138, %c0_139] : memref<64x256xf32, #tpu.memory_space<vmem>>, vector<8x128xf32>
    tpu.vector_store %arg9[%c32_138, %c0_139], %331 {strides = array<i32>} : memref<64x256xf32, #tpu.memory_space<vmem>>, vector<8x128xf32>,
    %c24_140 = arith.constant 24 : index
    %c128_141 = arith.constant 128 : index
    %363 = vector.load %arg9[%c24_140, %c128_141] : memref<64x256xf32, #tpu.memory_space<vmem>>, vector<8x128xf32>
    tpu.vector_store %arg9[%c24_140, %c128_141], %361 {strides = array<i32>} : memref<64x256xf32, #tpu.memory_space<vmem>>, vector<8x128xf32>,
    %364 = arith.truncf %331 : vector<8x128xf32> to vector<8x128xbf16>
    %c0_142 = arith.constant 0 : index
    %c0_143 = arith.constant 0 : index
    %c0_144 = arith.constant 0 : index
    %365 = vector.load %arg3[%c0_142, %c0_143, %c0_144] : memref<1x128x512xbf16, #tpu.memory_space<vmem>>, vector<1x128x512xbf16>
    %366 = vector.shape_cast %365 : vector<1x128x512xbf16> to vector<128x512xbf16>
    %cst_145 = arith.constant dense<0.000000e+00> : vector<8x512xf32>
    %367 = tpu.matmul %364, %366, %cst_145 {dimension_numbers = #tpu.dot_dimension_numbers<[1], [0], [0], [1], [0, 0, 1, 1], [], []>} : vector<8x128xbf16>, vector<128x512xbf16>, vector<8x512xf32> -> vector<8x512xf32>
    %368 = arith.truncf %361 : vector<8x128xf32> to vector<8x128xbf16>
    %c0_146 = arith.constant 0 : index
    %c0_147 = arith.constant 0 : index
    %c0_148 = arith.constant 0 : index
    %369 = vector.load %arg4[%c0_146, %c0_147, %c0_148] : memref<1x128x512xbf16, #tpu.memory_space<vmem>>, vector<1x128x512xbf16>
    %370 = vector.shape_cast %369 : vector<1x128x512xbf16> to vector<128x512xbf16>
    %cst_149 = arith.constant dense<0.000000e+00> : vector<8x512xf32>
    %371 = tpu.matmul %368, %370, %cst_149 {dimension_numbers = #tpu.dot_dimension_numbers<[1], [0], [0], [1], [0, 0, 1, 1], [], []>} : vector<8x128xbf16>, vector<128x512xbf16>, vector<8x512xf32> -> vector<8x512xf32>
    %c40_150 = arith.constant 40 : index
    %c0_151 = arith.constant 0 : index
    %372 = vector.load %arg10[%c40_150, %c0_151] : memref<64x1024xf32, #tpu.memory_space<vmem>>, vector<8x512xf32>
    %373 = arith.addf %372, %367 : vector<8x512xf32>
    %374 = vector.extract_strided_slice %373 {offsets = [0, 0], sizes = [8, 128], strides = [1, 1]} : vector<8x512xf32> to vector<8x128xf32>
    %cst_152 = arith.constant 0.000000e+00 : f32
    %375 = vector.broadcast %cst_152 : f32 to vector<8x128xf32>
    %376 = arith.subf %375, %374 : vector<8x128xf32>
    %377 = math.exp %376 : vector<8x128xf32>
    %cst_153 = arith.constant 1.000000e+00 : f32
    %378 = vector.broadcast %cst_153 : f32 to vector<8x128xf32>
    %379 = arith.addf %378, %377 : vector<8x128xf32>
    %380 = tpu.reciprocal %379 {approx = true} : vector<8x128xf32> -> vector<8x128xf32>
    %381 = vector.extract_strided_slice %373 {offsets = [0, 128], sizes = [8, 128], strides = [1, 1]} : vector<8x512xf32> to vector<8x128xf32>
    %cst_154 = arith.constant 0.000000e+00 : f32
    %382 = vector.broadcast %cst_154 : f32 to vector<8x128xf32>
    %383 = arith.subf %382, %381 : vector<8x128xf32>
    %384 = math.exp %383 : vector<8x128xf32>
    %cst_155 = arith.constant 1.000000e+00 : f32
    %385 = vector.broadcast %cst_155 : f32 to vector<8x128xf32>
    %386 = arith.addf %385, %384 : vector<8x128xf32>
    %387 = tpu.reciprocal %386 {approx = true} : vector<8x128xf32> -> vector<8x128xf32>
    %388 = vector.extract_strided_slice %373 {offsets = [0, 256], sizes = [8, 128], strides = [1, 1]} : vector<8x512xf32> to vector<8x128xf32>
    %389 = math.tanh %388 : vector<8x128xf32>
    %390 = vector.extract_strided_slice %373 {offsets = [0, 384], sizes = [8, 128], strides = [1, 1]} : vector<8x512xf32> to vector<8x128xf32>
    %cst_156 = arith.constant 0.000000e+00 : f32
    %391 = vector.broadcast %cst_156 : f32 to vector<8x128xf32>
    %392 = arith.subf %391, %390 : vector<8x128xf32>
    %393 = math.exp %392 : vector<8x128xf32>
    %cst_157 = arith.constant 1.000000e+00 : f32
    %394 = vector.broadcast %cst_157 : f32 to vector<8x128xf32>
    %395 = arith.addf %394, %393 : vector<8x128xf32>
    %396 = tpu.reciprocal %395 {approx = true} : vector<8x128xf32> -> vector<8x128xf32>
    %397 = arith.mulf %387, %329 : vector<8x128xf32>
    %398 = arith.mulf %380, %389 : vector<8x128xf32>
    %399 = arith.addf %397, %398 : vector<8x128xf32>
    %400 = math.tanh %399 : vector<8x128xf32>
    %401 = arith.mulf %396, %400 : vector<8x128xf32>
    %c16_158 = arith.constant 16 : index
    %c512_159 = arith.constant 512 : index
    %402 = vector.load %arg10[%c16_158, %c512_159] : memref<64x1024xf32, #tpu.memory_space<vmem>>, vector<8x512xf32>
    %403 = arith.addf %402, %371 : vector<8x512xf32>
    %404 = vector.extract_strided_slice %403 {offsets = [0, 0], sizes = [8, 128], strides = [1, 1]} : vector<8x512xf32> to vector<8x128xf32>
    %cst_160 = arith.constant 0.000000e+00 : f32
    %405 = vector.broadcast %cst_160 : f32 to vector<8x128xf32>
    %406 = arith.subf %405, %404 : vector<8x128xf32>
    %407 = math.exp %406 : vector<8x128xf32>
    %cst_161 = arith.constant 1.000000e+00 : f32
    %408 = vector.broadcast %cst_161 : f32 to vector<8x128xf32>
    %409 = arith.addf %408, %407 : vector<8x128xf32>
    %410 = tpu.reciprocal %409 {approx = true} : vector<8x128xf32> -> vector<8x128xf32>
    %411 = vector.extract_strided_slice %403 {offsets = [0, 128], sizes = [8, 128], strides = [1, 1]} : vector<8x512xf32> to vector<8x128xf32>
    %cst_162 = arith.constant 0.000000e+00 : f32
    %412 = vector.broadcast %cst_162 : f32 to vector<8x128xf32>
    %413 = arith.subf %412, %411 : vector<8x128xf32>
    %414 = math.exp %413 : vector<8x128xf32>
    %cst_163 = arith.constant 1.000000e+00 : f32
    %415 = vector.broadcast %cst_163 : f32 to vector<8x128xf32>
    %416 = arith.addf %415, %414 : vector<8x128xf32>
    %417 = tpu.reciprocal %416 {approx = true} : vector<8x128xf32> -> vector<8x128xf32>
    %418 = vector.extract_strided_slice %403 {offsets = [0, 256], sizes = [8, 128], strides = [1, 1]} : vector<8x512xf32> to vector<8x128xf32>
    %419 = math.tanh %418 : vector<8x128xf32>
    %420 = vector.extract_strided_slice %403 {offsets = [0, 384], sizes = [8, 128], strides = [1, 1]} : vector<8x512xf32> to vector<8x128xf32>
    %cst_164 = arith.constant 0.000000e+00 : f32
    %421 = vector.broadcast %cst_164 : f32 to vector<8x128xf32>
    %422 = arith.subf %421, %420 : vector<8x128xf32>
    %423 = math.exp %422 : vector<8x128xf32>
    %cst_165 = arith.constant 1.000000e+00 : f32
    %424 = vector.broadcast %cst_165 : f32 to vector<8x128xf32>
    %425 = arith.addf %424, %423 : vector<8x128xf32>
    %426 = tpu.reciprocal %425 {approx = true} : vector<8x128xf32> -> vector<8x128xf32>
    %427 = arith.mulf %417, %359 : vector<8x128xf32>
    %428 = arith.mulf %410, %419 : vector<8x128xf32>
    %429 = arith.addf %427, %428 : vector<8x128xf32>
    %430 = math.tanh %429 : vector<8x128xf32>
    %431 = arith.mulf %426, %430 : vector<8x128xf32>
    %c40_166 = arith.constant 40 : index
    %c0_167 = arith.constant 0 : index
    %432 = vector.load %arg9[%c40_166, %c0_167] : memref<64x256xf32, #tpu.memory_space<vmem>>, vector<8x128xf32>
    tpu.vector_store %arg9[%c40_166, %c0_167], %401 {strides = array<i32>} : memref<64x256xf32, #tpu.memory_space<vmem>>, vector<8x128xf32>,
    %c16_168 = arith.constant 16 : index
    %c128_169 = arith.constant 128 : index
    %433 = vector.load %arg9[%c16_168, %c128_169] : memref<64x256xf32, #tpu.memory_space<vmem>>, vector<8x128xf32>
    tpu.vector_store %arg9[%c16_168, %c128_169], %431 {strides = array<i32>} : memref<64x256xf32, #tpu.memory_space<vmem>>, vector<8x128xf32>,
    %434 = arith.truncf %401 : vector<8x128xf32> to vector<8x128xbf16>
    %c0_170 = arith.constant 0 : index
    %c0_171 = arith.constant 0 : index
    %c0_172 = arith.constant 0 : index
    %435 = vector.load %arg3[%c0_170, %c0_171, %c0_172] : memref<1x128x512xbf16, #tpu.memory_space<vmem>>, vector<1x128x512xbf16>
    %436 = vector.shape_cast %435 : vector<1x128x512xbf16> to vector<128x512xbf16>
    %cst_173 = arith.constant dense<0.000000e+00> : vector<8x512xf32>
    %437 = tpu.matmul %434, %436, %cst_173 {dimension_numbers = #tpu.dot_dimension_numbers<[1], [0], [0], [1], [0, 0, 1, 1], [], []>} : vector<8x128xbf16>, vector<128x512xbf16>, vector<8x512xf32> -> vector<8x512xf32>
    %438 = arith.truncf %431 : vector<8x128xf32> to vector<8x128xbf16>
    %c0_174 = arith.constant 0 : index
    %c0_175 = arith.constant 0 : index
    %c0_176 = arith.constant 0 : index
    %439 = vector.load %arg4[%c0_174, %c0_175, %c0_176] : memref<1x128x512xbf16, #tpu.memory_space<vmem>>, vector<1x128x512xbf16>
    %440 = vector.shape_cast %439 : vector<1x128x512xbf16> to vector<128x512xbf16>
    %cst_177 = arith.constant dense<0.000000e+00> : vector<8x512xf32>
    %441 = tpu.matmul %438, %440, %cst_177 {dimension_numbers = #tpu.dot_dimension_numbers<[1], [0], [0], [1], [0, 0, 1, 1], [], []>} : vector<8x128xbf16>, vector<128x512xbf16>, vector<8x512xf32> -> vector<8x512xf32>
    %c48_178 = arith.constant 48 : index
    %c0_179 = arith.constant 0 : index
    %442 = vector.load %arg10[%c48_178, %c0_179] : memref<64x1024xf32, #tpu.memory_space<vmem>>, vector<8x512xf32>
    %443 = arith.addf %442, %437 : vector<8x512xf32>
    %444 = vector.extract_strided_slice %443 {offsets = [0, 0], sizes = [8, 128], strides = [1, 1]} : vector<8x512xf32> to vector<8x128xf32>
    %cst_180 = arith.constant 0.000000e+00 : f32
    %445 = vector.broadcast %cst_180 : f32 to vector<8x128xf32>
    %446 = arith.subf %445, %444 : vector<8x128xf32>
    %447 = math.exp %446 : vector<8x128xf32>
    %cst_181 = arith.constant 1.000000e+00 : f32
    %448 = vector.broadcast %cst_181 : f32 to vector<8x128xf32>
    %449 = arith.addf %448, %447 : vector<8x128xf32>
    %450 = tpu.reciprocal %449 {approx = true} : vector<8x128xf32> -> vector<8x128xf32>
    %451 = vector.extract_strided_slice %443 {offsets = [0, 128], sizes = [8, 128], strides = [1, 1]} : vector<8x512xf32> to vector<8x128xf32>
    %cst_182 = arith.constant 0.000000e+00 : f32
    %452 = vector.broadcast %cst_182 : f32 to vector<8x128xf32>
    %453 = arith.subf %452, %451 : vector<8x128xf32>
    %454 = math.exp %453 : vector<8x128xf32>
    %cst_183 = arith.constant 1.000000e+00 : f32
    %455 = vector.broadcast %cst_183 : f32 to vector<8x128xf32>
    %456 = arith.addf %455, %454 : vector<8x128xf32>
    %457 = tpu.reciprocal %456 {approx = true} : vector<8x128xf32> -> vector<8x128xf32>
    %458 = vector.extract_strided_slice %443 {offsets = [0, 256], sizes = [8, 128], strides = [1, 1]} : vector<8x512xf32> to vector<8x128xf32>
    %459 = math.tanh %458 : vector<8x128xf32>
    %460 = vector.extract_strided_slice %443 {offsets = [0, 384], sizes = [8, 128], strides = [1, 1]} : vector<8x512xf32> to vector<8x128xf32>
    %cst_184 = arith.constant 0.000000e+00 : f32
    %461 = vector.broadcast %cst_184 : f32 to vector<8x128xf32>
    %462 = arith.subf %461, %460 : vector<8x128xf32>
    %463 = math.exp %462 : vector<8x128xf32>
    %cst_185 = arith.constant 1.000000e+00 : f32
    %464 = vector.broadcast %cst_185 : f32 to vector<8x128xf32>
    %465 = arith.addf %464, %463 : vector<8x128xf32>
    %466 = tpu.reciprocal %465 {approx = true} : vector<8x128xf32> -> vector<8x128xf32>
    %467 = arith.mulf %457, %399 : vector<8x128xf32>
    %468 = arith.mulf %450, %459 : vector<8x128xf32>
    %469 = arith.addf %467, %468 : vector<8x128xf32>
    %470 = math.tanh %469 : vector<8x128xf32>
    %471 = arith.mulf %466, %470 : vector<8x128xf32>
    %c8_186 = arith.constant 8 : index
    %c512_187 = arith.constant 512 : index
    %472 = vector.load %arg10[%c8_186, %c512_187] : memref<64x1024xf32, #tpu.memory_space<vmem>>, vector<8x512xf32>
    %473 = arith.addf %472, %441 : vector<8x512xf32>
    %474 = vector.extract_strided_slice %473 {offsets = [0, 0], sizes = [8, 128], strides = [1, 1]} : vector<8x512xf32> to vector<8x128xf32>
    %cst_188 = arith.constant 0.000000e+00 : f32
    %475 = vector.broadcast %cst_188 : f32 to vector<8x128xf32>
    %476 = arith.subf %475, %474 : vector<8x128xf32>
    %477 = math.exp %476 : vector<8x128xf32>
    %cst_189 = arith.constant 1.000000e+00 : f32
    %478 = vector.broadcast %cst_189 : f32 to vector<8x128xf32>
    %479 = arith.addf %478, %477 : vector<8x128xf32>
    %480 = tpu.reciprocal %479 {approx = true} : vector<8x128xf32> -> vector<8x128xf32>
    %481 = vector.extract_strided_slice %473 {offsets = [0, 128], sizes = [8, 128], strides = [1, 1]} : vector<8x512xf32> to vector<8x128xf32>
    %cst_190 = arith.constant 0.000000e+00 : f32
    %482 = vector.broadcast %cst_190 : f32 to vector<8x128xf32>
    %483 = arith.subf %482, %481 : vector<8x128xf32>
    %484 = math.exp %483 : vector<8x128xf32>
    %cst_191 = arith.constant 1.000000e+00 : f32
    %485 = vector.broadcast %cst_191 : f32 to vector<8x128xf32>
    %486 = arith.addf %485, %484 : vector<8x128xf32>
    %487 = tpu.reciprocal %486 {approx = true} : vector<8x128xf32> -> vector<8x128xf32>
    %488 = vector.extract_strided_slice %473 {offsets = [0, 256], sizes = [8, 128], strides = [1, 1]} : vector<8x512xf32> to vector<8x128xf32>
    %489 = math.tanh %488 : vector<8x128xf32>
    %490 = vector.extract_strided_slice %473 {offsets = [0, 384], sizes = [8, 128], strides = [1, 1]} : vector<8x512xf32> to vector<8x128xf32>
    %cst_192 = arith.constant 0.000000e+00 : f32
    %491 = vector.broadcast %cst_192 : f32 to vector<8x128xf32>
    %492 = arith.subf %491, %490 : vector<8x128xf32>
    %493 = math.exp %492 : vector<8x128xf32>
    %cst_193 = arith.constant 1.000000e+00 : f32
    %494 = vector.broadcast %cst_193 : f32 to vector<8x128xf32>
    %495 = arith.addf %494, %493 : vector<8x128xf32>
    %496 = tpu.reciprocal %495 {approx = true} : vector<8x128xf32> -> vector<8x128xf32>
    %497 = arith.mulf %487, %429 : vector<8x128xf32>
    %498 = arith.mulf %480, %489 : vector<8x128xf32>
    %499 = arith.addf %497, %498 : vector<8x128xf32>
    %500 = math.tanh %499 : vector<8x128xf32>
    %501 = arith.mulf %496, %500 : vector<8x128xf32>
    %c48_194 = arith.constant 48 : index
    %c0_195 = arith.constant 0 : index
    %502 = vector.load %arg9[%c48_194, %c0_195] : memref<64x256xf32, #tpu.memory_space<vmem>>, vector<8x128xf32>
    tpu.vector_store %arg9[%c48_194, %c0_195], %471 {strides = array<i32>} : memref<64x256xf32, #tpu.memory_space<vmem>>, vector<8x128xf32>,
    %c8_196 = arith.constant 8 : index
    %c128_197 = arith.constant 128 : index
    %503 = vector.load %arg9[%c8_196, %c128_197] : memref<64x256xf32, #tpu.memory_space<vmem>>, vector<8x128xf32>
    tpu.vector_store %arg9[%c8_196, %c128_197], %501 {strides = array<i32>} : memref<64x256xf32, #tpu.memory_space<vmem>>, vector<8x128xf32>,
    %504 = arith.truncf %471 : vector<8x128xf32> to vector<8x128xbf16>
    %c0_198 = arith.constant 0 : index
    %c0_199 = arith.constant 0 : index
    %c0_200 = arith.constant 0 : index
    %505 = vector.load %arg3[%c0_198, %c0_199, %c0_200] : memref<1x128x512xbf16, #tpu.memory_space<vmem>>, vector<1x128x512xbf16>
    %506 = vector.shape_cast %505 : vector<1x128x512xbf16> to vector<128x512xbf16>
    %cst_201 = arith.constant dense<0.000000e+00> : vector<8x512xf32>
    %507 = tpu.matmul %504, %506, %cst_201 {dimension_numbers = #tpu.dot_dimension_numbers<[1], [0], [0], [1], [0, 0, 1, 1], [], []>} : vector<8x128xbf16>, vector<128x512xbf16>, vector<8x512xf32> -> vector<8x512xf32>
    %508 = arith.truncf %501 : vector<8x128xf32> to vector<8x128xbf16>
    %c0_202 = arith.constant 0 : index
    %c0_203 = arith.constant 0 : index
    %c0_204 = arith.constant 0 : index
    %509 = vector.load %arg4[%c0_202, %c0_203, %c0_204] : memref<1x128x512xbf16, #tpu.memory_space<vmem>>, vector<1x128x512xbf16>
    %510 = vector.shape_cast %509 : vector<1x128x512xbf16> to vector<128x512xbf16>
    %cst_205 = arith.constant dense<0.000000e+00> : vector<8x512xf32>
    %511 = tpu.matmul %508, %510, %cst_205 {dimension_numbers = #tpu.dot_dimension_numbers<[1], [0], [0], [1], [0, 0, 1, 1], [], []>} : vector<8x128xbf16>, vector<128x512xbf16>, vector<8x512xf32> -> vector<8x512xf32>
    %c56_206 = arith.constant 56 : index
    %c0_207 = arith.constant 0 : index
    %512 = vector.load %arg10[%c56_206, %c0_207] : memref<64x1024xf32, #tpu.memory_space<vmem>>, vector<8x512xf32>
    %513 = arith.addf %512, %507 : vector<8x512xf32>
    %514 = vector.extract_strided_slice %513 {offsets = [0, 0], sizes = [8, 128], strides = [1, 1]} : vector<8x512xf32> to vector<8x128xf32>
    %cst_208 = arith.constant 0.000000e+00 : f32
    %515 = vector.broadcast %cst_208 : f32 to vector<8x128xf32>
    %516 = arith.subf %515, %514 : vector<8x128xf32>
    %517 = math.exp %516 : vector<8x128xf32>
    %cst_209 = arith.constant 1.000000e+00 : f32
    %518 = vector.broadcast %cst_209 : f32 to vector<8x128xf32>
    %519 = arith.addf %518, %517 : vector<8x128xf32>
    %520 = tpu.reciprocal %519 {approx = true} : vector<8x128xf32> -> vector<8x128xf32>
    %521 = vector.extract_strided_slice %513 {offsets = [0, 128], sizes = [8, 128], strides = [1, 1]} : vector<8x512xf32> to vector<8x128xf32>
    %cst_210 = arith.constant 0.000000e+00 : f32
    %522 = vector.broadcast %cst_210 : f32 to vector<8x128xf32>
    %523 = arith.subf %522, %521 : vector<8x128xf32>
    %524 = math.exp %523 : vector<8x128xf32>
    %cst_211 = arith.constant 1.000000e+00 : f32
    %525 = vector.broadcast %cst_211 : f32 to vector<8x128xf32>
    %526 = arith.addf %525, %524 : vector<8x128xf32>
    %527 = tpu.reciprocal %526 {approx = true} : vector<8x128xf32> -> vector<8x128xf32>
    %528 = vector.extract_strided_slice %513 {offsets = [0, 256], sizes = [8, 128], strides = [1, 1]} : vector<8x512xf32> to vector<8x128xf32>
    %529 = math.tanh %528 : vector<8x128xf32>
    %530 = vector.extract_strided_slice %513 {offsets = [0, 384], sizes = [8, 128], strides = [1, 1]} : vector<8x512xf32> to vector<8x128xf32>
    %cst_212 = arith.constant 0.000000e+00 : f32
    %531 = vector.broadcast %cst_212 : f32 to vector<8x128xf32>
    %532 = arith.subf %531, %530 : vector<8x128xf32>
    %533 = math.exp %532 : vector<8x128xf32>
    %cst_213 = arith.constant 1.000000e+00 : f32
    %534 = vector.broadcast %cst_213 : f32 to vector<8x128xf32>
    %535 = arith.addf %534, %533 : vector<8x128xf32>
    %536 = tpu.reciprocal %535 {approx = true} : vector<8x128xf32> -> vector<8x128xf32>
    %537 = arith.mulf %527, %469 : vector<8x128xf32>
    %538 = arith.mulf %520, %529 : vector<8x128xf32>
    %539 = arith.addf %537, %538 : vector<8x128xf32>
    %540 = math.tanh %539 : vector<8x128xf32>
    %541 = arith.mulf %536, %540 : vector<8x128xf32>
    %c0_214 = arith.constant 0 : index
    %c512_215 = arith.constant 512 : index
    %542 = vector.load %arg10[%c0_214, %c512_215] : memref<64x1024xf32, #tpu.memory_space<vmem>>, vector<8x512xf32>
    %543 = arith.addf %542, %511 : vector<8x512xf32>
    %544 = vector.extract_strided_slice %543 {offsets = [0, 0], sizes = [8, 128], strides = [1, 1]} : vector<8x512xf32> to vector<8x128xf32>
    %cst_216 = arith.constant 0.000000e+00 : f32
    %545 = vector.broadcast %cst_216 : f32 to vector<8x128xf32>
    %546 = arith.subf %545, %544 : vector<8x128xf32>
    %547 = math.exp %546 : vector<8x128xf32>
    %cst_217 = arith.constant 1.000000e+00 : f32
    %548 = vector.broadcast %cst_217 : f32 to vector<8x128xf32>
    %549 = arith.addf %548, %547 : vector<8x128xf32>
    %550 = tpu.reciprocal %549 {approx = true} : vector<8x128xf32> -> vector<8x128xf32>
    %551 = vector.extract_strided_slice %543 {offsets = [0, 128], sizes = [8, 128], strides = [1, 1]} : vector<8x512xf32> to vector<8x128xf32>
    %cst_218 = arith.constant 0.000000e+00 : f32
    %552 = vector.broadcast %cst_218 : f32 to vector<8x128xf32>
    %553 = arith.subf %552, %551 : vector<8x128xf32>
    %554 = math.exp %553 : vector<8x128xf32>
    %cst_219 = arith.constant 1.000000e+00 : f32
    %555 = vector.broadcast %cst_219 : f32 to vector<8x128xf32>
    %556 = arith.addf %555, %554 : vector<8x128xf32>
    %557 = tpu.reciprocal %556 {approx = true} : vector<8x128xf32> -> vector<8x128xf32>
    %558 = vector.extract_strided_slice %543 {offsets = [0, 256], sizes = [8, 128], strides = [1, 1]} : vector<8x512xf32> to vector<8x128xf32>
    %559 = math.tanh %558 : vector<8x128xf32>
    %560 = vector.extract_strided_slice %543 {offsets = [0, 384], sizes = [8, 128], strides = [1, 1]} : vector<8x512xf32> to vector<8x128xf32>
    %cst_220 = arith.constant 0.000000e+00 : f32
    %561 = vector.broadcast %cst_220 : f32 to vector<8x128xf32>
    %562 = arith.subf %561, %560 : vector<8x128xf32>
    %563 = math.exp %562 : vector<8x128xf32>
    %cst_221 = arith.constant 1.000000e+00 : f32
    %564 = vector.broadcast %cst_221 : f32 to vector<8x128xf32>
    %565 = arith.addf %564, %563 : vector<8x128xf32>
    %566 = tpu.reciprocal %565 {approx = true} : vector<8x128xf32> -> vector<8x128xf32>
    %567 = arith.mulf %557, %499 : vector<8x128xf32>
    %568 = arith.mulf %550, %559 : vector<8x128xf32>
    %569 = arith.addf %567, %568 : vector<8x128xf32>
    %570 = math.tanh %569 : vector<8x128xf32>
    %571 = arith.mulf %566, %570 : vector<8x128xf32>
    %c56_222 = arith.constant 56 : index
    %c0_223 = arith.constant 0 : index
    %572 = vector.load %arg9[%c56_222, %c0_223] : memref<64x256xf32, #tpu.memory_space<vmem>>, vector<8x128xf32>
    tpu.vector_store %arg9[%c56_222, %c0_223], %541 {strides = array<i32>} : memref<64x256xf32, #tpu.memory_space<vmem>>, vector<8x128xf32>,
    %c0_224 = arith.constant 0 : index
    %c128_225 = arith.constant 128 : index
    %573 = vector.load %arg9[%c0_224, %c128_225] : memref<64x256xf32, #tpu.memory_space<vmem>>, vector<8x128xf32>
    tpu.vector_store %arg9[%c0_224, %c128_225], %571 {strides = array<i32>} : memref<64x256xf32, #tpu.memory_space<vmem>>, vector<8x128xf32>,
    %c19_i32 = arith.constant 19 : i32
    %574 = arith.cmpi eq, %arg0, %c19_i32 : i32
    %575 = arith.extui %574 : i1 to i32
    %c0_i32_226 = arith.constant 0 : i32
    %576 = arith.cmpi ne, %575, %c0_i32_226 : i32
    scf.if %576 {
      %c56_227 = arith.constant 56 : index
      %c0_228 = arith.constant 0 : index
      %577 = vector.load %arg9[%c56_227, %c0_228] : memref<64x256xf32, #tpu.memory_space<vmem>>, vector<8x256xf32>
      %cst_229 = arith.constant 0.000000e+00 : f32
      %578 = vector.broadcast %cst_229 : f32 to vector<8x256xf32>
      %579 = arith.maximumf %577, %578 : vector<8x256xf32>
      %c0_230 = arith.constant 0 : index
      %c0_231 = arith.constant 0 : index
      %580 = vector.load %arg6[%c0_230, %c0_231] : memref<256x30xf32, #tpu.memory_space<vmem>>, vector<256x30xf32>
      %cst_232 = arith.constant dense<0.000000e+00> : vector<8x30xf32>
      %581 = tpu.matmul %579, %580, %cst_232 {dimension_numbers = #tpu.dot_dimension_numbers<[1], [0], [0], [1], [0, 0, 1, 1], [], []>} : vector<8x256xf32>, vector<256x30xf32>, vector<8x30xf32> -> vector<8x30xf32>
      %c0_233 = arith.constant 0 : index
      %c0_234 = arith.constant 0 : index
      %582 = vector.load %arg7[%c0_233, %c0_234] : memref<1x30xf32, #tpu.memory_space<vmem>>, vector<1x30xf32>
      %583 = vector.broadcast %582 : vector<1x30xf32> to vector<8x30xf32>
      %584 = arith.addf %581, %583 : vector<8x30xf32>
      %c0_235 = arith.constant 0 : index
      %c0_236 = arith.constant 0 : index
      %585 = vector.load %arg8[%c0_235, %c0_236] : memref<8x30xf32, #tpu.memory_space<vmem>>, vector<8x30xf32>
      tpu.vector_store %arg8[%c0_235, %c0_236], %584 {strides = array<i32>} : memref<8x30xf32, #tpu.memory_space<vmem>>, vector<8x30xf32>,
    } else {
    }
    return
  }
  func.func @transform_0(%arg0: i32) -> (i32, i32) {
    %c0_i32 = arith.constant 0 : i32
    %c0_i32_0 = arith.constant 0 : i32
    %c0_i32_1 = arith.constant 0 : i32
    return %c0_i32, %c0_i32_0 : i32, i32
  }
  func.func @transform_1(%arg0: i32) -> (i32, i32, i32) {
    %c0_i32 = arith.constant 0 : i32
    %c0_i32_0 = arith.constant 0 : i32
    %c0_i32_1 = arith.constant 0 : i32
    return %arg0, %c0_i32, %c0_i32_0 : i32, i32, i32
  }
  func.func @transform_2(%arg0: i32) -> (i32, i32, i32) {
    %c0_i32 = arith.constant 0 : i32
    %c0_i32_0 = arith.constant 0 : i32
    %c0_i32_1 = arith.constant 0 : i32
    return %arg0, %c0_i32, %c0_i32_0 : i32, i32, i32
  }
  func.func @transform_3(%arg0: i32) -> (i32, i32, i32) {
    %c0_i32 = arith.constant 0 : i32
    %c0_i32_0 = arith.constant 0 : i32
    %c0_i32_1 = arith.constant 0 : i32
    return %arg0, %c0_i32, %c0_i32_0 : i32, i32, i32
  }
  func.func @transform_4(%arg0: i32) -> (i32, i32, i32) {
    %c0_i32 = arith.constant 0 : i32
    %c0_i32_0 = arith.constant 0 : i32
    %c0_i32_1 = arith.constant 0 : i32
    return %arg0, %c0_i32, %c0_i32_0 : i32, i32, i32
  }
  func.func @transform_5(%arg0: i32) -> (i32, i32) {
    %c0_i32 = arith.constant 0 : i32
    %c0_i32_0 = arith.constant 0 : i32
    %c0_i32_1 = arith.constant 0 : i32
    return %c0_i32, %c0_i32_0 : i32, i32
  }
  func.func @transform_6(%arg0: i32) -> (i32, i32) {
    %c0_i32 = arith.constant 0 : i32
    %c0_i32_0 = arith.constant 0 : i32
    %c0_i32_1 = arith.constant 0 : i32
    return %c0_i32, %c0_i32_0 : i32, i32
  }
  func.func @transform_7(%arg0: i32) -> (i32, i32) {
    %c0_i32 = arith.constant 0 : i32
    %c0_i32_0 = arith.constant 0 : i32
    %c0_i32_1 = arith.constant 0 : i32
    return %c0_i32, %c0_i32_0 : i32, i32
  }
}

</mosaic_0001>

<bundles_post_ra>
// kernel: lstm_gan_forward.3
= control target key start
LH: loop header
LB: loop body
LE: loop exit
PB: predicated region body
PF: predicated region fallthrough
CT: control target
= control target key end

     0   :  { %s2600_s26 = smov 0   ;;  %s2975_s0 = inlined_call_operand.vmem [shape: f32[8,256], index: 0, kind: input, shape index: {}]   ;;  %s2976_s1 = inlined_call_operand.vmem [shape: bf16[20,256,1024], index: 1, kind: input, shape index: {}]   ;;  %s2977_s2 = inlined_call_operand.vmem [shape: bf16[20,128,512], index: 2, kind: input, shape index: {}]   ;;  %s2978_s3 = inlined_call_operand.vmem [shape: bf16[20,128,512], index: 3, kind: input, shape index: {}]   ;;  %s2979_s4 = inlined_call_operand.vmem [shape: f32[20,1,1024], index: 4, kind: input, shape index: {}]   ;;  %s2980_s5 = inlined_call_operand.vmem [shape: f32[256,1], index: 5, kind: input, shape index: {}]   ;;  %s2981_s6 = inlined_call_operand.<no memory space> [shape: f32[1,1], index: 6, kind: input, shape index: {}]   ;;  %s2982_s7 = inlined_call_operand.vmem [shape: f32[8,1], index: 7, kind: output, shape index: {}]  }
   0x1   :  { %v12_v0 = vstv %s2981_s6 }
   0x2   :  { %13 = vst [vmem:[#allocation4] sm:$0x1] %v12_v0 }
   0x3 LB: > { %s2606_s27 = sadd.s32 4294967295, %s2554_s26   ;;  %p2112_p0 = scmp.ge.s32.totalorder %s2554_s26, 1  ;;  %s2554_s26 = sphi %s2600_s26, %s19_s26  }
   0x4   : > { %p263_p1 = scmp.lt.s32.totalorder %s2554_s26, 21 }
   0x6   : > { %p264_p2 = pnand %p2112_p0, %p263_p1 }
   0x7   : > { %p304_p3 = scmp.lt.s32.totalorder (!%p264_p2), %s2606_s27, 19  ;;  %p2120_p4 = scmp.ne.s32.totalorder (!%p264_p2), %s2606_s27, 0 }
   0x8   : > { %267 = sbr.rel (%p264_p2) target bundleno = 708 (0x2c4), region = 48 }
   0xf   : > { %s305_s6 = scalar_select %p304_p3, %s2606_s27, 19 }
  0x10   : > { %327 = sbr.rel (%p2120_p4) target bundleno = 23 (0x17), region = 52  ;;  %v328_v1 = vld [vmem:[%s2975_s0] sm:$0xff] (!%p2120_p4)  ;;  %v329_v2 = vld [vmem:[%s2975_s0 + $0x8] sm:$0xff] (!%p2120_p4) }
  0x11   : > { %s2317_s28 = sshll.u32 %s305_s6, 10  ;;  %s2318_s29 = sshll.u32 %s305_s6, 8  ;;  %330 = vst [vmem:[#allocation2] sm:$0xff] (!%p2120_p4), %v328_v1  ;;  %331 = vst [vmem:[#allocation2 + $0x8] sm:$0xff] (!%p2120_p4), %v329_v2 }
  0x12   : > { %s2615_s9 = scalar_lea.vmem %s2976_s1, %s2317_s28  ;;  %s2620_s12 = scalar_lea.vmem %s2977_s2, %s2318_s29 }
  0x13   : > { %s2625_s15 = scalar_lea.vmem %s2978_s3, %s2318_s29  ;;  %s2119_s16 = sshll.u32 %s305_s6, 3 }
  0x14   : > { %s2630_s19 = scalar_lea.vmem %s2979_s4, %s2119_s16 }
  0x17 PF: > { %v336_v3 = vld [vmem:[%s2615_s9] sm:$0xff]  ;;  %v337_v5 = vld [vmem:[%s2615_s9 + $0x8] sm:$0xff]  ;;  %p2313_p5 = scmp.ne.s32.totalorder %s2606_s27, 19 }
  0x18   : > { %v340_v4 = vld [vmem:[%s2615_s9 + $0x20] sm:$0xff]  ;;  %v341_v7 = vld [vmem:[%s2615_s9 + $0x28] sm:$0xff]  ;;  %vm2043_vm0 = vcmask (!%p2313_p5), 7168  }
  0x19   : > { %v2122_v6 = vcombine.high %v336_v3, %v340_v4  ;;  %v2121_v8 = vcombine.low %v336_v3, %v340_v4  ;;  %v344_v9 = vld [vmem:[%s2615_s9 + $0x40] sm:$0xff]  ;;  %v2124_v11 = vcombine.high %v337_v5, %v341_v7  ;;  %v2123_v12 = vcombine.low %v337_v5, %v341_v7  ;;  %v345_v14 = vld [vmem:[%s2615_s9 + $0x48] sm:$0xff] }
  0x1a   : > { %v348_v10 = vld [vmem:[%s2615_s9 + $0x60] sm:$0xff]  ;;  %v349_v15 = vld [vmem:[%s2615_s9 + $0x68] sm:$0xff] }
  0x1b   : > { %v2130_v13 = vcombine.high %v344_v9, %v348_v10  ;;  %v352_v16 = vld [vmem:[%s2615_s9 + $0x80] sm:$0xff]  ;;  %1146 = vmatprep.subr.bf16.mxu0 %v2122_v6  ;;  %v2132_v17 = vcombine.high %v345_v14, %v349_v15  ;;  %v353_v19 = vld [vmem:[%s2615_s9 + $0x88] sm:$0xff]  ;;  %1187 = vmatprep.subr.bf16.mxu1 %v2124_v11  ;;  %v2129_v21 = vcombine.low %v344_v9, %v348_v10 }
  0x1c   : > { %v356_v18 = vld [vmem:[%s2615_s9 + $0xa0] sm:$0xff]  ;;  %v357_v20 = vld [vmem:[%s2615_s9 + $0xa8] sm:$0xff]  ;;  %1147 = vmatpush1.bf16.msra.mxu0 %v2121_v8  ;;  %1188 = vmatpush1.bf16.msra.mxu1 %v2123_v12  ;;  %v2131_v22 = vcombine.low %v345_v14, %v349_v15 }
  0x1d   : > { %1148 = vmatprep.subr.bf16.mxu0 %v2130_v13  ;;  %v2138_v23 = vcombine.high %v352_v16, %v356_v18  ;;  %1189 = vmatprep.subr.bf16.mxu1 %v2132_v17  ;;  %v2140_v24 = vcombine.high %v353_v19, %v357_v20  ;;  %v360_v25 = vld [vmem:[%s2615_s9 + $0xc0] sm:$0xff]  ;;  %v361_v27 = vld [vmem:[%s2615_s9 + $0xc8] sm:$0xff]  ;;  %v2137_v29 = vcombine.low %v352_v16, %v356_v18 }
  0x1e   : > { %v364_v26 = vld [vmem:[%s2615_s9 + $0xe0] sm:$0xff]  ;;  %v365_v28 = vld [vmem:[%s2615_s9 + $0xe8] sm:$0xff]  ;;  %v2139_v30 = vcombine.low %v353_v19, %v357_v20 }
  0x1f   : > { %v2146_v31 = vcombine.high %v360_v25, %v364_v26  ;;  %v2148_v32 = vcombine.high %v361_v27, %v365_v28  ;;  %v368_v33 = vld [vmem:[%s2615_s9 + $0x100] sm:$0xff]  ;;  %v369_v35 = vld [vmem:[%s2615_s9 + $0x108] sm:$0xff]  ;;  %v2145_v37 = vcombine.low %v360_v25, %v364_v26  ;;  %v2147_v38 = vcombine.low %v361_v27, %v365_v28 }
  0x20   : > { %1149 = vmatpush1.bf16.msra.mxu0 %v2129_v21  ;;  %1190 = vmatpush1.bf16.msra.mxu1 %v2131_v22  ;;  %v372_v34 = vld [vmem:[%s2615_s9 + $0x120] sm:$0xff]  ;;  %v373_v36 = vld [vmem:[%s2615_s9 + $0x128] sm:$0xff] }
  0x21   : > { %1150 = vmatprep.subr.bf16.mxu0 %v2138_v23  ;;  %1191 = vmatprep.subr.bf16.mxu1 %v2140_v24  ;;  %v2154_v39 = vcombine.high %v368_v33, %v372_v34  ;;  %v2156_v40 = vcombine.high %v369_v35, %v373_v36  ;;  %v376_v41 = vld [vmem:[%s2615_s9 + $0x140] sm:$0xff]  ;;  %v377_v43 = vld [vmem:[%s2615_s9 + $0x148] sm:$0xff]  ;;  %v2153_v45 = vcombine.low %v368_v33, %v372_v34 }
  0x22   : > { %v380_v42 = vld [vmem:[%s2615_s9 + $0x160] sm:$0xff]  ;;  %v381_v44 = vld [vmem:[%s2615_s9 + $0x168] sm:$0xff]  ;;  %v2155_v46 = vcombine.low %v369_v35, %v373_v36 }
  0x23   : > { %v2162_v47 = vcombine.high %v376_v41, %v380_v42  ;;  %v2164_v48 = vcombine.high %v377_v43, %v381_v44  ;;  %v384_v49 = vld [vmem:[%s2615_s9 + $0x180] sm:$0xff]  ;;  %v385_v51 = vld [vmem:[%s2615_s9 + $0x188] sm:$0xff]  ;;  %v2161_v53 = vcombine.low %v376_v41, %v380_v42  ;;  %v2163_v54 = vcombine.low %v377_v43, %v381_v44 }
  0x24   : > { %1151 = vmatpush1.bf16.msra.mxu0 %v2137_v29  ;;  %1192 = vmatpush1.bf16.msra.mxu1 %v2139_v30  ;;  %v388_v50 = vld [vmem:[%s2615_s9 + $0x1a0] sm:$0xff]  ;;  %v389_v52 = vld [vmem:[%s2615_s9 + $0x1a8] sm:$0xff] }
  0x25   : > { %1152 = vmatprep.subr.bf16.mxu0 %v2146_v31  ;;  %1193 = vmatprep.subr.bf16.mxu1 %v2148_v32  ;;  %v2170_v55 = vcombine.high %v384_v49, %v388_v50  ;;  %v333_v56 = vld [vmem:[#allocation2 + $0x8] sm:$0xff]  ;;  %v2172_v57 = vcombine.high %v385_v51, %v389_v52  ;;  %v392_v58 = vld [vmem:[%s2615_s9 + $0x1c0] sm:$0xff]  ;;  %v2169_v63 = vcombine.low %v384_v49, %v388_v50 }
  0x26   : > { %v396_v59 = vld [vmem:[%s2615_s9 + $0x1e0] sm:$0xff]  ;;  %v2669_v60 = vpack.c.bf16 %v333_v56, %v333_v56  ;;  %v393_v61 = vld [vmem:[%s2615_s9 + $0x1c8] sm:$0xff]  ;;  %v2171_v0 = vcombine.low %v385_v51, %v389_v52 }
  0x27   : > { %v397_v62 = vld [vmem:[%s2615_s9 + $0x1e8] sm:$0xff]  ;;  %v2178_v1 = vcombine.high %v392_v58, %v396_v59  ;;  %v400_v3 = vld [vmem:[%s2615_s9 + $0x200] sm:$0xff]  ;;  %v2177_v7 = vcombine.low %v392_v58, %v396_v59 }
  0x28   : > { %1153 = vmatpush1.bf16.msra.mxu0 %v2145_v37  ;;  %1194 = vmatpush1.bf16.msra.mxu1 %v2147_v38  ;;  %v2180_v2 = vcombine.high %v393_v61, %v397_v62  ;;  %v404_v4 = vld [vmem:[%s2615_s9 + $0x220] sm:$0xff]  ;;  %v401_v5 = vld [vmem:[%s2615_s9 + $0x208] sm:$0xff]  ;;  %v2179_v8 = vcombine.low %v393_v61, %v397_v62 }
  0x29   : > { %1154 = vmatprep.subr.bf16.mxu0 %v2154_v39  ;;  %1195 = vmatprep.subr.bf16.mxu1 %v2156_v40  ;;  %v405_v6 = vld [vmem:[%s2615_s9 + $0x228] sm:$0xff]  ;;  %v2186_v9 = vcombine.high %v400_v3, %v404_v4  ;;  %v408_v11 = vld [vmem:[%s2615_s9 + $0x240] sm:$0xff]  ;;  %v2185_v15 = vcombine.low %v400_v3, %v404_v4  ;;  %v338_v3 = vld [vmem:[%s2615_s9 + $0x10] sm:$0xff] }
  0x2a   : > { %1178 = vmatprep.mubr.bf16.mxu0 %v2669_v60  ;;  %1219 = vmatprep.mubr.bf16.mxu1 %v2669_v60  ;;  %v2188_v10 = vcombine.high %v401_v5, %v405_v6  ;;  %v412_v12 = vld [vmem:[%s2615_s9 + $0x260] sm:$0xff]  ;;  %v409_v13 = vld [vmem:[%s2615_s9 + $0x248] sm:$0xff]  ;;  %v2187_v16 = vcombine.low %v401_v5, %v405_v6  ;;  %v342_v4 = vld [vmem:[%s2615_s9 + $0x30] sm:$0xff] }
  0x2b   : > { %v413_v14 = vld [vmem:[%s2615_s9 + $0x268] sm:$0xff]  ;;  %v2194_v17 = vcombine.high %v408_v11, %v412_v12  ;;  %v416_v19 = vld [vmem:[%s2615_s9 + $0x280] sm:$0xff]  ;;  %v2193_v23 = vcombine.low %v408_v11, %v412_v12  ;;  %v339_v6 = vld [vmem:[%s2615_s9 + $0x18] sm:$0xff]  ;;  %v2126_v11 = vcombine.high %v338_v3, %v342_v4 }
  0x2c   : > { %1155 = vmatpush1.bf16.msra.mxu0 %v2153_v45  ;;  %1196 = vmatpush1.bf16.msra.mxu1 %v2155_v46  ;;  %v2196_v18 = vcombine.high %v409_v13, %v413_v14  ;;  %v420_v20 = vld [vmem:[%s2615_s9 + $0x2a0] sm:$0xff]  ;;  %v417_v21 = vld [vmem:[%s2615_s9 + $0x288] sm:$0xff]  ;;  %v2195_v24 = vcombine.low %v409_v13, %v413_v14  ;;  %v346_v12 = vld [vmem:[%s2615_s9 + $0x50] sm:$0xff] }
  0x2d   : > { %1156 = vmatprep.subr.bf16.mxu0 %v2162_v47  ;;  %1197 = vmatprep.subr.bf16.mxu1 %v2164_v48  ;;  %v421_v22 = vld [vmem:[%s2615_s9 + $0x2a8] sm:$0xff]  ;;  %v2202_v25 = vcombine.high %v416_v19, %v420_v20  ;;  %v424_v27 = vld [vmem:[%s2615_s9 + $0x2c0] sm:$0xff]  ;;  %v2201_v31 = vcombine.low %v416_v19, %v420_v20  ;;  %v350_v13 = vld [vmem:[%s2615_s9 + $0x70] sm:$0xff] }
  0x2e   : > { %v2204_v26 = vcombine.high %v417_v21, %v421_v22  ;;  %v428_v28 = vld [vmem:[%s2615_s9 + $0x2e0] sm:$0xff]  ;;  %v425_v29 = vld [vmem:[%s2615_s9 + $0x2c8] sm:$0xff]  ;;  %v2203_v32 = vcombine.low %v417_v21, %v421_v22  ;;  %v2134_v20 = vcombine.high %v346_v12, %v350_v13  ;;  %v354_v21 = vld [vmem:[%s2615_s9 + $0x90] sm:$0xff] }
  0x2f   : > { %v429_v30 = vld [vmem:[%s2615_s9 + $0x2e8] sm:$0xff]  ;;  %v2210_v33 = vcombine.high %v424_v27, %v428_v28  ;;  %v432_v35 = vld [vmem:[%s2615_s9 + $0x300] sm:$0xff]  ;;  %v2209_v39 = vcombine.low %v424_v27, %v428_v28  ;;  %v358_v22 = vld [vmem:[%s2615_s9 + $0xb0] sm:$0xff] }
  0x30   : > { %1157 = vmatpush1.bf16.msra.mxu0 %v2161_v53  ;;  %1198 = vmatpush1.bf16.msra.mxu1 %v2163_v54  ;;  %v2212_v34 = vcombine.high %v425_v29, %v429_v30  ;;  %v436_v36 = vld [vmem:[%s2615_s9 + $0x320] sm:$0xff]  ;;  %v433_v37 = vld [vmem:[%s2615_s9 + $0x308] sm:$0xff]  ;;  %v2211_v40 = vcombine.low %v425_v29, %v429_v30  ;;  %v2142_v28 = vcombine.high %v354_v21, %v358_v22  ;;  %v362_v29 = vld [vmem:[%s2615_s9 + $0xd0] sm:$0xff] }
  0x31   : > { %1158 = vmatprep.subr.bf16.mxu0 %v2170_v55  ;;  %1199 = vmatprep.subr.bf16.mxu1 %v2172_v57  ;;  %v437_v38 = vld [vmem:[%s2615_s9 + $0x328] sm:$0xff]  ;;  %v2218_v41 = vcombine.high %v432_v35, %v436_v36  ;;  %v440_v42 = vld [vmem:[%s2615_s9 + $0x340] sm:$0xff]  ;;  %v2217_v47 = vcombine.low %v432_v35, %v436_v36  ;;  %v366_v30 = vld [vmem:[%s2615_s9 + $0xf0] sm:$0xff] }
  0x32   : > { %v444_v43 = vld [vmem:[%s2615_s9 + $0x360] sm:$0xff]  ;;  %v2220_v44 = vcombine.high %v433_v37, %v437_v38  ;;  %v441_v45 = vld [vmem:[%s2615_s9 + $0x348] sm:$0xff]  ;;  %v2219_v48 = vcombine.low %v433_v37, %v437_v38  ;;  %v2150_v36 = vcombine.high %v362_v29, %v366_v30  ;;  %v370_v37 = vld [vmem:[%s2615_s9 + $0x110] sm:$0xff] }
  0x33   : > { %v445_v46 = vld [vmem:[%s2615_s9 + $0x368] sm:$0xff]  ;;  %v2226_v49 = vcombine.high %v440_v42, %v444_v43  ;;  %v448_v50 = vld [vmem:[%s2615_s9 + $0x380] sm:$0xff]  ;;  %v2225_v55 = vcombine.low %v440_v42, %v444_v43  ;;  %v374_v38 = vld [vmem:[%s2615_s9 + $0x130] sm:$0xff]  ;;  %v2149_v42 = vcombine.low %v362_v29, %v366_v30 }
  0x34   : > { %1159 = vmatpush1.bf16.msra.mxu0 %v2169_v63  ;;  %1200 = vmatpush1.bf16.msra.mxu1 %v2171_v0  ;;  %v452_v51 = vld [vmem:[%s2615_s9 + $0x3a0] sm:$0xff]  ;;  %v2228_v52 = vcombine.high %v441_v45, %v445_v46  ;;  %v449_v53 = vld [vmem:[%s2615_s9 + $0x388] sm:$0xff]  ;;  %v2227_v56 = vcombine.low %v441_v45, %v445_v46  ;;  %v2158_v43 = vcombine.high %v370_v37, %v374_v38  ;;  %v382_v45 = vld [vmem:[%s2615_s9 + $0x170] sm:$0xff] }
  0x35   : > { %1160 = vmatprep.subr.bf16.mxu0 %v2178_v1  ;;  %1201 = vmatprep.subr.bf16.mxu1 %v2180_v2  ;;  %v453_v54 = vld [vmem:[%s2615_s9 + $0x3a8] sm:$0xff]  ;;  %v2234_v57 = vcombine.high %v448_v50, %v452_v51  ;;  %v456_v58 = vld [vmem:[%s2615_s9 + $0x3c0] sm:$0xff]  ;;  %v2233_v0 = vcombine.low %v448_v50, %v452_v51 }
  0x36   : > { %v460_v59 = vld [vmem:[%s2615_s9 + $0x3e0] sm:$0xff]  ;;  %v2236_v61 = vcombine.high %v449_v53, %v453_v54  ;;  %v457_v62 = vld [vmem:[%s2615_s9 + $0x3c8] sm:$0xff]  ;;  %v2235_v1 = vcombine.low %v449_v53, %v453_v54  ;;  %v390_v53 = vld [vmem:[%s2615_s9 + $0x1b0] sm:$0xff] }
  0x37   : > { %v461_v63 = vld [vmem:[%s2615_s9 + $0x3e8] sm:$0xff]  ;;  %v2242_v2 = vcombine.high %v456_v58, %v460_v59 }
  0x38   : > { %1161 = vmatpush1.bf16.msra.mxu0 %v2177_v7  ;;  %1202 = vmatpush1.bf16.msra.mxu1 %v2179_v8  ;;  %v2244_v5 = vcombine.high %v457_v62, %v461_v63  ;;  %v343_v7 = vld [vmem:[%s2615_s9 + $0x38] sm:$0xff]  ;;  %v2241_v8 = vcombine.low %v456_v58, %v460_v59 }
  0x39   : > { %1162 = vmatprep.subr.bf16.mxu0 %v2186_v9  ;;  %1203 = vmatprep.subr.bf16.mxu1 %v2188_v10  ;;  %v332_v9 = vld [vmem:[#allocation2] sm:$0xff]  ;;  %v2243_v10 = vcombine.low %v457_v62, %v461_v63  ;;  %v2128_v14 = vcombine.high %v339_v6, %v343_v7  ;;  %v2127_v19 = vcombine.low %v339_v6, %v343_v7  ;;  %v394_v62 = vld [vmem:[%s2615_s9 + $0x1d0] sm:$0xff] }
  0x3a   : > { %v398_v63 = vld [vmem:[%s2615_s9 + $0x1f0] sm:$0xff] }
  0x3b   : > { %v402_v6 = vld [vmem:[%s2615_s9 + $0x210] sm:$0xff] }
  0x3c   : > { %1163 = vmatpush1.bf16.msra.mxu0 %v2185_v15  ;;  %1204 = vmatpush1.bf16.msra.mxu1 %v2187_v16  ;;  %v347_v15 = vld [vmem:[%s2615_s9 + $0x58] sm:$0xff]  ;;  %v2714_v16 = vpack.c.bf16 %v332_v9, %v332_v9  ;;  %v406_v7 = vld [vmem:[%s2615_s9 + $0x230] sm:$0xff] }
  0x3d   : > { %1164 = vmatprep.subr.bf16.mxu0 %v2194_v17  ;;  %1205 = vmatprep.subr.bf16.mxu1 %v2196_v18  ;;  %v351_v17 = vld [vmem:[%s2615_s9 + $0x78] sm:$0xff]  ;;  %v2125_v18 = vcombine.low %v338_v3, %v342_v4  ;;  %v2182_v4 = vcombine.high %v394_v62, %v398_v63 }
  0x3e   : > { %v2135_v27 = vcombine.low %v347_v15, %v351_v17  ;;  %v407_v9 = vld [vmem:[%s2615_s9 + $0x238] sm:$0xff] }
  0x40   : > { %1165 = vmatpush1.bf16.msra.mxu0 %v2193_v23  ;;  %1206 = vmatpush1.bf16.msra.mxu1 %v2195_v24  ;;  %v2136_v23 = vcombine.high %v347_v15, %v351_v17  ;;  %v355_v24 = vld [vmem:[%s2615_s9 + $0x98] sm:$0xff]  ;;  %v414_v15 = vld [vmem:[%s2615_s9 + $0x270] sm:$0xff] }
  0x41   : > { %1166 = vmatprep.subr.bf16.mxu0 %v2202_v25  ;;  %1207 = vmatprep.subr.bf16.mxu1 %v2204_v26  ;;  %v359_v25 = vld [vmem:[%s2615_s9 + $0xb8] sm:$0xff]  ;;  %v2133_v26 = vcombine.low %v346_v12, %v350_v13  ;;  %v2190_v12 = vcombine.high %v402_v6, %v406_v7 }
  0x42   : > { %v2143_v35 = vcombine.low %v355_v24, %v359_v25  ;;  %v411_v17 = vld [vmem:[%s2615_s9 + $0x258] sm:$0xff] }
  0x44   : > { %1167 = vmatpush1.bf16.msra.mxu0 %v2201_v31  ;;  %1208 = vmatpush1.bf16.msra.mxu1 %v2203_v32  ;;  %v2144_v31 = vcombine.high %v355_v24, %v359_v25  ;;  %v363_v32 = vld [vmem:[%s2615_s9 + $0xd8] sm:$0xff]  ;;  %v422_v24 = vld [vmem:[%s2615_s9 + $0x2b0] sm:$0xff] }
  0x45   : > { %1168 = vmatprep.subr.bf16.mxu0 %v2210_v33  ;;  %1209 = vmatprep.subr.bf16.mxu1 %v2212_v34  ;;  %v367_v33 = vld [vmem:[%s2615_s9 + $0xf8] sm:$0xff]  ;;  %v2141_v34 = vcombine.low %v354_v21, %v358_v22 }
  0x46   : > { %v419_v25 = vld [vmem:[%s2615_s9 + $0x298] sm:$0xff] }
  0x48   : > { %1169 = vmatpush1.bf16.msra.mxu0 %v2209_v39  ;;  %1210 = vmatpush1.bf16.msra.mxu1 %v2211_v40  ;;  %v2152_v39 = vcombine.high %v363_v32, %v367_v33  ;;  %v371_v40 = vld [vmem:[%s2615_s9 + $0x118] sm:$0xff] }
  0x49   : > { %1170 = vmatprep.subr.bf16.mxu0 %v2218_v41  ;;  %1211 = vmatprep.subr.bf16.mxu1 %v2220_v44  ;;  %v375_v41 = vld [vmem:[%s2615_s9 + $0x138] sm:$0xff]  ;;  %v378_v44 = vld [vmem:[%s2615_s9 + $0x150] sm:$0xff] }
  0x4a   : > { %v2160_v46 = vcombine.high %v371_v40, %v375_v41  ;;  %v2159_v50 = vcombine.low %v371_v40, %v375_v41  ;;  %v2166_v51 = vcombine.high %v378_v44, %v382_v45  ;;  %v438_v40 = vld [vmem:[%s2615_s9 + $0x330] sm:$0xff]  ;;  %v435_v41 = vld [vmem:[%s2615_s9 + $0x318] sm:$0xff] }
  0x4c   : > { %1171 = vmatpush1.bf16.msra.mxu0 %v2217_v47  ;;  %1212 = vmatpush1.bf16.msra.mxu1 %v2219_v48  ;;  %v379_v47 = vld [vmem:[%s2615_s9 + $0x158] sm:$0xff] }
  0x4d   : > { %1172 = vmatprep.subr.bf16.mxu0 %v2226_v49  ;;  %1213 = vmatprep.subr.bf16.mxu1 %v2228_v52  ;;  %v383_v48 = vld [vmem:[%s2615_s9 + $0x178] sm:$0xff]  ;;  %v2157_v49 = vcombine.low %v370_v37, %v374_v38  ;;  %v386_v52 = vld [vmem:[%s2615_s9 + $0x190] sm:$0xff] }
  0x4e   : > { %v2168_v54 = vcombine.high %v379_v47, %v383_v48  ;;  %v2167_v58 = vcombine.low %v379_v47, %v383_v48  ;;  %v2174_v59 = vcombine.high %v386_v52, %v390_v53  ;;  %v446_v47 = vld [vmem:[%s2615_s9 + $0x370] sm:$0xff]  ;;  %v443_v48 = vld [vmem:[%s2615_s9 + $0x358] sm:$0xff] }
  0x50   : > { %1173 = vmatpush1.bf16.msra.mxu0 %v2225_v55  ;;  %1214 = vmatpush1.bf16.msra.mxu1 %v2227_v56  ;;  %v387_v55 = vld [vmem:[%s2615_s9 + $0x198] sm:$0xff] }
  0x51   : > { %1174 = vmatprep.subr.bf16.mxu0 %v2234_v57  ;;  %1215 = vmatprep.subr.bf16.mxu1 %v2236_v61  ;;  %v391_v56 = vld [vmem:[%s2615_s9 + $0x1b8] sm:$0xff]  ;;  %v2165_v57 = vcombine.low %v378_v44, %v382_v45 }
  0x52   : > { %v2176_v61 = vcombine.high %v387_v55, %v391_v56  ;;  %v2175_v3 = vcombine.low %v387_v55, %v391_v56  ;;  %v454_v55 = vld [vmem:[%s2615_s9 + $0x3b0] sm:$0xff]  ;;  %v451_v56 = vld [vmem:[%s2615_s9 + $0x398] sm:$0xff] }
  0x54   : > { %1175 = vmatpush1.bf16.msra.mxu0 %v2233_v0  ;;  %1216 = vmatpush1.bf16.msra.mxu1 %v2235_v1  ;;  %v395_v0 = vld [vmem:[%s2615_s9 + $0x1d8] sm:$0xff] }
  0x55   : > { %1176 = vmatprep.subr.bf16.mxu0 %v2242_v2  ;;  %1217 = vmatprep.subr.bf16.mxu1 %v2244_v5  ;;  %v399_v1 = vld [vmem:[%s2615_s9 + $0x1f8] sm:$0xff]  ;;  %v2173_v2 = vcombine.low %v386_v52, %v390_v53 }
  0x56   : > { %v2184_v5 = vcombine.high %v395_v0, %v399_v1 }
  0x58   : > { %1177 = vmatpush1.bf16.msra.mxu0 %v2241_v8  ;;  %1218 = vmatpush1.bf16.msra.mxu1 %v2243_v10  ;;  %v403_v8 = vld [vmem:[%s2615_s9 + $0x218] sm:$0xff]  ;;  %v2181_v10 = vcombine.low %v394_v62, %v398_v63  ;;  %v458_v63 = vld [vmem:[%s2615_s9 + $0x3d0] sm:$0xff] }
  0x59   : > { %1228 = vmatprep.subr.bf16.mxu0 %v2126_v11  ;;  %1269 = vmatprep.subr.bf16.mxu1 %v2128_v14  ;;  %v2183_v11 = vcombine.low %v395_v0, %v399_v1  ;;  %v2192_v13 = vcombine.high %v403_v8, %v407_v9  ;;  %v410_v14 = vld [vmem:[%s2615_s9 + $0x250] sm:$0xff]  ;;  %v459_v1 = vld [vmem:[%s2615_s9 + $0x3d8] sm:$0xff] }
  0x5a   : > { %v2198_v21 = vcombine.high %v410_v14, %v414_v15  ;;  %v462_v0 = vld [vmem:[%s2615_s9 + $0x3f0] sm:$0xff] }
  0x5b   : > { %1179 = vmatmul.mubr.bf16.vlgmr.msra.gmra.mrb[0].mxu0 %v2714_v16  ;;  %1220 = vmatmul.mubr.bf16.vlgmr.msra.gmra.mrb[0].mxu1 %v2714_v16 }
  0x5c   : > { %1229 = vmatpush1.bf16.msra.mxu0 %v2125_v18  ;;  %1270 = vmatpush1.bf16.msra.mxu1 %v2127_v19  ;;  %v415_v18 = vld [vmem:[%s2615_s9 + $0x278] sm:$0xff]  ;;  %v2189_v19 = vcombine.low %v402_v6, %v406_v7  ;;  %v2245_v7 = vcombine.low %v458_v63, %v462_v0 }
  0x5d   : > { %1230 = vmatprep.subr.bf16.mxu0 %v2134_v20  ;;  %1271 = vmatprep.subr.bf16.mxu1 %v2136_v23  ;;  %v2191_v20 = vcombine.low %v403_v8, %v407_v9  ;;  %v2200_v22 = vcombine.high %v411_v17, %v415_v18  ;;  %v418_v23 = vld [vmem:[%s2615_s9 + $0x290] sm:$0xff] }
  0x5e   : > { %1260 = vmatprep.mubr.bf16.mxu0 %v2669_v60  ;;  %1301 = vmatprep.mubr.bf16.mxu1 %v2669_v60  ;;  %v2151_v60 = vcombine.low %v363_v32, %v367_v33  ;;  %v2206_v29 = vcombine.high %v418_v23, %v422_v24  ;;  %v430_v32 = vld [vmem:[%s2615_s9 + $0x2f0] sm:$0xff]  ;;  %v427_v33 = vld [vmem:[%s2615_s9 + $0x2d8] sm:$0xff] }
  0x5f   : > { %v2422_v9 = vld [vmem:[%s2620_s12 + $0x4] ss:$16 sps:$4 sm:$0xff]  }
  0x60   : > { %1231 = vmatpush1.bf16.msra.mxu0 %v2133_v26  ;;  %1272 = vmatpush1.bf16.msra.mxu1 %v2135_v27  ;;  %v423_v26 = vld [vmem:[%s2615_s9 + $0x2b8] sm:$0xff]  ;;  %v2197_v27 = vcombine.low %v410_v14, %v414_v15  ;;  %v2426_v15 = vld [vmem:[%s2620_s12 + $0x20] ss:$16 sps:$4 sm:$0xff]  }
  0x61   : > { %1232 = vmatprep.subr.bf16.mxu0 %v2142_v28  ;;  %1273 = vmatprep.subr.bf16.mxu1 %v2144_v31  ;;  %v2199_v28 = vcombine.low %v411_v17, %v415_v18  ;;  %v2208_v30 = vcombine.high %v419_v25, %v423_v26  ;;  %v426_v31 = vld [vmem:[%s2615_s9 + $0x2d0] sm:$0xff]  ;;  %v2431_v14 = vld [vmem:[%s2620_s12 + $0x2c] ss:$16 sps:$4 sm:$0xff]   ;;  %v2429_v17 = vld [vmem:[%s2620_s12 + $0x28] ss:$16 sps:$4 sm:$0xff]  }
  0x62   : > { %v2214_v37 = vcombine.high %v426_v31, %v430_v32  ;;  %v2434_v18 = vld [vmem:[%s2620_s12 + $0x44] ss:$16 sps:$4 sm:$0xff]  }
  0x64   : > { %1233 = vmatpush1.bf16.msra.mxu0 %v2141_v34  ;;  %1274 = vmatpush1.bf16.msra.mxu1 %v2143_v35  ;;  %v431_v34 = vld [vmem:[%s2615_s9 + $0x2f8] sm:$0xff]  ;;  %v2205_v35 = vcombine.low %v418_v23, %v422_v24  ;;  %v2438_v24 = vld [vmem:[%s2620_s12 + $0x60] ss:$16 sps:$4 sm:$0xff]  }
  0x65   : > { %1234 = vmatprep.subr.bf16.mxu0 %v2150_v36  ;;  %1275 = vmatprep.subr.bf16.mxu1 %v2152_v39  ;;  %v2207_v36 = vcombine.low %v419_v25, %v423_v26  ;;  %v2216_v38 = vcombine.high %v427_v33, %v431_v34  ;;  %v434_v39 = vld [vmem:[%s2615_s9 + $0x310] sm:$0xff]  ;;  %v2443_v23 = vld [vmem:[%s2620_s12 + $0x6c] ss:$16 sps:$4 sm:$0xff]   ;;  %v2441_v25 = vld [vmem:[%s2620_s12 + $0x68] ss:$16 sps:$4 sm:$0xff]  }
  0x66   : > { %v2222_v44 = vcombine.high %v434_v39, %v438_v40  ;;  %v2446_v26 = vld [vmem:[%s2620_s12 + $0x84] ss:$16 sps:$4 sm:$0xff]  }
  0x68   : > { %1235 = vmatpush1.bf16.msra.mxu0 %v2149_v42  ;;  %1276 = vmatpush1.bf16.msra.mxu1 %v2151_v60  ;;  %v439_v42 = vld [vmem:[%s2615_s9 + $0x338] sm:$0xff]  ;;  %v2213_v60 = vcombine.low %v426_v31, %v430_v32  ;;  %v2450_v32 = vld [vmem:[%s2620_s12 + $0xa0] ss:$16 sps:$4 sm:$0xff]  }
  0x69   : > { %1236 = vmatprep.subr.bf16.mxu0 %v2158_v43  ;;  %1277 = vmatprep.subr.bf16.mxu1 %v2160_v46  ;;  %v2215_v43 = vcombine.low %v427_v33, %v431_v34  ;;  %v2224_v45 = vcombine.high %v435_v41, %v439_v42  ;;  %v442_v46 = vld [vmem:[%s2615_s9 + $0x350] sm:$0xff]  ;;  %v2455_v31 = vld [vmem:[%s2620_s12 + $0xac] ss:$16 sps:$4 sm:$0xff]   ;;  %v2453_v33 = vld [vmem:[%s2620_s12 + $0xa8] ss:$16 sps:$4 sm:$0xff]  }
  0x6a   : > { %v2230_v52 = vcombine.high %v442_v46, %v446_v47  ;;  %v2458_v34 = vld [vmem:[%s2620_s12 + $0xc4] ss:$16 sps:$4 sm:$0xff]  }
  0x6c   : > { %1237 = vmatpush1.bf16.msra.mxu0 %v2157_v49  ;;  %1278 = vmatpush1.bf16.msra.mxu1 %v2159_v50  ;;  %v447_v49 = vld [vmem:[%s2615_s9 + $0x378] sm:$0xff]  ;;  %v2221_v50 = vcombine.low %v434_v39, %v438_v40  ;;  %v2462_v40 = vld [vmem:[%s2620_s12 + $0xe0] ss:$16 sps:$4 sm:$0xff]  }
  0x6d   : > { %1238 = vmatprep.subr.bf16.mxu0 %v2166_v51  ;;  %1279 = vmatprep.subr.bf16.mxu1 %v2168_v54  ;;  %v2223_v51 = vcombine.low %v435_v41, %v439_v42  ;;  %v2232_v53 = vcombine.high %v443_v48, %v447_v49  ;;  %v450_v54 = vld [vmem:[%s2615_s9 + $0x390] sm:$0xff]  ;;  %v2467_v39 = vld [vmem:[%s2620_s12 + $0xec] ss:$16 sps:$4 sm:$0xff]   ;;  %v2465_v41 = vld [vmem:[%s2620_s12 + $0xe8] ss:$16 sps:$4 sm:$0xff]  }
  0x6e   : > { %v2470_v42 = vld [vmem:[%s2625_s15 + $0x4] ss:$16 sps:$4 sm:$0xff]  }
  0x70   : > { %1239 = vmatpush1.bf16.msra.mxu0 %v2165_v57  ;;  %1280 = vmatpush1.bf16.msra.mxu1 %v2167_v58  ;;  %v455_v57 = vld [vmem:[%s2615_s9 + $0x3b8] sm:$0xff]  ;;  %v2229_v58 = vcombine.low %v442_v46, %v446_v47  ;;  %v2474_v47 = vld [vmem:[%s2625_s15 + $0x20] ss:$16 sps:$4 sm:$0xff]  }
  0x71   : > { %1240 = vmatprep.subr.bf16.mxu0 %v2174_v59  ;;  %1281 = vmatprep.subr.bf16.mxu1 %v2176_v61  ;;  %v2231_v59 = vcombine.low %v443_v48, %v447_v49  ;;  %v2238_v61 = vcombine.high %v450_v54, %v454_v55  ;;  %v2240_v62 = vcombine.high %v451_v56, %v455_v57  ;;  %v2479_v46 = vld [vmem:[%s2625_s15 + $0x2c] ss:$16 sps:$4 sm:$0xff]   ;;  %v2477_v48 = vld [vmem:[%s2625_s15 + $0x28] ss:$16 sps:$4 sm:$0xff]   ;;  %v2482_v49 = vld [vmem:[%s2625_s15 + $0x44] ss:$16 sps:$4 sm:$0xff]  }
  0x74   : > { %1241 = vmatpush1.bf16.msra.mxu0 %v2173_v2  ;;  %1282 = vmatpush1.bf16.msra.mxu1 %v2175_v3  ;;  %v463_v2 = vld [vmem:[%s2615_s9 + $0x3f8] sm:$0xff]  ;;  %v2237_v3 = vcombine.low %v450_v54, %v454_v55  ;;  %v2486_v55 = vld [vmem:[%s2625_s15 + $0x60] ss:$16 sps:$4 sm:$0xff]  }
  0x75   : > { %1242 = vmatprep.subr.bf16.mxu0 %v2182_v4  ;;  %1283 = vmatprep.subr.bf16.mxu1 %v2184_v5  ;;  %v2239_v4 = vcombine.low %v451_v56, %v455_v57  ;;  %v2246_v5 = vcombine.high %v458_v63, %v462_v0  ;;  %v2248_v6 = vcombine.high %v459_v1, %v463_v2  ;;  %v2491_v54 = vld [vmem:[%s2625_s15 + $0x6c] ss:$16 sps:$4 sm:$0xff]   ;;  %v2489_v56 = vld [vmem:[%s2625_s15 + $0x68] ss:$16 sps:$4 sm:$0xff]   ;;  %v2494_v57 = vld [vmem:[%s2625_s15 + $0x84] ss:$16 sps:$4 sm:$0xff]  }
  0x76   : > { %v2247_v8 = vcombine.low %v459_v1, %v463_v2  ;;  %v2503_v63 = vld [vmem:[%s2625_s15 + $0xac] ss:$16 sps:$4 sm:$0xff]   ;;  %v2498_v0 = vld [vmem:[%s2625_s15 + $0xa0] ss:$16 sps:$4 sm:$0xff]   ;;  %v2501_v1 = vld [vmem:[%s2625_s15 + $0xa8] ss:$16 sps:$4 sm:$0xff]  }
  0x77   : > { %v2506_v2 = vld [vmem:[%s2625_s15 + $0xc4] ss:$16 sps:$4 sm:$0xff]  }
  0x78   : > { %1243 = vmatpush1.bf16.msra.mxu0 %v2181_v10  ;;  %1284 = vmatpush1.bf16.msra.mxu1 %v2183_v11  ;;  %v2425_v10 = vld [vmem:[%s2620_s12 + $0xc] ss:$16 sps:$4 sm:$0xff]   ;;  %v2420_v11 = vld [vmem:[%s2620_s12] ss:$16 sps:$4 sm:$0xff]  }
  0x79   : > { %1244 = vmatprep.subr.bf16.mxu0 %v2190_v12  ;;  %1285 = vmatprep.subr.bf16.mxu1 %v2192_v13  ;;  %v2423_v12 = vld [vmem:[%s2620_s12 + $0x8] ss:$16 sps:$4 sm:$0xff]   ;;  %v2428_v13 = vld [vmem:[%s2620_s12 + $0x24] ss:$16 sps:$4 sm:$0xff]  }
  0x7c   : > { %1245 = vmatpush1.bf16.msra.mxu0 %v2189_v19  ;;  %1286 = vmatpush1.bf16.msra.mxu1 %v2191_v20  ;;  %v2437_v19 = vld [vmem:[%s2620_s12 + $0x4c] ss:$16 sps:$4 sm:$0xff]   ;;  %v2556_v20 = vmov 0  }
  0x7d   : > { %1246 = vmatprep.subr.bf16.mxu0 %v2198_v21  ;;  %1287 = vmatprep.subr.bf16.mxu1 %v2200_v22  ;;  %v2435_v21 = vld [vmem:[%s2620_s12 + $0x48] ss:$16 sps:$4 sm:$0xff]   ;;  %v2440_v22 = vld [vmem:[%s2620_s12 + $0x64] ss:$16 sps:$4 sm:$0xff]  }
  0x80   : > { %1247 = vmatpush1.bf16.msra.mxu0 %v2197_v27  ;;  %1288 = vmatpush1.bf16.msra.mxu1 %v2199_v28  ;;  %v2449_v27 = vld [vmem:[%s2620_s12 + $0x8c] ss:$16 sps:$4 sm:$0xff]   ;;  %v2444_v28 = vld [vmem:[%s2620_s12 + $0x80] ss:$16 sps:$4 sm:$0xff]  }
  0x81   : > { %1248 = vmatprep.subr.bf16.mxu0 %v2206_v29  ;;  %1289 = vmatprep.subr.bf16.mxu1 %v2208_v30  ;;  %v2447_v29 = vld [vmem:[%s2620_s12 + $0x88] ss:$16 sps:$4 sm:$0xff]   ;;  %v2452_v30 = vld [vmem:[%s2620_s12 + $0xa4] ss:$16 sps:$4 sm:$0xff]  }
  0x84   : > { %1249 = vmatpush1.bf16.msra.mxu0 %v2205_v35  ;;  %1290 = vmatpush1.bf16.msra.mxu1 %v2207_v36  ;;  %v2461_v35 = vld [vmem:[%s2620_s12 + $0xcc] ss:$16 sps:$4 sm:$0xff]   ;;  %v2456_v36 = vld [vmem:[%s2620_s12 + $0xc0] ss:$16 sps:$4 sm:$0xff]  }
  0x85   : > { %1250 = vmatprep.subr.bf16.mxu0 %v2214_v37  ;;  %1291 = vmatprep.subr.bf16.mxu1 %v2216_v38  ;;  %v2459_v37 = vld [vmem:[%s2620_s12 + $0xc8] ss:$16 sps:$4 sm:$0xff]   ;;  %v2464_v38 = vld [vmem:[%s2620_s12 + $0xe4] ss:$16 sps:$4 sm:$0xff]  }
  0x88   : > { %1251 = vmatpush1.bf16.msra.mxu0 %v2213_v60  ;;  %1292 = vmatpush1.bf16.msra.mxu1 %v2215_v43  ;;  %v2473_v60 = vld [vmem:[%s2625_s15 + $0xc] ss:$16 sps:$4 sm:$0xff]   ;;  %v2468_v43 = vld [vmem:[%s2625_s15] ss:$16 sps:$4 sm:$0xff]  }
  0x89   : > { %1252 = vmatprep.subr.bf16.mxu0 %v2222_v44  ;;  %1293 = vmatprep.subr.bf16.mxu1 %v2224_v45  ;;  %v2471_v44 = vld [vmem:[%s2625_s15 + $0x8] ss:$16 sps:$4 sm:$0xff]   ;;  %v2476_v45 = vld [vmem:[%s2625_s15 + $0x24] ss:$16 sps:$4 sm:$0xff]  }
  0x8c   : > { %1253 = vmatpush1.bf16.msra.mxu0 %v2221_v50  ;;  %1294 = vmatpush1.bf16.msra.mxu1 %v2223_v51  ;;  %v2485_v50 = vld [vmem:[%s2625_s15 + $0x4c] ss:$16 sps:$4 sm:$0xff]   ;;  %v2480_v51 = vld [vmem:[%s2625_s15 + $0x40] ss:$16 sps:$4 sm:$0xff]  }
  0x8d   : > { %1254 = vmatprep.subr.bf16.mxu0 %v2230_v52  ;;  %1295 = vmatprep.subr.bf16.mxu1 %v2232_v53  ;;  %v2483_v52 = vld [vmem:[%s2625_s15 + $0x48] ss:$16 sps:$4 sm:$0xff]   ;;  %v2488_v53 = vld [vmem:[%s2625_s15 + $0x64] ss:$16 sps:$4 sm:$0xff]  }
  0x90   : > { %1255 = vmatpush1.bf16.msra.mxu0 %v2229_v58  ;;  %1296 = vmatpush1.bf16.msra.mxu1 %v2231_v59  ;;  %v2497_v58 = vld [vmem:[%s2625_s15 + $0x8c] ss:$16 sps:$4 sm:$0xff]   ;;  %v2492_v59 = vld [vmem:[%s2625_s15 + $0x80] ss:$16 sps:$4 sm:$0xff]  }
  0x91   : > { %1256 = vmatprep.subr.bf16.mxu0 %v2238_v61  ;;  %1297 = vmatprep.subr.bf16.mxu1 %v2240_v62  ;;  %v2495_v61 = vld [vmem:[%s2625_s15 + $0x88] ss:$16 sps:$4 sm:$0xff]   ;;  %v2500_v62 = vld [vmem:[%s2625_s15 + $0xa4] ss:$16 sps:$4 sm:$0xff]  }
  0x94   : > { %1257 = vmatpush1.bf16.msra.mxu0 %v2237_v3  ;;  %1298 = vmatpush1.bf16.msra.mxu1 %v2239_v4  ;;  %v2509_v3 = vld [vmem:[%s2625_s15 + $0xcc] ss:$16 sps:$4 sm:$0xff]   ;;  %v2504_v4 = vld [vmem:[%s2625_s15 + $0xc0] ss:$16 sps:$4 sm:$0xff]  }
  0x95   : > { %1258 = vmatprep.subr.bf16.mxu0 %v2246_v5  ;;  %1299 = vmatprep.subr.bf16.mxu1 %v2248_v6  ;;  %v2507_v5 = vld [vmem:[%s2625_s15 + $0xc8] ss:$16 sps:$4 sm:$0xff]   ;;  %v2512_v6 = vld [vmem:[%s2625_s15 + $0xe4] ss:$16 sps:$4 sm:$0xff]  }
  0x98   : > { %1259 = vmatpush1.bf16.msra.mxu0 %v2245_v7  ;;  %1300 = vmatpush1.bf16.msra.mxu1 %v2247_v8  ;;  %v2515_v7 = vld [vmem:[%s2625_s15 + $0xec] ss:$16 sps:$4 sm:$0xff]   ;;  %v2510_v8 = vld [vmem:[%s2625_s15 + $0xe0] ss:$16 sps:$4 sm:$0xff]  }
  0x99   : > { %1510 = vmatprep.subr.bf16.mxu0 %v2422_v9  ;;  %1551 = vmatprep.subr.bf16.mxu1 %v2425_v10  ;;  %v2513_v9 = vld [vmem:[%s2625_s15 + $0xe8] ss:$16 sps:$4 sm:$0xff]   ;;  %v466_v10 = vlaneseq }
  0x9b   : > { %1261 = vmatmul.mubr.bf16.vlgmr.msra.gmra.mrb[4].mxu0 %v2714_v16  ;;  %1302 = vmatmul.mubr.bf16.vlgmr.msra.gmra.mrb[4].mxu1 %v2714_v16  ;;  %v2432_v16 = vld [vmem:[%s2620_s12 + $0x40] ss:$16 sps:$4 sm:$0xff]  }
  0x9c   : > { %1511 = vmatpush1.bf16.msra.mxu0 %v2420_v11  ;;  %1552 = vmatpush1.bf16.msra.mxu1 %v2423_v12  ;;  %v2851_v11 = vshrl.u32 %v466_v10, 7 }
  0x9d   : > { %1512 = vmatprep.subr.bf16.mxu0 %v2428_v13  ;;  %1553 = vmatprep.subr.bf16.mxu1 %v2431_v14  ;;  %v2855_v13 = vld [vmem:[%s2630_s19] sm:$0xff] }
  0x9e   : > { %1542 = vmatprep.mubr.bf16.mxu0 %v2556_v20  ;;  %1583 = vmatprep.mubr.bf16.mxu1 %v2556_v20  ;;  %v468_v12 = vsub.s32 0, %v2851_v11  ;;  %v472_v14 = vsub.s32 1, %v2851_v11 }
  0xa0   : > { %1513 = vmatpush1.bf16.msra.mxu0 %v2426_v15  ;;  %1554 = vmatpush1.bf16.msra.mxu1 %v2429_v17  ;;  %v469_v15 = vrot.slane %v2855_v13, %v468_v12  ;;  %v473_v17 = vrot.slane %v2855_v13, %v472_v14 }
  0xa1   : > { %1514 = vmatprep.subr.bf16.mxu0 %v2434_v18  ;;  %1555 = vmatprep.subr.bf16.mxu1 %v2437_v19  ;;  %v480_v18 = vsub.s32 3, %v2851_v11 }
  0xa4   : > { %1515 = vmatpush1.bf16.msra.mxu0 %v2432_v16  ;;  %1556 = vmatpush1.bf16.msra.mxu1 %v2435_v21 }
  0xa5   : > { %1516 = vmatprep.subr.bf16.mxu0 %v2440_v22  ;;  %1557 = vmatprep.subr.bf16.mxu1 %v2443_v23  ;;  %v481_v23 = vrot.slane %v2855_v13, %v480_v18 }
  0xa8   : > { %1517 = vmatpush1.bf16.msra.mxu0 %v2438_v24  ;;  %1558 = vmatpush1.bf16.msra.mxu1 %v2441_v25 }
  0xa9   : > { %1518 = vmatprep.subr.bf16.mxu0 %v2446_v26  ;;  %1559 = vmatprep.subr.bf16.mxu1 %v2449_v27 }
  0xac   : > { %1519 = vmatpush1.bf16.msra.mxu0 %v2444_v28  ;;  %1560 = vmatpush1.bf16.msra.mxu1 %v2447_v29 }
  0xad   : > { %1520 = vmatprep.subr.bf16.mxu0 %v2452_v30  ;;  %1561 = vmatprep.subr.bf16.mxu1 %v2455_v31 }
  0xb0   : > { %1521 = vmatpush1.bf16.msra.mxu0 %v2450_v32  ;;  %1562 = vmatpush1.bf16.msra.mxu1 %v2453_v33 }
  0xb1   : > { %1522 = vmatprep.subr.bf16.mxu0 %v2458_v34  ;;  %1563 = vmatprep.subr.bf16.mxu1 %v2461_v35  ;;  %v476_v34 = vsub.s32 2, %v2851_v11 }
  0xb4   : > { %1523 = vmatpush1.bf16.msra.mxu0 %v2456_v36  ;;  %1564 = vmatpush1.bf16.msra.mxu1 %v2459_v37  ;;  %v477_v36 = vrot.slane %v2855_v13, %v476_v34 }
  0xb5   : > { %1524 = vmatprep.subr.bf16.mxu0 %v2464_v38  ;;  %1565 = vmatprep.subr.bf16.mxu1 %v2467_v39 }
  0xb8   : > { %1525 = vmatpush1.bf16.msra.mxu0 %v2462_v40  ;;  %1566 = vmatpush1.bf16.msra.mxu1 %v2465_v41 }
  0xb9   : > { %1784 = vmatprep.subr.bf16.mxu0 %v2470_v42  ;;  %1825 = vmatprep.subr.bf16.mxu1 %v2473_v60  ;;  %v484_v60 = vsub.s32 4, %v2851_v11 }
  0xbb   : > { %1543 = vmatmul.mubr.bf16.vlgmr.msra.gmra.mrb[0].mxu0 %v2556_v20  ;;  %1584 = vmatmul.mubr.bf16.vlgmr.msra.gmra.mrb[0].mxu1 %v2556_v20 }
  0xbc   : > { %1785 = vmatpush1.bf16.msra.mxu0 %v2468_v43  ;;  %1826 = vmatpush1.bf16.msra.mxu1 %v2471_v44  ;;  %v488_v43 = vsub.s32 5, %v2851_v11 }
  0xbd   : > { %1786 = vmatprep.subr.bf16.mxu0 %v2476_v45  ;;  %1827 = vmatprep.subr.bf16.mxu1 %v2479_v46  ;;  %v485_v46 = vrot.slane %v2855_v13, %v484_v60  ;;  %v1955_v60 = vld [vmem:[%s2980_s5 + $0xa8] sm:$0xff] (!%p2313_p5) }
  0xbe   : > { %1816 = vmatprep.mubr.bf16.mxu0 %v2556_v20  ;;  %1857 = vmatprep.mubr.bf16.mxu1 %v2556_v20 }
  0xc0   : > { %1787 = vmatpush1.bf16.msra.mxu0 %v2474_v47  ;;  %1828 = vmatpush1.bf16.msra.mxu1 %v2477_v48  ;;  %v489_v48 = vrot.slane %v2855_v13, %v488_v43 }
  0xc1   : > { %1788 = vmatprep.subr.bf16.mxu0 %v2482_v49  ;;  %1829 = vmatprep.subr.bf16.mxu1 %v2485_v50  ;;  %v496_v49 = vsub.s32 7, %v2851_v11 }
  0xc4   : > { %1789 = vmatpush1.bf16.msra.mxu0 %v2480_v51  ;;  %1830 = vmatpush1.bf16.msra.mxu1 %v2483_v52 }
  0xc5   : > { %1790 = vmatprep.subr.bf16.mxu0 %v2488_v53  ;;  %1831 = vmatprep.subr.bf16.mxu1 %v2491_v54 }
  0xc8   : > { %1791 = vmatpush1.bf16.msra.mxu0 %v2486_v55  ;;  %1832 = vmatpush1.bf16.msra.mxu1 %v2489_v56 }
  0xc9   : > { %1792 = vmatprep.subr.bf16.mxu0 %v2494_v57  ;;  %1833 = vmatprep.subr.bf16.mxu1 %v2497_v58 }
  0xcc   : > { %1793 = vmatpush1.bf16.msra.mxu0 %v2492_v59  ;;  %1834 = vmatpush1.bf16.msra.mxu1 %v2495_v61  ;;  %v497_v61 = vrot.slane %v2855_v13, %v496_v49 }
  0xcd   : > { %1794 = vmatprep.subr.bf16.mxu0 %v2500_v62  ;;  %1835 = vmatprep.subr.bf16.mxu1 %v2503_v63 }
  0xd0   : > { %1795 = vmatpush1.bf16.msra.mxu0 %v2498_v0  ;;  %1836 = vmatpush1.bf16.msra.mxu1 %v2501_v1 }
  0xd1   : > { %1796 = vmatprep.subr.bf16.mxu0 %v2506_v2  ;;  %1837 = vmatprep.subr.bf16.mxu1 %v2509_v3 }
  0xd4   : > { %1797 = vmatpush1.bf16.msra.mxu0 %v2504_v4  ;;  %1838 = vmatpush1.bf16.msra.mxu1 %v2507_v5 }
  0xd5   : > { %1798 = vmatprep.subr.bf16.mxu0 %v2512_v6  ;;  %1839 = vmatprep.subr.bf16.mxu1 %v2515_v7 }
  0xd8   : > { %1799 = vmatpush1.bf16.msra.mxu0 %v2510_v8  ;;  %1840 = vmatpush1.bf16.msra.mxu1 %v2513_v9  ;;  %v492_v8 = vsub.s32 6, %v2851_v11 }
  0xda   : > { %v493_v10 = vrot.slane %v2855_v13, %v492_v8  ;;  %v1946_v8 = vld [vmem:[%s2980_s5 + $0x60] sm:$0xff] (!%p2313_p5) }
  0xdb   : > { %1817 = vmatmul.mubr.bf16.vlgmr.msra.gmra.mrb[4].mxu0 %v2556_v20  ;;  %1858 = vmatmul.mubr.bf16.vlgmr.msra.gmra.mrb[4].mxu1 %v2556_v20 }
 0x18e   : > { %v1544_v19 = vpop.f32.mrb[0].mxu0  ;;  %v1585_v21 = vpop.f32.mrb[0].mxu1 }
 0x18f   : > { %v2387_v16 = vadd.f32 %v1544_v19, %v469_v15  ;;  %v1546_v22 = vpop.f32.mrb[1].mxu0  ;;  %v1587_v24 = vpop.f32.mrb[1].mxu1  ;;  %v2389_v38 = vadd.f32 %v1585_v21, %v477_v36  ;;  %v1952_v36 = vld [vmem:[%s2980_s5 + $0x90] sm:$0xff] (!%p2313_p5) }
 0x190   : > { %v2388_v20 = vadd.f32 %v1546_v22, %v473_v17  ;;  %v1548_v25 = vpop.f32.mrb[2].mxu0  ;;  %v1589_v27 = vpop.f32.mrb[2].mxu1  ;;  %v2390_v33 = vadd.f32 %v1587_v24, %v481_v23 }
 0x191   : > { %v1874_v26 = vsub.f32 0.0, %v2387_v16  ;;  %v1549_v28 = vpop.f32.mrb[3].mxu0  ;;  %v1590_v30 = vpop.f32.mrb[3].mxu1 }
 0x192   : > { %v1879_v29 = vsub.f32 0.0, %v2388_v20  ;;  %v1885_v35 = vsub.f32 0.0, %v2390_v33  ;;  %v1934_v33 = vld [vmem:[%s2980_s5] sm:$0xff] (!%p2313_p5) }
 0x193   : > { %v1875_v31 = vmul.f32 1.442695, %v1874_v26 }
 0x194   : > { %v1880_v32 = vmul.f32 1.442695, %v1879_v29  ;;  %v1886_v37 = vmul.f32 1.442695, %v1885_v35  ;;  %v1935_v35 = vld [vmem:[%s2980_s5 + $0x8] sm:$0xff] (!%p2313_p5) }
 0x195   : > { %2516 = vpow2.f32 %v1875_v31  ;;  %v1950_v31 = vld [vmem:[%s2980_s5 + $0x80] sm:$0xff] (!%p2313_p5) }
 0x196   : > { %2518 = vpow2.f32 %v1880_v32  ;;  %v1951_v32 = vld [vmem:[%s2980_s5 + $0x88] sm:$0xff] (!%p2313_p5) }
 0x197   : > { %2520 = vpow2.f32 %v1886_v37  ;;  %v2355_v34 = vpack.c.bf16 (!%p2313_p5), %v1951_v32, %v1950_v31  ;;  %v1953_v37 = vld [vmem:[%s2980_s5 + $0x98] sm:$0xff] (!%p2313_p5) }
 0x198   : > { %2522 = vtanh.f32 %v2389_v38  ;;  %v2357_v38 = vpack.c.bf16 (!%p2313_p5), %v1935_v35, %v1934_v33 }
 0x199   : > { %2356 = vmatprep.subr.bf16.mxu0 (!%p2313_p5), %v2355_v34 }
 0x19a   : > { %2358 = vmatpush3.bf16.msra.mxu0 (!%p2313_p5), %v2357_v38 }
 0x19f   : > { %v2517_v39 = vpop.eup %2516 }
 0x1a0   : > { %v2519_v40 = vpop.eup %2518  ;;  %v1877_v41 = vadd.f32 1.0, %v2517_v39  ;;  %v2359_v39 = vpack.c.bf16 (!%p2313_p5), %v1953_v37, %v1952_v36 }
 0x1a1   : > { %v1882_v42 = vadd.f32 1.0, %v2519_v40  ;;  %v2521_v44 = vpop.eup %2520  ;;  %v1936_v40 = vld [vmem:[%s2980_s5 + $0x10] sm:$0xff] (!%p2313_p5) }
 0x1a2   : > { %2524 = vrcp.f32 %v1877_v41  ;;  %v2523_v45 = vpop.eup %2522  ;;  %v1888_v52 = vadd.f32 1.0, %v2521_v44  ;;  %v1937_v41 = vld [vmem:[%s2980_s5 + $0x18] sm:$0xff] (!%p2313_p5)  ;;  %2360 = vmatprep.subr.bf16.mxu0 (!%p2313_p5), %v2359_v39 }
 0x1a3   : > { %2526 = vrcp.f32 %v1882_v42  ;;  %v1954_v42 = vld [vmem:[%s2980_s5 + $0xa0] sm:$0xff] (!%p2313_p5)  ;;  %v2361_v43 = vpack.c.bf16 (!%p2313_p5), %v1937_v41, %v1936_v40 }
 0x1a4   : > { %2528 = vrcp.f32 %v1888_v52  ;;  %v2363_v44 = vpack.c.bf16 (!%p2313_p5), %v1955_v60, %v1954_v42  ;;  %v1941_v52 = vld [vmem:[%s2980_s5 + $0x38] sm:$0xff] (!%p2313_p5) }
 0x1a5   : > { %2362 = vmatpush3.bf16.msra.mxu0 (!%p2313_p5), %v2361_v43 }
 0x1a6   : > { %2364 = vmatprep.subr.bf16.mxu0 (!%p2313_p5), %v2363_v44 }
 0x1ac   : > { %v2525_v47 = vpop.eup %2524 }
 0x1ad   : > { %v2527_v50 = vpop.eup %2526  ;;  %v1891_v51 = vmul.f32 %v2525_v47, %v2523_v45  ;;  %v1938_v45 = vld [vmem:[%s2980_s5 + $0x20] sm:$0xff] (!%p2313_p5)  ;;  %v1956_v47 = vld [vmem:[%s2980_s5 + $0xb0] sm:$0xff] (!%p2313_p5) }
 0x1ae   : > { %v1890_v53 = vmul.f32 0.0, %v2527_v50  ;;  %v1818_v54 = vpop.f32.mrb[4].mxu0  ;;  %v1859_v56 = vpop.f32.mrb[4].mxu1 }
 0x1af   : > { %v2391_v55 = vadd.f32 %v1818_v54, %v485_v46  ;;  %v1820_v57 = vpop.f32.mrb[5].mxu0  ;;  %v1861_v62 = vpop.f32.mrb[5].mxu1  ;;  %v2393_v18 = vadd.f32 %v1859_v56, %v493_v10  ;;  %v1939_v46 = vld [vmem:[%s2980_s5 + $0x28] sm:$0xff] (!%p2313_p5)  ;;  %v1964_v10 = vld [vmem:[%s2980_s5 + $0xf0] sm:$0xff] (!%p2313_p5) }
 0x1b0   : > { %v1892_v58 = vadd.f32 %v1891_v51, %v1890_v53  ;;  %v2392_v59 = vadd.f32 %v1820_v57, %v489_v48  ;;  %v1822_v63 = vpop.f32.mrb[6].mxu0  ;;  %v1863_v1 = vpop.f32.mrb[6].mxu1  ;;  %v2394_v7 = vadd.f32 %v1861_v62, %v497_v61  ;;  %v1957_v48 = vld [vmem:[%s2980_s5 + $0xb8] sm:$0xff] (!%p2313_p5)  ;;  %v2365_v49 = vpack.c.bf16 (!%p2313_p5), %v1939_v46, %v1938_v45  ;;  %v1940_v51 = vld [vmem:[%s2980_s5 + $0x30] sm:$0xff] (!%p2313_p5)  ;;  %v1958_v53 = vld [vmem:[%s2980_s5 + $0xc0] sm:$0xff] (!%p2313_p5) }
 0x1b1   : > { %v1903_v0 = vsub.f32 0.0, %v2391_v55  ;;  %v1823_v2 = vpop.f32.mrb[7].mxu0  ;;  %v1864_v4 = vpop.f32.mrb[7].mxu1  ;;  %v2367_v50 = vpack.c.bf16 (!%p2313_p5), %v1957_v48, %v1956_v47  ;;  %v1959_v54 = vld [vmem:[%s2980_s5 + $0xc8] sm:$0xff] (!%p2313_p5)  ;;  %v2369_v57 = vpack.c.bf16 (!%p2313_p5), %v1941_v52, %v1940_v51  ;;  %v1960_v62 = vld [vmem:[%s2980_s5 + $0xd0] sm:$0xff] (!%p2313_p5)  ;;  %v1961_v63 = vld [vmem:[%s2980_s5 + $0xd8] sm:$0xff] (!%p2313_p5) }
 0x1b2   : > { %2530 = vtanh.f32 %v1892_v58  ;;  %v1908_v3 = vsub.f32 0.0, %v2392_v59  ;;  %v1914_v9 = vsub.f32 0.0, %v2394_v7  ;;  %v2529_v12 = vpop.eup %2528  ;;  %2366 = vmatpush3.bf16.msra.mxu0 (!%p2313_p5), %v2365_v49  ;;  %v2371_v58 = vpack.c.bf16 (!%p2313_p5), %v1959_v54, %v1958_v53  ;;  %v1942_v59 = vld [vmem:[%s2980_s5 + $0x40] sm:$0xff] (!%p2313_p5)  ;;  %v1943_v61 = vld [vmem:[%s2980_s5 + $0x48] sm:$0xff] (!%p2313_p5)  ;;  %v1944_v2 = vld [vmem:[%s2980_s5 + $0x50] sm:$0xff] (!%p2313_p5) }
 0x1b3   : > { %v1904_v5 = vmul.f32 1.442695, %v1903_v0  ;;  %2368 = vmatprep.subr.bf16.mxu0 (!%p2313_p5), %v2367_v50  ;;  %v2373_v0 = vpack.c.bf16 (!%p2313_p5), %v1943_v61, %v1942_v59  ;;  %v2375_v1 = vpack.c.bf16 (!%p2313_p5), %v1961_v63, %v1960_v62  ;;  %v1962_v4 = vld [vmem:[%s2980_s5 + $0xe0] sm:$0xff] (!%p2313_p5) }
 0x1b4   : > { %v1909_v6 = vmul.f32 1.442695, %v1908_v3  ;;  %v1915_v15 = vmul.f32 1.442695, %v1914_v9  ;;  %v1945_v3 = vld [vmem:[%s2980_s5 + $0x58] sm:$0xff] (!%p2313_p5)  ;;  %v1947_v9 = vld [vmem:[%s2980_s5 + $0x68] sm:$0xff] (!%p2313_p5) }
 0x1b5   : > { %2532 = vpow2.f32 %v1904_v5  ;;  %v1963_v5 = vld [vmem:[%s2980_s5 + $0xe8] sm:$0xff] (!%p2313_p5) }
 0x1b6   : > { %2534 = vpow2.f32 %v1909_v6  ;;  %2370 = vmatpush3.bf16.msra.mxu0 (!%p2313_p5), %v2369_v57  ;;  %v2377_v6 = vpack.c.bf16 (!%p2313_p5), %v1945_v3, %v1944_v2  ;;  %v2379_v7 = vpack.c.bf16 (!%p2313_p5), %v1963_v5, %v1962_v4 }
 0x1b7   : > { %2536 = vpow2.f32 %v1915_v15  ;;  %2372 = vmatprep.subr.bf16.mxu0 (!%p2313_p5), %v2371_v58 }
 0x1b8   : > { %2538 = vtanh.f32 %v2393_v18  ;;  %v1949_v18 = vld [vmem:[%s2980_s5 + $0x78] sm:$0xff] (!%p2313_p5) }
 0x1ba   : > { %2374 = vmatpush3.bf16.msra.mxu0 (!%p2313_p5), %v2373_v0 }
 0x1bb   : > { %2376 = vmatprep.subr.bf16.mxu0 (!%p2313_p5), %v2375_v1 }
 0x1bc   : > { %v2531_v14 = vpop.eup %2530 }
 0x1bd   : > { %v1894_v17 = vmul.f32 %v2531_v14, %v2529_v12  ;;  %v1965_v12 = vld [vmem:[%s2980_s5 + $0xf8] sm:$0xff] (!%p2313_p5)  ;;  %v2381_v14 = vpack.c.bf16 (!%p2313_p5), %v1947_v9, %v1946_v8 }
 0x1be   : > { %2378 = vmatpush3.bf16.msra.mxu0 (!%p2313_p5), %v2377_v6  ;;  %v2383_v15 = vpack.c.bf16 (!%p2313_p5), %v1965_v12, %v1964_v10 }
 0x1bf   : > { %v2533_v19 = vpop.eup %2532  ;;  %1924 = vst [vmem:[#allocation2] sm:$0xff] %v1894_v17  ;;  %2380 = vmatprep.subr.bf16.mxu0 (!%p2313_p5), %v2379_v7  ;;  %v1948_v17 = vld [vmem:[%s2980_s5 + $0x70] sm:$0xff] (!%p2313_p5) }
 0x1c0   : > { %v2535_v16 = vpop.eup %2534  ;;  %v1906_v21 = vadd.f32 1.0, %v2533_v19  ;;  %v2385_v19 = vpack.c.bf16 (!%p2313_p5), %v1949_v18, %v1948_v17 }
 0x1c1   : > { %v1911_v22 = vadd.f32 1.0, %v2535_v16  ;;  %v2537_v20 = vpop.eup %2536 }
 0x1c2   : > { %2540 = vrcp.f32 %v1906_v21  ;;  %v2539_v11 = vpop.eup %2538  ;;  %v1917_v13 = vadd.f32 1.0, %v2537_v20  ;;  %2382 = vmatpush3.bf16.msra.mxu0 (!%p2313_p5), %v2381_v14  ;;  %v2314_v20 = vld [vmem:[#allocation4] ss:$0 sm:$0xff] (!%p2313_p5) }
 0x1c3   : > { %2542 = vrcp.f32 %v1911_v22  ;;  %2384 = vmatprep.subr.bf16.mxu0 (!%p2313_p5), %v2383_v15 }
 0x1c4   : > { %2544 = vrcp.f32 %v1917_v13 }
 0x1c6   : > { %v1930_v16 = vld [vmem:[#allocation2] sm:$0xff] (!%p2313_p5)  ;;  %2386 = vmatpush3.bf16.msra.mxu0 (!%p2313_p5), %v2385_v19 }
 0x1c7   : > { %v1932_v21 = vmax.f32 (!%p2313_p5), %v1930_v16, 0.0 }
 0x1cc   : > { %v2541_v23 = vpop.eup %2540 }
 0x1cd   : > { %v2543_v24 = vpop.eup %2542  ;;  %v1920_v25 = vmul.f32 %v2541_v23, %v2539_v11 }
 0x1ce   : > { %v1919_v26 = vmul.f32 0.0, %v2543_v24  ;;  %v2545_v28 = vpop.eup %2544 }
 0x1d0   : > { %v1921_v27 = vadd.f32 %v1920_v25, %v1919_v26 }
 0x1d2   : > { %2546 = vtanh.f32 %v1921_v27 }
 0x1d9   : > { %1929 = sbr.rel (%p2313_p5) target bundleno = 708 (0x2c4), region = 56 }
 0x1dc   : > { %v2547_v29 = vpop.eup %2546 }
 0x1dd   : > { %v1923_v30 = vmul.f32 %v2547_v29, %v2545_v28 }
 0x1df   : > { %1925 = vst [vmem:[#allocation2 + $0x8] sm:$0xff] %v1923_v30 }
 0x1e6   : > { %v1931_v55 = vld [vmem:[#allocation2 + $0x8] sm:$0xff] }
 0x1e7   : > { %v1933_v56 = vmax.f32 %v1931_v55, 0.0 }
 0x1e9   : > { %2037 = vmatprep.mubr.f32.mxu0 %v1933_v56 }
 0x1ea   : > { %2038 = vmatmul.mubr.f32.vlgmr.msra.gmra.mrb[0].mxu0 %v1932_v21 }
 0x2bd   : > { %v2352_v22 = vpop.f32.mrb[0].mxu0 }
 0x2be   : > { %v2353_v11 = vpop.f32.mrb[1].mxu0 }
 0x2bf   : > { %v2354_v23 = vadd.f32 %v2353_v11, %v2352_v22 }
 0x2c1   : > { %v2040_v24 = vadd.f32 %v2354_v23, %v2314_v20 }
 0x2c3   : > { %2044 = vst.msk [vmem:[%s2982_s7] sm:$0xff] %vm2043_vm0, %v2040_v24 }
 0x2c4 PF: > { %s19_s26 = sadd.s32 1, %s2554_s26  }
 0x2c5   : > { %p16_p6 = scmp.ge.s32.totalorder %s19_s26, 22  }
 0x2c7   :  { %18 = sbr.rel (!%p16_p6) target bundleno = 3 (0x3), region = 91 }

// kernel: lstm_gan_forward.2
= control target key start
LH: loop header
LB: loop body
LE: loop exit
PB: predicated region body
PF: predicated region fallthrough
CT: control target
= control target key end

     0   :  { %s10693_s0 = inlined_call_operand.vmem [shape: f32[64,256], index: 0, kind: input, shape index: {}]   ;;  %s10694_s1 = inlined_call_operand.hbm [shape: bf16[20,256,1024], index: 1, kind: input, shape index: {}]   ;;  %s10695_s2 = inlined_call_operand.hbm [shape: bf16[20,128,512], index: 2, kind: input, shape index: {}]   ;;  %s10696_s3 = inlined_call_operand.hbm [shape: bf16[20,128,512], index: 3, kind: input, shape index: {}]   ;;  %s10697_s4 = inlined_call_operand.hbm [shape: f32[20,1,1024], index: 4, kind: input, shape index: {}]   ;;  %s10698_s5 = inlined_call_operand.vmem [shape: f32[256,30], index: 5, kind: input, shape index: {}]   ;;  %s10699_s6 = inlined_call_operand.hbm [shape: f32[1,30], index: 6, kind: input, shape index: {}]   ;;  %s10700_s7 = inlined_call_operand.vmem [shape: f32[8,30], index: 7, kind: output, shape index: {}]  }
   0x1   :  { %10734 = sst [smem:[#allocation74_spill]] %s10695_s2 }
   0x2   :  { %10735 = sst [smem:[#allocation75_spill]] %s10699_s6 }
   0x3   :  { %12 = vsyncpa [#allocation5], 0 }
   0x4   :  { %14 = vsyncpa [#allocation5 + $0x1], 0 }
   0x5   :  { %15 = vsyncpa [#allocation7], 0 }
   0x6   :  { %17 = vsyncpa [#allocation7 + $0x1], 0 }
   0x7   :  { %18 = vsyncpa [#allocation10], 0 }
   0x8   :  { %20 = vsyncpa [#allocation10 + $0x1], 0  ;;  %s8443_s24 = smov 0   ;;  %s8445_s25 = smov 0  }
   0x9   :  { %s8447_s26 = smov 0   ;;  %s8449_s27 = smov 0  }
   0xa LB: > { %10736 = sst [smem:[#allocation16_spill]] %s8387_s26  ;;  %s8462_s28 = sadd.s32 4294967295, %s8391_s27   ;;  %s8391_s27 = sphi %s8449_s27, %s10908_s27   ;;  %s8387_s26 = sphi %s8447_s26, %s10910_s26   ;;  %s8383_s25 = sphi %s8445_s25, %s10912_s25   ;;  %s8379_s24 = sphi %s8443_s24, %s10911_s24  }
   0xb   : > { %s8465_s29 = sadd.s32 1, %s8391_s27   ;;  %s54_s8 = sadd.s32 1, %s8387_s26 }
   0xc   : > { %10737 = sst [smem:[#allocation17_spill]] %s8465_s29  ;;  %s51_s30 = ssub.s32 %s8391_s27, %s8465_s29 }
   0xd   : > { %p52_p0 = scmp.eq.s32.totalorder %s51_s30, 0  ;;  %p61_p1 = scmp.ne.s32.totalorder %s8387_s26, %s8383_s25 }
   0xe   : > { %p62_p2 = scmp.eq.s32.totalorder %s8391_s27, 0  ;;  %p67_p3 = scmp.ne.s32.totalorder %s8383_s25, %s8379_s24 }
   0xf   : > { %s8475_s9 = scalar_select %p52_p0, %s8387_s26, %s54_s8  }
  0x10   : > { %p8477_p4 = por %p62_p2, %p61_p1  ;;  %p10701_p5 = scmp.eq.s32.totalorder %s8462_s28, 0 }
  0x11   : > { %10738 = sst [smem:[#allocation18_spill]] %s8475_s9  ;;  %p6750_p6 = scmp.ge.s32.totalorder %s8391_s27, 1 }
  0x12   : > { %p219_p7 = scmp.lt.s32.totalorder %s8391_s27, 21  ;;  %p8486_p8 = por %p10701_p5, %p67_p3 }
  0x13   : > { %s8393_s13 = smov [#allocation11]   ;;  %p7517_p12 = scmp.lt.s32.totalorder %s8391_s27, 20 }
  0x14   : > { %s10740_s11 = scalar_select %p8486_p8, 1, 0 }
  0x15   : > { %p8491_p10 = pnand %p6750_p6, %p219_p7  ;;  %s238_s14 = sshll.u32 %s8393_s13, 4  ;;  %s239_s14 = int_to_ptr.vmem [resolvable:$true] %s238_s14 }
  0x16   : > { %s8499_s15 = sand.u32 1, %s8387_s26   ;;  %s10705_s17 = sand.u32 1, %s8391_s27  }
  0x17   : > { %s10741_s12 = scalar_select %p8491_p10, 1, 0 }
  0x18   : > { %p7499_p11 = pneg %p8491_p10  ;;  %p8510_p0 = pnand %p7517_p12, %p8477_p4 }
  0x19   : > { %s6756_s19 = sshll.u32 %s8499_s15, 8  ;;  %s10744_s6 = sld [smem:[#allocation75_spill]] }
  0x1a   : > { %p8503_p13 = pnand %p7499_p11, %p10701_p5 }
  0x1b   : > { %s10743_s18 = scalar_select %p8510_p0, 1, 0 }
  0x1c   : > { %p8199_p2 = pneg %p8503_p13 }
  0x1f   : > { %s8197_s22 = scalar_lea.hbm %s10744_s6, 16 }
  0x20   : > { %p8198_p1 = scmp.ne.s32.totalorder %s10744_s6, %s8197_s22  ;;  %p8204_p4 = scmp.lt.u32.totalorder %s8197_s22, %s10744_s6 }
  0x22   : > { %p8200_p3 = pnand %p8199_p2, %p8198_p1 }
  0x24   : > { %p8201_p6 = pneg %p8200_p3 }
  0x26   : > { %p8206_p7 = pnand %p8204_p4, %p8201_p6 }
  0x28   : > { %8209 = shalt.err (!%p8206_p7)
}
  0x29   : > { %s8210_s10 = scalar_lea.vmem %s239_s14, 16  ;;  %s8217_s13 = scalar_lea.vmem %s239_s14, 32 }
  0x2a   : > { %p8211_p11 = scmp.ne.s32.totalorder %s239_s14, %s8210_s10  ;;  %p8218_p5 = scmp.lt.s32.totalorder %s239_s14, %s239_s14 }
  0x2b   : > { %p8219_p8 = scmp.lt.s32.totalorder %s8217_s13, %s8210_s10 }
  0x2c   : > { %p8213_p12 = pnand %p8211_p11, %p8199_p2 }
  0x2d   : > { %p8220_p10 = por %p8219_p8, %p8218_p5 }
  0x2e   : > { %p8214_p9 = pneg %p8213_p12 }
  0x30   : > { %p8221_p0 = pnand %p8220_p10, %p8214_p9 }
  0x32   : > { %8224 = shalt.err (!%p8221_p0)
}
  0x33   : > { %7502 = dma.hbm_to_vmem [thread:$0]  (!%p8503_p13), %s10744_s6, 16, %s239_s14, [#allocation10]  }
  0x34   : > { %s7417_s22 = sshll.u32 %s8391_s27, 12  ;;  %s274_s23 = scalar_lea.vmem [#allocation6], %s6756_s19 }
  0x35   : > { %s281_s24 = sshll.u32 %s274_s23, 4  ;;  %s10745_s2 = sld [smem:[#allocation74_spill]]  ;;  %s8541_s24 = int_to_ptr.vmem [resolvable:$true] %s281_s24 }
  0x36   : > { %s8545_s16 = scalar_lea.sflag [#allocation7], %s10705_s17  ;;  %p10746_p8 = scmp.ne.s32.totalorder %s10743_s18, 0 }
  0x38   : > { %p8551_p9 = pneg %p10746_p8 }
  0x3b   : > { %s8539_s10 = scalar_lea.hbm %s10745_s2, %s7417_s22  ;;  %s8230_s23 = scalar_lea.hbm %s10745_s2, 81920 }
  0x3c   : > { %s8225_s14 = scalar_lea.hbm %s8539_s10, 4096  ;;  %p8231_p0 = scmp.lt.u32.totalorder %s8539_s10, %s10745_s2 }
  0x3d   : > { %p8226_p5 = scmp.ne.s32.totalorder %s8539_s10, %s8225_s14  ;;  %p8232_p1 = scmp.lt.u32.totalorder %s8230_s23, %s8225_s14 }
  0x3e   : > { %p8234_p3 = scmp.lt.u32.totalorder %s8225_s14, %s8539_s10 }
  0x3f   : > { %p8228_p10 = pnand %p8551_p9, %p8226_p5  ;;  %p8233_p2 = por %p8232_p1, %p8231_p0 }
  0x41   : > { %p8229_p13 = pneg %p8228_p10  ;;  %p8235_p6 = por %p8234_p3, %p8233_p2 }
  0x43   : > { %p8236_p4 = pnand %p8235_p6, %p8229_p13 }
  0x45   : > { %8239 = shalt.err (!%p8236_p4)
}
  0x46   : > { %s8240_s17 = scalar_lea.vmem %s8541_s24, 4096  ;;  %s8394_s20 = smov [#allocation6]  }
  0x47   : > { %p8241_p7 = scmp.ne.s32.totalorder %s8541_s24, %s8240_s17  ;;  %s8245_s21 = sshll.u32 %s8394_s20, 4  ;;  %s8246_s21 = int_to_ptr.vmem [resolvable:$false] %s8245_s21 }
  0x48   : > { %s8247_s30 = scalar_lea.vmem %s8246_s21, 8192  ;;  %p8248_p5 = scmp.lt.s32.totalorder %s8541_s24, %s8246_s21 }
  0x49   : > { %p8243_p11 = pnand %p8241_p7, %p8551_p9  ;;  %p8249_p10 = scmp.lt.s32.totalorder %s8247_s30, %s8240_s17 }
  0x4b   : > { %p8244_p12 = pneg %p8243_p11  ;;  %p8250_p0 = por %p8249_p10, %p8248_p5 }
  0x4d   : > { %p8251_p1 = pnand %p8250_p0, %p8244_p12 }
  0x4f   : > { %8254 = shalt.err (!%p8251_p1)
}
  0x50   : > { %s8395_s14 = smov 256   ;;  %s8396_s23 = smov 16  }
  0x51   : > { %7509 = dma.hbm_to_vmem [thread:$0]  (!%p10746_p8), %s8539_s10, 4096, %s8541_s24, %s8545_s16, %s8395_s14, %s8395_s14, %s8396_s23  }
  0x52   : > { %s8583_s20 = scalar_lea.hbm %s10696_s3, %s7417_s22  ;;  %s295_s21 = scalar_lea.vmem [#allocation8], %s6756_s19 }
  0x53   : > { %s302_s30 = sshll.u32 %s295_s21, 4  ;;  %s6753_s2 = sshll.u32 %s8499_s15, 10  ;;  %s8587_s30 = int_to_ptr.vmem [resolvable:$true] %s302_s30 }
  0x54   : > { %s7416_s6 = sshll.u32 %s8391_s27, 14  ;;  %s253_s24 = scalar_lea.vmem [#allocation4], %s6753_s2 }
  0x55   : > { %s8594_s29 = scalar_lea.hbm %s10694_s1, %s7416_s6  ;;  %s260_s10 = sshll.u32 %s253_s24, 4  ;;  %s8596_s10 = int_to_ptr.vmem [resolvable:$true] %s260_s10 }
  0x56   : > { %s250_s22 = scalar_lea.sflag [#allocation5], %s8499_s15  ;;  %s8255_s19 = scalar_lea.hbm %s8594_s29, 16384 }
  0x57   : > { %p8256_p13 = scmp.ne.s32.totalorder %s8594_s29, %s8255_s19  ;;  %s8260_s26 = scalar_lea.hbm %s10694_s1, 327680 }
  0x58   : > { %p8261_p6 = scmp.lt.u32.totalorder %s8594_s29, %s10694_s1  ;;  %p8262_p4 = scmp.lt.u32.totalorder %s8260_s26, %s8255_s19 }
  0x59   : > { %p8258_p2 = pnand %p8256_p13, %p8551_p9  ;;  %p8264_p11 = scmp.lt.u32.totalorder %s8255_s19, %s8594_s29 }
  0x5a   : > { %p8263_p7 = por %p8262_p4, %p8261_p6 }
  0x5b   : > { %p8259_p3 = pneg %p8258_p2 }
  0x5c   : > { %p8265_p12 = por %p8264_p11, %p8263_p7 }
  0x5e   : > { %p8266_p5 = pnand %p8265_p12, %p8259_p3 }
  0x60   : > { %8269 = shalt.err (!%p8266_p5)
}
  0x61   : > { %s8270_s2 = scalar_lea.vmem %s8596_s10, 16384  ;;  %s8397_s21 = smov [#allocation4]  }
  0x62   : > { %p8271_p10 = scmp.ne.s32.totalorder %s8596_s10, %s8270_s2  ;;  %s8275_s24 = sshll.u32 %s8397_s21, 4  ;;  %s8276_s24 = int_to_ptr.vmem [resolvable:$false] %s8275_s24 }
  0x63   : > { %s8277_s17 = scalar_lea.vmem %s8276_s24, 32768  ;;  %p8278_p13 = scmp.lt.s32.totalorder %s8596_s10, %s8276_s24 }
  0x64   : > { %p8273_p0 = pnand %p8271_p10, %p8551_p9  ;;  %p8279_p2 = scmp.lt.s32.totalorder %s8277_s17, %s8270_s2 }
  0x66   : > { %p8274_p1 = pneg %p8273_p0  ;;  %p8280_p6 = por %p8279_p2, %p8278_p13 }
  0x68   : > { %p8281_p4 = pnand %p8280_p6, %p8274_p1 }
  0x6a   : > { %8284 = shalt.err (!%p8281_p4)
}
  0x6b   : > { %s8398_s19 = smov 512   ;;  %s8399_s8 = smov 32  }
  0x6c   : > { %7506 = dma.hbm_to_vmem [thread:$0]  (!%p10746_p8), %s8594_s29, 16384, %s8596_s10, %s250_s22, %s8398_s19, %s8398_s19, %s8399_s8  }
  0x6d   : > { %s8285_s26 = scalar_lea.hbm %s8583_s20, 4096  ;;  %s8290_s2 = scalar_lea.hbm %s10696_s3, 81920 }
  0x6e   : > { %p8286_p3 = scmp.ne.s32.totalorder %s8583_s20, %s8285_s26  ;;  %p8291_p12 = scmp.lt.u32.totalorder %s8583_s20, %s10696_s3 }
  0x6f   : > { %p8292_p5 = scmp.lt.u32.totalorder %s8290_s2, %s8285_s26  ;;  %p8294_p0 = scmp.lt.u32.totalorder %s8285_s26, %s8583_s20 }
  0x70   : > { %p8288_p7 = pnand %p8286_p3, %p8551_p9 }
  0x71   : > { %p8293_p10 = por %p8292_p5, %p8291_p12 }
  0x72   : > { %p8289_p11 = pneg %p8288_p7 }
  0x73   : > { %p8295_p1 = por %p8294_p0, %p8293_p10 }
  0x75   : > { %p8296_p13 = pnand %p8295_p1, %p8289_p11 }
  0x77   : > { %8299 = shalt.err (!%p8296_p13)
}
  0x78   : > { %s8300_s29 = scalar_lea.vmem %s8587_s30, 4096  ;;  %s8400_s10 = smov [#allocation8]  }
  0x79   : > { %p8301_p2 = scmp.ne.s32.totalorder %s8587_s30, %s8300_s29  ;;  %s8305_s22 = sshll.u32 %s8400_s10, 4  ;;  %s8306_s22 = int_to_ptr.vmem [resolvable:$false] %s8305_s22 }
  0x7a   : > { %s8307_s17 = scalar_lea.vmem %s8306_s22, 8192  ;;  %p8308_p3 = scmp.lt.s32.totalorder %s8587_s30, %s8306_s22 }
  0x7b   : > { %p8303_p6 = pnand %p8301_p2, %p8551_p9  ;;  %p8309_p7 = scmp.lt.s32.totalorder %s8307_s17, %s8300_s29 }
  0x7d   : > { %p8304_p4 = pneg %p8303_p6  ;;  %p8310_p12 = por %p8309_p7, %p8308_p3 }
  0x7f   : > { %p8311_p5 = pnand %p8310_p12, %p8304_p4 }
  0x81   : > { %8314 = shalt.err (!%p8311_p5)
}
  0x82   : > { %7512 = dma.hbm_to_vmem [thread:$0]  (!%p10746_p8), %s8583_s20, 4096, %s8587_s30, %s8545_s16, %s8395_s14, %s8395_s14, %s8396_s23  }
  0x83   : > { %s6762_s19 = sshll.u32 %s8499_s15, 3  ;;  %s7419_s8 = sshll.u32 %s8391_s27, 7 }
  0x84   : > { %s8652_s9 = scalar_lea.hbm %s10697_s4, %s7419_s8  ;;  %s316_s2 = scalar_lea.vmem [#allocation9], %s6762_s19 }
  0x85   : > { %s324_s21 = sshll.u32 %s316_s2, 4  ;;  %s10748_s24 = sand.u32 1, %s8391_s27   ;;  %s325_s21 = int_to_ptr.vmem [resolvable:$true] %s324_s21 }
  0x86   : > { %s313_s29 = scalar_lea.sflag [#allocation10], %s10748_s24  ;;  %s8315_s10 = scalar_lea.hbm %s8652_s9, 128 }
  0x87   : > { %p8316_p11 = scmp.ne.s32.totalorder %s8652_s9, %s8315_s10  ;;  %s8320_s14 = scalar_lea.hbm %s10697_s4, 2560 }
  0x88   : > { %p8321_p1 = scmp.lt.u32.totalorder %s8652_s9, %s10697_s4  ;;  %p8322_p13 = scmp.lt.u32.totalorder %s8320_s14, %s8315_s10 }
  0x89   : > { %p8318_p10 = pnand %p8316_p11, %p8551_p9  ;;  %p8324_p6 = scmp.lt.u32.totalorder %s8315_s10, %s8652_s9 }
  0x8a   : > { %p8323_p2 = por %p8322_p13, %p8321_p1 }
  0x8b   : > { %p8319_p0 = pneg %p8318_p10 }
  0x8c   : > { %p8325_p4 = por %p8324_p6, %p8323_p2 }
  0x8e   : > { %p8326_p3 = pnand %p8325_p4, %p8319_p0 }
  0x90   : > { %8329 = shalt.err (!%p8326_p3)
}
  0x91   : > { %s8330_s27 = scalar_lea.vmem %s325_s21, 128  ;;  %s8401_s30 = smov [#allocation9]  }
  0x92   : > { %p8331_p7 = scmp.ne.s32.totalorder %s325_s21, %s8330_s27  ;;  %s8335_s22 = sshll.u32 %s8401_s30, 4  ;;  %s8336_s22 = int_to_ptr.vmem [resolvable:$false] %s8335_s22 }
  0x93   : > { %s8337_s17 = scalar_lea.vmem %s8336_s22, 256  ;;  %p8338_p11 = scmp.lt.s32.totalorder %s325_s21, %s8336_s22 }
  0x94   : > { %p8333_p12 = pnand %p8331_p7, %p8551_p9  ;;  %p8339_p10 = scmp.lt.s32.totalorder %s8337_s17, %s8330_s27 }
  0x96   : > { %p8334_p5 = pneg %p8333_p12  ;;  %p8340_p8 = por %p8339_p10, %p8338_p11 }
  0x98   : > { %p8341_p1 = pnand %p8340_p8, %p8334_p5 }
  0x9a   : > { %8344 = shalt.err (!%p8341_p1)
}
  0x9b   : > { %p10749_p13 = scmp.ne.s32.totalorder %s10743_s18, 0  ;;  %p10750_p0 = scmp.ne.s32.totalorder %s10741_s12, 0 }
  0x9d   : > { %7515 = dma.hbm_to_vmem [thread:$0]  (!%p10749_p13), %s8652_s9, 128, %s325_s21, %s313_s29  }
  0x9e   : > { %333 = sbr.rel (%p10750_p0) target bundleno = 2713 (0xa99), region = 48 }
  0xa5   : > { %s335_s13 = sand.u32 1, %s8383_s25   ;;  %p10751_p9 = scmp.ne.s32.totalorder %s10740_s11, 0 }
  0xa6   : > { %s6766_s19 = sshll.u32 %s335_s13, 10  ;;  %s336_s8 = scalar_lea.sflag [#allocation5], %s335_s13 }
  0xa7   : > { %s8676_s26 = scalar_lea.vmem [#allocation4], %s6766_s19 }
  0xa8   : > { %8362 = dma.done.wait (%p10751_p9), %s336_s8, 16384  }
  0xa9   : > { %8364 = vsyncadd (%p10751_p9), %s336_s8, 4294950912  ;;  %s344_s18 = sand.u32 1, %s8462_s28   ;;  %s6767_s6 = sshll.u32 %s335_s13, 8 }
  0xaa   : > { %s345_s9 = scalar_lea.sflag [#allocation7], %s344_s18  ;;  %s8683_s2 = scalar_lea.vmem [#allocation6], %s6767_s6 }
  0xab   : > { %8366 = dma.done.wait (%p10751_p9), %s345_s9, 8192  }
  0xac   : > { %8368 = vsyncadd (%p10751_p9), %s345_s9, 4294959104  ;;  %s6769_s12 = sshll.u32 %s335_s13, 3  ;;  %s8689_s21 = scalar_lea.vmem [#allocation8], %s6767_s6 }
  0xad   : > { %s363_s24 = scalar_lea.sflag [#allocation10], %s344_s18  ;;  %s8691_s29 = scalar_lea.vmem [#allocation9], %s6769_s12 }
  0xae   : > { %8370 = dma.done.wait (%p10751_p9), %s363_s24, 128  }
  0xaf   : > { %8372 = vsyncadd (%p10751_p9), %s363_s24, 4294967168  ;;  %p10752_p8 = scmp.eq.s32.totalorder %s8462_s28, 0 }
  0xb1   : > { %8374 = dma.done.wait (%p10752_p8), [#allocation10], 16   ;;  %p10753_p2 = pmov %p10752_p8 }
  0xb2   : > { %p10754_p6 = scmp.ne.s32.totalorder %s8462_s28, 0 }
  0xb3   : > { %8376 = vsyncadd (%p10753_p2), [#allocation10], 4294967280  ;;  %v416_v0 = vld [vmem:[%s10693_s0] sm:$0xff] (!%p10754_p6)  ;;  %v417_v1 = vld [vmem:[%s10693_s0 + $0x8] sm:$0xff] (!%p10754_p6) }
  0xb4   : > { %415 = sbr.rel (%p10754_p6) target bundleno = 188 (0xbc), region = 72  ;;  %v418_v2 = vld [vmem:[%s10693_s0 + $0x10] sm:$0xff] (!%p10754_p6)  ;;  %432 = vst [vmem:[#allocation2] sm:$0xff] (!%p10754_p6), %v416_v0  ;;  %433 = vst [vmem:[#allocation2 + $0x8] sm:$0xff] (!%p10754_p6), %v417_v1  ;;  %v419_v3 = vld [vmem:[%s10693_s0 + $0x18] sm:$0xff] (!%p10754_p6) }
  0xb5   : > { %434 = vst [vmem:[#allocation2 + $0x10] sm:$0xff] (!%p10754_p6), %v418_v2  ;;  %v420_v4 = vld [vmem:[%s10693_s0 + $0x20] sm:$0xff] (!%p10754_p6)  ;;  %v421_v5 = vld [vmem:[%s10693_s0 + $0x28] sm:$0xff] (!%p10754_p6)  ;;  %435 = vst [vmem:[#allocation2 + $0x18] sm:$0xff] (!%p10754_p6), %v419_v3 }
  0xb6   : > { %436 = vst [vmem:[#allocation2 + $0x20] sm:$0xff] (!%p10754_p6), %v420_v4  ;;  %437 = vst [vmem:[#allocation2 + $0x28] sm:$0xff] (!%p10754_p6), %v421_v5  ;;  %v422_v6 = vld [vmem:[%s10693_s0 + $0x30] sm:$0xff] (!%p10754_p6)  ;;  %v423_v7 = vld [vmem:[%s10693_s0 + $0x38] sm:$0xff] (!%p10754_p6) }
  0xb7   : > { %v424_v8 = vld [vmem:[%s10693_s0 + $0x40] sm:$0xff] (!%p10754_p6)  ;;  %438 = vst [vmem:[#allocation2 + $0x30] sm:$0xff] (!%p10754_p6), %v422_v6  ;;  %439 = vst [vmem:[#allocation2 + $0x38] sm:$0xff] (!%p10754_p6), %v423_v7  ;;  %v425_v9 = vld [vmem:[%s10693_s0 + $0x48] sm:$0xff] (!%p10754_p6) }
  0xb8   : > { %440 = vst [vmem:[#allocation2 + $0x40] sm:$0xff] (!%p10754_p6), %v424_v8  ;;  %v426_v10 = vld [vmem:[%s10693_s0 + $0x50] sm:$0xff] (!%p10754_p6)  ;;  %v427_v11 = vld [vmem:[%s10693_s0 + $0x58] sm:$0xff] (!%p10754_p6)  ;;  %441 = vst [vmem:[#allocation2 + $0x48] sm:$0xff] (!%p10754_p6), %v425_v9 }
  0xb9   : > { %442 = vst [vmem:[#allocation2 + $0x50] sm:$0xff] (!%p10754_p6), %v426_v10  ;;  %443 = vst [vmem:[#allocation2 + $0x58] sm:$0xff] (!%p10754_p6), %v427_v11  ;;  %v428_v12 = vld [vmem:[%s10693_s0 + $0x60] sm:$0xff] (!%p10754_p6)  ;;  %v429_v13 = vld [vmem:[%s10693_s0 + $0x68] sm:$0xff] (!%p10754_p6) }
  0xba   : > { %v430_v14 = vld [vmem:[%s10693_s0 + $0x70] sm:$0xff] (!%p10754_p6)  ;;  %444 = vst [vmem:[#allocation2 + $0x60] sm:$0xff] (!%p10754_p6), %v428_v12  ;;  %445 = vst [vmem:[#allocation2 + $0x68] sm:$0xff] (!%p10754_p6), %v429_v13  ;;  %v431_v15 = vld [vmem:[%s10693_s0 + $0x78] sm:$0xff] (!%p10754_p6) }
  0xbb   : > { %446 = vst [vmem:[#allocation2 + $0x70] sm:$0xff] %v430_v14  ;;  %447 = vst [vmem:[#allocation2 + $0x78] sm:$0xff] %v431_v15 }
  0xbc PF: > { %v472_v16 = vld [vmem:[%s8676_s26] sm:$0xff]  ;;  %v473_v18 = vld [vmem:[%s8676_s26 + $0x8] sm:$0xff]  ;;  %p7412_p4 = scmp.ne.s32.totalorder %s8462_s28, 19 }
  0xbd   : > { %v476_v17 = vld [vmem:[%s8676_s26 + $0x20] sm:$0xff]  ;;  %v477_v20 = vld [vmem:[%s8676_s26 + $0x28] sm:$0xff]  ;;  %v451_v6 = vld [vmem:[#allocation2 + $0x18] sm:$0xff]  ;;  %vm6633_vm0 = vcmask (!%p7412_p4), 244736  }
  0xbe   : > { %v6773_v19 = vcombine.high %v472_v16, %v476_v17  ;;  %v6772_v21 = vcombine.low %v472_v16, %v476_v17  ;;  %v480_v22 = vld [vmem:[%s8676_s26 + $0x40] sm:$0xff]  ;;  %v6775_v24 = vcombine.high %v473_v18, %v477_v20  ;;  %v6774_v25 = vcombine.low %v473_v18, %v477_v20  ;;  %v481_v27 = vld [vmem:[%s8676_s26 + $0x48] sm:$0xff] }
  0xbf   : > { %v484_v23 = vld [vmem:[%s8676_s26 + $0x60] sm:$0xff]  ;;  %v485_v28 = vld [vmem:[%s8676_s26 + $0x68] sm:$0xff] }
  0xc0   : > { %v6781_v26 = vcombine.high %v480_v22, %v484_v23  ;;  %v488_v29 = vld [vmem:[%s8676_s26 + $0x80] sm:$0xff]  ;;  %1282 = vmatprep.subr.bf16.mxu0 %v6773_v19  ;;  %v6783_v30 = vcombine.high %v481_v27, %v485_v28  ;;  %v489_v32 = vld [vmem:[%s8676_s26 + $0x88] sm:$0xff]  ;;  %1355 = vmatprep.subr.bf16.mxu1 %v6775_v24  ;;  %v6780_v34 = vcombine.low %v480_v22, %v484_v23 }
  0xc1   : > { %v492_v31 = vld [vmem:[%s8676_s26 + $0xa0] sm:$0xff]  ;;  %v493_v33 = vld [vmem:[%s8676_s26 + $0xa8] sm:$0xff]  ;;  %1283 = vmatpush1.bf16.msra.mxu0 %v6772_v21  ;;  %1356 = vmatpush1.bf16.msra.mxu1 %v6774_v25  ;;  %v6782_v35 = vcombine.low %v481_v27, %v485_v28 }
  0xc2   : > { %1284 = vmatprep.subr.bf16.mxu0 %v6781_v26  ;;  %v6789_v36 = vcombine.high %v488_v29, %v492_v31  ;;  %1357 = vmatprep.subr.bf16.mxu1 %v6783_v30  ;;  %v6791_v37 = vcombine.high %v489_v32, %v493_v33  ;;  %v496_v38 = vld [vmem:[%s8676_s26 + $0xc0] sm:$0xff]  ;;  %v497_v40 = vld [vmem:[%s8676_s26 + $0xc8] sm:$0xff]  ;;  %v6788_v42 = vcombine.low %v488_v29, %v492_v31 }
  0xc3   : > { %v500_v39 = vld [vmem:[%s8676_s26 + $0xe0] sm:$0xff]  ;;  %v501_v41 = vld [vmem:[%s8676_s26 + $0xe8] sm:$0xff]  ;;  %v6790_v43 = vcombine.low %v489_v32, %v493_v33 }
  0xc4   : > { %v6797_v44 = vcombine.high %v496_v38, %v500_v39  ;;  %v6799_v45 = vcombine.high %v497_v40, %v501_v41  ;;  %v504_v46 = vld [vmem:[%s8676_s26 + $0x100] sm:$0xff]  ;;  %v505_v48 = vld [vmem:[%s8676_s26 + $0x108] sm:$0xff]  ;;  %v6796_v50 = vcombine.low %v496_v38, %v500_v39  ;;  %v6798_v51 = vcombine.low %v497_v40, %v501_v41 }
  0xc5   : > { %1285 = vmatpush1.bf16.msra.mxu0 %v6780_v34  ;;  %1358 = vmatpush1.bf16.msra.mxu1 %v6782_v35  ;;  %v508_v47 = vld [vmem:[%s8676_s26 + $0x120] sm:$0xff]  ;;  %v509_v49 = vld [vmem:[%s8676_s26 + $0x128] sm:$0xff] }
  0xc6   : > { %1286 = vmatprep.subr.bf16.mxu0 %v6789_v36  ;;  %1359 = vmatprep.subr.bf16.mxu1 %v6791_v37  ;;  %v6805_v52 = vcombine.high %v504_v46, %v508_v47  ;;  %v6807_v53 = vcombine.high %v505_v48, %v509_v49  ;;  %v512_v54 = vld [vmem:[%s8676_s26 + $0x140] sm:$0xff]  ;;  %v513_v56 = vld [vmem:[%s8676_s26 + $0x148] sm:$0xff]  ;;  %v6804_v58 = vcombine.low %v504_v46, %v508_v47 }
  0xc7   : > { %v516_v55 = vld [vmem:[%s8676_s26 + $0x160] sm:$0xff]  ;;  %v517_v57 = vld [vmem:[%s8676_s26 + $0x168] sm:$0xff]  ;;  %v6806_v59 = vcombine.low %v505_v48, %v509_v49 }
  0xc8   : > { %v6813_v60 = vcombine.high %v512_v54, %v516_v55  ;;  %v6815_v61 = vcombine.high %v513_v56, %v517_v57  ;;  %v520_v62 = vld [vmem:[%s8676_s26 + $0x180] sm:$0xff]  ;;  %v521_v0 = vld [vmem:[%s8676_s26 + $0x188] sm:$0xff]  ;;  %v6812_v2 = vcombine.low %v512_v54, %v516_v55  ;;  %v6814_v3 = vcombine.low %v513_v56, %v517_v57 }
  0xc9   : > { %1287 = vmatpush1.bf16.msra.mxu0 %v6788_v42  ;;  %1360 = vmatpush1.bf16.msra.mxu1 %v6790_v43  ;;  %v524_v63 = vld [vmem:[%s8676_s26 + $0x1a0] sm:$0xff]  ;;  %v525_v1 = vld [vmem:[%s8676_s26 + $0x1a8] sm:$0xff] }
  0xca   : > { %1288 = vmatprep.subr.bf16.mxu0 %v6797_v44  ;;  %1361 = vmatprep.subr.bf16.mxu1 %v6799_v45  ;;  %v6821_v4 = vcombine.high %v520_v62, %v524_v63  ;;  %v449_v5 = vld [vmem:[#allocation2 + $0x8] sm:$0xff]  ;;  %v6823_v7 = vcombine.high %v521_v0, %v525_v1  ;;  %v528_v8 = vld [vmem:[%s8676_s26 + $0x1c0] sm:$0xff]  ;;  %v6820_v13 = vcombine.low %v520_v62, %v524_v63 }
  0xcb   : > { %v532_v9 = vld [vmem:[%s8676_s26 + $0x1e0] sm:$0xff]  ;;  %v8781_v10 = vpack.c.bf16 %v451_v6, %v449_v5  ;;  %v529_v11 = vld [vmem:[%s8676_s26 + $0x1c8] sm:$0xff]  ;;  %v6822_v14 = vcombine.low %v521_v0, %v525_v1 }
  0xcc   : > { %v533_v12 = vld [vmem:[%s8676_s26 + $0x1e8] sm:$0xff]  ;;  %v6829_v15 = vcombine.high %v528_v8, %v532_v9  ;;  %v536_v17 = vld [vmem:[%s8676_s26 + $0x200] sm:$0xff]  ;;  %v6828_v21 = vcombine.low %v528_v8, %v532_v9 }
  0xcd   : > { %1289 = vmatpush1.bf16.msra.mxu0 %v6796_v50  ;;  %1362 = vmatpush1.bf16.msra.mxu1 %v6798_v51  ;;  %v6831_v16 = vcombine.high %v529_v11, %v533_v12  ;;  %v540_v18 = vld [vmem:[%s8676_s26 + $0x220] sm:$0xff]  ;;  %v537_v19 = vld [vmem:[%s8676_s26 + $0x208] sm:$0xff]  ;;  %v6830_v22 = vcombine.low %v529_v11, %v533_v12 }
  0xce   : > { %1290 = vmatprep.subr.bf16.mxu0 %v6805_v52  ;;  %1363 = vmatprep.subr.bf16.mxu1 %v6807_v53  ;;  %v541_v20 = vld [vmem:[%s8676_s26 + $0x228] sm:$0xff]  ;;  %v6837_v23 = vcombine.high %v536_v17, %v540_v18  ;;  %v544_v25 = vld [vmem:[%s8676_s26 + $0x240] sm:$0xff]  ;;  %v6836_v29 = vcombine.low %v536_v17, %v540_v18 }
  0xcf   : > { %1314 = vmatprep.mubr.bf16.mxu0 %v8781_v10  ;;  %1387 = vmatprep.mubr.bf16.mxu1 %v8781_v10  ;;  %v6839_v24 = vcombine.high %v537_v19, %v541_v20  ;;  %v548_v26 = vld [vmem:[%s8676_s26 + $0x260] sm:$0xff]  ;;  %v545_v27 = vld [vmem:[%s8676_s26 + $0x248] sm:$0xff]  ;;  %v6838_v30 = vcombine.low %v537_v19, %v541_v20  ;;  %v450_v19 = vld [vmem:[#allocation2 + $0x10] sm:$0xff] }
  0xd0   : > { %v549_v28 = vld [vmem:[%s8676_s26 + $0x268] sm:$0xff]  ;;  %v6845_v31 = vcombine.high %v544_v25, %v548_v26  ;;  %v552_v33 = vld [vmem:[%s8676_s26 + $0x280] sm:$0xff]  ;;  %v6844_v37 = vcombine.low %v544_v25, %v548_v26  ;;  %v474_v20 = vld [vmem:[%s8676_s26 + $0x10] sm:$0xff] }
  0xd1   : > { %1291 = vmatpush1.bf16.msra.mxu0 %v6804_v58  ;;  %1364 = vmatpush1.bf16.msra.mxu1 %v6806_v59  ;;  %v6847_v32 = vcombine.high %v545_v27, %v549_v28  ;;  %v556_v34 = vld [vmem:[%s8676_s26 + $0x2a0] sm:$0xff]  ;;  %v553_v35 = vld [vmem:[%s8676_s26 + $0x288] sm:$0xff]  ;;  %v6846_v38 = vcombine.low %v545_v27, %v549_v28  ;;  %v482_v25 = vld [vmem:[%s8676_s26 + $0x50] sm:$0xff] }
  0xd2   : > { %1292 = vmatprep.subr.bf16.mxu0 %v6813_v60  ;;  %1365 = vmatprep.subr.bf16.mxu1 %v6815_v61  ;;  %v557_v36 = vld [vmem:[%s8676_s26 + $0x2a8] sm:$0xff]  ;;  %v6853_v39 = vcombine.high %v552_v33, %v556_v34  ;;  %v560_v41 = vld [vmem:[%s8676_s26 + $0x2c0] sm:$0xff]  ;;  %v6852_v45 = vcombine.low %v552_v33, %v556_v34  ;;  %v486_v28 = vld [vmem:[%s8676_s26 + $0x70] sm:$0xff] }
  0xd3   : > { %v6855_v40 = vcombine.high %v553_v35, %v557_v36  ;;  %v564_v42 = vld [vmem:[%s8676_s26 + $0x2e0] sm:$0xff]  ;;  %v561_v43 = vld [vmem:[%s8676_s26 + $0x2c8] sm:$0xff]  ;;  %v6854_v46 = vcombine.low %v553_v35, %v557_v36  ;;  %v455_v34 = vld [vmem:[#allocation2 + $0x38] sm:$0xff] }
  0xd4   : > { %v565_v44 = vld [vmem:[%s8676_s26 + $0x2e8] sm:$0xff]  ;;  %v6861_v47 = vcombine.high %v560_v41, %v564_v42  ;;  %v568_v49 = vld [vmem:[%s8676_s26 + $0x300] sm:$0xff]  ;;  %v6860_v53 = vcombine.low %v560_v41, %v564_v42  ;;  %v491_v41 = vld [vmem:[%s8676_s26 + $0x98] sm:$0xff] }
  0xd5   : > { %1293 = vmatpush1.bf16.msra.mxu0 %v6812_v2  ;;  %1366 = vmatpush1.bf16.msra.mxu1 %v6814_v3  ;;  %v6863_v48 = vcombine.high %v561_v43, %v565_v44  ;;  %v572_v50 = vld [vmem:[%s8676_s26 + $0x320] sm:$0xff]  ;;  %v569_v51 = vld [vmem:[%s8676_s26 + $0x308] sm:$0xff]  ;;  %v6862_v54 = vcombine.low %v561_v43, %v565_v44  ;;  %v495_v43 = vld [vmem:[%s8676_s26 + $0xb8] sm:$0xff] }
  0xd6   : > { %1294 = vmatprep.subr.bf16.mxu0 %v6821_v4  ;;  %1367 = vmatprep.subr.bf16.mxu1 %v6823_v7  ;;  %v573_v52 = vld [vmem:[%s8676_s26 + $0x328] sm:$0xff]  ;;  %v6869_v55 = vcombine.high %v568_v49, %v572_v50  ;;  %v576_v57 = vld [vmem:[%s8676_s26 + $0x340] sm:$0xff]  ;;  %v6868_v61 = vcombine.low %v568_v49, %v572_v50  ;;  %v502_v50 = vld [vmem:[%s8676_s26 + $0xf0] sm:$0xff] }
  0xd7   : > { %v6871_v56 = vcombine.high %v569_v51, %v573_v52  ;;  %v580_v58 = vld [vmem:[%s8676_s26 + $0x360] sm:$0xff]  ;;  %v577_v59 = vld [vmem:[%s8676_s26 + $0x348] sm:$0xff]  ;;  %v6870_v62 = vcombine.low %v569_v51, %v573_v52  ;;  %v6795_v51 = vcombine.high %v491_v41, %v495_v43  ;;  %v499_v52 = vld [vmem:[%s8676_s26 + $0xd8] sm:$0xff] }
  0xd8   : > { %v581_v60 = vld [vmem:[%s8676_s26 + $0x368] sm:$0xff]  ;;  %v6877_v63 = vcombine.high %v576_v57, %v580_v58  ;;  %v584_v1 = vld [vmem:[%s8676_s26 + $0x380] sm:$0xff]  ;;  %v6876_v5 = vcombine.low %v576_v57, %v580_v58  ;;  %v6794_v58 = vcombine.low %v491_v41, %v495_v43  ;;  %v542_v43 = vld [vmem:[%s8676_s26 + $0x230] sm:$0xff] }
  0xd9   : > { %1295 = vmatpush1.bf16.msra.mxu0 %v6820_v13  ;;  %1368 = vmatpush1.bf16.msra.mxu1 %v6822_v14  ;;  %v6879_v0 = vcombine.high %v577_v59, %v581_v60  ;;  %v588_v2 = vld [vmem:[%s8676_s26 + $0x3a0] sm:$0xff]  ;;  %v585_v3 = vld [vmem:[%s8676_s26 + $0x388] sm:$0xff]  ;;  %v6878_v6 = vcombine.low %v577_v59, %v581_v60  ;;  %v506_v60 = vld [vmem:[%s8676_s26 + $0x110] sm:$0xff] }
  0xda   : > { %1296 = vmatprep.subr.bf16.mxu0 %v6829_v15  ;;  %1369 = vmatprep.subr.bf16.mxu1 %v6831_v16  ;;  %v589_v4 = vld [vmem:[%s8676_s26 + $0x3a8] sm:$0xff]  ;;  %v6885_v7 = vcombine.high %v584_v1, %v588_v2  ;;  %v592_v9 = vld [vmem:[%s8676_s26 + $0x3c0] sm:$0xff]  ;;  %v6884_v14 = vcombine.low %v584_v1, %v588_v2  ;;  %v511_v1 = vld [vmem:[%s8676_s26 + $0x138] sm:$0xff] }
  0xdb   : > { %v6887_v8 = vcombine.high %v585_v3, %v589_v4  ;;  %v596_v11 = vld [vmem:[%s8676_s26 + $0x3e0] sm:$0xff]  ;;  %v593_v12 = vld [vmem:[%s8676_s26 + $0x3c8] sm:$0xff]  ;;  %v6886_v15 = vcombine.low %v585_v3, %v589_v4  ;;  %v514_v4 = vld [vmem:[%s8676_s26 + $0x150] sm:$0xff] }
  0xdc   : > { %v597_v13 = vld [vmem:[%s8676_s26 + $0x3e8] sm:$0xff]  ;;  %v6893_v16 = vcombine.high %v592_v9, %v596_v11  ;;  %v448_v18 = vld [vmem:[#allocation2] sm:$0xff] }
  0xdd   : > { %1297 = vmatpush1.bf16.msra.mxu0 %v6828_v21  ;;  %1370 = vmatpush1.bf16.msra.mxu1 %v6830_v22  ;;  %v6895_v17 = vcombine.high %v593_v12, %v597_v13  ;;  %v478_v21 = vld [vmem:[%s8676_s26 + $0x30] sm:$0xff]  ;;  %v475_v22 = vld [vmem:[%s8676_s26 + $0x18] sm:$0xff]  ;;  %v6894_v26 = vcombine.low %v593_v12, %v597_v13  ;;  %v453_v33 = vld [vmem:[#allocation2 + $0x28] sm:$0xff] }
  0xde   : > { %1298 = vmatprep.subr.bf16.mxu0 %v6837_v23  ;;  %1371 = vmatprep.subr.bf16.mxu1 %v6839_v24  ;;  %v479_v23 = vld [vmem:[%s8676_s26 + $0x38] sm:$0xff]  ;;  %v6892_v24 = vcombine.low %v592_v9, %v596_v11  ;;  %v6777_v27 = vcombine.high %v474_v20, %v478_v21  ;;  %v6776_v35 = vcombine.low %v474_v20, %v478_v21  ;;  %v452_v44 = vld [vmem:[#allocation2 + $0x20] sm:$0xff]  ;;  %v526_v21 = vld [vmem:[%s8676_s26 + $0x1b0] sm:$0xff] }
  0xdf   : > { %v6778_v36 = vcombine.low %v475_v22, %v479_v23  ;;  %v8832_v42 = vpack.c.bf16 %v455_v34, %v453_v33  ;;  %v456_v2 = vld [vmem:[#allocation2 + $0x40] sm:$0xff]  ;;  %v515_v11 = vld [vmem:[%s8676_s26 + $0x158] sm:$0xff]  ;;  %v534_v33 = vld [vmem:[%s8676_s26 + $0x1f0] sm:$0xff] }
  0xe0   : > { %v519_v12 = vld [vmem:[%s8676_s26 + $0x178] sm:$0xff] }
  0xe1   : > { %1299 = vmatpush1.bf16.msra.mxu0 %v6836_v29  ;;  %1372 = vmatpush1.bf16.msra.mxu1 %v6838_v30  ;;  %v6779_v29 = vcombine.high %v475_v22, %v479_v23  ;;  %v483_v30 = vld [vmem:[%s8676_s26 + $0x58] sm:$0xff]  ;;  %v6819_v20 = vcombine.high %v515_v11, %v519_v12 }
  0xe2   : > { %1300 = vmatprep.subr.bf16.mxu0 %v6845_v31  ;;  %1373 = vmatprep.subr.bf16.mxu1 %v6847_v32  ;;  %v487_v31 = vld [vmem:[%s8676_s26 + $0x78] sm:$0xff]  ;;  %v8827_v32 = vpack.c.bf16 %v450_v19, %v448_v18  ;;  %v522_v19 = vld [vmem:[%s8676_s26 + $0x190] sm:$0xff] }
  0xe3   : > { %v523_v22 = vld [vmem:[%s8676_s26 + $0x198] sm:$0xff] }
  0xe4   : > { %v531_v34 = vld [vmem:[%s8676_s26 + $0x1d8] sm:$0xff] }
  0xe5   : > { %1301 = vmatpush1.bf16.msra.mxu0 %v6844_v37  ;;  %1374 = vmatpush1.bf16.msra.mxu1 %v6846_v38  ;;  %v6785_v37 = vcombine.high %v482_v25, %v486_v28  ;;  %v490_v38 = vld [vmem:[%s8676_s26 + $0x90] sm:$0xff] }
  0xe6   : > { %1302 = vmatprep.subr.bf16.mxu0 %v6853_v39  ;;  %1375 = vmatprep.subr.bf16.mxu1 %v6855_v40  ;;  %v6787_v39 = vcombine.high %v483_v30, %v487_v31  ;;  %v494_v40 = vld [vmem:[%s8676_s26 + $0xb0] sm:$0xff] }
  0xe7   : > { %v6793_v49 = vcombine.high %v490_v38, %v494_v40  ;;  %v6792_v57 = vcombine.low %v490_v38, %v494_v40  ;;  %v538_v40 = vld [vmem:[%s8676_s26 + $0x210] sm:$0xff] }
  0xe9   : > { %1303 = vmatpush1.bf16.msra.mxu0 %v6852_v45  ;;  %1376 = vmatpush1.bf16.msra.mxu1 %v6854_v46  ;;  %v6784_v45 = vcombine.low %v482_v25, %v486_v28  ;;  %v498_v46 = vld [vmem:[%s8676_s26 + $0xd0] sm:$0xff]  ;;  %v460_v25 = vld [vmem:[#allocation2 + $0x60] sm:$0xff]  ;;  %v6818_v28 = vcombine.low %v515_v11, %v519_v12 }
  0xea   : > { %1304 = vmatprep.subr.bf16.mxu0 %v6861_v47  ;;  %1377 = vmatprep.subr.bf16.mxu1 %v6863_v48  ;;  %v454_v47 = vld [vmem:[#allocation2 + $0x30] sm:$0xff]  ;;  %v6786_v48 = vcombine.low %v483_v30, %v487_v31  ;;  %v6801_v59 = vcombine.high %v498_v46, %v502_v50  ;;  %v6800_v3 = vcombine.low %v498_v46, %v502_v50 }
  0xeb   : > { %v530_v31 = vld [vmem:[%s8676_s26 + $0x1d0] sm:$0xff]  ;;  %v6841_v50 = vcombine.high %v538_v40, %v542_v43 }
  0xec   : > { %v6832_v46 = vcombine.low %v530_v31, %v534_v33 }
  0xed   : > { %1305 = vmatpush1.bf16.msra.mxu0 %v6860_v53  ;;  %1378 = vmatpush1.bf16.msra.mxu1 %v6862_v54  ;;  %v503_v53 = vld [vmem:[%s8676_s26 + $0xf8] sm:$0xff]  ;;  %v8842_v54 = vpack.c.bf16 %v454_v47, %v452_v44  ;;  %v546_v47 = vld [vmem:[%s8676_s26 + $0x250] sm:$0xff] }
  0xee   : > { %1306 = vmatprep.subr.bf16.mxu0 %v6869_v55  ;;  %1379 = vmatprep.subr.bf16.mxu1 %v6871_v56  ;;  %v457_v55 = vld [vmem:[#allocation2 + $0x48] sm:$0xff]  ;;  %v459_v56 = vld [vmem:[#allocation2 + $0x58] sm:$0xff] }
  0xef   : > { %v539_v44 = vld [vmem:[%s8676_s26 + $0x218] sm:$0xff] }
  0xf1   : > { %1307 = vmatpush1.bf16.msra.mxu0 %v6868_v61  ;;  %1380 = vmatpush1.bf16.msra.mxu1 %v6870_v62  ;;  %v6803_v61 = vcombine.high %v499_v52, %v503_v53  ;;  %v510_v62 = vld [vmem:[%s8676_s26 + $0x130] sm:$0xff] }
  0xf2   : > { %1308 = vmatprep.subr.bf16.mxu0 %v6877_v63  ;;  %1381 = vmatprep.subr.bf16.mxu1 %v6879_v0  ;;  %v507_v63 = vld [vmem:[%s8676_s26 + $0x118] sm:$0xff]  ;;  %v8848_v0 = vpack.c.bf16 %v459_v56, %v457_v55  ;;  %v6840_v55 = vcombine.low %v538_v40, %v542_v43  ;;  %v554_v56 = vld [vmem:[%s8676_s26 + $0x290] sm:$0xff] }
  0xf3   : > { %v6811_v9 = vcombine.high %v507_v63, %v511_v1  ;;  %v599_v43 = vld [vmem:[%s8676_s26 + $0x3f8] sm:$0xff] }
  0xf5   : > { %1309 = vmatpush1.bf16.msra.mxu0 %v6876_v5  ;;  %1382 = vmatpush1.bf16.msra.mxu1 %v6878_v6  ;;  %v458_v5 = vld [vmem:[#allocation2 + $0x50] sm:$0xff]  ;;  %v6802_v6 = vcombine.low %v499_v52, %v503_v53  ;;  %v551_v52 = vld [vmem:[%s8676_s26 + $0x278] sm:$0xff] }
  0xf6   : > { %1310 = vmatprep.subr.bf16.mxu0 %v6885_v7  ;;  %1383 = vmatprep.subr.bf16.mxu1 %v6887_v8  ;;  %v6809_v7 = vcombine.high %v506_v60, %v510_v62  ;;  %v518_v8 = vld [vmem:[%s8676_s26 + $0x170] sm:$0xff]  ;;  %v8858_v13 = vpack.c.bf16 %v458_v5, %v456_v2  ;;  %v567_v5 = vld [vmem:[%s8676_s26 + $0x2f8] sm:$0xff] }
  0xf7   : > { %v6817_v18 = vcombine.high %v514_v4, %v518_v8 }
  0xf9   : > { %1311 = vmatpush1.bf16.msra.mxu0 %v6884_v14  ;;  %1384 = vmatpush1.bf16.msra.mxu1 %v6886_v15  ;;  %v461_v14 = vld [vmem:[#allocation2 + $0x68] sm:$0xff]  ;;  %v463_v15 = vld [vmem:[#allocation2 + $0x78] sm:$0xff] }
  0xfa   : > { %1312 = vmatprep.subr.bf16.mxu0 %v6893_v16  ;;  %1385 = vmatprep.subr.bf16.mxu1 %v6895_v17  ;;  %v6808_v16 = vcombine.low %v506_v60, %v510_v62  ;;  %v6810_v17 = vcombine.low %v507_v63, %v511_v1  ;;  %v8864_v23 = vpack.c.bf16 %v463_v15, %v461_v14  ;;  %v555_v60 = vld [vmem:[%s8676_s26 + $0x298] sm:$0xff]  ;;  %v566_v1 = vld [vmem:[%s8676_s26 + $0x2f0] sm:$0xff] }
  0xfb   : > { %v571_v14 = vld [vmem:[%s8676_s26 + $0x318] sm:$0xff] }
  0xfc   : > { %v575_v15 = vld [vmem:[%s8676_s26 + $0x338] sm:$0xff] }
  0xfd   : > { %1313 = vmatpush1.bf16.msra.mxu0 %v6892_v24  ;;  %1386 = vmatpush1.bf16.msra.mxu1 %v6894_v26  ;;  %v527_v24 = vld [vmem:[%s8676_s26 + $0x1b8] sm:$0xff]  ;;  %v6816_v26 = vcombine.low %v514_v4, %v518_v8  ;;  %v570_v8 = vld [vmem:[%s8676_s26 + $0x310] sm:$0xff] }
  0xfe   : > { %1428 = vmatprep.subr.bf16.mxu0 %v6777_v27  ;;  %1501 = vmatprep.subr.bf16.mxu1 %v6779_v29  ;;  %v462_v27 = vld [vmem:[#allocation2 + $0x70] sm:$0xff]  ;;  %v6825_v29 = vcombine.high %v522_v19, %v526_v21  ;;  %v6827_v30 = vcombine.high %v523_v22, %v527_v24  ;;  %v6826_v38 = vcombine.low %v523_v22, %v527_v24  ;;  %v563_v4 = vld [vmem:[%s8676_s26 + $0x2d8] sm:$0xff] }
  0xff   : > { %v579_v22 = vld [vmem:[%s8676_s26 + $0x358] sm:$0xff] }
 0x100   : > { %1315 = vmatmul.mubr.bf16.vlgmr.msra.gmra.mrb[0].mxu0 %v8827_v32  ;;  %1388 = vmatmul.mubr.bf16.vlgmr.msra.gmra.mrb[0].mxu1 %v8827_v32  ;;  %v583_v24 = vld [vmem:[%s8676_s26 + $0x378] sm:$0xff] }
 0x101   : > { %1429 = vmatpush1.bf16.msra.mxu0 %v6776_v35  ;;  %1502 = vmatpush1.bf16.msra.mxu1 %v6778_v36  ;;  %v535_v35 = vld [vmem:[%s8676_s26 + $0x1f8] sm:$0xff]  ;;  %v8874_v36 = vpack.c.bf16 %v462_v27, %v460_v25  ;;  %v6875_v25 = vcombine.high %v571_v14, %v575_v15  ;;  %v586_v27 = vld [vmem:[%s8676_s26 + $0x390] sm:$0xff] }
 0x102   : > { %1430 = vmatprep.subr.bf16.mxu0 %v6785_v37  ;;  %1503 = vmatprep.subr.bf16.mxu1 %v6787_v39  ;;  %v6824_v37 = vcombine.low %v522_v19, %v526_v21  ;;  %v6833_v39 = vcombine.high %v530_v31, %v534_v33  ;;  %v6835_v41 = vcombine.high %v531_v34, %v535_v35  ;;  %v582_v19 = vld [vmem:[%s8676_s26 + $0x370] sm:$0xff]  ;;  %v587_v31 = vld [vmem:[%s8676_s26 + $0x398] sm:$0xff] }
 0x103   : > { %1324 = vmatprep.mubr.bf16.mxu0 %v8832_v42  ;;  %1397 = vmatprep.mubr.bf16.mxu1 %v8832_v42  ;;  %v591_v33 = vld [vmem:[%s8676_s26 + $0x3b8] sm:$0xff] }
 0x105   : > { %1431 = vmatpush1.bf16.msra.mxu0 %v6784_v45  ;;  %1504 = vmatpush1.bf16.msra.mxu1 %v6786_v48  ;;  %v543_v45 = vld [vmem:[%s8676_s26 + $0x238] sm:$0xff]  ;;  %v550_v48 = vld [vmem:[%s8676_s26 + $0x270] sm:$0xff] }
 0x106   : > { %1432 = vmatprep.subr.bf16.mxu0 %v6793_v49  ;;  %1505 = vmatprep.subr.bf16.mxu1 %v6795_v51  ;;  %v6834_v49 = vcombine.low %v531_v34, %v535_v35  ;;  %v547_v51 = vld [vmem:[%s8676_s26 + $0x258] sm:$0xff]  ;;  %v6843_v53 = vcombine.high %v539_v44, %v543_v45  ;;  %v6848_v63 = vcombine.low %v546_v47, %v550_v48 }
 0x107   : > { %v6851_v62 = vcombine.high %v547_v51, %v551_v52  ;;  %v6850_v2 = vcombine.low %v547_v51, %v551_v52  ;;  %v6883_v34 = vcombine.high %v579_v22, %v583_v24  ;;  %v8917_v51 = vld [vmem:[%s8683_s2 + $0xc] ss:$16 sps:$4 sm:$0xff]  }
 0x108   : > { %1325 = vmatmul.mubr.bf16.gmra.mrb[4].mxu0 %v8842_v54  ;;  %1398 = vmatmul.mubr.bf16.gmra.mrb[4].mxu1 %v8842_v54 }
 0x109   : > { %1433 = vmatpush1.bf16.msra.mxu0 %v6792_v57  ;;  %1506 = vmatpush1.bf16.msra.mxu1 %v6794_v58  ;;  %v558_v57 = vld [vmem:[%s8676_s26 + $0x2b0] sm:$0xff]  ;;  %v6842_v58 = vcombine.low %v539_v44, %v543_v45  ;;  %v6891_v44 = vcombine.high %v587_v31, %v591_v33 }
 0x10a   : > { %1434 = vmatprep.subr.bf16.mxu0 %v6801_v59  ;;  %1507 = vmatprep.subr.bf16.mxu1 %v6803_v61  ;;  %v6849_v59 = vcombine.high %v546_v47, %v550_v48  ;;  %v559_v61 = vld [vmem:[%s8676_s26 + $0x2b8] sm:$0xff] }
 0x10b   : > { %1334 = vmatprep.mubr.bf16.mxu0 %v8848_v0  ;;  %1407 = vmatprep.mubr.bf16.mxu1 %v8848_v0  ;;  %v6858_v11 = vcombine.low %v555_v60, %v559_v61 }
 0x10d   : > { %1435 = vmatpush1.bf16.msra.mxu0 %v6800_v3  ;;  %1508 = vmatpush1.bf16.msra.mxu1 %v6802_v6  ;;  %v6857_v3 = vcombine.high %v554_v56, %v558_v57  ;;  %v6859_v6 = vcombine.high %v555_v60, %v559_v61  ;;  %v8941_v60 = vld [vmem:[%s8683_s2 + $0x44] ss:$16 sps:$4 sm:$0xff]   ;;  %v8946_v61 = vld [vmem:[%s8683_s2 + $0x4c] ss:$16 sps:$4 sm:$0xff]  }
 0x10e   : > { %1436 = vmatprep.subr.bf16.mxu0 %v6809_v7  ;;  %1509 = vmatprep.subr.bf16.mxu1 %v6811_v9  ;;  %v6856_v7 = vcombine.low %v554_v56, %v558_v57  ;;  %v574_v9 = vld [vmem:[%s8676_s26 + $0x330] sm:$0xff]  ;;  %v8929_v57 = vld [vmem:[%s8683_s2 + $0x2c] ss:$16 sps:$4 sm:$0xff]  }
 0x10f   : > { %v6873_v21 = vcombine.high %v570_v8, %v574_v9  ;;  %v8926_v56 = vld [vmem:[%s8683_s2 + $0x24] ss:$16 sps:$4 sm:$0xff]  }
 0x110   : > { %1335 = vmatmul.mubr.bf16.gmra.mrb[8].mxu0 %v8858_v13  ;;  %1408 = vmatmul.mubr.bf16.gmra.mrb[8].mxu1 %v8858_v13 }
 0x111   : > { %1437 = vmatpush1.bf16.msra.mxu0 %v6808_v16  ;;  %1510 = vmatpush1.bf16.msra.mxu1 %v6810_v17  ;;  %v6867_v16 = vcombine.high %v563_v4, %v567_v5 }
 0x112   : > { %1438 = vmatprep.subr.bf16.mxu0 %v6817_v18  ;;  %1511 = vmatprep.subr.bf16.mxu1 %v6819_v20  ;;  %v578_v18 = vld [vmem:[%s8676_s26 + $0x350] sm:$0xff]  ;;  %v6866_v20 = vcombine.low %v563_v4, %v567_v5 }
 0x113   : > { %1344 = vmatprep.mubr.bf16.mxu0 %v8864_v23  ;;  %1417 = vmatprep.mubr.bf16.mxu1 %v8864_v23  ;;  %v6880_v35 = vcombine.low %v578_v18, %v582_v19  ;;  %v8989_v4 = vld [vmem:[%s8683_s2 + $0x80] ss:$16 sps:$4 sm:$0xff]   ;;  %v8996_v5 = vld [vmem:[%s8683_s2 + $0xa4] ss:$16 sps:$4 sm:$0xff]  }
 0x115   : > { %1439 = vmatpush1.bf16.msra.mxu0 %v6816_v26  ;;  %1512 = vmatpush1.bf16.msra.mxu1 %v6818_v28  ;;  %v6872_v26 = vcombine.low %v570_v8, %v574_v9  ;;  %v590_v28 = vld [vmem:[%s8676_s26 + $0x3b0] sm:$0xff]  ;;  %v9018_v9 = vld [vmem:[%s8683_s2 + $0xcc] ss:$16 sps:$4 sm:$0xff]  }
 0x116   : > { %1440 = vmatprep.subr.bf16.mxu0 %v6825_v29  ;;  %1513 = vmatprep.subr.bf16.mxu1 %v6827_v30  ;;  %v6874_v29 = vcombine.low %v571_v14, %v575_v15  ;;  %v6881_v30 = vcombine.high %v578_v18, %v582_v19  ;;  %v6889_v40 = vcombine.high %v586_v27, %v590_v28  ;;  %v9013_v8 = vld [vmem:[%s8683_s2 + $0xc4] ss:$16 sps:$4 sm:$0xff]   ;;  %v9036_v14 = vld [vmem:[%s8683_s2 + $0xec] ss:$16 sps:$4 sm:$0xff]   ;;  %v9050_v15 = vld [vmem:[%s8683_s2 + $0xe8] ss:$16 sps:$4 sm:$0xff]  }
 0x117   : > { %v6888_v45 = vcombine.low %v586_v27, %v590_v28  ;;  %v9063_v18 = vld [vmem:[%s8689_s21] ss:$16 sps:$4 sm:$0xff]   ;;  %v9068_v19 = vld [vmem:[%s8689_s21 + $0x8] ss:$16 sps:$4 sm:$0xff]  }
 0x118   : > { %1345 = vmatmul.mubr.bf16.gmra.mrb[12].mxu0 %v8874_v36  ;;  %1418 = vmatmul.mubr.bf16.gmra.mrb[12].mxu1 %v8874_v36  ;;  %v9099_v27 = vld [vmem:[%s8689_s21 + $0x40] ss:$16 sps:$4 sm:$0xff]   ;;  %v9104_v28 = vld [vmem:[%s8689_s21 + $0x48] ss:$16 sps:$4 sm:$0xff]  }
 0x119   : > { %1441 = vmatpush1.bf16.msra.mxu0 %v6824_v37  ;;  %1514 = vmatpush1.bf16.msra.mxu1 %v6826_v38  ;;  %v594_v37 = vld [vmem:[%s8676_s26 + $0x3d0] sm:$0xff] }
 0x11a   : > { %1442 = vmatprep.subr.bf16.mxu0 %v6833_v39  ;;  %1515 = vmatprep.subr.bf16.mxu1 %v6835_v41  ;;  %v598_v38 = vld [vmem:[%s8676_s26 + $0x3f0] sm:$0xff]  ;;  %v6882_v39 = vcombine.low %v579_v22, %v583_v24  ;;  %v595_v41 = vld [vmem:[%s8676_s26 + $0x3d8] sm:$0xff] }
 0x11b   : > { %1460 = vmatprep.mubr.bf16.mxu0 %v8781_v10  ;;  %1533 = vmatprep.mubr.bf16.mxu1 %v8781_v10  ;;  %v562_v10 = vld [vmem:[%s8676_s26 + $0x2d0] sm:$0xff]  ;;  %v6897_v47 = vcombine.high %v594_v37, %v598_v38  ;;  %v6899_v48 = vcombine.high %v595_v41, %v599_v43  ;;  %v6898_v52 = vcombine.low %v595_v41, %v599_v43  ;;  %v9086_v24 = vld [vmem:[%s8689_s21 + $0x28] ss:$16 sps:$4 sm:$0xff]  }
 0x11c   : > { %v6865_v12 = vcombine.high %v562_v10, %v566_v1  ;;  %v6864_v17 = vcombine.low %v562_v10, %v566_v1  ;;  %v8964_v10 = vld [vmem:[%s8683_s2 + $0x6c] ss:$16 sps:$4 sm:$0xff]   ;;  %v8970_v1 = vld [vmem:[%s8683_s2 + $0x60] ss:$16 sps:$4 sm:$0xff]   ;;  %v9152_v43 = vld [vmem:[%s8689_s21 + $0xa8] ss:$16 sps:$4 sm:$0xff]  }
 0x11d   : > { %1443 = vmatpush1.bf16.msra.mxu0 %v6832_v46  ;;  %1516 = vmatpush1.bf16.msra.mxu1 %v6834_v49  ;;  %v6890_v46 = vcombine.low %v587_v31, %v591_v33  ;;  %v8914_v49 = vld [vmem:[%s8683_s2 + $0x4] ss:$16 sps:$4 sm:$0xff]   ;;  %v9081_v22 = vld [vmem:[%s8689_s21 + $0x20] ss:$16 sps:$4 sm:$0xff]   ;;  %v9120_v33 = vld [vmem:[%s8689_s21 + $0x68] ss:$16 sps:$4 sm:$0xff]  }
 0x11e   : > { %1444 = vmatprep.subr.bf16.mxu0 %v6841_v50  ;;  %1517 = vmatprep.subr.bf16.mxu1 %v6843_v53  ;;  %v6896_v50 = vcombine.low %v594_v37, %v598_v38  ;;  %v8920_v53 = vld [vmem:[%s8683_s2] ss:$16 sps:$4 sm:$0xff]   ;;  %v9136_v38 = vld [vmem:[%s8689_s21 + $0x88] ss:$16 sps:$4 sm:$0xff]  }
 0x11f   : > { %v9115_v31 = vld [vmem:[%s8689_s21 + $0x60] ss:$16 sps:$4 sm:$0xff]  }
 0x120   : > { %v9131_v37 = vld [vmem:[%s8689_s21 + $0x80] ss:$16 sps:$4 sm:$0xff]  }
 0x121   : > { %1445 = vmatpush1.bf16.msra.mxu0 %v6840_v55  ;;  %1518 = vmatpush1.bf16.msra.mxu1 %v6842_v58  ;;  %v8923_v55 = vld [vmem:[%s8683_s2 + $0x8] ss:$16 sps:$4 sm:$0xff]   ;;  %v8934_v58 = vld [vmem:[%s8683_s2 + $0x20] ss:$16 sps:$4 sm:$0xff]  }
 0x122   : > { %1446 = vmatprep.subr.bf16.mxu0 %v6849_v59  ;;  %1519 = vmatprep.subr.bf16.mxu1 %v6851_v62  ;;  %v8938_v59 = vld [vmem:[%s8683_s2 + $0x28] ss:$16 sps:$4 sm:$0xff]   ;;  %v8953_v62 = vld [vmem:[%s8683_s2 + $0x40] ss:$16 sps:$4 sm:$0xff]  }
 0x123   : > { %v9147_v41 = vld [vmem:[%s8689_s21 + $0xa0] ss:$16 sps:$4 sm:$0xff]  }
 0x125   : > { %1447 = vmatpush1.bf16.msra.mxu0 %v6848_v63  ;;  %1520 = vmatpush1.bf16.msra.mxu1 %v6850_v2  ;;  %v8960_v63 = vld [vmem:[%s8683_s2 + $0x64] ss:$16 sps:$4 sm:$0xff]  }
 0x126   : > { %1448 = vmatprep.subr.bf16.mxu0 %v6857_v3  ;;  %1521 = vmatprep.subr.bf16.mxu1 %v6859_v6  ;;  %v8977_v2 = vld [vmem:[%s8683_s2 + $0x84] ss:$16 sps:$4 sm:$0xff]   ;;  %v8982_v3 = vld [vmem:[%s8683_s2 + $0x8c] ss:$16 sps:$4 sm:$0xff]  }
 0x127   : > { %v9000_v6 = vld [vmem:[%s8683_s2 + $0xac] ss:$16 sps:$4 sm:$0xff]  }
 0x129   : > { %1449 = vmatpush1.bf16.msra.mxu0 %v6856_v7  ;;  %1522 = vmatpush1.bf16.msra.mxu1 %v6858_v11  ;;  %v9006_v7 = vld [vmem:[%s8683_s2 + $0xa0] ss:$16 sps:$4 sm:$0xff]  }
 0x12a   : > { %1450 = vmatprep.subr.bf16.mxu0 %v6865_v12  ;;  %1523 = vmatprep.subr.bf16.mxu1 %v6867_v16  ;;  %v9025_v11 = vld [vmem:[%s8683_s2 + $0xc0] ss:$16 sps:$4 sm:$0xff]   ;;  %v9032_v12 = vld [vmem:[%s8683_s2 + $0xe4] ss:$16 sps:$4 sm:$0xff]  }
 0x12b   : > { %v9053_v16 = vld [vmem:[%s8689_s21 + $0x4] ss:$16 sps:$4 sm:$0xff]  }
 0x12d   : > { %1451 = vmatpush1.bf16.msra.mxu0 %v6864_v17  ;;  %1524 = vmatpush1.bf16.msra.mxu1 %v6866_v20  ;;  %v10710_v17 = vmov 0   ;;  %v9071_v20 = vld [vmem:[%s8689_s21 + $0x24] ss:$16 sps:$4 sm:$0xff]  }
 0x12e   : > { %1452 = vmatprep.subr.bf16.mxu0 %v6873_v21  ;;  %1525 = vmatprep.subr.bf16.mxu1 %v6875_v25  ;;  %v9075_v21 = vld [vmem:[%s8689_s21 + $0x2c] ss:$16 sps:$4 sm:$0xff]   ;;  %v9089_v25 = vld [vmem:[%s8689_s21 + $0x44] ss:$16 sps:$4 sm:$0xff]  }
 0x131   : > { %1453 = vmatpush1.bf16.msra.mxu0 %v6872_v26  ;;  %1526 = vmatpush1.bf16.msra.mxu1 %v6874_v29  ;;  %v9093_v26 = vld [vmem:[%s8689_s21 + $0x4c] ss:$16 sps:$4 sm:$0xff]   ;;  %v9107_v29 = vld [vmem:[%s8689_s21 + $0x64] ss:$16 sps:$4 sm:$0xff]  }
 0x132   : > { %1454 = vmatprep.subr.bf16.mxu0 %v6881_v30  ;;  %1527 = vmatprep.subr.bf16.mxu1 %v6883_v34  ;;  %v9111_v30 = vld [vmem:[%s8689_s21 + $0x6c] ss:$16 sps:$4 sm:$0xff]   ;;  %v9123_v34 = vld [vmem:[%s8689_s21 + $0x84] ss:$16 sps:$4 sm:$0xff]  }
 0x135   : > { %1455 = vmatpush1.bf16.msra.mxu0 %v6880_v35  ;;  %1528 = vmatpush1.bf16.msra.mxu1 %v6882_v39  ;;  %v9127_v35 = vld [vmem:[%s8689_s21 + $0x8c] ss:$16 sps:$4 sm:$0xff]   ;;  %v9139_v39 = vld [vmem:[%s8689_s21 + $0xa4] ss:$16 sps:$4 sm:$0xff]  }
 0x136   : > { %1456 = vmatprep.subr.bf16.mxu0 %v6889_v40  ;;  %1529 = vmatprep.subr.bf16.mxu1 %v6891_v44  ;;  %v9143_v40 = vld [vmem:[%s8689_s21 + $0xac] ss:$16 sps:$4 sm:$0xff]   ;;  %v9155_v44 = vld [vmem:[%s8689_s21 + $0xc4] ss:$16 sps:$4 sm:$0xff]  }
 0x139   : > { %1457 = vmatpush1.bf16.msra.mxu0 %v6888_v45  ;;  %1530 = vmatpush1.bf16.msra.mxu1 %v6890_v46  ;;  %v9159_v45 = vld [vmem:[%s8689_s21 + $0xcc] ss:$16 sps:$4 sm:$0xff]   ;;  %v9163_v46 = vld [vmem:[%s8689_s21 + $0xc0] ss:$16 sps:$4 sm:$0xff]  }
 0x13a   : > { %1458 = vmatprep.subr.bf16.mxu0 %v6897_v47  ;;  %1531 = vmatprep.subr.bf16.mxu1 %v6899_v48  ;;  %10755 = vst [vmem:[#allocation19_spill] sm:$0xff] %v9159_v45  ;;  %v9168_v47 = vld [vmem:[%s8689_s21 + $0xc8] ss:$16 sps:$4 sm:$0xff]   ;;  %v9171_v48 = vld [vmem:[%s8689_s21 + $0xe4] ss:$16 sps:$4 sm:$0xff]  }
 0x13d   : > { %1459 = vmatpush1.bf16.msra.mxu0 %v6896_v50  ;;  %1532 = vmatpush1.bf16.msra.mxu1 %v6898_v52  ;;  %v9175_v50 = vld [vmem:[%s8689_s21 + $0xec] ss:$16 sps:$4 sm:$0xff]   ;;  %v9179_v52 = vld [vmem:[%s8689_s21 + $0xe0] ss:$16 sps:$4 sm:$0xff]  }
 0x13e   : > { %1830 = vmatprep.subr.bf16.mxu0 %v8914_v49  ;;  %1871 = vmatprep.subr.bf16.mxu1 %v8917_v51 }
 0x140   : > { %1461 = vmatmul.mubr.bf16.vlgmr.msra.gmra.mrb[16].mxu0 %v8827_v32  ;;  %1534 = vmatmul.mubr.bf16.vlgmr.msra.gmra.mrb[16].mxu1 %v8827_v32  ;;  %v8957_v32 = vld [vmem:[%s8683_s2 + $0x48] ss:$16 sps:$4 sm:$0xff]  }
 0x141   : > { %1831 = vmatpush1.bf16.msra.mxu0 %v8920_v53  ;;  %1872 = vmatpush1.bf16.msra.mxu1 %v8923_v55 }
 0x142   : > { %1832 = vmatprep.subr.bf16.mxu0 %v8926_v56  ;;  %1873 = vmatprep.subr.bf16.mxu1 %v8929_v57 }
 0x143   : > { %1470 = vmatprep.mubr.bf16.mxu0 %v8832_v42  ;;  %1543 = vmatprep.mubr.bf16.mxu1 %v8832_v42  ;;  %v8974_v42 = vld [vmem:[%s8683_s2 + $0x68] ss:$16 sps:$4 sm:$0xff]  }
 0x145   : > { %1833 = vmatpush1.bf16.msra.mxu0 %v8934_v58  ;;  %1874 = vmatpush1.bf16.msra.mxu1 %v8938_v59 }
 0x146   : > { %1834 = vmatprep.subr.bf16.mxu0 %v8941_v60  ;;  %1875 = vmatprep.subr.bf16.mxu1 %v8946_v61 }
 0x148   : > { %1471 = vmatmul.mubr.bf16.gmra.mrb[20].mxu0 %v8842_v54  ;;  %1544 = vmatmul.mubr.bf16.gmra.mrb[20].mxu1 %v8842_v54  ;;  %v8993_v54 = vld [vmem:[%s8683_s2 + $0x88] ss:$16 sps:$4 sm:$0xff]  }
 0x149   : > { %1835 = vmatpush1.bf16.msra.mxu0 %v8953_v62  ;;  %1876 = vmatpush1.bf16.msra.mxu1 %v8957_v32 }
 0x14a   : > { %1836 = vmatprep.subr.bf16.mxu0 %v8960_v63  ;;  %1877 = vmatprep.subr.bf16.mxu1 %v8964_v10 }
 0x14b   : > { %1480 = vmatprep.mubr.bf16.mxu0 %v8848_v0  ;;  %1553 = vmatprep.mubr.bf16.mxu1 %v8848_v0  ;;  %v9010_v0 = vld [vmem:[%s8683_s2 + $0xa8] ss:$16 sps:$4 sm:$0xff]  }
 0x14d   : > { %1837 = vmatpush1.bf16.msra.mxu0 %v8970_v1  ;;  %1878 = vmatpush1.bf16.msra.mxu1 %v8974_v42 }
 0x14e   : > { %1838 = vmatprep.subr.bf16.mxu0 %v8977_v2  ;;  %1879 = vmatprep.subr.bf16.mxu1 %v8982_v3 }
 0x150   : > { %1481 = vmatmul.mubr.bf16.gmra.mrb[24].mxu0 %v8858_v13  ;;  %1554 = vmatmul.mubr.bf16.gmra.mrb[24].mxu1 %v8858_v13  ;;  %v9029_v13 = vld [vmem:[%s8683_s2 + $0xc8] ss:$16 sps:$4 sm:$0xff]  }
 0x151   : > { %1839 = vmatpush1.bf16.msra.mxu0 %v8989_v4  ;;  %1880 = vmatpush1.bf16.msra.mxu1 %v8993_v54 }
 0x152   : > { %1840 = vmatprep.subr.bf16.mxu0 %v8996_v5  ;;  %1881 = vmatprep.subr.bf16.mxu1 %v9000_v6 }
 0x153   : > { %1490 = vmatprep.mubr.bf16.mxu0 %v8864_v23  ;;  %1563 = vmatprep.mubr.bf16.mxu1 %v8864_v23  ;;  %v9045_v23 = vld [vmem:[%s8683_s2 + $0xe0] ss:$16 sps:$4 sm:$0xff]  }
 0x155   : > { %1841 = vmatpush1.bf16.msra.mxu0 %v9006_v7  ;;  %1882 = vmatpush1.bf16.msra.mxu1 %v9010_v0 }
 0x156   : > { %1842 = vmatprep.subr.bf16.mxu0 %v9013_v8  ;;  %1883 = vmatprep.subr.bf16.mxu1 %v9018_v9 }
 0x158   : > { %1491 = vmatmul.mubr.bf16.gmra.mrb[28].mxu0 %v8874_v36  ;;  %1564 = vmatmul.mubr.bf16.gmra.mrb[28].mxu1 %v8874_v36  ;;  %v9058_v36 = vld [vmem:[%s8689_s21 + $0xc] ss:$16 sps:$4 sm:$0xff]  }
 0x159   : > { %1843 = vmatpush1.bf16.msra.mxu0 %v9025_v11  ;;  %1884 = vmatpush1.bf16.msra.mxu1 %v9029_v13 }
 0x15a   : > { %1844 = vmatprep.subr.bf16.mxu0 %v9032_v12  ;;  %1885 = vmatprep.subr.bf16.mxu1 %v9036_v14 }
 0x15b   : > { %1862 = vmatprep.mubr.bf16.mxu0 %v10710_v17  ;;  %1903 = vmatprep.mubr.bf16.mxu1 %v10710_v17 }
 0x15d   : > { %1845 = vmatpush1.bf16.msra.mxu0 %v9045_v23  ;;  %1886 = vmatpush1.bf16.msra.mxu1 %v9050_v15 }
 0x15e   : > { %2104 = vmatprep.subr.bf16.mxu0 %v9053_v16  ;;  %2145 = vmatprep.subr.bf16.mxu1 %v9058_v36 }
 0x160   : > { %1863 = vmatmul.mubr.bf16.vlgmr.msra.gmra.mrb[32].mxu0 %v10710_v17  ;;  %1904 = vmatmul.mubr.bf16.vlgmr.msra.gmra.mrb[32].mxu1 %v10710_v17 }
 0x161   : > { %2105 = vmatpush1.bf16.msra.mxu0 %v9063_v18  ;;  %2146 = vmatpush1.bf16.msra.mxu1 %v9068_v19 }
 0x162   : > { %2106 = vmatprep.subr.bf16.mxu0 %v9071_v20  ;;  %2147 = vmatprep.subr.bf16.mxu1 %v9075_v21 }
 0x163   : > { %2136 = vmatprep.mubr.bf16.mxu0 %v10710_v17  ;;  %2177 = vmatprep.mubr.bf16.mxu1 %v10710_v17  ;;  %v9184_v17 = vld [vmem:[%s8689_s21 + $0xe8] ss:$16 sps:$4 sm:$0xff]  }
 0x165   : > { %2107 = vmatpush1.bf16.msra.mxu0 %v9081_v22  ;;  %2148 = vmatpush1.bf16.msra.mxu1 %v9086_v24 }
 0x166   : > { %2108 = vmatprep.subr.bf16.mxu0 %v9089_v25  ;;  %2149 = vmatprep.subr.bf16.mxu1 %v9093_v26 }
 0x169   : > { %2109 = vmatpush1.bf16.msra.mxu0 %v9099_v27  ;;  %2150 = vmatpush1.bf16.msra.mxu1 %v9104_v28 }
 0x16a   : > { %2110 = vmatprep.subr.bf16.mxu0 %v9107_v29  ;;  %2151 = vmatprep.subr.bf16.mxu1 %v9111_v30 }
 0x16d   : > { %2111 = vmatpush1.bf16.msra.mxu0 %v9115_v31  ;;  %2152 = vmatpush1.bf16.msra.mxu1 %v9120_v33 }
 0x16e   : > { %2112 = vmatprep.subr.bf16.mxu0 %v9123_v34  ;;  %2153 = vmatprep.subr.bf16.mxu1 %v9127_v35 }
 0x171   : > { %2113 = vmatpush1.bf16.msra.mxu0 %v9131_v37  ;;  %2154 = vmatpush1.bf16.msra.mxu1 %v9136_v38 }
 0x172   : > { %2114 = vmatprep.subr.bf16.mxu0 %v9139_v39  ;;  %2155 = vmatprep.subr.bf16.mxu1 %v9143_v40 }
 0x175   : > { %2115 = vmatpush1.bf16.msra.mxu0 %v9147_v41  ;;  %2156 = vmatpush1.bf16.msra.mxu1 %v9152_v43 }
 0x176   : > { %2116 = vmatprep.subr.bf16.mxu0 %v9155_v44  ;;  %2157 = vmatprep.subr.bf16.mxu1 %v9159_v45  ;;  %v10756_v45 = vmov 0  }
 0x179   : > { %2117 = vmatpush1.bf16.msra.mxu0 %v9163_v46  ;;  %2158 = vmatpush1.bf16.msra.mxu1 %v9168_v47 }
 0x17a   : > { %2118 = vmatprep.subr.bf16.mxu0 %v9171_v48  ;;  %2159 = vmatprep.subr.bf16.mxu1 %v9175_v50 }
 0x17d   : > { %2119 = vmatpush1.bf16.msra.mxu0 %v9179_v52  ;;  %2160 = vmatpush1.bf16.msra.mxu1 %v9184_v17 }
 0x17e   : > { %2439 = vmatprep.subr.bf16.mxu0 %v8914_v49  ;;  %2480 = vmatprep.subr.bf16.mxu1 %v8917_v51  ;;  %v602_v49 = vlaneseq }
 0x180   : > { %2137 = vmatmul.mubr.bf16.vlgmr.msra.gmra.mrb[36].mxu0 %v10756_v45  ;;  %2178 = vmatmul.mubr.bf16.vlgmr.msra.gmra.mrb[36].mxu1 %v10756_v45  ;;  %v9227_v51 = vshrl.u32 %v602_v49, 7 }
 0x181   : > { %2440 = vmatpush1.bf16.msra.mxu0 %v8920_v53  ;;  %2481 = vmatpush1.bf16.msra.mxu1 %v8923_v55  ;;  %v9231_v55 = vld [vmem:[%s8691_s29] sm:$0xff] }
 0x182   : > { %2441 = vmatprep.subr.bf16.mxu0 %v8926_v56  ;;  %2482 = vmatprep.subr.bf16.mxu1 %v8929_v57  ;;  %v604_v53 = vsub.s32 0, %v9227_v51  ;;  %v612_v56 = vsub.s32 2, %v9227_v51  ;;  %v616_v57 = vsub.s32 3, %v9227_v51 }
 0x183   : > { %2471 = vmatprep.mubr.bf16.mxu0 %v10756_v45  ;;  %2512 = vmatprep.mubr.bf16.mxu1 %v10756_v45 }
 0x185   : > { %2442 = vmatpush1.bf16.msra.mxu0 %v8934_v58  ;;  %2483 = vmatpush1.bf16.msra.mxu1 %v8938_v59  ;;  %v608_v58 = vsub.s32 1, %v9227_v51  ;;  %v9237_v59 = vrot.slane %v9231_v55, %v604_v53 }
 0x186   : > { %2443 = vmatprep.subr.bf16.mxu0 %v8941_v60  ;;  %2484 = vmatprep.subr.bf16.mxu1 %v8946_v61  ;;  %v9242_v61 = vrot.slane %v9231_v55, %v612_v56 }
 0x189   : > { %2444 = vmatpush1.bf16.msra.mxu0 %v8953_v62  ;;  %2485 = vmatpush1.bf16.msra.mxu1 %v8957_v32 }
 0x18a   : > { %2445 = vmatprep.subr.bf16.mxu0 %v8960_v63  ;;  %2486 = vmatprep.subr.bf16.mxu1 %v8964_v10  ;;  %v9249_v63 = vrot.slane %v9231_v55, %v616_v57  ;;  %v9252_v10 = vrot.slane %v9231_v55, %v608_v58 }
 0x18d   : > { %2446 = vmatpush1.bf16.msra.mxu0 %v8970_v1  ;;  %2487 = vmatpush1.bf16.msra.mxu1 %v8974_v42 }
 0x18e   : > { %2447 = vmatprep.subr.bf16.mxu0 %v8977_v2  ;;  %2488 = vmatprep.subr.bf16.mxu1 %v8982_v3 }
 0x191   : > { %2448 = vmatpush1.bf16.msra.mxu0 %v8989_v4  ;;  %2489 = vmatpush1.bf16.msra.mxu1 %v8993_v54 }
 0x192   : > { %2449 = vmatprep.subr.bf16.mxu0 %v8996_v5  ;;  %2490 = vmatprep.subr.bf16.mxu1 %v9000_v6 }
 0x195   : > { %2450 = vmatpush1.bf16.msra.mxu0 %v9006_v7  ;;  %2491 = vmatpush1.bf16.msra.mxu1 %v9010_v0 }
 0x196   : > { %2451 = vmatprep.subr.bf16.mxu0 %v9013_v8  ;;  %2492 = vmatprep.subr.bf16.mxu1 %v9018_v9 }
 0x199   : > { %2452 = vmatpush1.bf16.msra.mxu0 %v9025_v11  ;;  %2493 = vmatpush1.bf16.msra.mxu1 %v9029_v13 }
 0x19a   : > { %2453 = vmatprep.subr.bf16.mxu0 %v9032_v12  ;;  %2494 = vmatprep.subr.bf16.mxu1 %v9036_v14 }
 0x19d   : > { %2454 = vmatpush1.bf16.msra.mxu0 %v9045_v23  ;;  %2495 = vmatpush1.bf16.msra.mxu1 %v9050_v15 }
 0x19e   : > { %2714 = vmatprep.subr.bf16.mxu0 %v9053_v16  ;;  %2755 = vmatprep.subr.bf16.mxu1 %v9058_v36 }
 0x1d3   : > { %v9239_v60 = vpop.f32.mrb[0].mxu0  ;;  %v9246_v32 = vpop.f32.mrb[0].mxu1 }
 0x1d4   : > { %v9244_v62 = vpop.f32.mrb[1].mxu0  ;;  %v9254_v42 = vpop.f32.mrb[1].mxu1 }
 0x1d5   : > { %v1320_v1 = vpop.f32.mrb[2].mxu0  ;;  %v1393_v4 = vpop.f32.mrb[2].mxu1 }
 0x1d6   : > { %v9257_v2 = vadd.f32 %v1320_v1, %v9237_v59  ;;  %v1322_v3 = vpop.f32.mrb[3].mxu0  ;;  %v9263_v5 = vadd.f32 %v1393_v4, %v9242_v61  ;;  %v1395_v6 = vpop.f32.mrb[3].mxu1 }
 0x1d7   : > { %v9260_v54 = vadd.f32 %v1322_v3, %v9252_v10  ;;  %v9266_v7 = vadd.f32 %v1395_v6, %v9249_v63 }
 0x1d9   : > { %10757 = vst [vmem:[#allocation20_spill] sm:$0xff] %v9260_v54  ;;  %10758 = vst [vmem:[#allocation21_spill] sm:$0xff] %v9266_v7 }
 0x1db   : > { %v1326_v0 = vpop.f32.mrb[4].mxu0  ;;  %v1399_v11 = vpop.f32.mrb[4].mxu1 }
 0x1dc   : > { %v9269_v8 = vadd.f32 %v1326_v0, %v9237_v59  ;;  %v1328_v9 = vpop.f32.mrb[5].mxu0  ;;  %v9275_v14 = vadd.f32 %v1399_v11, %v9242_v61  ;;  %v1401_v23 = vpop.f32.mrb[5].mxu1 }
 0x1dd   : > { %v9272_v13 = vadd.f32 %v1328_v9, %v9252_v10  ;;  %v1330_v12 = vpop.f32.mrb[6].mxu0  ;;  %v9281_v36 = vadd.f32 %v1401_v23, %v9249_v63  ;;  %v1403_v49 = vpop.f32.mrb[6].mxu1 }
 0x1de   : > { %10759 = vst [vmem:[#allocation22_spill] sm:$0xff] %v9269_v8  ;;  %10761 = vst [vmem:[#allocation24_spill] sm:$0xff] %v9275_v14  ;;  %v9278_v15 = vadd.f32 %v1330_v12, %v9237_v59  ;;  %v1332_v16 = vpop.f32.mrb[7].mxu0  ;;  %v9287_v56 = vadd.f32 %v1403_v49, %v9242_v61  ;;  %v1405_v57 = vpop.f32.mrb[7].mxu1 }
 0x1df   : > { %10760 = vst [vmem:[#allocation23_spill] sm:$0xff] %v9272_v13  ;;  %10763 = vst [vmem:[#allocation26_spill] sm:$0xff] %v9281_v36  ;;  %v9284_v53 = vadd.f32 %v1332_v16, %v9252_v10  ;;  %v9290_v58 = vadd.f32 %v1405_v57, %v9249_v63 }
 0x1e0   : > { %10762 = vst [vmem:[#allocation25_spill] sm:$0xff] %v9278_v15  ;;  %10765 = vst [vmem:[#allocation28_spill] sm:$0xff] %v9287_v56 }
 0x1e1   : > { %10764 = vst [vmem:[#allocation27_spill] sm:$0xff] %v9284_v53  ;;  %10766 = vst [vmem:[#allocation29_spill] sm:$0xff] %v9290_v58 }
 0x1e3   : > { %v1336_v1 = vpop.f32.mrb[8].mxu0  ;;  %v1409_v6 = vpop.f32.mrb[8].mxu1 }
 0x1e4   : > { %v9293_v3 = vadd.f32 %v1336_v1, %v9237_v59  ;;  %v1338_v4 = vpop.f32.mrb[9].mxu0  ;;  %v9299_v11 = vadd.f32 %v1409_v6, %v9242_v61  ;;  %v1411_v12 = vpop.f32.mrb[9].mxu1 }
 0x1e5   : > { %v9296_v0 = vadd.f32 %v1338_v4, %v9252_v10  ;;  %v1340_v9 = vpop.f32.mrb[10].mxu0  ;;  %v9305_v49 = vadd.f32 %v1411_v12, %v9249_v63  ;;  %v1413_v57 = vpop.f32.mrb[10].mxu1 }
 0x1e6   : > { %10767 = vst [vmem:[#allocation30_spill] sm:$0xff] %v9293_v3  ;;  %10769 = vst [vmem:[#allocation32_spill] sm:$0xff] %v9299_v11  ;;  %v9302_v23 = vadd.f32 %v1340_v9, %v9237_v59  ;;  %v1342_v16 = vpop.f32.mrb[11].mxu0  ;;  %v9311_v3 = vadd.f32 %v1413_v57, %v9242_v61  ;;  %v1415_v4 = vpop.f32.mrb[11].mxu1 }
 0x1e7   : > { %10768 = vst [vmem:[#allocation31_spill] sm:$0xff] %v9296_v0  ;;  %10771 = vst [vmem:[#allocation34_spill] sm:$0xff] %v9305_v49  ;;  %v9308_v1 = vadd.f32 %v1342_v16, %v9252_v10  ;;  %v9314_v0 = vadd.f32 %v1415_v4, %v9249_v63 }
 0x1e8   : > { %10770 = vst [vmem:[#allocation33_spill] sm:$0xff] %v9302_v23  ;;  %10773 = vst [vmem:[#allocation36_spill] sm:$0xff] %v9311_v3 }
 0x1e9   : > { %10772 = vst [vmem:[#allocation35_spill] sm:$0xff] %v9308_v1  ;;  %10774 = vst [vmem:[#allocation37_spill] sm:$0xff] %v9314_v0 }
 0x1eb   : > { %v1346_v6 = vpop.f32.mrb[12].mxu0  ;;  %v1419_v23 = vpop.f32.mrb[12].mxu1 }
 0x1ec   : > { %v9317_v11 = vadd.f32 %v1346_v6, %v9237_v59  ;;  %v1348_v9 = vpop.f32.mrb[13].mxu0  ;;  %v9323_v16 = vadd.f32 %v1419_v23, %v9242_v61  ;;  %v1421_v1 = vpop.f32.mrb[13].mxu1  ;;  %v620_v23 = vsub.s32 4, %v9227_v51 }
 0x1ed   : > { %v9320_v12 = vadd.f32 %v1348_v9, %v9252_v10  ;;  %v1350_v49 = vpop.f32.mrb[14].mxu0  ;;  %v9329_v4 = vadd.f32 %v1421_v1, %v9249_v63  ;;  %v1423_v0 = vpop.f32.mrb[14].mxu1  ;;  %v632_v1 = vsub.s32 7, %v9227_v51 }
 0x1ee   : > { %10775 = vst [vmem:[#allocation38_spill] sm:$0xff] %v9317_v11  ;;  %10777 = vst [vmem:[#allocation40_spill] sm:$0xff] %v9323_v16  ;;  %v9326_v57 = vadd.f32 %v1350_v49, %v9237_v59  ;;  %v1352_v3 = vpop.f32.mrb[15].mxu0  ;;  %v9335_v11 = vadd.f32 %v1423_v0, %v9242_v61  ;;  %v1425_v9 = vpop.f32.mrb[15].mxu1  ;;  %v624_v49 = vsub.s32 5, %v9227_v51 }
 0x1ef   : > { %10776 = vst [vmem:[#allocation39_spill] sm:$0xff] %v9320_v12  ;;  %10779 = vst [vmem:[#allocation42_spill] sm:$0xff] %v9329_v4  ;;  %v9332_v6 = vadd.f32 %v1352_v3, %v9252_v10  ;;  %v9338_v12 = vadd.f32 %v1425_v9, %v9249_v63  ;;  %v9345_v4 = vrot.slane %v9231_v55, %v620_v23 }
 0x1f0   : > { %10778 = vst [vmem:[#allocation41_spill] sm:$0xff] %v9326_v57  ;;  %10781 = vst [vmem:[#allocation44_spill] sm:$0xff] %v9335_v11  ;;  %v628_v57 = vsub.s32 6, %v9227_v51  ;;  %v9348_v3 = vrot.slane %v9231_v55, %v624_v49  ;;  %v9354_v9 = vrot.slane %v9231_v55, %v632_v1 }
 0x1f1   : > { %10780 = vst [vmem:[#allocation43_spill] sm:$0xff] %v9332_v6  ;;  %10782 = vst [vmem:[#allocation45_spill] sm:$0xff] %v9338_v12 }
 0x1f2   : > { %v9351_v0 = vrot.slane %v9231_v55, %v628_v57 }
 0x213   : > { %v1462_v12 = vpop.f32.mrb[16].mxu0  ;;  %v1535_v16 = vpop.f32.mrb[16].mxu1 }
 0x214   : > { %v9357_v6 = vadd.f32 %v1462_v12, %v9345_v4  ;;  %v1464_v11 = vpop.f32.mrb[17].mxu0  ;;  %v9363_v58 = vadd.f32 %v1535_v16, %v9351_v0  ;;  %v1537_v49 = vpop.f32.mrb[17].mxu1 }
 0x215   : > { %v9360_v51 = vadd.f32 %v1464_v11, %v9348_v3  ;;  %v1466_v23 = vpop.f32.mrb[18].mxu0  ;;  %v9369_v55 = vadd.f32 %v1537_v49, %v9354_v9  ;;  %v1539_v1 = vpop.f32.mrb[18].mxu1 }
 0x216   : > { %10783 = vst [vmem:[#allocation46_spill] sm:$0xff] %v9357_v6  ;;  %10785 = vst [vmem:[#allocation48_spill] sm:$0xff] %v9363_v58  ;;  %v9366_v57 = vadd.f32 %v1466_v23, %v9345_v4  ;;  %v1468_v53 = vpop.f32.mrb[19].mxu0  ;;  %v9375_v6 = vadd.f32 %v1539_v1, %v9351_v0  ;;  %v1541_v11 = vpop.f32.mrb[19].mxu1 }
 0x217   : > { %10784 = vst [vmem:[#allocation47_spill] sm:$0xff] %v9360_v51  ;;  %10787 = vst [vmem:[#allocation50_spill] sm:$0xff] %v9369_v55  ;;  %v9372_v12 = vadd.f32 %v1468_v53, %v9348_v3  ;;  %v9378_v51 = vadd.f32 %v1541_v11, %v9354_v9 }
 0x218   : > { %10786 = vst [vmem:[#allocation49_spill] sm:$0xff] %v9366_v57  ;;  %10789 = vst [vmem:[#allocation52_spill] sm:$0xff] %v9375_v6 }
 0x219   : > { %10788 = vst [vmem:[#allocation51_spill] sm:$0xff] %v9372_v12  ;;  %10790 = vst [vmem:[#allocation53_spill] sm:$0xff] %v9378_v51 }
 0x21b   : > { %v1472_v16 = vpop.f32.mrb[20].mxu0  ;;  %v1545_v57 = vpop.f32.mrb[20].mxu1 }
 0x21c   : > { %v9381_v58 = vadd.f32 %v1472_v16, %v9345_v4  ;;  %v1474_v23 = vpop.f32.mrb[21].mxu0  ;;  %v9387_v53 = vadd.f32 %v1545_v57, %v9351_v0  ;;  %v1547_v12 = vpop.f32.mrb[21].mxu1 }
 0x21d   : > { %v9384_v49 = vadd.f32 %v1474_v23, %v9348_v3  ;;  %v1476_v55 = vpop.f32.mrb[22].mxu0  ;;  %v9393_v11 = vadd.f32 %v1547_v12, %v9354_v9  ;;  %v1549_v51 = vpop.f32.mrb[22].mxu1 }
 0x21e   : > { %10791 = vst [vmem:[#allocation54_spill] sm:$0xff] %v9381_v58  ;;  %10793 = vst [vmem:[#allocation56_spill] sm:$0xff] %v9387_v53  ;;  %v9390_v1 = vadd.f32 %v1476_v55, %v9345_v4  ;;  %v1478_v6 = vpop.f32.mrb[23].mxu0  ;;  %v9399_v58 = vadd.f32 %v1549_v51, %v9351_v0  ;;  %v1551_v23 = vpop.f32.mrb[23].mxu1 }
 0x21f   : > { %10792 = vst [vmem:[#allocation55_spill] sm:$0xff] %v9384_v49  ;;  %10795 = vst [vmem:[#allocation58_spill] sm:$0xff] %v9393_v11  ;;  %v9396_v16 = vadd.f32 %v1478_v6, %v9348_v3  ;;  %v9402_v49 = vadd.f32 %v1551_v23, %v9354_v9 }
 0x220   : > { %10794 = vst [vmem:[#allocation57_spill] sm:$0xff] %v9390_v1  ;;  %10797 = vst [vmem:[#allocation60_spill] sm:$0xff] %v9399_v58 }
 0x221   : > { %10796 = vst [vmem:[#allocation59_spill] sm:$0xff] %v9396_v16  ;;  %10798 = vst [vmem:[#allocation61_spill] sm:$0xff] %v9402_v49 }
 0x223   : > { %v1482_v57 = vpop.f32.mrb[24].mxu0  ;;  %v1555_v1 = vpop.f32.mrb[24].mxu1 }
 0x224   : > { %v9405_v53 = vadd.f32 %v1482_v57, %v9345_v4  ;;  %v1484_v55 = vpop.f32.mrb[25].mxu0  ;;  %v9411_v6 = vadd.f32 %v1555_v1, %v9351_v0  ;;  %v1557_v16 = vpop.f32.mrb[25].mxu1 }
 0x225   : > { %v9408_v12 = vadd.f32 %v1484_v55, %v9348_v3  ;;  %v1486_v11 = vpop.f32.mrb[26].mxu0  ;;  %v9417_v23 = vadd.f32 %v1557_v16, %v9354_v9  ;;  %v1559_v49 = vpop.f32.mrb[26].mxu1 }
 0x226   : > { %10799 = vst [vmem:[#allocation62_spill] sm:$0xff] %v9405_v53  ;;  %10801 = vst [vmem:[#allocation64_spill] sm:$0xff] %v9411_v6  ;;  %v9414_v51 = vadd.f32 %v1486_v11, %v9345_v4  ;;  %v1488_v58 = vpop.f32.mrb[27].mxu0  ;;  %v9423_v53 = vadd.f32 %v1559_v49, %v9351_v0  ;;  %v1561_v55 = vpop.f32.mrb[27].mxu1 }
 0x227   : > { %10800 = vst [vmem:[#allocation63_spill] sm:$0xff] %v9408_v12  ;;  %10803 = vst [vmem:[#allocation66_spill] sm:$0xff] %v9417_v23  ;;  %v9420_v57 = vadd.f32 %v1488_v58, %v9348_v3  ;;  %v9426_v12 = vadd.f32 %v1561_v55, %v9354_v9 }
 0x228   : > { %10802 = vst [vmem:[#allocation65_spill] sm:$0xff] %v9414_v51  ;;  %10805 = vst [vmem:[#allocation68_spill] sm:$0xff] %v9423_v53  ;;  %v1319_v53 = vadd.f32 %v9244_v62, %v9252_v10 }
 0x229   : > { %10804 = vst [vmem:[#allocation67_spill] sm:$0xff] %v9420_v57  ;;  %10806 = vst [vmem:[#allocation69_spill] sm:$0xff] %v9426_v12 }
 0x22b   : > { %v1492_v1 = vpop.f32.mrb[28].mxu0  ;;  %v1565_v56 = vpop.f32.mrb[28].mxu1 }
 0x22c   : > { %v9429_v6 = vadd.f32 %v1492_v1, %v9345_v4  ;;  %v1494_v11 = vpop.f32.mrb[29].mxu0  ;;  %v9435_v58 = vadd.f32 %v1565_v56, %v9351_v0  ;;  %v1567_v15 = vpop.f32.mrb[29].mxu1  ;;  %v1317_v1 = vadd.f32 %v9239_v60, %v9237_v59  ;;  %v1392_v56 = vadd.f32 %v9254_v42, %v9249_v63 }
 0x22d   : > { %v9432_v16 = vadd.f32 %v1494_v11, %v9348_v3  ;;  %v1496_v23 = vpop.f32.mrb[30].mxu0  ;;  %v9438_v57 = vadd.f32 %v1567_v15, %v9354_v9  ;;  %v1569_v55 = vpop.f32.mrb[30].mxu1  ;;  %v1390_v11 = vadd.f32 %v9246_v32, %v9242_v61 }
 0x22e   : > { %10807 = vst [vmem:[#allocation70_spill] sm:$0xff] %v9429_v6  ;;  %10809 = vst [vmem:[#allocation72_spill] sm:$0xff] %v9435_v58  ;;  %v1498_v49 = vpop.f32.mrb[31].mxu0  ;;  %v1571_v12 = vpop.f32.mrb[31].mxu1 }
 0x22f   : > { %10808 = vst [vmem:[#allocation71_spill] sm:$0xff] %v9432_v16  ;;  %10810 = vst [vmem:[#allocation73_spill] sm:$0xff] %v9438_v57 }
 0x233   : > { %v1864_v51 = vpop.f32.mrb[32].mxu0  ;;  %v1905_v13 = vpop.f32.mrb[32].mxu1 }
 0x234   : > { %v2190_v36 = vadd.f32 %v1864_v51, %v1317_v1  ;;  %v1866_v14 = vpop.f32.mrb[33].mxu0  ;;  %v2192_v15 = vadd.f32 %v1905_v13, %v1390_v11  ;;  %v1907_v57 = vpop.f32.mrb[33].mxu1  ;;  %v1572_v11 = vadd.f32 %v1571_v12, %v9354_v9 }
 0x235   : > { %v2191_v8 = vadd.f32 %v1866_v14, %v1319_v53  ;;  %v1868_v16 = vpop.f32.mrb[34].mxu0  ;;  %v2193_v6 = vadd.f32 %v1907_v57, %v1392_v56  ;;  %v1909_v60 = vpop.f32.mrb[34].mxu1 }
 0x236   : > { %v2194_v58 = vsub.f32 0.0, %v2190_v36  ;;  %v1869_v59 = vpop.f32.mrb[35].mxu0  ;;  %v1910_v62 = vpop.f32.mrb[35].mxu1 }
 0x237   : > { %v2199_v7 = vsub.f32 0.0, %v2191_v8  ;;  %v2205_v61 = vsub.f32 0.0, %v2193_v6  ;;  %v1497_v8 = vadd.f32 %v1496_v23, %v9345_v4  ;;  %v1570_v6 = vadd.f32 %v1569_v55, %v9351_v0 }
 0x238   : > { %v2195_v10 = vmul.f32 1.442695, %v2194_v58 }
 0x239   : > { %v2200_v54 = vmul.f32 1.442695, %v2199_v7  ;;  %v2206_v32 = vmul.f32 1.442695, %v2205_v61 }
 0x23a   : > { %7941 = vpow2.f32 %v2195_v10 }
 0x23b   : > { %7943 = vpow2.f32 %v2200_v54  ;;  %v1499_v54 = vadd.f32 %v1498_v49, %v9348_v3 }
 0x23c   : > { %7945 = vpow2.f32 %v2206_v32 }
 0x23d   : > { %7947 = vtanh.f32 %v2192_v15 }
 0x244   : > { %v7942_v63 = vpop.eup %7941 }
 0x245   : > { %v7944_v42 = vpop.eup %7943  ;;  %v2197_v51 = vadd.f32 1.0, %v7942_v63 }
 0x246   : > { %v2202_v13 = vadd.f32 1.0, %v7944_v42  ;;  %v7946_v14 = vpop.eup %7945 }
 0x247   : > { %7949 = vrcp.f32 %v2197_v51  ;;  %v7948_v36 = vpop.eup %7947  ;;  %v2208_v7 = vadd.f32 1.0, %v7946_v14 }
 0x248   : > { %7951 = vrcp.f32 %v2202_v13 }
 0x249   : > { %7953 = vrcp.f32 %v2208_v7 }
 0x251   : > { %v7950_v53 = vpop.eup %7949 }
 0x252   : > { %v7952_v57 = vpop.eup %7951  ;;  %v2211_v16 = vmul.f32 %v7950_v53, %v7948_v36 }
 0x253   : > { %v2210_v58 = vmul.f32 0.0, %v7952_v57  ;;  %v2138_v1 = vpop.f32.mrb[36].mxu0  ;;  %v2179_v15 = vpop.f32.mrb[36].mxu1 }
 0x254   : > { %v2219_v56 = vadd.f32 %v2138_v1, %v1497_v8  ;;  %v2140_v59 = vpop.f32.mrb[37].mxu0  ;;  %v2221_v62 = vadd.f32 %v2179_v15, %v1570_v6  ;;  %v2181_v61 = vpop.f32.mrb[37].mxu1  ;;  %v9563_v6 = vld [vmem:[%s8683_s2 + $0x80] ss:$16 sps:$4 sm:$0xff]   ;;  %v9573_v1 = vld [vmem:[%s8683_s2 + $0xa4] ss:$16 sps:$4 sm:$0xff]  }
 0x255   : > { %v9452_v60 = vadd.f32 %v2211_v16, %v2210_v58  ;;  %v2220_v10 = vadd.f32 %v2140_v59, %v1499_v54  ;;  %v2142_v32 = vpop.f32.mrb[38].mxu0  ;;  %v2222_v23 = vadd.f32 %v2181_v61, %v1572_v11  ;;  %v2183_v3 = vpop.f32.mrb[38].mxu1  ;;  %v9566_v58 = vld [vmem:[%s8683_s2 + $0x88] ss:$16 sps:$4 sm:$0xff]   ;;  %v9576_v11 = vld [vmem:[%s8683_s2 + $0xac] ss:$16 sps:$4 sm:$0xff]  }
 0x256   : > { %v2223_v4 = vsub.f32 0.0, %v2219_v56  ;;  %v2143_v63 = vpop.f32.mrb[39].mxu0  ;;  %v2184_v49 = vpop.f32.mrb[39].mxu1  ;;  %v9579_v56 = vld [vmem:[%s8683_s2 + $0xa0] ss:$16 sps:$4 sm:$0xff]  }
 0x257   : > { %7955 = vtanh.f32 %v9452_v60  ;;  %v2228_v0 = vsub.f32 0.0, %v2220_v10  ;;  %v2234_v12 = vsub.f32 0.0, %v2222_v23  ;;  %v7954_v42 = vpop.eup %7953  ;;  %v9582_v15 = vld [vmem:[%s8683_s2 + $0xa8] ss:$16 sps:$4 sm:$0xff]   ;;  %v9589_v59 = vld [vmem:[%s8683_s2 + $0xc4] ss:$16 sps:$4 sm:$0xff]  }
 0x258   : > { %v2224_v55 = vmul.f32 1.442695, %v2223_v4  ;;  %v9595_v10 = vld [vmem:[%s8683_s2 + $0xc0] ss:$16 sps:$4 sm:$0xff]   ;;  %v9598_v61 = vld [vmem:[%s8683_s2 + $0xc8] ss:$16 sps:$4 sm:$0xff]  }
 0x259   : > { %v2229_v9 = vmul.f32 1.442695, %v2228_v0  ;;  %v2235_v13 = vmul.f32 1.442695, %v2234_v12  ;;  %v9605_v32 = vld [vmem:[%s8683_s2 + $0xe4] ss:$16 sps:$4 sm:$0xff]  }
 0x25a   : > { %7957 = vpow2.f32 %v2224_v55  ;;  %v9608_v4 = vld [vmem:[%s8683_s2 + $0xec] ss:$16 sps:$4 sm:$0xff]   ;;  %v9611_v23 = vld [vmem:[%s8683_s2 + $0xe0] ss:$16 sps:$4 sm:$0xff]   ;;  %v9614_v63 = vld [vmem:[%s8683_s2 + $0xe8] ss:$16 sps:$4 sm:$0xff]  }
 0x25b   : > { %7959 = vpow2.f32 %v2229_v9  ;;  %v9621_v3 = vld [vmem:[%s8689_s21 + $0x4] ss:$16 sps:$4 sm:$0xff]   ;;  %v9624_v0 = vld [vmem:[%s8689_s21 + $0xc] ss:$16 sps:$4 sm:$0xff]  }
 0x25c   : > { %7961 = vpow2.f32 %v2235_v13  ;;  %v10812_v13 = vld [vmem:[#allocation20_spill] sm:$0xff] }
 0x25d   : > { %7963 = vtanh.f32 %v2221_v62  ;;  %v9592_v62 = vld [vmem:[%s8683_s2 + $0xcc] ss:$16 sps:$4 sm:$0xff]  }
 0x261   : > { %v7956_v51 = vpop.eup %7955 }
 0x262   : > { %v2214_v14 = vmul.f32 %v7956_v51, %v7954_v42 }
 0x264   : > { %v7958_v36 = vpop.eup %7957  ;;  %2244 = vst [vmem:[#allocation2] sm:$0xff] %v2214_v14  ;;  %v2246_v53 = vpack.c.bf16 %v2214_v14, %v2214_v14 }
 0x265   : > { %v7960_v57 = vpop.eup %7959  ;;  %v2226_v8 = vadd.f32 1.0, %v7958_v36  ;;  %v10813_v36 = vld [vmem:[#allocation21_spill] sm:$0xff] }
 0x266   : > { %v2231_v16 = vadd.f32 1.0, %v7960_v57  ;;  %2472 = vmatmul.mubr.bf16.vlgmr.msra.gmra.mrb[40].mxu0 %v2246_v53  ;;  %2513 = vmatmul.mubr.bf16.vlgmr.msra.gmra.mrb[40].mxu1 %v2246_v53 }
 0x267   : > { %7965 = vrcp.f32 %v2226_v8  ;;  %2715 = vmatpush1.bf16.msra.mxu0 %v9063_v18  ;;  %2756 = vmatpush1.bf16.msra.mxu1 %v9068_v19  ;;  %v7962_v18 = vpop.eup %7961 }
 0x268   : > { %7967 = vrcp.f32 %v2231_v16  ;;  %2716 = vmatprep.subr.bf16.mxu0 %v9071_v20  ;;  %2757 = vmatprep.subr.bf16.mxu1 %v9075_v21  ;;  %v7964_v19 = vpop.eup %7963 }
 0x269   : > { %2746 = vmatprep.mubr.bf16.mxu0 %v10756_v45  ;;  %2787 = vmatprep.mubr.bf16.mxu1 %v10756_v45 }
 0x26b   : > { %2717 = vmatpush1.bf16.msra.mxu0 %v9081_v22  ;;  %2758 = vmatpush1.bf16.msra.mxu1 %v9086_v24  ;;  %v2237_v22 = vadd.f32 1.0, %v7962_v18 }
 0x26c   : > { %2718 = vmatprep.subr.bf16.mxu0 %v9089_v25  ;;  %2759 = vmatprep.subr.bf16.mxu1 %v9093_v26  ;;  %v10811_v25 = vld [vmem:[#allocation19_spill] sm:$0xff] }
 0x26d   : > { %7969 = vrcp.f32 %v2237_v22 }
 0x26f   : > { %2719 = vmatpush1.bf16.msra.mxu0 %v9099_v27  ;;  %2760 = vmatpush1.bf16.msra.mxu1 %v9104_v28 }
 0x270   : > { %2720 = vmatprep.subr.bf16.mxu0 %v9107_v29  ;;  %2761 = vmatprep.subr.bf16.mxu1 %v9111_v30  ;;  %v9493_v30 = vld [vmem:[%s8683_s2 + $0x4] ss:$16 sps:$4 sm:$0xff]  }
 0x271   : > { %v7966_v20 = vpop.eup %7965 }
 0x272   : > { %v7968_v21 = vpop.eup %7967  ;;  %v2240_v7 = vmul.f32 %v7966_v20, %v7964_v19 }
 0x273   : > { %v2239_v54 = vmul.f32 0.0, %v7968_v21  ;;  %2721 = vmatpush1.bf16.msra.mxu0 %v9115_v31  ;;  %2762 = vmatpush1.bf16.msra.mxu1 %v9120_v33  ;;  %v9496_v31 = vld [vmem:[%s8683_s2 + $0xc] ss:$16 sps:$4 sm:$0xff]   ;;  %v9499_v33 = vld [vmem:[%s8683_s2] ss:$16 sps:$4 sm:$0xff]  }
 0x274   : > { %2722 = vmatprep.subr.bf16.mxu0 %v9123_v34  ;;  %2763 = vmatprep.subr.bf16.mxu1 %v9127_v35  ;;  %v9509_v34 = vld [vmem:[%s8683_s2 + $0x24] ss:$16 sps:$4 sm:$0xff]   ;;  %v9512_v35 = vld [vmem:[%s8683_s2 + $0x2c] ss:$16 sps:$4 sm:$0xff]  }
 0x275   : > { %v9473_v24 = vadd.f32 %v2240_v7, %v2239_v54 }
 0x277   : > { %7971 = vtanh.f32 %v9473_v24  ;;  %2723 = vmatpush1.bf16.msra.mxu0 %v9131_v37  ;;  %2764 = vmatpush1.bf16.msra.mxu1 %v9136_v38  ;;  %v7970_v26 = vpop.eup %7969  ;;  %v9515_v37 = vld [vmem:[%s8683_s2 + $0x20] ss:$16 sps:$4 sm:$0xff]   ;;  %v9518_v38 = vld [vmem:[%s8683_s2 + $0x28] ss:$16 sps:$4 sm:$0xff]  }
 0x278   : > { %2724 = vmatprep.subr.bf16.mxu0 %v9139_v39  ;;  %2765 = vmatprep.subr.bf16.mxu1 %v9143_v40  ;;  %v9525_v39 = vld [vmem:[%s8683_s2 + $0x44] ss:$16 sps:$4 sm:$0xff]   ;;  %v9528_v40 = vld [vmem:[%s8683_s2 + $0x4c] ss:$16 sps:$4 sm:$0xff]  }
 0x27b   : > { %2725 = vmatpush1.bf16.msra.mxu0 %v9147_v41  ;;  %2766 = vmatpush1.bf16.msra.mxu1 %v9152_v43  ;;  %v9531_v41 = vld [vmem:[%s8683_s2 + $0x40] ss:$16 sps:$4 sm:$0xff]   ;;  %v9534_v43 = vld [vmem:[%s8683_s2 + $0x48] ss:$16 sps:$4 sm:$0xff]  }
 0x27c   : > { %2726 = vmatprep.subr.bf16.mxu0 %v9155_v44  ;;  %2767 = vmatprep.subr.bf16.mxu1 %v10811_v25  ;;  %v9541_v44 = vld [vmem:[%s8683_s2 + $0x64] ss:$16 sps:$4 sm:$0xff]  }
 0x27f   : > { %2727 = vmatpush1.bf16.msra.mxu0 %v9163_v46  ;;  %2768 = vmatpush1.bf16.msra.mxu1 %v9168_v47  ;;  %v9544_v46 = vld [vmem:[%s8683_s2 + $0x6c] ss:$16 sps:$4 sm:$0xff]   ;;  %v9547_v47 = vld [vmem:[%s8683_s2 + $0x60] ss:$16 sps:$4 sm:$0xff]  }
 0x280   : > { %2728 = vmatprep.subr.bf16.mxu0 %v9171_v48  ;;  %2769 = vmatprep.subr.bf16.mxu1 %v9175_v50  ;;  %v9550_v48 = vld [vmem:[%s8683_s2 + $0x68] ss:$16 sps:$4 sm:$0xff]   ;;  %v9557_v50 = vld [vmem:[%s8683_s2 + $0x84] ss:$16 sps:$4 sm:$0xff]  }
 0x281   : > { %v7972_v27 = vpop.eup %7971 }
 0x282   : > { %v2243_v28 = vmul.f32 %v7972_v27, %v7970_v26 }
 0x283   : > { %2729 = vmatpush1.bf16.msra.mxu0 %v9179_v52  ;;  %2770 = vmatpush1.bf16.msra.mxu1 %v9184_v17  ;;  %v9502_v17 = vld [vmem:[%s8683_s2 + $0x8] ss:$16 sps:$4 sm:$0xff]   ;;  %v9560_v52 = vld [vmem:[%s8683_s2 + $0x8c] ss:$16 sps:$4 sm:$0xff]  }
 0x284   : > { %2245 = vst [vmem:[#allocation2 + $0x78] sm:$0xff] %v2243_v28  ;;  %v2521_v29 = vpack.c.bf16 %v2243_v28, %v2243_v28  ;;  %3049 = vmatprep.subr.bf16.mxu0 %v9493_v30  ;;  %3090 = vmatprep.subr.bf16.mxu1 %v9496_v31 }
 0x286   : > { %2747 = vmatmul.mubr.bf16.vlgmr.msra.gmra.mrb[44].mxu0 %v2521_v29  ;;  %2788 = vmatmul.mubr.bf16.vlgmr.msra.gmra.mrb[44].mxu1 %v2521_v29 }
 0x287   : > { %3081 = vmatprep.mubr.bf16.mxu0 %v10756_v45  ;;  %3122 = vmatprep.mubr.bf16.mxu1 %v10756_v45 }
 0x288   : > { %3050 = vmatpush1.bf16.msra.mxu0 %v9499_v33  ;;  %3091 = vmatpush1.bf16.msra.mxu1 %v9502_v17 }
 0x289   : > { %3051 = vmatprep.subr.bf16.mxu0 %v9509_v34  ;;  %3092 = vmatprep.subr.bf16.mxu1 %v9512_v35 }
 0x28c   : > { %3052 = vmatpush1.bf16.msra.mxu0 %v9515_v37  ;;  %3093 = vmatpush1.bf16.msra.mxu1 %v9518_v38 }
 0x28d   : > { %3053 = vmatprep.subr.bf16.mxu0 %v9525_v39  ;;  %3094 = vmatprep.subr.bf16.mxu1 %v9528_v40 }
 0x290   : > { %3054 = vmatpush1.bf16.msra.mxu0 %v9531_v41  ;;  %3095 = vmatpush1.bf16.msra.mxu1 %v9534_v43 }
 0x291   : > { %3055 = vmatprep.subr.bf16.mxu0 %v9541_v44  ;;  %3096 = vmatprep.subr.bf16.mxu1 %v9544_v46 }
 0x294   : > { %3056 = vmatpush1.bf16.msra.mxu0 %v9547_v47  ;;  %3097 = vmatpush1.bf16.msra.mxu1 %v9550_v48 }
 0x295   : > { %3057 = vmatprep.subr.bf16.mxu0 %v9557_v50  ;;  %3098 = vmatprep.subr.bf16.mxu1 %v9560_v52 }
 0x298   : > { %3058 = vmatpush1.bf16.msra.mxu0 %v9563_v6  ;;  %3099 = vmatpush1.bf16.msra.mxu1 %v9566_v58 }
 0x299   : > { %3059 = vmatprep.subr.bf16.mxu0 %v9573_v1  ;;  %3100 = vmatprep.subr.bf16.mxu1 %v9576_v11 }
 0x29c   : > { %3060 = vmatpush1.bf16.msra.mxu0 %v9579_v56  ;;  %3101 = vmatpush1.bf16.msra.mxu1 %v9582_v15 }
 0x29d   : > { %3061 = vmatprep.subr.bf16.mxu0 %v9589_v59  ;;  %3102 = vmatprep.subr.bf16.mxu1 %v9592_v62 }
 0x2a0   : > { %3062 = vmatpush1.bf16.msra.mxu0 %v9595_v10  ;;  %3103 = vmatpush1.bf16.msra.mxu1 %v9598_v61 }
 0x2a1   : > { %3063 = vmatprep.subr.bf16.mxu0 %v9605_v32  ;;  %3104 = vmatprep.subr.bf16.mxu1 %v9608_v4 }
 0x2a4   : > { %3064 = vmatpush1.bf16.msra.mxu0 %v9611_v23  ;;  %3105 = vmatpush1.bf16.msra.mxu1 %v9614_v63 }
 0x2a5   : > { %3324 = vmatprep.subr.bf16.mxu0 %v9621_v3  ;;  %3365 = vmatprep.subr.bf16.mxu1 %v9624_v0 }
 0x339   : > { %v2473_v49 = vpop.f32.mrb[40].mxu0  ;;  %v2514_v55 = vpop.f32.mrb[40].mxu1 }
 0x33a   : > { %v2800_v9 = vadd.f32 %v2473_v49, %v9257_v2  ;;  %v2802_v12 = vadd.f32 %v2514_v55, %v9263_v5  ;;  %v2475_v42 = vpop.f32.mrb[41].mxu0  ;;  %v2516_v51 = vpop.f32.mrb[41].mxu1 }
 0x33b   : > { %v2801_v14 = vadd.f32 %v2475_v42, %v10812_v13  ;;  %v2803_v53 = vadd.f32 %v2516_v51, %v10813_v36  ;;  %v2477_v57 = vpop.f32.mrb[42].mxu0  ;;  %v2518_v8 = vpop.f32.mrb[42].mxu1 }
 0x33c   : > { %v2804_v16 = vsub.f32 0.0, %v2800_v9  ;;  %v2478_v18 = vpop.f32.mrb[43].mxu0  ;;  %v2519_v19 = vpop.f32.mrb[43].mxu1 }
 0x33d   : > { %v2809_v20 = vsub.f32 0.0, %v2801_v14  ;;  %v2815_v22 = vsub.f32 0.0, %v2803_v53  ;;  %v10814_v14 = vld [vmem:[#allocation70_spill] sm:$0xff]  ;;  %v10815_v53 = vld [vmem:[#allocation72_spill] sm:$0xff]  ;;  %v10816_v18 = vld [vmem:[#allocation71_spill] sm:$0xff] }
 0x33e   : > { %v2805_v21 = vmul.f32 1.442695, %v2804_v16 }
 0x33f   : > { %v2810_v7 = vmul.f32 1.442695, %v2809_v20  ;;  %v2816_v2 = vmul.f32 1.442695, %v2815_v22  ;;  %v10817_v20 = vld [vmem:[#allocation73_spill] sm:$0xff] }
 0x340   : > { %7973 = vpow2.f32 %v2805_v21 }
 0x341   : > { %7975 = vpow2.f32 %v2810_v7 }
 0x342   : > { %7977 = vpow2.f32 %v2816_v2 }
 0x343   : > { %7979 = vtanh.f32 %v2802_v12 }
 0x34a   : > { %v7974_v54 = vpop.eup %7973 }
 0x34b   : > { %v7976_v5 = vpop.eup %7975  ;;  %v2807_v25 = vadd.f32 1.0, %v7974_v54 }
 0x34c   : > { %v2812_v26 = vadd.f32 1.0, %v7976_v5  ;;  %v7978_v27 = vpop.eup %7977 }
 0x34d   : > { %7981 = vrcp.f32 %v2807_v25  ;;  %v7980_v28 = vpop.eup %7979  ;;  %v2818_v9 = vadd.f32 1.0, %v7978_v27 }
 0x34e   : > { %7983 = vrcp.f32 %v2812_v26 }
 0x34f   : > { %7985 = vrcp.f32 %v2818_v9  ;;  %v9644_v9 = vld [vmem:[%s8689_s21 + $0x8] ss:$16 sps:$4 sm:$0xff]  }
 0x357   : > { %v7982_v29 = vpop.eup %7981 }
 0x358   : > { %v7984_v49 = vpop.eup %7983  ;;  %v2821_v55 = vmul.f32 %v7982_v29, %v7980_v28 }
 0x359   : > { %v2820_v42 = vmul.f32 %v7984_v49, %v9452_v60  ;;  %v2748_v51 = vpop.f32.mrb[44].mxu0  ;;  %v2789_v13 = vpop.f32.mrb[44].mxu1 }
 0x35a   : > { %v2829_v36 = vadd.f32 %v2748_v51, %v10814_v14  ;;  %v2831_v57 = vadd.f32 %v2789_v13, %v10815_v53  ;;  %v2750_v8 = vpop.f32.mrb[45].mxu0  ;;  %v2791_v16 = vpop.f32.mrb[45].mxu1  ;;  %v9647_v14 = vld [vmem:[%s8689_s21 + $0x24] ss:$16 sps:$4 sm:$0xff]  }
 0x35b   : > { %v9635_v12 = vadd.f32 %v2821_v55, %v2820_v42  ;;  %v2830_v19 = vadd.f32 %v2750_v8, %v10816_v18  ;;  %v2832_v21 = vadd.f32 %v2791_v16, %v10817_v20  ;;  %v2752_v7 = vpop.f32.mrb[46].mxu0  ;;  %v2793_v22 = vpop.f32.mrb[46].mxu1  ;;  %v9641_v42 = vld [vmem:[%s8689_s21] ss:$16 sps:$4 sm:$0xff]   ;;  %v9666_v20 = vld [vmem:[%s8689_s21 + $0x4c] ss:$16 sps:$4 sm:$0xff]  }
 0x35c   : > { %v2833_v60 = vsub.f32 0.0, %v2829_v36  ;;  %v2753_v2 = vpop.f32.mrb[47].mxu0  ;;  %v2794_v54 = vpop.f32.mrb[47].mxu1  ;;  %v9650_v36 = vld [vmem:[%s8689_s21 + $0x2c] ss:$16 sps:$4 sm:$0xff]  }
 0x35d   : > { %7987 = vtanh.f32 %v9635_v12  ;;  %v2838_v5 = vsub.f32 0.0, %v2830_v19  ;;  %v2844_v27 = vsub.f32 0.0, %v2832_v21  ;;  %v7986_v28 = vpop.eup %7985  ;;  %v9655_v18 = vld [vmem:[%s8689_s21 + $0x20] ss:$16 sps:$4 sm:$0xff]   ;;  %v9658_v19 = vld [vmem:[%s8689_s21 + $0x28] ss:$16 sps:$4 sm:$0xff]  }
 0x35e   : > { %v2834_v25 = vmul.f32 1.442695, %v2833_v60  ;;  %v9673_v21 = vld [vmem:[%s8689_s21 + $0x40] ss:$16 sps:$4 sm:$0xff]   ;;  %v9676_v7 = vld [vmem:[%s8689_s21 + $0x48] ss:$16 sps:$4 sm:$0xff]  }
 0x35f   : > { %v2839_v26 = vmul.f32 1.442695, %v2838_v5  ;;  %v2845_v49 = vmul.f32 1.442695, %v2844_v27  ;;  %v9681_v22 = vld [vmem:[%s8689_s21 + $0x64] ss:$16 sps:$4 sm:$0xff]  }
 0x360   : > { %7989 = vpow2.f32 %v2834_v25  ;;  %v9684_v60 = vld [vmem:[%s8689_s21 + $0x6c] ss:$16 sps:$4 sm:$0xff]   ;;  %v9689_v54 = vld [vmem:[%s8689_s21 + $0x60] ss:$16 sps:$4 sm:$0xff]   ;;  %v9692_v5 = vld [vmem:[%s8689_s21 + $0x68] ss:$16 sps:$4 sm:$0xff]  }
 0x361   : > { %7991 = vpow2.f32 %v2839_v26  ;;  %v9697_v26 = vld [vmem:[%s8689_s21 + $0x84] ss:$16 sps:$4 sm:$0xff]   ;;  %v9700_v27 = vld [vmem:[%s8689_s21 + $0x8c] ss:$16 sps:$4 sm:$0xff]  }
 0x362   : > { %7993 = vpow2.f32 %v2845_v49 }
 0x363   : > { %7995 = vtanh.f32 %v2831_v57  ;;  %v9663_v57 = vld [vmem:[%s8689_s21 + $0x44] ss:$16 sps:$4 sm:$0xff]  }
 0x367   : > { %v7988_v29 = vpop.eup %7987 }
 0x368   : > { %v2824_v55 = vmul.f32 %v7988_v29, %v7986_v28 }
 0x36a   : > { %v7990_v51 = vpop.eup %7989  ;;  %2854 = vst [vmem:[#allocation2 + $0x10] sm:$0xff] %v2824_v55  ;;  %v2856_v13 = vpack.c.bf16 %v2824_v55, %v2824_v55 }
 0x36b   : > { %v7992_v53 = vpop.eup %7991  ;;  %v2836_v8 = vadd.f32 1.0, %v7990_v51 }
 0x36c   : > { %v2841_v16 = vadd.f32 1.0, %v7992_v53  ;;  %3082 = vmatmul.mubr.bf16.vlgmr.msra.gmra.mrb[48].mxu0 %v2856_v13  ;;  %3123 = vmatmul.mubr.bf16.vlgmr.msra.gmra.mrb[48].mxu1 %v2856_v13  ;;  %v7994_v2 = vpop.eup %7993  ;;  %v9706_v13 = vld [vmem:[%s8689_s21 + $0x80] ss:$16 sps:$4 sm:$0xff]   ;;  %v9709_v53 = vld [vmem:[%s8689_s21 + $0x88] ss:$16 sps:$4 sm:$0xff]  }
 0x36d   : > { %7997 = vrcp.f32 %v2836_v8  ;;  %3325 = vmatpush1.bf16.msra.mxu0 %v9641_v42  ;;  %3366 = vmatpush1.bf16.msra.mxu1 %v9644_v9  ;;  %v7996_v25 = vpop.eup %7995  ;;  %v2847_v55 = vadd.f32 1.0, %v7994_v2  ;;  %10818 = vst [vmem:[#allocation19_spill] sm:$0xff] %v9709_v53  ;;  %v9714_v8 = vld [vmem:[%s8689_s21 + $0xa4] ss:$16 sps:$4 sm:$0xff]   ;;  %v9725_v2 = vld [vmem:[%s8689_s21 + $0xa0] ss:$16 sps:$4 sm:$0xff]  }
 0x36e   : > { %7999 = vrcp.f32 %v2841_v16  ;;  %3326 = vmatprep.subr.bf16.mxu0 %v9647_v14  ;;  %3367 = vmatprep.subr.bf16.mxu1 %v9650_v36  ;;  %10819 = vst [vmem:[#allocation20_spill] sm:$0xff] %v9714_v8  ;;  %v9717_v16 = vld [vmem:[%s8689_s21 + $0xac] ss:$16 sps:$4 sm:$0xff]   ;;  %10821 = vst [vmem:[#allocation70_spill] sm:$0xff] %v9725_v2 }
 0x36f   : > { %3356 = vmatprep.mubr.bf16.mxu0 %v10756_v45  ;;  %3397 = vmatprep.mubr.bf16.mxu1 %v10756_v45  ;;  %10820 = vst [vmem:[#allocation21_spill] sm:$0xff] %v9717_v16  ;;  %8001 = vrcp.f32 %v2847_v55  ;;  %v9744_v55 = vld [vmem:[%s8689_s21 + $0xc8] ss:$16 sps:$4 sm:$0xff]  }
 0x371   : > { %3327 = vmatpush1.bf16.msra.mxu0 %v9655_v18  ;;  %3368 = vmatpush1.bf16.msra.mxu1 %v9658_v19 }
 0x372   : > { %3328 = vmatprep.subr.bf16.mxu0 %v9663_v57  ;;  %3369 = vmatprep.subr.bf16.mxu1 %v9666_v20 }
 0x375   : > { %3329 = vmatpush1.bf16.msra.mxu0 %v9673_v21  ;;  %3370 = vmatpush1.bf16.msra.mxu1 %v9676_v7 }
 0x376   : > { %3330 = vmatprep.subr.bf16.mxu0 %v9681_v22  ;;  %3371 = vmatprep.subr.bf16.mxu1 %v9684_v60 }
 0x377   : > { %v7998_v28 = vpop.eup %7997 }
 0x378   : > { %v8000_v29 = vpop.eup %7999  ;;  %v2850_v49 = vmul.f32 %v7998_v28, %v7996_v25  ;;  %v9728_v25 = vld [vmem:[%s8689_s21 + $0xa8] ss:$16 sps:$4 sm:$0xff]   ;;  %v9733_v28 = vld [vmem:[%s8689_s21 + $0xc4] ss:$16 sps:$4 sm:$0xff]  }
 0x379   : > { %v2849_v51 = vmul.f32 %v8000_v29, %v9473_v24  ;;  %3331 = vmatpush1.bf16.msra.mxu0 %v9689_v54  ;;  %3372 = vmatpush1.bf16.msra.mxu1 %v9692_v5  ;;  %10822 = vst [vmem:[#allocation72_spill] sm:$0xff] %v9728_v25  ;;  %10823 = vst [vmem:[#allocation71_spill] sm:$0xff] %v9733_v28  ;;  %v9736_v29 = vld [vmem:[%s8689_s21 + $0xcc] ss:$16 sps:$4 sm:$0xff]  }
 0x37a   : > { %3332 = vmatprep.subr.bf16.mxu0 %v9697_v26  ;;  %3373 = vmatprep.subr.bf16.mxu1 %v9700_v27  ;;  %10824 = vst [vmem:[#allocation73_spill] sm:$0xff] %v9736_v29 }
 0x37b   : > { %v9719_v24 = vadd.f32 %v2850_v49, %v2849_v51  ;;  %v9741_v49 = vld [vmem:[%s8689_s21 + $0xc0] ss:$16 sps:$4 sm:$0xff]   ;;  %v9749_v51 = vld [vmem:[%s8689_s21 + $0xe4] ss:$16 sps:$4 sm:$0xff]  }
 0x37d   : > { %8003 = vtanh.f32 %v9719_v24  ;;  %3333 = vmatpush1.bf16.msra.mxu0 %v9706_v13  ;;  %3374 = vmatpush1.bf16.msra.mxu1 %v9709_v53 }
 0x37e   : > { %3334 = vmatprep.subr.bf16.mxu0 %v9714_v8  ;;  %3375 = vmatprep.subr.bf16.mxu1 %v9717_v16  ;;  %v9752_v8 = vld [vmem:[%s8689_s21 + $0xec] ss:$16 sps:$4 sm:$0xff]   ;;  %v9757_v16 = vld [vmem:[%s8689_s21 + $0xe0] ss:$16 sps:$4 sm:$0xff]  }
 0x381   : > { %3335 = vmatpush1.bf16.msra.mxu0 %v9725_v2  ;;  %3376 = vmatpush1.bf16.msra.mxu1 %v9728_v25  ;;  %v9760_v2 = vld [vmem:[%s8689_s21 + $0xe8] ss:$16 sps:$4 sm:$0xff]   ;;  %v8002_v25 = vpop.eup %8001 }
 0x382   : > { %3336 = vmatprep.subr.bf16.mxu0 %v9733_v28  ;;  %3377 = vmatprep.subr.bf16.mxu1 %v9736_v29 }
 0x385   : > { %3337 = vmatpush1.bf16.msra.mxu0 %v9741_v49  ;;  %3378 = vmatpush1.bf16.msra.mxu1 %v9744_v55 }
 0x386   : > { %3338 = vmatprep.subr.bf16.mxu0 %v9749_v51  ;;  %3379 = vmatprep.subr.bf16.mxu1 %v9752_v8 }
 0x387   : > { %v8004_v28 = vpop.eup %8003 }
 0x388   : > { %v2853_v53 = vmul.f32 %v8004_v28, %v8002_v25  ;;  %v10829_v25 = vld [vmem:[#allocation65_spill] sm:$0xff] }
 0x389   : > { %3339 = vmatpush1.bf16.msra.mxu0 %v9757_v16  ;;  %3380 = vmatpush1.bf16.msra.mxu1 %v9760_v2 }
 0x38a   : > { %2855 = vst [vmem:[#allocation2 + $0x68] sm:$0xff] %v2853_v53  ;;  %v3131_v29 = vpack.c.bf16 %v2853_v53, %v2853_v53  ;;  %3659 = vmatprep.subr.bf16.mxu0 %v9493_v30  ;;  %3700 = vmatprep.subr.bf16.mxu1 %v9496_v31 }
 0x38c   : > { %3357 = vmatmul.mubr.bf16.vlgmr.msra.gmra.mrb[52].mxu0 %v3131_v29  ;;  %3398 = vmatmul.mubr.bf16.vlgmr.msra.gmra.mrb[52].mxu1 %v3131_v29  ;;  %v10830_v29 = vld [vmem:[#allocation68_spill] sm:$0xff] }
 0x38d   : > { %3660 = vmatpush1.bf16.msra.mxu0 %v9499_v33  ;;  %3701 = vmatpush1.bf16.msra.mxu1 %v9502_v17  ;;  %v10825_v33 = vld [vmem:[#allocation22_spill] sm:$0xff] }
 0x38e   : > { %3661 = vmatprep.subr.bf16.mxu0 %v9509_v34  ;;  %3702 = vmatprep.subr.bf16.mxu1 %v9512_v35  ;;  %v10826_v34 = vld [vmem:[#allocation24_spill] sm:$0xff] }
 0x38f   : > { %3691 = vmatprep.mubr.bf16.mxu0 %v10756_v45  ;;  %3732 = vmatprep.mubr.bf16.mxu1 %v10756_v45 }
 0x391   : > { %3662 = vmatpush1.bf16.msra.mxu0 %v9515_v37  ;;  %3703 = vmatpush1.bf16.msra.mxu1 %v9518_v38 }
 0x392   : > { %3663 = vmatprep.subr.bf16.mxu0 %v9525_v39  ;;  %3704 = vmatprep.subr.bf16.mxu1 %v9528_v40  ;;  %v10827_v39 = vld [vmem:[#allocation23_spill] sm:$0xff] }
 0x395   : > { %3664 = vmatpush1.bf16.msra.mxu0 %v9531_v41  ;;  %3705 = vmatpush1.bf16.msra.mxu1 %v9534_v43  ;;  %v10828_v41 = vld [vmem:[#allocation26_spill] sm:$0xff] }
 0x396   : > { %3665 = vmatprep.subr.bf16.mxu0 %v9541_v44  ;;  %3706 = vmatprep.subr.bf16.mxu1 %v9544_v46 }
 0x399   : > { %3666 = vmatpush1.bf16.msra.mxu0 %v9547_v47  ;;  %3707 = vmatpush1.bf16.msra.mxu1 %v9550_v48 }
 0x39a   : > { %3667 = vmatprep.subr.bf16.mxu0 %v9557_v50  ;;  %3708 = vmatprep.subr.bf16.mxu1 %v9560_v52 }
 0x39d   : > { %3668 = vmatpush1.bf16.msra.mxu0 %v9563_v6  ;;  %3709 = vmatpush1.bf16.msra.mxu1 %v9566_v58 }
 0x39e   : > { %3669 = vmatprep.subr.bf16.mxu0 %v9573_v1  ;;  %3710 = vmatprep.subr.bf16.mxu1 %v9576_v11 }
 0x3a1   : > { %3670 = vmatpush1.bf16.msra.mxu0 %v9579_v56  ;;  %3711 = vmatpush1.bf16.msra.mxu1 %v9582_v15 }
 0x3a2   : > { %3671 = vmatprep.subr.bf16.mxu0 %v9589_v59  ;;  %3712 = vmatprep.subr.bf16.mxu1 %v9592_v62 }
 0x3a5   : > { %3672 = vmatpush1.bf16.msra.mxu0 %v9595_v10  ;;  %3713 = vmatpush1.bf16.msra.mxu1 %v9598_v61 }
 0x3a6   : > { %3673 = vmatprep.subr.bf16.mxu0 %v9605_v32  ;;  %3714 = vmatprep.subr.bf16.mxu1 %v9608_v4 }
 0x3a9   : > { %3674 = vmatpush1.bf16.msra.mxu0 %v9611_v23  ;;  %3715 = vmatpush1.bf16.msra.mxu1 %v9614_v63 }
 0x3aa   : > { %3934 = vmatprep.subr.bf16.mxu0 %v9621_v3  ;;  %3975 = vmatprep.subr.bf16.mxu1 %v9624_v0 }
 0x43f   : > { %v3083_v30 = vpop.f32.mrb[48].mxu0  ;;  %v3124_v31 = vpop.f32.mrb[48].mxu1 }
 0x440   : > { %v3410_v17 = vadd.f32 %v3083_v30, %v10825_v33  ;;  %v3412_v35 = vadd.f32 %v3124_v31, %v10826_v34  ;;  %v3085_v37 = vpop.f32.mrb[49].mxu0  ;;  %v3126_v38 = vpop.f32.mrb[49].mxu1  ;;  %v10831_v34 = vld [vmem:[#allocation67_spill] sm:$0xff] }
 0x441   : > { %v3411_v40 = vadd.f32 %v3085_v37, %v10827_v39  ;;  %v3413_v43 = vadd.f32 %v3126_v38, %v10828_v41  ;;  %v3087_v44 = vpop.f32.mrb[50].mxu0  ;;  %v3128_v46 = vpop.f32.mrb[50].mxu1  ;;  %v10832_v37 = vld [vmem:[#allocation69_spill] sm:$0xff] }
 0x442   : > { %v3414_v47 = vsub.f32 0.0, %v3410_v17  ;;  %v3088_v48 = vpop.f32.mrb[51].mxu0  ;;  %v3129_v50 = vpop.f32.mrb[51].mxu1 }
 0x443   : > { %v3419_v52 = vsub.f32 0.0, %v3411_v40  ;;  %v3425_v1 = vsub.f32 0.0, %v3413_v43 }
 0x444   : > { %v3415_v6 = vmul.f32 1.442695, %v3414_v47 }
 0x445   : > { %v3420_v58 = vmul.f32 1.442695, %v3419_v52  ;;  %v3426_v11 = vmul.f32 1.442695, %v3425_v1 }
 0x446   : > { %8005 = vpow2.f32 %v3415_v6 }
 0x447   : > { %8007 = vpow2.f32 %v3420_v58 }
 0x448   : > { %8009 = vpow2.f32 %v3426_v11 }
 0x449   : > { %8011 = vtanh.f32 %v3412_v35 }
 0x450   : > { %v8006_v56 = vpop.eup %8005 }
 0x451   : > { %v8008_v15 = vpop.eup %8007  ;;  %v3417_v59 = vadd.f32 1.0, %v8006_v56 }
 0x452   : > { %v3422_v62 = vadd.f32 1.0, %v8008_v15  ;;  %v8010_v10 = vpop.eup %8009 }
 0x453   : > { %8013 = vrcp.f32 %v3417_v59  ;;  %v8012_v61 = vpop.eup %8011  ;;  %v3428_v63 = vadd.f32 1.0, %v8010_v10  ;;  %v9875_v10 = vld [vmem:[%s8683_s2 + $0x20] ss:$16 sps:$4 sm:$0xff]  }
 0x454   : > { %8015 = vrcp.f32 %v3422_v62 }
 0x455   : > { %8017 = vrcp.f32 %v3428_v63  ;;  %v9894_v63 = vld [vmem:[%s8683_s2 + $0x48] ss:$16 sps:$4 sm:$0xff]  }
 0x45d   : > { %v8014_v32 = vpop.eup %8013 }
 0x45e   : > { %v8016_v4 = vpop.eup %8015  ;;  %v3431_v23 = vmul.f32 %v8014_v32, %v8012_v61  ;;  %v9878_v61 = vld [vmem:[%s8683_s2 + $0x28] ss:$16 sps:$4 sm:$0xff]   ;;  %v9885_v32 = vld [vmem:[%s8683_s2 + $0x44] ss:$16 sps:$4 sm:$0xff]  }
 0x45f   : > { %v3430_v3 = vmul.f32 %v8016_v4, %v9635_v12  ;;  %v3358_v0 = vpop.f32.mrb[52].mxu0  ;;  %v3399_v53 = vpop.f32.mrb[52].mxu1  ;;  %v9888_v4 = vld [vmem:[%s8683_s2 + $0x4c] ss:$16 sps:$4 sm:$0xff]  }
 0x460   : > { %v3439_v28 = vadd.f32 %v3358_v0, %v10829_v25  ;;  %v3441_v30 = vadd.f32 %v3399_v53, %v10830_v29  ;;  %v3360_v31 = vpop.f32.mrb[53].mxu0  ;;  %v3401_v33 = vpop.f32.mrb[53].mxu1  ;;  %v9904_v0 = vld [vmem:[%s8683_s2 + $0x6c] ss:$16 sps:$4 sm:$0xff]   ;;  %v9907_v53 = vld [vmem:[%s8683_s2 + $0x60] ss:$16 sps:$4 sm:$0xff]  }
 0x461   : > { %v9809_v17 = vadd.f32 %v3431_v23, %v3430_v3  ;;  %v3440_v35 = vadd.f32 %v3360_v31, %v10831_v34  ;;  %v3442_v38 = vadd.f32 %v3401_v33, %v10832_v37  ;;  %v3362_v39 = vpop.f32.mrb[54].mxu0  ;;  %v3403_v40 = vpop.f32.mrb[54].mxu1  ;;  %v9891_v23 = vld [vmem:[%s8683_s2 + $0x40] ss:$16 sps:$4 sm:$0xff]   ;;  %v9901_v3 = vld [vmem:[%s8683_s2 + $0x64] ss:$16 sps:$4 sm:$0xff]  }
 0x462   : > { %v3443_v41 = vsub.f32 0.0, %v3439_v28  ;;  %v3363_v43 = vpop.f32.mrb[55].mxu0  ;;  %v3404_v12 = vpop.f32.mrb[55].mxu1  ;;  %v9910_v25 = vld [vmem:[%s8683_s2 + $0x68] ss:$16 sps:$4 sm:$0xff]  }
 0x463   : > { %8019 = vtanh.f32 %v9809_v17  ;;  %v3448_v44 = vsub.f32 0.0, %v3440_v35  ;;  %v3454_v48 = vsub.f32 0.0, %v3442_v38  ;;  %v8018_v50 = vpop.eup %8017  ;;  %v9917_v28 = vld [vmem:[%s8683_s2 + $0x84] ss:$16 sps:$4 sm:$0xff]   ;;  %v9920_v29 = vld [vmem:[%s8683_s2 + $0x8c] ss:$16 sps:$4 sm:$0xff]  }
 0x464   : > { %v3444_v46 = vmul.f32 1.442695, %v3443_v41  ;;  %v9926_v31 = vld [vmem:[%s8683_s2 + $0x88] ss:$16 sps:$4 sm:$0xff]   ;;  %v9933_v33 = vld [vmem:[%s8683_s2 + $0xa4] ss:$16 sps:$4 sm:$0xff]  }
 0x465   : > { %v3449_v47 = vmul.f32 1.442695, %v3448_v44  ;;  %v3455_v6 = vmul.f32 1.442695, %v3454_v48  ;;  %v9936_v34 = vld [vmem:[%s8683_s2 + $0xac] ss:$16 sps:$4 sm:$0xff]  }
 0x466   : > { %8021 = vpow2.f32 %v3444_v46  ;;  %v9939_v35 = vld [vmem:[%s8683_s2 + $0xa0] ss:$16 sps:$4 sm:$0xff]   ;;  %v9942_v37 = vld [vmem:[%s8683_s2 + $0xa8] ss:$16 sps:$4 sm:$0xff]   ;;  %v9949_v38 = vld [vmem:[%s8683_s2 + $0xc4] ss:$16 sps:$4 sm:$0xff]  }
 0x467   : > { %8023 = vpow2.f32 %v3449_v47  ;;  %v9952_v39 = vld [vmem:[%s8683_s2 + $0xcc] ss:$16 sps:$4 sm:$0xff]   ;;  %v9955_v40 = vld [vmem:[%s8683_s2 + $0xc0] ss:$16 sps:$4 sm:$0xff]   ;;  %v9958_v41 = vld [vmem:[%s8683_s2 + $0xc8] ss:$16 sps:$4 sm:$0xff]  }
 0x468   : > { %8025 = vpow2.f32 %v3455_v6  ;;  %v9965_v43 = vld [vmem:[%s8683_s2 + $0xe4] ss:$16 sps:$4 sm:$0xff]   ;;  %v9968_v12 = vld [vmem:[%s8683_s2 + $0xec] ss:$16 sps:$4 sm:$0xff]   ;;  %v9971_v44 = vld [vmem:[%s8683_s2 + $0xe0] ss:$16 sps:$4 sm:$0xff]  }
 0x469   : > { %8027 = vtanh.f32 %v3441_v30  ;;  %v9923_v30 = vld [vmem:[%s8683_s2 + $0x80] ss:$16 sps:$4 sm:$0xff]   ;;  %v9974_v46 = vld [vmem:[%s8683_s2 + $0xe8] ss:$16 sps:$4 sm:$0xff]   ;;  %v9981_v47 = vld [vmem:[%s8689_s21 + $0x4] ss:$16 sps:$4 sm:$0xff]  }
 0x46a   : > { %v9984_v48 = vld [vmem:[%s8689_s21 + $0xc] ss:$16 sps:$4 sm:$0xff]   ;;  %v10840_v6 = vld [vmem:[#allocation25_spill] sm:$0xff] }
 0x46d   : > { %v8020_v52 = vpop.eup %8019 }
 0x46e   : > { %v3434_v58 = vmul.f32 %v8020_v52, %v8018_v50 }
 0x470   : > { %v8022_v1 = vpop.eup %8021  ;;  %3464 = vst [vmem:[#allocation2 + $0x20] sm:$0xff] %v3434_v58  ;;  %v3466_v11 = vpack.c.bf16 %v3434_v58, %v3434_v58 }
 0x471   : > { %v8024_v56 = vpop.eup %8023  ;;  %v3446_v15 = vadd.f32 1.0, %v8022_v1  ;;  %v10841_v1 = vld [vmem:[#allocation28_spill] sm:$0xff] }
 0x472   : > { %v3451_v59 = vadd.f32 1.0, %v8024_v56  ;;  %3692 = vmatmul.mubr.bf16.vlgmr.msra.gmra.mrb[56].mxu0 %v3466_v11  ;;  %3733 = vmatmul.mubr.bf16.vlgmr.msra.gmra.mrb[56].mxu1 %v3466_v11 }
 0x473   : > { %8029 = vrcp.f32 %v3446_v15  ;;  %3935 = vmatpush1.bf16.msra.mxu0 %v9641_v42  ;;  %3976 = vmatpush1.bf16.msra.mxu1 %v9644_v9  ;;  %v8026_v42 = vpop.eup %8025 }
 0x474   : > { %8031 = vrcp.f32 %v3451_v59  ;;  %3936 = vmatprep.subr.bf16.mxu0 %v9647_v14  ;;  %3977 = vmatprep.subr.bf16.mxu1 %v9650_v36  ;;  %v8028_v9 = vpop.eup %8027  ;;  %v10842_v59 = vld [vmem:[#allocation27_spill] sm:$0xff] }
 0x475   : > { %3966 = vmatprep.mubr.bf16.mxu0 %v10756_v45  ;;  %4007 = vmatprep.mubr.bf16.mxu1 %v10756_v45 }
 0x477   : > { %3937 = vmatpush1.bf16.msra.mxu0 %v9655_v18  ;;  %3978 = vmatpush1.bf16.msra.mxu1 %v9658_v19  ;;  %v3457_v18 = vadd.f32 1.0, %v8026_v42 }
 0x478   : > { %3938 = vmatprep.subr.bf16.mxu0 %v9663_v57  ;;  %3979 = vmatprep.subr.bf16.mxu1 %v9666_v20  ;;  %v10833_v20 = vld [vmem:[#allocation19_spill] sm:$0xff] }
 0x479   : > { %8033 = vrcp.f32 %v3457_v18 }
 0x47b   : > { %3939 = vmatpush1.bf16.msra.mxu0 %v9673_v21  ;;  %3980 = vmatpush1.bf16.msra.mxu1 %v9676_v7  ;;  %v10834_v21 = vld [vmem:[#allocation20_spill] sm:$0xff]  ;;  %v10835_v7 = vld [vmem:[#allocation21_spill] sm:$0xff] }
 0x47c   : > { %3940 = vmatprep.subr.bf16.mxu0 %v9681_v22  ;;  %3981 = vmatprep.subr.bf16.mxu1 %v9684_v60  ;;  %v10836_v22 = vld [vmem:[#allocation70_spill] sm:$0xff]  ;;  %v10837_v60 = vld [vmem:[#allocation72_spill] sm:$0xff] }
 0x47d   : > { %v8030_v14 = vpop.eup %8029 }
 0x47e   : > { %v8032_v36 = vpop.eup %8031  ;;  %v3460_v62 = vmul.f32 %v8030_v14, %v8028_v9  ;;  %v10843_v9 = vld [vmem:[#allocation29_spill] sm:$0xff] }
 0x47f   : > { %v3459_v19 = vmul.f32 %v8032_v36, %v9719_v24  ;;  %3941 = vmatpush1.bf16.msra.mxu0 %v9689_v54  ;;  %3982 = vmatpush1.bf16.msra.mxu1 %v9692_v5  ;;  %v10838_v54 = vld [vmem:[#allocation71_spill] sm:$0xff]  ;;  %v10839_v5 = vld [vmem:[#allocation73_spill] sm:$0xff] }
 0x480   : > { %3942 = vmatprep.subr.bf16.mxu0 %v9697_v26  ;;  %3983 = vmatprep.subr.bf16.mxu1 %v9700_v27 }
 0x481   : > { %v9833_v57 = vadd.f32 %v3460_v62, %v3459_v19 }
 0x483   : > { %8035 = vtanh.f32 %v9833_v57  ;;  %3943 = vmatpush1.bf16.msra.mxu0 %v9706_v13  ;;  %3984 = vmatpush1.bf16.msra.mxu1 %v10833_v20  ;;  %v8034_v26 = vpop.eup %8033 }
 0x484   : > { %3944 = vmatprep.subr.bf16.mxu0 %v10834_v21  ;;  %3985 = vmatprep.subr.bf16.mxu1 %v10835_v7 }
 0x487   : > { %3945 = vmatpush1.bf16.msra.mxu0 %v10836_v22  ;;  %3986 = vmatpush1.bf16.msra.mxu1 %v10837_v60 }
 0x488   : > { %3946 = vmatprep.subr.bf16.mxu0 %v10838_v54  ;;  %3987 = vmatprep.subr.bf16.mxu1 %v10839_v5 }
 0x48b   : > { %3947 = vmatpush1.bf16.msra.mxu0 %v9741_v49  ;;  %3988 = vmatpush1.bf16.msra.mxu1 %v9744_v55  ;;  %v9853_v49 = vld [vmem:[%s8683_s2 + $0x4] ss:$16 sps:$4 sm:$0xff]  }
 0x48c   : > { %3948 = vmatprep.subr.bf16.mxu0 %v9749_v51  ;;  %3989 = vmatprep.subr.bf16.mxu1 %v9752_v8  ;;  %v9856_v8 = vld [vmem:[%s8683_s2 + $0xc] ss:$16 sps:$4 sm:$0xff]   ;;  %v9869_v55 = vld [vmem:[%s8683_s2 + $0x24] ss:$16 sps:$4 sm:$0xff]  }
 0x48d   : > { %v8036_v27 = vpop.eup %8035  ;;  %v9872_v51 = vld [vmem:[%s8683_s2 + $0x2c] ss:$16 sps:$4 sm:$0xff]  }
 0x48e   : > { %v3463_v13 = vmul.f32 %v8036_v27, %v8034_v26 }
 0x48f   : > { %3949 = vmatpush1.bf16.msra.mxu0 %v9757_v16  ;;  %3990 = vmatpush1.bf16.msra.mxu1 %v9760_v2  ;;  %v9859_v16 = vld [vmem:[%s8683_s2] ss:$16 sps:$4 sm:$0xff]   ;;  %v9862_v2 = vld [vmem:[%s8683_s2 + $0x8] ss:$16 sps:$4 sm:$0xff]  }
 0x490   : > { %3465 = vst [vmem:[#allocation2 + $0x58] sm:$0xff] %v3463_v13  ;;  %v3741_v24 = vpack.c.bf16 %v3463_v13, %v3463_v13  ;;  %4269 = vmatprep.subr.bf16.mxu0 %v9853_v49  ;;  %4310 = vmatprep.subr.bf16.mxu1 %v9856_v8 }
 0x492   : > { %3967 = vmatmul.mubr.bf16.vlgmr.msra.gmra.mrb[60].mxu0 %v3741_v24  ;;  %4008 = vmatmul.mubr.bf16.vlgmr.msra.gmra.mrb[60].mxu1 %v3741_v24 }
 0x493   : > { %4301 = vmatprep.mubr.bf16.mxu0 %v10756_v45  ;;  %4342 = vmatprep.mubr.bf16.mxu1 %v10756_v45 }
 0x494   : > { %4270 = vmatpush1.bf16.msra.mxu0 %v9859_v16  ;;  %4311 = vmatpush1.bf16.msra.mxu1 %v9862_v2 }
 0x495   : > { %4271 = vmatprep.subr.bf16.mxu0 %v9869_v55  ;;  %4312 = vmatprep.subr.bf16.mxu1 %v9872_v51 }
 0x498   : > { %4272 = vmatpush1.bf16.msra.mxu0 %v9875_v10  ;;  %4313 = vmatpush1.bf16.msra.mxu1 %v9878_v61 }
 0x499   : > { %4273 = vmatprep.subr.bf16.mxu0 %v9885_v32  ;;  %4314 = vmatprep.subr.bf16.mxu1 %v9888_v4 }
 0x49c   : > { %4274 = vmatpush1.bf16.msra.mxu0 %v9891_v23  ;;  %4315 = vmatpush1.bf16.msra.mxu1 %v9894_v63 }
 0x49d   : > { %4275 = vmatprep.subr.bf16.mxu0 %v9901_v3  ;;  %4316 = vmatprep.subr.bf16.mxu1 %v9904_v0 }
 0x4a0   : > { %4276 = vmatpush1.bf16.msra.mxu0 %v9907_v53  ;;  %4317 = vmatpush1.bf16.msra.mxu1 %v9910_v25 }
 0x4a1   : > { %4277 = vmatprep.subr.bf16.mxu0 %v9917_v28  ;;  %4318 = vmatprep.subr.bf16.mxu1 %v9920_v29 }
 0x4a4   : > { %4278 = vmatpush1.bf16.msra.mxu0 %v9923_v30  ;;  %4319 = vmatpush1.bf16.msra.mxu1 %v9926_v31 }
 0x4a5   : > { %4279 = vmatprep.subr.bf16.mxu0 %v9933_v33  ;;  %4320 = vmatprep.subr.bf16.mxu1 %v9936_v34 }
 0x4a8   : > { %4280 = vmatpush1.bf16.msra.mxu0 %v9939_v35  ;;  %4321 = vmatpush1.bf16.msra.mxu1 %v9942_v37 }
 0x4a9   : > { %4281 = vmatprep.subr.bf16.mxu0 %v9949_v38  ;;  %4322 = vmatprep.subr.bf16.mxu1 %v9952_v39 }
 0x4ac   : > { %4282 = vmatpush1.bf16.msra.mxu0 %v9955_v40  ;;  %4323 = vmatpush1.bf16.msra.mxu1 %v9958_v41 }
 0x4ad   : > { %4283 = vmatprep.subr.bf16.mxu0 %v9965_v43  ;;  %4324 = vmatprep.subr.bf16.mxu1 %v9968_v12 }
 0x4b0   : > { %4284 = vmatpush1.bf16.msra.mxu0 %v9971_v44  ;;  %4325 = vmatpush1.bf16.msra.mxu1 %v9974_v46 }
 0x4b1   : > { %4544 = vmatprep.subr.bf16.mxu0 %v9981_v47  ;;  %4585 = vmatprep.subr.bf16.mxu1 %v9984_v48 }
 0x545   : > { %v3693_v50 = vpop.f32.mrb[56].mxu0  ;;  %v3734_v52 = vpop.f32.mrb[56].mxu1 }
 0x546   : > { %v4020_v58 = vadd.f32 %v3693_v50, %v10840_v6  ;;  %v4022_v11 = vadd.f32 %v3734_v52, %v10841_v1  ;;  %v3695_v56 = vpop.f32.mrb[57].mxu0  ;;  %v3736_v15 = vpop.f32.mrb[57].mxu1 }
 0x547   : > { %v4021_v42 = vadd.f32 %v3695_v56, %v10842_v59  ;;  %v4023_v14 = vadd.f32 %v3736_v15, %v10843_v9  ;;  %v3697_v36 = vpop.f32.mrb[58].mxu0  ;;  %v3738_v62 = vpop.f32.mrb[58].mxu1 }
 0x548   : > { %v4024_v18 = vsub.f32 0.0, %v4020_v58  ;;  %v3698_v19 = vpop.f32.mrb[59].mxu0  ;;  %v3739_v20 = vpop.f32.mrb[59].mxu1 }
 0x549   : > { %v4029_v21 = vsub.f32 0.0, %v4021_v42  ;;  %v4035_v60 = vsub.f32 0.0, %v4023_v14  ;;  %v10844_v42 = vld [vmem:[#allocation62_spill] sm:$0xff]  ;;  %v10845_v14 = vld [vmem:[#allocation64_spill] sm:$0xff]  ;;  %v10846_v19 = vld [vmem:[#allocation63_spill] sm:$0xff] }
 0x54a   : > { %v4025_v7 = vmul.f32 1.442695, %v4024_v18 }
 0x54b   : > { %v4030_v22 = vmul.f32 1.442695, %v4029_v21  ;;  %v4036_v54 = vmul.f32 1.442695, %v4035_v60  ;;  %v10847_v21 = vld [vmem:[#allocation66_spill] sm:$0xff] }
 0x54c   : > { %8037 = vpow2.f32 %v4025_v7 }
 0x54d   : > { %8039 = vpow2.f32 %v4030_v22 }
 0x54e   : > { %8041 = vpow2.f32 %v4036_v54 }
 0x54f   : > { %8043 = vtanh.f32 %v4022_v11 }
 0x556   : > { %v8038_v5 = vpop.eup %8037 }
 0x557   : > { %v8040_v26 = vpop.eup %8039  ;;  %v4027_v27 = vadd.f32 1.0, %v8038_v5 }
 0x558   : > { %v4032_v13 = vadd.f32 1.0, %v8040_v26  ;;  %v8042_v24 = vpop.eup %8041 }
 0x559   : > { %8045 = vrcp.f32 %v4027_v27  ;;  %v8044_v50 = vpop.eup %8043  ;;  %v4038_v1 = vadd.f32 1.0, %v8042_v24 }
 0x55a   : > { %8047 = vrcp.f32 %v4032_v13 }
 0x55b   : > { %8049 = vrcp.f32 %v4038_v1  ;;  %v10004_v1 = vld [vmem:[%s8689_s21 + $0x8] ss:$16 sps:$4 sm:$0xff]  }
 0x563   : > { %v8046_v52 = vpop.eup %8045 }
 0x564   : > { %v8048_v6 = vpop.eup %8047  ;;  %v4041_v58 = vmul.f32 %v8046_v52, %v8044_v50 }
 0x565   : > { %v4040_v56 = vmul.f32 %v8048_v6, %v9809_v17  ;;  %v3968_v15 = vpop.f32.mrb[60].mxu0  ;;  %v4009_v59 = vpop.f32.mrb[60].mxu1 }
 0x566   : > { %v4049_v9 = vadd.f32 %v3968_v15, %v10844_v42  ;;  %v4051_v36 = vadd.f32 %v4009_v59, %v10845_v14  ;;  %v3970_v62 = vpop.f32.mrb[61].mxu0  ;;  %v4011_v18 = vpop.f32.mrb[61].mxu1  ;;  %v10007_v42 = vld [vmem:[%s8689_s21 + $0x24] ss:$16 sps:$4 sm:$0xff]  }
 0x567   : > { %v9995_v11 = vadd.f32 %v4041_v58, %v4040_v56  ;;  %v4050_v20 = vadd.f32 %v3970_v62, %v10846_v19  ;;  %v4052_v7 = vadd.f32 %v4011_v18, %v10847_v21  ;;  %v3972_v22 = vpop.f32.mrb[62].mxu0  ;;  %v4013_v60 = vpop.f32.mrb[62].mxu1  ;;  %v10001_v56 = vld [vmem:[%s8689_s21] ss:$16 sps:$4 sm:$0xff]   ;;  %v10026_v21 = vld [vmem:[%s8689_s21 + $0x4c] ss:$16 sps:$4 sm:$0xff]  }
 0x568   : > { %v4053_v17 = vsub.f32 0.0, %v4049_v9  ;;  %v3973_v54 = vpop.f32.mrb[63].mxu0  ;;  %v4014_v5 = vpop.f32.mrb[63].mxu1  ;;  %v10010_v9 = vld [vmem:[%s8689_s21 + $0x2c] ss:$16 sps:$4 sm:$0xff]  }
 0x569   : > { %8051 = vtanh.f32 %v9995_v11  ;;  %v4058_v26 = vsub.f32 0.0, %v4050_v20  ;;  %v4064_v24 = vsub.f32 0.0, %v4052_v7  ;;  %v8050_v50 = vpop.eup %8049  ;;  %v10015_v19 = vld [vmem:[%s8689_s21 + $0x20] ss:$16 sps:$4 sm:$0xff]   ;;  %v10018_v20 = vld [vmem:[%s8689_s21 + $0x28] ss:$16 sps:$4 sm:$0xff]  }
 0x56a   : > { %v4054_v27 = vmul.f32 1.442695, %v4053_v17  ;;  %v10033_v7 = vld [vmem:[%s8689_s21 + $0x40] ss:$16 sps:$4 sm:$0xff]   ;;  %v10036_v22 = vld [vmem:[%s8689_s21 + $0x48] ss:$16 sps:$4 sm:$0xff]  }
 0x56b   : > { %v4059_v13 = vmul.f32 1.442695, %v4058_v26  ;;  %v4065_v6 = vmul.f32 1.442695, %v4064_v24  ;;  %v10041_v60 = vld [vmem:[%s8689_s21 + $0x64] ss:$16 sps:$4 sm:$0xff]  }
 0x56c   : > { %8053 = vpow2.f32 %v4054_v27  ;;  %v10044_v17 = vld [vmem:[%s8689_s21 + $0x6c] ss:$16 sps:$4 sm:$0xff]   ;;  %v10049_v5 = vld [vmem:[%s8689_s21 + $0x60] ss:$16 sps:$4 sm:$0xff]   ;;  %v10052_v26 = vld [vmem:[%s8689_s21 + $0x68] ss:$16 sps:$4 sm:$0xff]  }
 0x56d   : > { %8055 = vpow2.f32 %v4059_v13  ;;  %v10057_v13 = vld [vmem:[%s8689_s21 + $0x84] ss:$16 sps:$4 sm:$0xff]   ;;  %v10060_v24 = vld [vmem:[%s8689_s21 + $0x8c] ss:$16 sps:$4 sm:$0xff]  }
 0x56e   : > { %8057 = vpow2.f32 %v4065_v6 }
 0x56f   : > { %8059 = vtanh.f32 %v4051_v36  ;;  %v10023_v36 = vld [vmem:[%s8689_s21 + $0x44] ss:$16 sps:$4 sm:$0xff]  }
 0x573   : > { %v8052_v52 = vpop.eup %8051 }
 0x574   : > { %v4044_v58 = vmul.f32 %v8052_v52, %v8050_v50 }
 0x576   : > { %v8054_v15 = vpop.eup %8053  ;;  %4074 = vst [vmem:[#allocation2 + $0x30] sm:$0xff] %v4044_v58  ;;  %v4076_v59 = vpack.c.bf16 %v4044_v58, %v4044_v58 }
 0x577   : > { %v8056_v14 = vpop.eup %8055  ;;  %v4056_v62 = vadd.f32 1.0, %v8054_v15 }
 0x578   : > { %v4061_v18 = vadd.f32 1.0, %v8056_v14  ;;  %4302 = vmatmul.mubr.bf16.vlgmr.msra.gmra.mrb[64].mxu0 %v4076_v59  ;;  %4343 = vmatmul.mubr.bf16.vlgmr.msra.gmra.mrb[64].mxu1 %v4076_v59  ;;  %v8058_v54 = vpop.eup %8057  ;;  %v10066_v59 = vld [vmem:[%s8689_s21 + $0x80] ss:$16 sps:$4 sm:$0xff]   ;;  %v10069_v14 = vld [vmem:[%s8689_s21 + $0x88] ss:$16 sps:$4 sm:$0xff]  }
 0x579   : > { %8061 = vrcp.f32 %v4056_v62  ;;  %4545 = vmatpush1.bf16.msra.mxu0 %v10001_v56  ;;  %4586 = vmatpush1.bf16.msra.mxu1 %v10004_v1  ;;  %v8060_v27 = vpop.eup %8059  ;;  %v4067_v58 = vadd.f32 1.0, %v8058_v54  ;;  %10848 = vst [vmem:[#allocation22_spill] sm:$0xff] %v10069_v14  ;;  %v10074_v62 = vld [vmem:[%s8689_s21 + $0xa4] ss:$16 sps:$4 sm:$0xff]   ;;  %v10085_v54 = vld [vmem:[%s8689_s21 + $0xa0] ss:$16 sps:$4 sm:$0xff]  }
 0x57a   : > { %8063 = vrcp.f32 %v4061_v18  ;;  %4546 = vmatprep.subr.bf16.mxu0 %v10007_v42  ;;  %4587 = vmatprep.subr.bf16.mxu1 %v10010_v9  ;;  %10849 = vst [vmem:[#allocation24_spill] sm:$0xff] %v10074_v62  ;;  %v10077_v18 = vld [vmem:[%s8689_s21 + $0xac] ss:$16 sps:$4 sm:$0xff]   ;;  %10851 = vst [vmem:[#allocation26_spill] sm:$0xff] %v10085_v54 }
 0x57b   : > { %4576 = vmatprep.mubr.bf16.mxu0 %v10756_v45  ;;  %4617 = vmatprep.mubr.bf16.mxu1 %v10756_v45  ;;  %10850 = vst [vmem:[#allocation23_spill] sm:$0xff] %v10077_v18  ;;  %8065 = vrcp.f32 %v4067_v58  ;;  %v10104_v58 = vld [vmem:[%s8689_s21 + $0xc8] ss:$16 sps:$4 sm:$0xff]  }
 0x57d   : > { %4547 = vmatpush1.bf16.msra.mxu0 %v10015_v19  ;;  %4588 = vmatpush1.bf16.msra.mxu1 %v10018_v20 }
 0x57e   : > { %4548 = vmatprep.subr.bf16.mxu0 %v10023_v36  ;;  %4589 = vmatprep.subr.bf16.mxu1 %v10026_v21 }
 0x581   : > { %4549 = vmatpush1.bf16.msra.mxu0 %v10033_v7  ;;  %4590 = vmatpush1.bf16.msra.mxu1 %v10036_v22 }
 0x582   : > { %4550 = vmatprep.subr.bf16.mxu0 %v10041_v60  ;;  %4591 = vmatprep.subr.bf16.mxu1 %v10044_v17 }
 0x583   : > { %v8062_v50 = vpop.eup %8061 }
 0x584   : > { %v8064_v52 = vpop.eup %8063  ;;  %v4070_v6 = vmul.f32 %v8062_v50, %v8060_v27  ;;  %v10088_v27 = vld [vmem:[%s8689_s21 + $0xa8] ss:$16 sps:$4 sm:$0xff]   ;;  %v10093_v50 = vld [vmem:[%s8689_s21 + $0xc4] ss:$16 sps:$4 sm:$0xff]  }
 0x585   : > { %v4069_v15 = vmul.f32 %v8064_v52, %v9833_v57  ;;  %4551 = vmatpush1.bf16.msra.mxu0 %v10049_v5  ;;  %4592 = vmatpush1.bf16.msra.mxu1 %v10052_v26  ;;  %10852 = vst [vmem:[#allocation65_spill] sm:$0xff] %v10088_v27  ;;  %10853 = vst [vmem:[#allocation68_spill] sm:$0xff] %v10093_v50  ;;  %v10096_v52 = vld [vmem:[%s8689_s21 + $0xcc] ss:$16 sps:$4 sm:$0xff]  }
 0x586   : > { %4552 = vmatprep.subr.bf16.mxu0 %v10057_v13  ;;  %4593 = vmatprep.subr.bf16.mxu1 %v10060_v24  ;;  %10854 = vst [vmem:[#allocation67_spill] sm:$0xff] %v10096_v52 }
 0x587   : > { %v10079_v57 = vadd.f32 %v4070_v6, %v4069_v15  ;;  %v10101_v6 = vld [vmem:[%s8689_s21 + $0xc0] ss:$16 sps:$4 sm:$0xff]   ;;  %v10109_v15 = vld [vmem:[%s8689_s21 + $0xe4] ss:$16 sps:$4 sm:$0xff]  }
 0x589   : > { %8067 = vtanh.f32 %v10079_v57  ;;  %4553 = vmatpush1.bf16.msra.mxu0 %v10066_v59  ;;  %4594 = vmatpush1.bf16.msra.mxu1 %v10069_v14 }
 0x58a   : > { %4554 = vmatprep.subr.bf16.mxu0 %v10074_v62  ;;  %4595 = vmatprep.subr.bf16.mxu1 %v10077_v18  ;;  %v10112_v62 = vld [vmem:[%s8689_s21 + $0xec] ss:$16 sps:$4 sm:$0xff]   ;;  %v10117_v18 = vld [vmem:[%s8689_s21 + $0xe0] ss:$16 sps:$4 sm:$0xff]  }
 0x58d   : > { %4555 = vmatpush1.bf16.msra.mxu0 %v10085_v54  ;;  %4596 = vmatpush1.bf16.msra.mxu1 %v10088_v27  ;;  %v10120_v54 = vld [vmem:[%s8689_s21 + $0xe8] ss:$16 sps:$4 sm:$0xff]   ;;  %v8066_v27 = vpop.eup %8065 }
 0x58e   : > { %4556 = vmatprep.subr.bf16.mxu0 %v10093_v50  ;;  %4597 = vmatprep.subr.bf16.mxu1 %v10096_v52 }
 0x591   : > { %4557 = vmatpush1.bf16.msra.mxu0 %v10101_v6  ;;  %4598 = vmatpush1.bf16.msra.mxu1 %v10104_v58 }
 0x592   : > { %4558 = vmatprep.subr.bf16.mxu0 %v10109_v15  ;;  %4599 = vmatprep.subr.bf16.mxu1 %v10112_v62 }
 0x593   : > { %v8068_v50 = vpop.eup %8067 }
 0x594   : > { %v4073_v14 = vmul.f32 %v8068_v50, %v8066_v27  ;;  %v10859_v27 = vld [vmem:[#allocation57_spill] sm:$0xff] }
 0x595   : > { %4559 = vmatpush1.bf16.msra.mxu0 %v10117_v18  ;;  %4600 = vmatpush1.bf16.msra.mxu1 %v10120_v54 }
 0x596   : > { %4075 = vst [vmem:[#allocation2 + $0x48] sm:$0xff] %v4073_v14  ;;  %v4351_v52 = vpack.c.bf16 %v4073_v14, %v4073_v14  ;;  %4879 = vmatprep.subr.bf16.mxu0 %v9853_v49  ;;  %4920 = vmatprep.subr.bf16.mxu1 %v9856_v8 }
 0x598   : > { %4577 = vmatmul.mubr.bf16.vlgmr.msra.gmra.mrb[68].mxu0 %v4351_v52  ;;  %4618 = vmatmul.mubr.bf16.vlgmr.msra.gmra.mrb[68].mxu1 %v4351_v52  ;;  %v10860_v52 = vld [vmem:[#allocation60_spill] sm:$0xff] }
 0x599   : > { %4880 = vmatpush1.bf16.msra.mxu0 %v9859_v16  ;;  %4921 = vmatpush1.bf16.msra.mxu1 %v9862_v2  ;;  %v10855_v16 = vld [vmem:[#allocation30_spill] sm:$0xff] }
 0x59a   : > { %4881 = vmatprep.subr.bf16.mxu0 %v9869_v55  ;;  %4922 = vmatprep.subr.bf16.mxu1 %v9872_v51  ;;  %v10856_v55 = vld [vmem:[#allocation32_spill] sm:$0xff] }
 0x59b   : > { %4911 = vmatprep.mubr.bf16.mxu0 %v10756_v45  ;;  %4952 = vmatprep.mubr.bf16.mxu1 %v10756_v45 }
 0x59d   : > { %4882 = vmatpush1.bf16.msra.mxu0 %v9875_v10  ;;  %4923 = vmatpush1.bf16.msra.mxu1 %v9878_v61 }
 0x59e   : > { %4883 = vmatprep.subr.bf16.mxu0 %v9885_v32  ;;  %4924 = vmatprep.subr.bf16.mxu1 %v9888_v4  ;;  %v10857_v32 = vld [vmem:[#allocation31_spill] sm:$0xff] }
 0x5a1   : > { %4884 = vmatpush1.bf16.msra.mxu0 %v9891_v23  ;;  %4925 = vmatpush1.bf16.msra.mxu1 %v9894_v63  ;;  %v10858_v23 = vld [vmem:[#allocation34_spill] sm:$0xff] }
 0x5a2   : > { %4885 = vmatprep.subr.bf16.mxu0 %v9901_v3  ;;  %4926 = vmatprep.subr.bf16.mxu1 %v9904_v0 }
 0x5a5   : > { %4886 = vmatpush1.bf16.msra.mxu0 %v9907_v53  ;;  %4927 = vmatpush1.bf16.msra.mxu1 %v9910_v25 }
 0x5a6   : > { %4887 = vmatprep.subr.bf16.mxu0 %v9917_v28  ;;  %4928 = vmatprep.subr.bf16.mxu1 %v9920_v29 }
 0x5a9   : > { %4888 = vmatpush1.bf16.msra.mxu0 %v9923_v30  ;;  %4929 = vmatpush1.bf16.msra.mxu1 %v9926_v31 }
 0x5aa   : > { %4889 = vmatprep.subr.bf16.mxu0 %v9933_v33  ;;  %4930 = vmatprep.subr.bf16.mxu1 %v9936_v34 }
 0x5ad   : > { %4890 = vmatpush1.bf16.msra.mxu0 %v9939_v35  ;;  %4931 = vmatpush1.bf16.msra.mxu1 %v9942_v37 }
 0x5ae   : > { %4891 = vmatprep.subr.bf16.mxu0 %v9949_v38  ;;  %4932 = vmatprep.subr.bf16.mxu1 %v9952_v39 }
 0x5b1   : > { %4892 = vmatpush1.bf16.msra.mxu0 %v9955_v40  ;;  %4933 = vmatpush1.bf16.msra.mxu1 %v9958_v41 }
 0x5b2   : > { %4893 = vmatprep.subr.bf16.mxu0 %v9965_v43  ;;  %4934 = vmatprep.subr.bf16.mxu1 %v9968_v12 }
 0x5b5   : > { %4894 = vmatpush1.bf16.msra.mxu0 %v9971_v44  ;;  %4935 = vmatpush1.bf16.msra.mxu1 %v9974_v46 }
 0x5b6   : > { %5154 = vmatprep.subr.bf16.mxu0 %v9981_v47  ;;  %5195 = vmatprep.subr.bf16.mxu1 %v9984_v48 }
 0x64b   : > { %v4303_v49 = vpop.f32.mrb[64].mxu0  ;;  %v4344_v8 = vpop.f32.mrb[64].mxu1 }
 0x64c   : > { %v4630_v2 = vadd.f32 %v4303_v49, %v10855_v16  ;;  %v4632_v51 = vadd.f32 %v4344_v8, %v10856_v55  ;;  %v4305_v10 = vpop.f32.mrb[65].mxu0  ;;  %v4346_v61 = vpop.f32.mrb[65].mxu1  ;;  %v10861_v55 = vld [vmem:[#allocation59_spill] sm:$0xff] }
 0x64d   : > { %v4631_v4 = vadd.f32 %v4305_v10, %v10857_v32  ;;  %v4633_v63 = vadd.f32 %v4346_v61, %v10858_v23  ;;  %v4307_v3 = vpop.f32.mrb[66].mxu0  ;;  %v4348_v0 = vpop.f32.mrb[66].mxu1  ;;  %v10862_v10 = vld [vmem:[#allocation61_spill] sm:$0xff] }
 0x64e   : > { %v4634_v53 = vsub.f32 0.0, %v4630_v2  ;;  %v4308_v25 = vpop.f32.mrb[67].mxu0  ;;  %v4349_v28 = vpop.f32.mrb[67].mxu1 }
 0x64f   : > { %v4639_v29 = vsub.f32 0.0, %v4631_v4  ;;  %v4645_v33 = vsub.f32 0.0, %v4633_v63 }
 0x650   : > { %v4635_v30 = vmul.f32 1.442695, %v4634_v53 }
 0x651   : > { %v4640_v31 = vmul.f32 1.442695, %v4639_v29  ;;  %v4646_v34 = vmul.f32 1.442695, %v4645_v33 }
 0x652   : > { %8069 = vpow2.f32 %v4635_v30 }
 0x653   : > { %8071 = vpow2.f32 %v4640_v31 }
 0x654   : > { %8073 = vpow2.f32 %v4646_v34 }
 0x655   : > { %8075 = vtanh.f32 %v4632_v51 }
 0x65c   : > { %v8070_v35 = vpop.eup %8069 }
 0x65d   : > { %v8072_v37 = vpop.eup %8071  ;;  %v4637_v38 = vadd.f32 1.0, %v8070_v35 }
 0x65e   : > { %v4642_v39 = vadd.f32 1.0, %v8072_v37  ;;  %v8074_v40 = vpop.eup %8073 }
 0x65f   : > { %8077 = vrcp.f32 %v4637_v38  ;;  %v8076_v41 = vpop.eup %8075  ;;  %v4648_v46 = vadd.f32 1.0, %v8074_v40  ;;  %v10235_v40 = vld [vmem:[%s8683_s2 + $0x20] ss:$16 sps:$4 sm:$0xff]  }
 0x660   : > { %8079 = vrcp.f32 %v4642_v39 }
 0x661   : > { %8081 = vrcp.f32 %v4648_v46  ;;  %v10254_v46 = vld [vmem:[%s8683_s2 + $0x48] ss:$16 sps:$4 sm:$0xff]  }
 0x669   : > { %v8078_v43 = vpop.eup %8077 }
 0x66a   : > { %v8080_v12 = vpop.eup %8079  ;;  %v4651_v44 = vmul.f32 %v8078_v43, %v8076_v41  ;;  %v10238_v41 = vld [vmem:[%s8683_s2 + $0x28] ss:$16 sps:$4 sm:$0xff]   ;;  %v10245_v43 = vld [vmem:[%s8683_s2 + $0x44] ss:$16 sps:$4 sm:$0xff]  }
 0x66b   : > { %v4650_v47 = vmul.f32 %v8080_v12, %v9995_v11  ;;  %v4578_v48 = vpop.f32.mrb[68].mxu0  ;;  %v4619_v14 = vpop.f32.mrb[68].mxu1  ;;  %v10248_v12 = vld [vmem:[%s8683_s2 + $0x4c] ss:$16 sps:$4 sm:$0xff]  }
 0x66c   : > { %v4659_v50 = vadd.f32 %v4578_v48, %v10859_v27  ;;  %v4661_v49 = vadd.f32 %v4619_v14, %v10860_v52  ;;  %v4580_v8 = vpop.f32.mrb[69].mxu0  ;;  %v4621_v16 = vpop.f32.mrb[69].mxu1  ;;  %v10264_v48 = vld [vmem:[%s8683_s2 + $0x6c] ss:$16 sps:$4 sm:$0xff]   ;;  %v10267_v14 = vld [vmem:[%s8683_s2 + $0x60] ss:$16 sps:$4 sm:$0xff]  }
 0x66d   : > { %v10169_v2 = vadd.f32 %v4651_v44, %v4650_v47  ;;  %v4660_v51 = vadd.f32 %v4580_v8, %v10861_v55  ;;  %v4662_v61 = vadd.f32 %v4621_v16, %v10862_v10  ;;  %v4582_v32 = vpop.f32.mrb[70].mxu0  ;;  %v4623_v4 = vpop.f32.mrb[70].mxu1  ;;  %v10251_v44 = vld [vmem:[%s8683_s2 + $0x40] ss:$16 sps:$4 sm:$0xff]   ;;  %v10261_v47 = vld [vmem:[%s8683_s2 + $0x64] ss:$16 sps:$4 sm:$0xff]  }
 0x66e   : > { %v4663_v23 = vsub.f32 0.0, %v4659_v50  ;;  %v4583_v63 = vpop.f32.mrb[71].mxu0  ;;  %v4624_v11 = vpop.f32.mrb[71].mxu1  ;;  %v10270_v27 = vld [vmem:[%s8683_s2 + $0x68] ss:$16 sps:$4 sm:$0xff]  }
 0x66f   : > { %8083 = vtanh.f32 %v10169_v2  ;;  %v4668_v3 = vsub.f32 0.0, %v4660_v51  ;;  %v4674_v25 = vsub.f32 0.0, %v4662_v61  ;;  %v8082_v28 = vpop.eup %8081  ;;  %v10277_v50 = vld [vmem:[%s8683_s2 + $0x84] ss:$16 sps:$4 sm:$0xff]   ;;  %v10280_v52 = vld [vmem:[%s8683_s2 + $0x8c] ss:$16 sps:$4 sm:$0xff]  }
 0x670   : > { %v4664_v0 = vmul.f32 1.442695, %v4663_v23  ;;  %v10286_v8 = vld [vmem:[%s8683_s2 + $0x88] ss:$16 sps:$4 sm:$0xff]   ;;  %v10293_v16 = vld [vmem:[%s8683_s2 + $0xa4] ss:$16 sps:$4 sm:$0xff]  }
 0x671   : > { %v4669_v53 = vmul.f32 1.442695, %v4668_v3  ;;  %v4675_v30 = vmul.f32 1.442695, %v4674_v25  ;;  %v10296_v55 = vld [vmem:[%s8683_s2 + $0xac] ss:$16 sps:$4 sm:$0xff]  }
 0x672   : > { %8085 = vpow2.f32 %v4664_v0  ;;  %v10299_v51 = vld [vmem:[%s8683_s2 + $0xa0] ss:$16 sps:$4 sm:$0xff]   ;;  %v10302_v10 = vld [vmem:[%s8683_s2 + $0xa8] ss:$16 sps:$4 sm:$0xff]   ;;  %v10309_v61 = vld [vmem:[%s8683_s2 + $0xc4] ss:$16 sps:$4 sm:$0xff]  }
 0x673   : > { %8087 = vpow2.f32 %v4669_v53  ;;  %v10312_v32 = vld [vmem:[%s8683_s2 + $0xcc] ss:$16 sps:$4 sm:$0xff]   ;;  %v10315_v4 = vld [vmem:[%s8683_s2 + $0xc0] ss:$16 sps:$4 sm:$0xff]   ;;  %v10318_v23 = vld [vmem:[%s8683_s2 + $0xc8] ss:$16 sps:$4 sm:$0xff]  }
 0x674   : > { %8089 = vpow2.f32 %v4675_v30  ;;  %v10325_v63 = vld [vmem:[%s8683_s2 + $0xe4] ss:$16 sps:$4 sm:$0xff]   ;;  %v10328_v11 = vld [vmem:[%s8683_s2 + $0xec] ss:$16 sps:$4 sm:$0xff]   ;;  %v10331_v3 = vld [vmem:[%s8683_s2 + $0xe0] ss:$16 sps:$4 sm:$0xff]  }
 0x675   : > { %8091 = vtanh.f32 %v4661_v49  ;;  %v10283_v49 = vld [vmem:[%s8683_s2 + $0x80] ss:$16 sps:$4 sm:$0xff]   ;;  %v10334_v0 = vld [vmem:[%s8683_s2 + $0xe8] ss:$16 sps:$4 sm:$0xff]   ;;  %v10341_v53 = vld [vmem:[%s8689_s21 + $0x4] ss:$16 sps:$4 sm:$0xff]  }
 0x676   : > { %v10344_v25 = vld [vmem:[%s8689_s21 + $0xc] ss:$16 sps:$4 sm:$0xff]   ;;  %v10870_v30 = vld [vmem:[#allocation33_spill] sm:$0xff] }
 0x679   : > { %v8084_v29 = vpop.eup %8083 }
 0x67a   : > { %v4654_v31 = vmul.f32 %v8084_v29, %v8082_v28 }
 0x67c   : > { %v8086_v33 = vpop.eup %8085  ;;  %4684 = vst [vmem:[#allocation2 + $0x40] sm:$0xff] %v4654_v31  ;;  %v4686_v34 = vpack.c.bf16 %v4654_v31, %v4654_v31 }
 0x67d   : > { %v8088_v35 = vpop.eup %8087  ;;  %v4666_v37 = vadd.f32 1.0, %v8086_v33  ;;  %v10871_v33 = vld [vmem:[#allocation36_spill] sm:$0xff] }
 0x67e   : > { %v4671_v38 = vadd.f32 1.0, %v8088_v35  ;;  %4912 = vmatmul.mubr.bf16.vlgmr.msra.gmra.mrb[72].mxu0 %v4686_v34  ;;  %4953 = vmatmul.mubr.bf16.vlgmr.msra.gmra.mrb[72].mxu1 %v4686_v34 }
 0x67f   : > { %8093 = vrcp.f32 %v4666_v37  ;;  %5155 = vmatpush1.bf16.msra.mxu0 %v10001_v56  ;;  %5196 = vmatpush1.bf16.msra.mxu1 %v10004_v1  ;;  %v8090_v56 = vpop.eup %8089 }
 0x680   : > { %8095 = vrcp.f32 %v4671_v38  ;;  %5156 = vmatprep.subr.bf16.mxu0 %v10007_v42  ;;  %5197 = vmatprep.subr.bf16.mxu1 %v10010_v9  ;;  %v8092_v1 = vpop.eup %8091  ;;  %v10872_v38 = vld [vmem:[#allocation35_spill] sm:$0xff] }
 0x681   : > { %5186 = vmatprep.mubr.bf16.mxu0 %v10756_v45  ;;  %5227 = vmatprep.mubr.bf16.mxu1 %v10756_v45 }
 0x683   : > { %5157 = vmatpush1.bf16.msra.mxu0 %v10015_v19  ;;  %5198 = vmatpush1.bf16.msra.mxu1 %v10018_v20  ;;  %v4677_v19 = vadd.f32 1.0, %v8090_v56 }
 0x684   : > { %5158 = vmatprep.subr.bf16.mxu0 %v10023_v36  ;;  %5199 = vmatprep.subr.bf16.mxu1 %v10026_v21  ;;  %v10863_v21 = vld [vmem:[#allocation22_spill] sm:$0xff] }
 0x685   : > { %8097 = vrcp.f32 %v4677_v19 }
 0x687   : > { %5159 = vmatpush1.bf16.msra.mxu0 %v10033_v7  ;;  %5200 = vmatpush1.bf16.msra.mxu1 %v10036_v22  ;;  %v10864_v7 = vld [vmem:[#allocation24_spill] sm:$0xff]  ;;  %v10865_v22 = vld [vmem:[#allocation23_spill] sm:$0xff] }
 0x688   : > { %5160 = vmatprep.subr.bf16.mxu0 %v10041_v60  ;;  %5201 = vmatprep.subr.bf16.mxu1 %v10044_v17  ;;  %v10866_v60 = vld [vmem:[#allocation26_spill] sm:$0xff]  ;;  %v10867_v17 = vld [vmem:[#allocation65_spill] sm:$0xff] }
 0x689   : > { %v8094_v42 = vpop.eup %8093 }
 0x68a   : > { %v8096_v9 = vpop.eup %8095  ;;  %v4680_v39 = vmul.f32 %v8094_v42, %v8092_v1  ;;  %v10873_v1 = vld [vmem:[#allocation37_spill] sm:$0xff] }
 0x68b   : > { %v4679_v20 = vmul.f32 %v8096_v9, %v10079_v57  ;;  %5161 = vmatpush1.bf16.msra.mxu0 %v10049_v5  ;;  %5202 = vmatpush1.bf16.msra.mxu1 %v10052_v26  ;;  %v10868_v5 = vld [vmem:[#allocation68_spill] sm:$0xff]  ;;  %v10869_v26 = vld [vmem:[#allocation67_spill] sm:$0xff] }
 0x68c   : > { %5162 = vmatprep.subr.bf16.mxu0 %v10057_v13  ;;  %5203 = vmatprep.subr.bf16.mxu1 %v10060_v24 }
 0x68d   : > { %v10193_v36 = vadd.f32 %v4680_v39, %v4679_v20 }
 0x68f   : > { %8099 = vtanh.f32 %v10193_v36  ;;  %5163 = vmatpush1.bf16.msra.mxu0 %v10066_v59  ;;  %5204 = vmatpush1.bf16.msra.mxu1 %v10863_v21  ;;  %v8098_v13 = vpop.eup %8097 }
 0x690   : > { %5164 = vmatprep.subr.bf16.mxu0 %v10864_v7  ;;  %5205 = vmatprep.subr.bf16.mxu1 %v10865_v22 }
 0x693   : > { %5165 = vmatpush1.bf16.msra.mxu0 %v10866_v60  ;;  %5206 = vmatpush1.bf16.msra.mxu1 %v10867_v17 }
 0x694   : > { %5166 = vmatprep.subr.bf16.mxu0 %v10868_v5  ;;  %5207 = vmatprep.subr.bf16.mxu1 %v10869_v26 }
 0x697   : > { %5167 = vmatpush1.bf16.msra.mxu0 %v10101_v6  ;;  %5208 = vmatpush1.bf16.msra.mxu1 %v10104_v58  ;;  %v10213_v6 = vld [vmem:[%s8683_s2 + $0x4] ss:$16 sps:$4 sm:$0xff]  }
 0x698   : > { %5168 = vmatprep.subr.bf16.mxu0 %v10109_v15  ;;  %5209 = vmatprep.subr.bf16.mxu1 %v10112_v62  ;;  %v10216_v62 = vld [vmem:[%s8683_s2 + $0xc] ss:$16 sps:$4 sm:$0xff]   ;;  %v10229_v58 = vld [vmem:[%s8683_s2 + $0x24] ss:$16 sps:$4 sm:$0xff]  }
 0x699   : > { %v8100_v24 = vpop.eup %8099  ;;  %v10232_v15 = vld [vmem:[%s8683_s2 + $0x2c] ss:$16 sps:$4 sm:$0xff]  }
 0x69a   : > { %v4683_v59 = vmul.f32 %v8100_v24, %v8098_v13 }
 0x69b   : > { %5169 = vmatpush1.bf16.msra.mxu0 %v10117_v18  ;;  %5210 = vmatpush1.bf16.msra.mxu1 %v10120_v54  ;;  %v10219_v18 = vld [vmem:[%s8683_s2] ss:$16 sps:$4 sm:$0xff]   ;;  %v10222_v54 = vld [vmem:[%s8683_s2 + $0x8] ss:$16 sps:$4 sm:$0xff]  }
 0x69c   : > { %4685 = vst [vmem:[#allocation2 + $0x38] sm:$0xff] %v4683_v59  ;;  %v4961_v57 = vpack.c.bf16 %v4683_v59, %v4683_v59  ;;  %5489 = vmatprep.subr.bf16.mxu0 %v10213_v6  ;;  %5530 = vmatprep.subr.bf16.mxu1 %v10216_v62 }
 0x69e   : > { %5187 = vmatmul.mubr.bf16.vlgmr.msra.gmra.mrb[76].mxu0 %v4961_v57  ;;  %5228 = vmatmul.mubr.bf16.vlgmr.msra.gmra.mrb[76].mxu1 %v4961_v57 }
 0x69f   : > { %5521 = vmatprep.mubr.bf16.mxu0 %v10756_v45  ;;  %5562 = vmatprep.mubr.bf16.mxu1 %v10756_v45 }
 0x6a0   : > { %5490 = vmatpush1.bf16.msra.mxu0 %v10219_v18  ;;  %5531 = vmatpush1.bf16.msra.mxu1 %v10222_v54 }
 0x6a1   : > { %5491 = vmatprep.subr.bf16.mxu0 %v10229_v58  ;;  %5532 = vmatprep.subr.bf16.mxu1 %v10232_v15 }
 0x6a4   : > { %5492 = vmatpush1.bf16.msra.mxu0 %v10235_v40  ;;  %5533 = vmatpush1.bf16.msra.mxu1 %v10238_v41 }
 0x6a5   : > { %5493 = vmatprep.subr.bf16.mxu0 %v10245_v43  ;;  %5534 = vmatprep.subr.bf16.mxu1 %v10248_v12 }
 0x6a8   : > { %5494 = vmatpush1.bf16.msra.mxu0 %v10251_v44  ;;  %5535 = vmatpush1.bf16.msra.mxu1 %v10254_v46 }
 0x6a9   : > { %5495 = vmatprep.subr.bf16.mxu0 %v10261_v47  ;;  %5536 = vmatprep.subr.bf16.mxu1 %v10264_v48 }
 0x6ac   : > { %5496 = vmatpush1.bf16.msra.mxu0 %v10267_v14  ;;  %5537 = vmatpush1.bf16.msra.mxu1 %v10270_v27 }
 0x6ad   : > { %5497 = vmatprep.subr.bf16.mxu0 %v10277_v50  ;;  %5538 = vmatprep.subr.bf16.mxu1 %v10280_v52 }
 0x6b0   : > { %5498 = vmatpush1.bf16.msra.mxu0 %v10283_v49  ;;  %5539 = vmatpush1.bf16.msra.mxu1 %v10286_v8 }
 0x6b1   : > { %5499 = vmatprep.subr.bf16.mxu0 %v10293_v16  ;;  %5540 = vmatprep.subr.bf16.mxu1 %v10296_v55 }
 0x6b4   : > { %5500 = vmatpush1.bf16.msra.mxu0 %v10299_v51  ;;  %5541 = vmatpush1.bf16.msra.mxu1 %v10302_v10 }
 0x6b5   : > { %5501 = vmatprep.subr.bf16.mxu0 %v10309_v61  ;;  %5542 = vmatprep.subr.bf16.mxu1 %v10312_v32 }
 0x6b8   : > { %5502 = vmatpush1.bf16.msra.mxu0 %v10315_v4  ;;  %5543 = vmatpush1.bf16.msra.mxu1 %v10318_v23 }
 0x6b9   : > { %5503 = vmatprep.subr.bf16.mxu0 %v10325_v63  ;;  %5544 = vmatprep.subr.bf16.mxu1 %v10328_v11 }
 0x6bc   : > { %5504 = vmatpush1.bf16.msra.mxu0 %v10331_v3  ;;  %5545 = vmatpush1.bf16.msra.mxu1 %v10334_v0 }
 0x6bd   : > { %5764 = vmatprep.subr.bf16.mxu0 %v10341_v53  ;;  %5805 = vmatprep.subr.bf16.mxu1 %v10344_v25 }
 0x751   : > { %v4913_v28 = vpop.f32.mrb[72].mxu0  ;;  %v4954_v29 = vpop.f32.mrb[72].mxu1 }
 0x752   : > { %v5240_v31 = vadd.f32 %v4913_v28, %v10870_v30  ;;  %v5242_v34 = vadd.f32 %v4954_v29, %v10871_v33  ;;  %v4915_v35 = vpop.f32.mrb[73].mxu0  ;;  %v4956_v37 = vpop.f32.mrb[73].mxu1 }
 0x753   : > { %v5241_v56 = vadd.f32 %v4915_v35, %v10872_v38  ;;  %v5243_v42 = vadd.f32 %v4956_v37, %v10873_v1  ;;  %v4917_v9 = vpop.f32.mrb[74].mxu0  ;;  %v4958_v39 = vpop.f32.mrb[74].mxu1 }
 0x754   : > { %v5244_v19 = vsub.f32 0.0, %v5240_v31  ;;  %v4918_v20 = vpop.f32.mrb[75].mxu0  ;;  %v4959_v21 = vpop.f32.mrb[75].mxu1 }
 0x755   : > { %v5249_v7 = vsub.f32 0.0, %v5241_v56  ;;  %v5255_v17 = vsub.f32 0.0, %v5243_v42  ;;  %v10874_v56 = vld [vmem:[#allocation54_spill] sm:$0xff]  ;;  %v10875_v42 = vld [vmem:[#allocation56_spill] sm:$0xff]  ;;  %v10876_v20 = vld [vmem:[#allocation55_spill] sm:$0xff] }
 0x756   : > { %v5245_v22 = vmul.f32 1.442695, %v5244_v19 }
 0x757   : > { %v5250_v60 = vmul.f32 1.442695, %v5249_v7  ;;  %v5256_v5 = vmul.f32 1.442695, %v5255_v17  ;;  %v10877_v7 = vld [vmem:[#allocation58_spill] sm:$0xff] }
 0x758   : > { %8101 = vpow2.f32 %v5245_v22 }
 0x759   : > { %8103 = vpow2.f32 %v5250_v60 }
 0x75a   : > { %8105 = vpow2.f32 %v5256_v5 }
 0x75b   : > { %8107 = vtanh.f32 %v5242_v34 }
 0x762   : > { %v8102_v26 = vpop.eup %8101 }
 0x763   : > { %v8104_v13 = vpop.eup %8103  ;;  %v5247_v24 = vadd.f32 1.0, %v8102_v26 }
 0x764   : > { %v5252_v59 = vadd.f32 1.0, %v8104_v13  ;;  %v8106_v57 = vpop.eup %8105 }
 0x765   : > { %8109 = vrcp.f32 %v5247_v24  ;;  %v8108_v28 = vpop.eup %8107  ;;  %v5258_v33 = vadd.f32 1.0, %v8106_v57 }
 0x766   : > { %8111 = vrcp.f32 %v5252_v59 }
 0x767   : > { %8113 = vrcp.f32 %v5258_v33  ;;  %v10364_v33 = vld [vmem:[%s8689_s21 + $0x8] ss:$16 sps:$4 sm:$0xff]  }
 0x76f   : > { %v8110_v29 = vpop.eup %8109 }
 0x770   : > { %v8112_v30 = vpop.eup %8111  ;;  %v5261_v31 = vmul.f32 %v8110_v29, %v8108_v28 }
 0x771   : > { %v5260_v35 = vmul.f32 %v8112_v30, %v10169_v2  ;;  %v5188_v37 = vpop.f32.mrb[76].mxu0  ;;  %v5229_v38 = vpop.f32.mrb[76].mxu1 }
 0x772   : > { %v5269_v1 = vadd.f32 %v5188_v37, %v10874_v56  ;;  %v5271_v9 = vadd.f32 %v5229_v38, %v10875_v42  ;;  %v5190_v39 = vpop.f32.mrb[77].mxu0  ;;  %v5231_v19 = vpop.f32.mrb[77].mxu1  ;;  %v10367_v56 = vld [vmem:[%s8689_s21 + $0x24] ss:$16 sps:$4 sm:$0xff]  }
 0x773   : > { %v10355_v34 = vadd.f32 %v5261_v31, %v5260_v35  ;;  %v5270_v21 = vadd.f32 %v5190_v39, %v10876_v20  ;;  %v5272_v22 = vadd.f32 %v5231_v19, %v10877_v7  ;;  %v5192_v60 = vpop.f32.mrb[78].mxu0  ;;  %v5233_v17 = vpop.f32.mrb[78].mxu1  ;;  %v10361_v35 = vld [vmem:[%s8689_s21] ss:$16 sps:$4 sm:$0xff]   ;;  %v10386_v7 = vld [vmem:[%s8689_s21 + $0x4c] ss:$16 sps:$4 sm:$0xff]  }
 0x774   : > { %v5273_v2 = vsub.f32 0.0, %v5269_v1  ;;  %v5193_v5 = vpop.f32.mrb[79].mxu0  ;;  %v5234_v26 = vpop.f32.mrb[79].mxu1  ;;  %v10370_v1 = vld [vmem:[%s8689_s21 + $0x2c] ss:$16 sps:$4 sm:$0xff]  }
 0x775   : > { %8115 = vtanh.f32 %v10355_v34  ;;  %v5278_v13 = vsub.f32 0.0, %v5270_v21  ;;  %v5284_v57 = vsub.f32 0.0, %v5272_v22  ;;  %v8114_v28 = vpop.eup %8113  ;;  %v10375_v20 = vld [vmem:[%s8689_s21 + $0x20] ss:$16 sps:$4 sm:$0xff]   ;;  %v10378_v21 = vld [vmem:[%s8689_s21 + $0x28] ss:$16 sps:$4 sm:$0xff]  }
 0x776   : > { %v5274_v24 = vmul.f32 1.442695, %v5273_v2  ;;  %v10393_v22 = vld [vmem:[%s8689_s21 + $0x40] ss:$16 sps:$4 sm:$0xff]   ;;  %v10396_v60 = vld [vmem:[%s8689_s21 + $0x48] ss:$16 sps:$4 sm:$0xff]  }
 0x777   : > { %v5279_v59 = vmul.f32 1.442695, %v5278_v13  ;;  %v5285_v30 = vmul.f32 1.442695, %v5284_v57  ;;  %v10401_v17 = vld [vmem:[%s8689_s21 + $0x64] ss:$16 sps:$4 sm:$0xff]  }
 0x778   : > { %8117 = vpow2.f32 %v5274_v24  ;;  %v10404_v2 = vld [vmem:[%s8689_s21 + $0x6c] ss:$16 sps:$4 sm:$0xff]   ;;  %v10409_v26 = vld [vmem:[%s8689_s21 + $0x60] ss:$16 sps:$4 sm:$0xff]   ;;  %v10412_v13 = vld [vmem:[%s8689_s21 + $0x68] ss:$16 sps:$4 sm:$0xff]  }
 0x779   : > { %8119 = vpow2.f32 %v5279_v59  ;;  %v10417_v59 = vld [vmem:[%s8689_s21 + $0x84] ss:$16 sps:$4 sm:$0xff]   ;;  %v10420_v57 = vld [vmem:[%s8689_s21 + $0x8c] ss:$16 sps:$4 sm:$0xff]  }
 0x77a   : > { %8121 = vpow2.f32 %v5285_v30 }
 0x77b   : > { %8123 = vtanh.f32 %v5271_v9  ;;  %v10383_v9 = vld [vmem:[%s8689_s21 + $0x44] ss:$16 sps:$4 sm:$0xff]  }
 0x77f   : > { %v8116_v29 = vpop.eup %8115 }
 0x780   : > { %v5264_v31 = vmul.f32 %v8116_v29, %v8114_v28 }
 0x782   : > { %v8118_v37 = vpop.eup %8117  ;;  %5294 = vst [vmem:[#allocation2 + $0x50] sm:$0xff] %v5264_v31  ;;  %v5296_v38 = vpack.c.bf16 %v5264_v31, %v5264_v31 }
 0x783   : > { %v8120_v42 = vpop.eup %8119  ;;  %v5276_v39 = vadd.f32 1.0, %v8118_v37 }
 0x784   : > { %v5281_v19 = vadd.f32 1.0, %v8120_v42  ;;  %5522 = vmatmul.mubr.bf16.vlgmr.msra.gmra.mrb[80].mxu0 %v5296_v38  ;;  %5563 = vmatmul.mubr.bf16.vlgmr.msra.gmra.mrb[80].mxu1 %v5296_v38  ;;  %v8122_v5 = vpop.eup %8121  ;;  %v10426_v38 = vld [vmem:[%s8689_s21 + $0x80] ss:$16 sps:$4 sm:$0xff]   ;;  %v10429_v42 = vld [vmem:[%s8689_s21 + $0x88] ss:$16 sps:$4 sm:$0xff]  }
 0x785   : > { %8125 = vrcp.f32 %v5276_v39  ;;  %5765 = vmatpush1.bf16.msra.mxu0 %v10361_v35  ;;  %5806 = vmatpush1.bf16.msra.mxu1 %v10364_v33  ;;  %v8124_v24 = vpop.eup %8123  ;;  %v5287_v31 = vadd.f32 1.0, %v8122_v5  ;;  %10878 = vst [vmem:[#allocation69_spill] sm:$0xff] %v10429_v42  ;;  %v10434_v39 = vld [vmem:[%s8689_s21 + $0xa4] ss:$16 sps:$4 sm:$0xff]   ;;  %v10445_v5 = vld [vmem:[%s8689_s21 + $0xa0] ss:$16 sps:$4 sm:$0xff]  }
 0x786   : > { %8127 = vrcp.f32 %v5281_v19  ;;  %5766 = vmatprep.subr.bf16.mxu0 %v10367_v56  ;;  %5807 = vmatprep.subr.bf16.mxu1 %v10370_v1  ;;  %10879 = vst [vmem:[#allocation19_spill] sm:$0xff] %v10434_v39  ;;  %v10437_v19 = vld [vmem:[%s8689_s21 + $0xac] ss:$16 sps:$4 sm:$0xff]   ;;  %10881 = vst [vmem:[#allocation21_spill] sm:$0xff] %v10445_v5 }
 0x787   : > { %5796 = vmatprep.mubr.bf16.mxu0 %v10756_v45  ;;  %5837 = vmatprep.mubr.bf16.mxu1 %v10756_v45  ;;  %10880 = vst [vmem:[#allocation20_spill] sm:$0xff] %v10437_v19  ;;  %8129 = vrcp.f32 %v5287_v31  ;;  %v10464_v31 = vld [vmem:[%s8689_s21 + $0xc8] ss:$16 sps:$4 sm:$0xff]  }
 0x789   : > { %5767 = vmatpush1.bf16.msra.mxu0 %v10375_v20  ;;  %5808 = vmatpush1.bf16.msra.mxu1 %v10378_v21 }
 0x78a   : > { %5768 = vmatprep.subr.bf16.mxu0 %v10383_v9  ;;  %5809 = vmatprep.subr.bf16.mxu1 %v10386_v7 }
 0x78d   : > { %5769 = vmatpush1.bf16.msra.mxu0 %v10393_v22  ;;  %5810 = vmatpush1.bf16.msra.mxu1 %v10396_v60 }
 0x78e   : > { %5770 = vmatprep.subr.bf16.mxu0 %v10401_v17  ;;  %5811 = vmatprep.subr.bf16.mxu1 %v10404_v2 }
 0x78f   : > { %v8126_v28 = vpop.eup %8125 }
 0x790   : > { %v8128_v29 = vpop.eup %8127  ;;  %v5290_v30 = vmul.f32 %v8126_v28, %v8124_v24  ;;  %v10448_v24 = vld [vmem:[%s8689_s21 + $0xa8] ss:$16 sps:$4 sm:$0xff]   ;;  %v10453_v28 = vld [vmem:[%s8689_s21 + $0xc4] ss:$16 sps:$4 sm:$0xff]  }
 0x791   : > { %v5289_v37 = vmul.f32 %v8128_v29, %v10193_v36  ;;  %5771 = vmatpush1.bf16.msra.mxu0 %v10409_v26  ;;  %5812 = vmatpush1.bf16.msra.mxu1 %v10412_v13  ;;  %10882 = vst [vmem:[#allocation70_spill] sm:$0xff] %v10448_v24  ;;  %10883 = vst [vmem:[#allocation72_spill] sm:$0xff] %v10453_v28  ;;  %v10456_v29 = vld [vmem:[%s8689_s21 + $0xcc] ss:$16 sps:$4 sm:$0xff]  }
 0x792   : > { %5772 = vmatprep.subr.bf16.mxu0 %v10417_v59  ;;  %5813 = vmatprep.subr.bf16.mxu1 %v10420_v57  ;;  %10884 = vst [vmem:[#allocation71_spill] sm:$0xff] %v10456_v29 }
 0x793   : > { %v10439_v36 = vadd.f32 %v5290_v30, %v5289_v37  ;;  %v10461_v30 = vld [vmem:[%s8689_s21 + $0xc0] ss:$16 sps:$4 sm:$0xff]   ;;  %v10469_v37 = vld [vmem:[%s8689_s21 + $0xe4] ss:$16 sps:$4 sm:$0xff]  }
 0x795   : > { %8131 = vtanh.f32 %v10439_v36  ;;  %5773 = vmatpush1.bf16.msra.mxu0 %v10426_v38  ;;  %5814 = vmatpush1.bf16.msra.mxu1 %v10429_v42 }
 0x796   : > { %5774 = vmatprep.subr.bf16.mxu0 %v10434_v39  ;;  %5815 = vmatprep.subr.bf16.mxu1 %v10437_v19  ;;  %v10472_v39 = vld [vmem:[%s8689_s21 + $0xec] ss:$16 sps:$4 sm:$0xff]   ;;  %v10477_v19 = vld [vmem:[%s8689_s21 + $0xe0] ss:$16 sps:$4 sm:$0xff]  }
 0x799   : > { %5775 = vmatpush1.bf16.msra.mxu0 %v10445_v5  ;;  %5816 = vmatpush1.bf16.msra.mxu1 %v10448_v24  ;;  %v10480_v5 = vld [vmem:[%s8689_s21 + $0xe8] ss:$16 sps:$4 sm:$0xff]   ;;  %v8130_v24 = vpop.eup %8129 }
 0x79a   : > { %5776 = vmatprep.subr.bf16.mxu0 %v10453_v28  ;;  %5817 = vmatprep.subr.bf16.mxu1 %v10456_v29 }
 0x79d   : > { %5777 = vmatpush1.bf16.msra.mxu0 %v10461_v30  ;;  %5818 = vmatpush1.bf16.msra.mxu1 %v10464_v31 }
 0x79e   : > { %5778 = vmatprep.subr.bf16.mxu0 %v10469_v37  ;;  %5819 = vmatprep.subr.bf16.mxu1 %v10472_v39 }
 0x79f   : > { %v8132_v28 = vpop.eup %8131 }
 0x7a0   : > { %v5293_v42 = vmul.f32 %v8132_v28, %v8130_v24  ;;  %v10889_v24 = vld [vmem:[#allocation49_spill] sm:$0xff] }
 0x7a1   : > { %5779 = vmatpush1.bf16.msra.mxu0 %v10477_v19  ;;  %5820 = vmatpush1.bf16.msra.mxu1 %v10480_v5 }
 0x7a2   : > { %5295 = vst [vmem:[#allocation2 + $0x28] sm:$0xff] %v5293_v42  ;;  %v5571_v29 = vpack.c.bf16 %v5293_v42, %v5293_v42  ;;  %6099 = vmatprep.subr.bf16.mxu0 %v10213_v6  ;;  %6140 = vmatprep.subr.bf16.mxu1 %v10216_v62 }
 0x7a4   : > { %5797 = vmatmul.mubr.bf16.vlgmr.msra.gmra.mrb[84].mxu0 %v5571_v29  ;;  %5838 = vmatmul.mubr.bf16.vlgmr.msra.gmra.mrb[84].mxu1 %v5571_v29  ;;  %v10890_v29 = vld [vmem:[#allocation52_spill] sm:$0xff] }
 0x7a5   : > { %6100 = vmatpush1.bf16.msra.mxu0 %v10219_v18  ;;  %6141 = vmatpush1.bf16.msra.mxu1 %v10222_v54  ;;  %v10885_v18 = vld [vmem:[#allocation38_spill] sm:$0xff] }
 0x7a6   : > { %6101 = vmatprep.subr.bf16.mxu0 %v10229_v58  ;;  %6142 = vmatprep.subr.bf16.mxu1 %v10232_v15  ;;  %v10886_v58 = vld [vmem:[#allocation40_spill] sm:$0xff] }
 0x7a7   : > { %6131 = vmatprep.mubr.bf16.mxu0 %v10756_v45  ;;  %6172 = vmatprep.mubr.bf16.mxu1 %v10756_v45 }
 0x7a9   : > { %6102 = vmatpush1.bf16.msra.mxu0 %v10235_v40  ;;  %6143 = vmatpush1.bf16.msra.mxu1 %v10238_v41 }
 0x7aa   : > { %6103 = vmatprep.subr.bf16.mxu0 %v10245_v43  ;;  %6144 = vmatprep.subr.bf16.mxu1 %v10248_v12  ;;  %v10887_v43 = vld [vmem:[#allocation39_spill] sm:$0xff] }
 0x7ad   : > { %6104 = vmatpush1.bf16.msra.mxu0 %v10251_v44  ;;  %6145 = vmatpush1.bf16.msra.mxu1 %v10254_v46  ;;  %v10888_v44 = vld [vmem:[#allocation42_spill] sm:$0xff] }
 0x7ae   : > { %6105 = vmatprep.subr.bf16.mxu0 %v10261_v47  ;;  %6146 = vmatprep.subr.bf16.mxu1 %v10264_v48 }
 0x7b1   : > { %6106 = vmatpush1.bf16.msra.mxu0 %v10267_v14  ;;  %6147 = vmatpush1.bf16.msra.mxu1 %v10270_v27 }
 0x7b2   : > { %6107 = vmatprep.subr.bf16.mxu0 %v10277_v50  ;;  %6148 = vmatprep.subr.bf16.mxu1 %v10280_v52 }
 0x7b5   : > { %6108 = vmatpush1.bf16.msra.mxu0 %v10283_v49  ;;  %6149 = vmatpush1.bf16.msra.mxu1 %v10286_v8 }
 0x7b6   : > { %6109 = vmatprep.subr.bf16.mxu0 %v10293_v16  ;;  %6150 = vmatprep.subr.bf16.mxu1 %v10296_v55 }
 0x7b9   : > { %6110 = vmatpush1.bf16.msra.mxu0 %v10299_v51  ;;  %6151 = vmatpush1.bf16.msra.mxu1 %v10302_v10 }
 0x7ba   : > { %6111 = vmatprep.subr.bf16.mxu0 %v10309_v61  ;;  %6152 = vmatprep.subr.bf16.mxu1 %v10312_v32 }
 0x7bd   : > { %6112 = vmatpush1.bf16.msra.mxu0 %v10315_v4  ;;  %6153 = vmatpush1.bf16.msra.mxu1 %v10318_v23 }
 0x7be   : > { %6113 = vmatprep.subr.bf16.mxu0 %v10325_v63  ;;  %6154 = vmatprep.subr.bf16.mxu1 %v10328_v11 }
 0x7c1   : > { %6114 = vmatpush1.bf16.msra.mxu0 %v10331_v3  ;;  %6155 = vmatpush1.bf16.msra.mxu1 %v10334_v0 }
 0x7c2   : > { %6374 = vmatprep.subr.bf16.mxu0 %v10341_v53  ;;  %6415 = vmatprep.subr.bf16.mxu1 %v10344_v25 }
 0x857   : > { %v5523_v6 = vpop.f32.mrb[80].mxu0  ;;  %v5564_v62 = vpop.f32.mrb[80].mxu1 }
 0x858   : > { %v5850_v54 = vadd.f32 %v5523_v6, %v10885_v18  ;;  %v5852_v15 = vadd.f32 %v5564_v62, %v10886_v58  ;;  %v5525_v40 = vpop.f32.mrb[81].mxu0  ;;  %v5566_v41 = vpop.f32.mrb[81].mxu1  ;;  %v10891_v58 = vld [vmem:[#allocation51_spill] sm:$0xff] }
 0x859   : > { %v5851_v12 = vadd.f32 %v5525_v40, %v10887_v43  ;;  %v5853_v46 = vadd.f32 %v5566_v41, %v10888_v44  ;;  %v5527_v47 = vpop.f32.mrb[82].mxu0  ;;  %v5568_v48 = vpop.f32.mrb[82].mxu1  ;;  %v10892_v40 = vld [vmem:[#allocation53_spill] sm:$0xff] }
 0x85a   : > { %v5854_v14 = vsub.f32 0.0, %v5850_v54  ;;  %v5528_v27 = vpop.f32.mrb[83].mxu0  ;;  %v5569_v50 = vpop.f32.mrb[83].mxu1 }
 0x85b   : > { %v5859_v52 = vsub.f32 0.0, %v5851_v12  ;;  %v5865_v16 = vsub.f32 0.0, %v5853_v46 }
 0x85c   : > { %v5855_v49 = vmul.f32 1.442695, %v5854_v14 }
 0x85d   : > { %v5860_v8 = vmul.f32 1.442695, %v5859_v52  ;;  %v5866_v55 = vmul.f32 1.442695, %v5865_v16 }
 0x85e   : > { %8133 = vpow2.f32 %v5855_v49 }
 0x85f   : > { %8135 = vpow2.f32 %v5860_v8 }
 0x860   : > { %8137 = vpow2.f32 %v5866_v55 }
 0x861   : > { %8139 = vtanh.f32 %v5852_v15 }
 0x868   : > { %v8134_v51 = vpop.eup %8133 }
 0x869   : > { %v8136_v10 = vpop.eup %8135  ;;  %v5857_v61 = vadd.f32 1.0, %v8134_v51 }
 0x86a   : > { %v5862_v32 = vadd.f32 1.0, %v8136_v10  ;;  %v8138_v4 = vpop.eup %8137 }
 0x86b   : > { %8141 = vrcp.f32 %v5857_v61  ;;  %v8140_v23 = vpop.eup %8139  ;;  %v5868_v0 = vadd.f32 1.0, %v8138_v4 }
 0x86c   : > { %8143 = vrcp.f32 %v5862_v32 }
 0x86d   : > { %8145 = vrcp.f32 %v5868_v0  ;;  %v10903_v0 = vld [vmem:[#allocation45_spill] sm:$0xff] }
 0x875   : > { %v8142_v63 = vpop.eup %8141 }
 0x876   : > { %v8144_v11 = vpop.eup %8143  ;;  %v5871_v3 = vmul.f32 %v8142_v63, %v8140_v23 }
 0x877   : > { %v5870_v53 = vmul.f32 %v8144_v11, %v10355_v34  ;;  %v5798_v25 = vpop.f32.mrb[84].mxu0  ;;  %v5839_v42 = vpop.f32.mrb[84].mxu1 }
 0x878   : > { %v5879_v28 = vadd.f32 %v5798_v25, %v10889_v24  ;;  %v5881_v6 = vadd.f32 %v5839_v42, %v10890_v29  ;;  %v5800_v62 = vpop.f32.mrb[85].mxu0  ;;  %v5841_v18 = vpop.f32.mrb[85].mxu1 }
 0x879   : > { %v10529_v54 = vadd.f32 %v5871_v3, %v5870_v53  ;;  %v5880_v15 = vadd.f32 %v5800_v62, %v10891_v58  ;;  %v5882_v41 = vadd.f32 %v5841_v18, %v10892_v40  ;;  %v5802_v43 = vpop.f32.mrb[86].mxu0  ;;  %v5843_v12 = vpop.f32.mrb[86].mxu1  ;;  %v10902_v3 = vld [vmem:[#allocation43_spill] sm:$0xff] }
 0x87a   : > { %v5883_v44 = vsub.f32 0.0, %v5879_v28  ;;  %v5803_v46 = vpop.f32.mrb[87].mxu0  ;;  %v5844_v34 = vpop.f32.mrb[87].mxu1 }
 0x87b   : > { %8147 = vtanh.f32 %v10529_v54  ;;  %v5888_v47 = vsub.f32 0.0, %v5880_v15  ;;  %v5894_v27 = vsub.f32 0.0, %v5882_v41  ;;  %v8146_v50 = vpop.eup %8145 }
 0x87c   : > { %v5884_v48 = vmul.f32 1.442695, %v5883_v44 }
 0x87d   : > { %v5889_v14 = vmul.f32 1.442695, %v5888_v47  ;;  %v5895_v49 = vmul.f32 1.442695, %v5894_v27 }
 0x87e   : > { %8149 = vpow2.f32 %v5884_v48 }
 0x87f   : > { %8151 = vpow2.f32 %v5889_v14 }
 0x880   : > { %8153 = vpow2.f32 %v5895_v49  ;;  %v10905_v49 = vld [vmem:[#allocation48_spill] sm:$0xff] }
 0x881   : > { %8155 = vtanh.f32 %v5881_v6 }
 0x885   : > { %v8148_v52 = vpop.eup %8147 }
 0x886   : > { %v5874_v8 = vmul.f32 %v8148_v52, %v8146_v50  ;;  %v10904_v50 = vld [vmem:[#allocation46_spill] sm:$0xff] }
 0x888   : > { %v8150_v16 = vpop.eup %8149  ;;  %5904 = vst [vmem:[#allocation2 + $0x60] sm:$0xff] %v5874_v8  ;;  %v5906_v55 = vpack.c.bf16 %v5874_v8, %v5874_v8 }
 0x889   : > { %v8152_v51 = vpop.eup %8151  ;;  %v5886_v10 = vadd.f32 1.0, %v8150_v16 }
 0x88a   : > { %v5891_v61 = vadd.f32 1.0, %v8152_v51  ;;  %6132 = vmatmul.mubr.bf16.vlgmr.msra.gmra.mrb[88].mxu0 %v5906_v55  ;;  %6173 = vmatmul.mubr.bf16.vlgmr.msra.gmra.mrb[88].mxu1 %v5906_v55 }
 0x88b   : > { %8157 = vrcp.f32 %v5886_v10  ;;  %6375 = vmatpush1.bf16.msra.mxu0 %v10361_v35  ;;  %6416 = vmatpush1.bf16.msra.mxu1 %v10364_v33  ;;  %v8154_v35 = vpop.eup %8153  ;;  %v10906_v10 = vld [vmem:[#allocation47_spill] sm:$0xff] }
 0x88c   : > { %8159 = vrcp.f32 %v5891_v61  ;;  %6376 = vmatprep.subr.bf16.mxu0 %v10367_v56  ;;  %6417 = vmatprep.subr.bf16.mxu1 %v10370_v1  ;;  %v8156_v33 = vpop.eup %8155 }
 0x88d   : > { %6406 = vmatprep.mubr.bf16.mxu0 %v10756_v45  ;;  %6447 = vmatprep.mubr.bf16.mxu1 %v10756_v45 }
 0x88f   : > { %6377 = vmatpush1.bf16.msra.mxu0 %v10375_v20  ;;  %6418 = vmatpush1.bf16.msra.mxu1 %v10378_v21  ;;  %v5897_v20 = vadd.f32 1.0, %v8154_v35  ;;  %v10907_v35 = vld [vmem:[#allocation50_spill] sm:$0xff] }
 0x890   : > { %6378 = vmatprep.subr.bf16.mxu0 %v10383_v9  ;;  %6419 = vmatprep.subr.bf16.mxu1 %v10386_v7  ;;  %v10893_v7 = vld [vmem:[#allocation69_spill] sm:$0xff] }
 0x891   : > { %8161 = vrcp.f32 %v5897_v20 }
 0x893   : > { %6379 = vmatpush1.bf16.msra.mxu0 %v10393_v22  ;;  %6420 = vmatpush1.bf16.msra.mxu1 %v10396_v60  ;;  %v10894_v22 = vld [vmem:[#allocation19_spill] sm:$0xff]  ;;  %v10895_v60 = vld [vmem:[#allocation20_spill] sm:$0xff] }
 0x894   : > { %6380 = vmatprep.subr.bf16.mxu0 %v10401_v17  ;;  %6421 = vmatprep.subr.bf16.mxu1 %v10404_v2  ;;  %v10896_v17 = vld [vmem:[#allocation21_spill] sm:$0xff]  ;;  %v10897_v2 = vld [vmem:[#allocation70_spill] sm:$0xff] }
 0x895   : > { %v8158_v56 = vpop.eup %8157 }
 0x896   : > { %v8160_v45 = vpop.eup %8159  ;;  %v5900_v1 = vmul.f32 %v8158_v56, %v8156_v33 }
 0x897   : > { %v5899_v21 = vmul.f32 %v8160_v45, %v10439_v36  ;;  %6381 = vmatpush1.bf16.msra.mxu0 %v10409_v26  ;;  %6422 = vmatpush1.bf16.msra.mxu1 %v10412_v13  ;;  %v10898_v26 = vld [vmem:[#allocation72_spill] sm:$0xff]  ;;  %v10899_v13 = vld [vmem:[#allocation71_spill] sm:$0xff] }
 0x898   : > { %6382 = vmatprep.subr.bf16.mxu0 %v10417_v59  ;;  %6423 = vmatprep.subr.bf16.mxu1 %v10420_v57 }
 0x899   : > { %v10553_v9 = vadd.f32 %v5900_v1, %v5899_v21 }
 0x89b   : > { %8163 = vtanh.f32 %v10553_v9  ;;  %6383 = vmatpush1.bf16.msra.mxu0 %v10426_v38  ;;  %6424 = vmatpush1.bf16.msra.mxu1 %v10893_v7  ;;  %v8162_v59 = vpop.eup %8161 }
 0x89c   : > { %6384 = vmatprep.subr.bf16.mxu0 %v10894_v22  ;;  %6425 = vmatprep.subr.bf16.mxu1 %v10895_v60 }
 0x89f   : > { %6385 = vmatpush1.bf16.msra.mxu0 %v10896_v17  ;;  %6426 = vmatpush1.bf16.msra.mxu1 %v10897_v2 }
 0x8a0   : > { %6386 = vmatprep.subr.bf16.mxu0 %v10898_v26  ;;  %6427 = vmatprep.subr.bf16.mxu1 %v10899_v13 }
 0x8a3   : > { %6387 = vmatpush1.bf16.msra.mxu0 %v10461_v30  ;;  %6428 = vmatpush1.bf16.msra.mxu1 %v10464_v31  ;;  %v10900_v30 = vld [vmem:[#allocation41_spill] sm:$0xff]  ;;  %v10901_v31 = vld [vmem:[#allocation44_spill] sm:$0xff] }
 0x8a4   : > { %6388 = vmatprep.subr.bf16.mxu0 %v10469_v37  ;;  %6429 = vmatprep.subr.bf16.mxu1 %v10472_v39 }
 0x8a5   : > { %v8164_v57 = vpop.eup %8163 }
 0x8a6   : > { %v5903_v38 = vmul.f32 %v8164_v57, %v8162_v59 }
 0x8a7   : > { %6389 = vmatpush1.bf16.msra.mxu0 %v10477_v19  ;;  %6430 = vmatpush1.bf16.msra.mxu1 %v10480_v5 }
 0x8a8   : > { %5905 = vst [vmem:[#allocation2 + $0x18] sm:$0xff] %v5903_v38  ;;  %v6181_v36 = vpack.c.bf16 %v5903_v38, %v5903_v38 }
 0x8aa   : > { %6407 = vmatmul.mubr.bf16.vlgmr.msra.gmra.mrb[92].mxu0 %v6181_v36  ;;  %6448 = vmatmul.mubr.bf16.vlgmr.msra.gmra.mrb[92].mxu1 %v6181_v36 }
 0x95d   : > { %v6133_v32 = vpop.f32.mrb[88].mxu0  ;;  %v6174_v4 = vpop.f32.mrb[88].mxu1 }
 0x95e   : > { %v6460_v23 = vadd.f32 %v6133_v32, %v10900_v30  ;;  %v6462_v63 = vadd.f32 %v6174_v4, %v10901_v31  ;;  %v6135_v11 = vpop.f32.mrb[89].mxu0  ;;  %v6176_v37 = vpop.f32.mrb[89].mxu1 }
 0x95f   : > { %v6461_v39 = vadd.f32 %v6135_v11, %v10902_v3  ;;  %v6463_v53 = vadd.f32 %v6176_v37, %v10903_v0  ;;  %v6137_v25 = vpop.f32.mrb[90].mxu0  ;;  %v6178_v19 = vpop.f32.mrb[90].mxu1 }
 0x960   : > { %v6464_v42 = vsub.f32 0.0, %v6460_v23  ;;  %v6138_v5 = vpop.f32.mrb[91].mxu0  ;;  %v6179_v24 = vpop.f32.mrb[91].mxu1  ;;  %v6541_v25 = vld [vmem:[%s10698_s5 + $0x88] sm:$0xff] (!%p7412_p4) }
 0x961   : > { %v6469_v28 = vsub.f32 0.0, %v6461_v39  ;;  %v6475_v62 = vsub.f32 0.0, %v6463_v53  ;;  %v6540_v53 = vld [vmem:[%s10698_s5 + $0x80] sm:$0xff] (!%p7412_p4)  ;;  %v6542_v5 = vld [vmem:[%s10698_s5 + $0x90] sm:$0xff] (!%p7412_p4)  ;;  %v6543_v24 = vld [vmem:[%s10698_s5 + $0x98] sm:$0xff] (!%p7412_p4) }
 0x962   : > { %v6465_v29 = vmul.f32 1.442695, %v6464_v42  ;;  %v7455_v19 = vpack.c.bf16 (!%p7412_p4), %v6541_v25, %v6540_v53  ;;  %v6525_v42 = vld [vmem:[%s10698_s5 + $0x8] sm:$0xff] (!%p7412_p4) }
 0x963   : > { %v6470_v6 = vmul.f32 1.442695, %v6469_v28  ;;  %v6476_v18 = vmul.f32 1.442695, %v6475_v62  ;;  %v6527_v62 = vld [vmem:[%s10698_s5 + $0x18] sm:$0xff] (!%p7412_p4) }
 0x964   : > { %8165 = vpow2.f32 %v6465_v29  ;;  %v7459_v29 = vpack.c.bf16 (!%p7412_p4), %v6543_v24, %v6542_v5  ;;  %7456 = vmatprep.subr.bf16.mxu0 (!%p7412_p4), %v7455_v19 }
 0x965   : > { %8167 = vpow2.f32 %v6470_v6  ;;  %v6526_v6 = vld [vmem:[%s10698_s5 + $0x10] sm:$0xff] (!%p7412_p4) }
 0x966   : > { %8169 = vpow2.f32 %v6476_v18  ;;  %v6544_v18 = vld [vmem:[%s10698_s5 + $0xa0] sm:$0xff] (!%p7412_p4) }
 0x967   : > { %8171 = vtanh.f32 %v6462_v63 }
 0x96e   : > { %v8166_v58 = vpop.eup %8165 }
 0x96f   : > { %v8168_v15 = vpop.eup %8167  ;;  %v6467_v40 = vadd.f32 1.0, %v8166_v58  ;;  %v6545_v58 = vld [vmem:[%s10698_s5 + $0xa8] sm:$0xff] (!%p7412_p4) }
 0x970   : > { %v6472_v41 = vadd.f32 1.0, %v8168_v15  ;;  %v8170_v43 = vpop.eup %8169  ;;  %v7461_v15 = vpack.c.bf16 (!%p7412_p4), %v6527_v62, %v6526_v6 }
 0x971   : > { %8173 = vrcp.f32 %v6467_v40  ;;  %v8172_v12 = vpop.eup %8171  ;;  %v6478_v47 = vadd.f32 1.0, %v8170_v43  ;;  %v7463_v40 = vpack.c.bf16 (!%p7412_p4), %v6545_v58, %v6544_v18  ;;  %v6529_v43 = vld [vmem:[%s10698_s5 + $0x28] sm:$0xff] (!%p7412_p4) }
 0x972   : > { %8175 = vrcp.f32 %v6472_v41  ;;  %v6528_v41 = vld [vmem:[%s10698_s5 + $0x20] sm:$0xff] (!%p7412_p4) }
 0x973   : > { %8177 = vrcp.f32 %v6478_v47  ;;  %v6530_v47 = vld [vmem:[%s10698_s5 + $0x30] sm:$0xff] (!%p7412_p4) }
 0x97b   : > { %v8174_v44 = vpop.eup %8173 }
 0x97c   : > { %v8176_v46 = vpop.eup %8175  ;;  %v6481_v34 = vmul.f32 %v8174_v44, %v8172_v12  ;;  %v6546_v12 = vld [vmem:[%s10698_s5 + $0xb0] sm:$0xff] (!%p7412_p4)  ;;  %v6547_v44 = vld [vmem:[%s10698_s5 + $0xb8] sm:$0xff] (!%p7412_p4) }
 0x97d   : > { %v6480_v48 = vmul.f32 %v8176_v46, %v10529_v54  ;;  %v6408_v14 = vpop.f32.mrb[92].mxu0  ;;  %v6449_v27 = vpop.f32.mrb[92].mxu1  ;;  %v7465_v46 = vpack.c.bf16 (!%p7412_p4), %v6529_v43, %v6528_v41 }
 0x97e   : > { %v6489_v52 = vadd.f32 %v6408_v14, %v10904_v50  ;;  %v6491_v8 = vadd.f32 %v6449_v27, %v10905_v49  ;;  %v6410_v16 = vpop.f32.mrb[93].mxu0  ;;  %v6451_v55 = vpop.f32.mrb[93].mxu1  ;;  %v6548_v14 = vld [vmem:[%s10698_s5 + $0xc0] sm:$0xff] (!%p7412_p4)  ;;  %v6549_v27 = vld [vmem:[%s10698_s5 + $0xc8] sm:$0xff] (!%p7412_p4)  ;;  %v6521_v50 = vld [vmem:[#allocation2 + $0x78] sm:$0xff] (!%p7412_p4) }
 0x97f   : > { %v6482_v51 = vadd.f32 %v6481_v34, %v6480_v48  ;;  %v6490_v61 = vadd.f32 %v6410_v16, %v10906_v10  ;;  %v6492_v33 = vadd.f32 %v6451_v55, %v10907_v35  ;;  %v6412_v56 = vpop.f32.mrb[94].mxu0  ;;  %v6453_v45 = vpop.f32.mrb[94].mxu1  ;;  %v7467_v34 = vpack.c.bf16 (!%p7412_p4), %v6547_v44, %v6546_v12  ;;  %v6531_v48 = vld [vmem:[%s10698_s5 + $0x38] sm:$0xff] (!%p7412_p4)  ;;  %v6532_v16 = vld [vmem:[%s10698_s5 + $0x40] sm:$0xff] (!%p7412_p4)  ;;  %v6533_v55 = vld [vmem:[%s10698_s5 + $0x48] sm:$0xff] (!%p7412_p4) }
 0x980   : > { %v6493_v1 = vsub.f32 0.0, %v6489_v52  ;;  %v6413_v20 = vpop.f32.mrb[95].mxu0  ;;  %v6454_v21 = vpop.f32.mrb[95].mxu1  ;;  %v6523_v52 = vmax.f32 (!%p7412_p4), %v6521_v50, 0.0  ;;  %v7469_v49 = vpack.c.bf16 (!%p7412_p4), %v6531_v48, %v6530_v47  ;;  %v6551_v10 = vld [vmem:[%s10698_s5 + $0xd8] sm:$0xff] (!%p7412_p4)  ;;  %v6552_v45 = vld [vmem:[%s10698_s5 + $0xe0] sm:$0xff] (!%p7412_p4) }
 0x981   : > { %8179 = vtanh.f32 %v6482_v51  ;;  %v6498_v54 = vsub.f32 0.0, %v6490_v61  ;;  %v6504_v60 = vsub.f32 0.0, %v6492_v33  ;;  %v8178_v17 = vpop.eup %8177  ;;  %v6550_v51 = vld [vmem:[%s10698_s5 + $0xd0] sm:$0xff] (!%p7412_p4)  ;;  %v7473_v61 = vpack.c.bf16 (!%p7412_p4), %v6533_v55, %v6532_v16  ;;  %v6535_v56 = vld [vmem:[%s10698_s5 + $0x58] sm:$0xff] (!%p7412_p4) }
 0x982   : > { %v6494_v7 = vmul.f32 1.442695, %v6493_v1  ;;  %6627 = vmatprep.mubr.f32.mxu0 (!%p7412_p4), %v6523_v52  ;;  %v7475_v35 = vpack.c.bf16 (!%p7412_p4), %v6551_v10, %v6550_v51  ;;  %v6534_v33 = vld [vmem:[%s10698_s5 + $0x50] sm:$0xff] (!%p7412_p4)  ;;  %v6553_v1 = vld [vmem:[%s10698_s5 + $0xe8] sm:$0xff] (!%p7412_p4) }
 0x983   : > { %v6499_v22 = vmul.f32 1.442695, %v6498_v54  ;;  %v6505_v26 = vmul.f32 1.442695, %v6504_v60  ;;  %v7477_v20 = vpack.c.bf16 (!%p7412_p4), %v6535_v56, %v6534_v33  ;;  %v7479_v21 = vpack.c.bf16 (!%p7412_p4), %v6553_v1, %v6552_v45  ;;  %v6536_v54 = vld [vmem:[%s10698_s5 + $0x60] sm:$0xff] (!%p7412_p4)  ;;  %v6555_v60 = vld [vmem:[%s10698_s5 + $0xf8] sm:$0xff] (!%p7412_p4) }
 0x984   : > { %8181 = vpow2.f32 %v6494_v7  ;;  %v6537_v7 = vld [vmem:[%s10698_s5 + $0x68] sm:$0xff] (!%p7412_p4) }
 0x985   : > { %8183 = vpow2.f32 %v6499_v22  ;;  %v6554_v22 = vld [vmem:[%s10698_s5 + $0xf0] sm:$0xff] (!%p7412_p4) }
 0x986   : > { %8185 = vpow2.f32 %v6505_v26  ;;  %v6538_v26 = vld [vmem:[%s10698_s5 + $0x70] sm:$0xff] (!%p7412_p4) }
 0x987   : > { %8187 = vtanh.f32 %v6491_v8  ;;  %v7471_v8 = vpack.c.bf16 (!%p7412_p4), %v6549_v27, %v6548_v14 }
 0x98b   : > { %v8180_v2 = vpop.eup %8179 }
 0x98c   : > { %v6484_v13 = vmul.f32 %v8180_v2, %v8178_v17  ;;  %v7481_v17 = vpack.c.bf16 (!%p7412_p4), %v6537_v7, %v6536_v54  ;;  %v7483_v2 = vpack.c.bf16 (!%p7412_p4), %v6555_v60, %v6554_v22 }
 0x98e   : > { %v8182_v59 = vpop.eup %8181  ;;  %6514 = vst [vmem:[#allocation2 + $0x70] sm:$0xff] %v6484_v13  ;;  %v6539_v13 = vld [vmem:[%s10698_s5 + $0x78] sm:$0xff] (!%p7412_p4) }
 0x98f   : > { %v8184_v57 = vpop.eup %8183  ;;  %v6496_v38 = vadd.f32 1.0, %v8182_v59  ;;  %v7485_v59 = vpack.c.bf16 (!%p7412_p4), %v6539_v13, %v6538_v26 }
 0x990   : > { %v6501_v36 = vadd.f32 1.0, %v8184_v57  ;;  %v8186_v32 = vpop.eup %8185 }
 0x991   : > { %8189 = vrcp.f32 %v6496_v38  ;;  %v8188_v4 = vpop.eup %8187  ;;  %v6507_v63 = vadd.f32 1.0, %v8186_v32  ;;  %v7413_v32 = vld [vmem:[#allocation11] ss:$0 sm:$0xff] (!%p7412_p4) }
 0x992   : > { %8191 = vrcp.f32 %v6501_v36 }
 0x993   : > { %8193 = vrcp.f32 %v6507_v63 }
 0x995   : > { %v6520_v57 = vld [vmem:[#allocation2 + $0x70] sm:$0xff] (!%p7412_p4) }
 0x996   : > { %v6522_v38 = vmax.f32 (!%p7412_p4), %v6520_v57, 0.0 }
 0x99b   : > { %v8190_v30 = vpop.eup %8189 }
 0x99c   : > { %v8192_v23 = vpop.eup %8191  ;;  %v6510_v31 = vmul.f32 %v8190_v30, %v8188_v4 }
 0x99d   : > { %v6509_v11 = vmul.f32 %v8192_v23, %v10553_v9  ;;  %v8194_v3 = vpop.eup %8193  ;;  %v6524_v9 = vld [vmem:[%s10698_s5] sm:$0xff] (!%p7412_p4) }
 0x99e   : > { %v7457_v28 = vpack.c.bf16 (!%p7412_p4), %v6525_v42, %v6524_v9 }
 0x99f   : > { %v6511_v37 = vadd.f32 %v6510_v31, %v6509_v11 }
 0x9a0   : > { %7458 = vmatpush3.bf16.msra.mxu0 (!%p7412_p4), %v7457_v28 }
 0x9a1   : > { %8195 = vtanh.f32 %v6511_v37  ;;  %7460 = vmatprep.subr.bf16.mxu0 (!%p7412_p4), %v7459_v29 }
 0x9a4   : > { %7462 = vmatpush3.bf16.msra.mxu0 (!%p7412_p4), %v7461_v15 }
 0x9a5   : > { %7464 = vmatprep.subr.bf16.mxu0 (!%p7412_p4), %v7463_v40 }
 0x9a8   : > { %6519 = sbr.rel (%p7412_p4) target bundleno = 2713 (0xa99), region = 76  ;;  %7466 = vmatpush3.bf16.msra.mxu0 (!%p7412_p4), %v7465_v46 }
 0x9a9   : > { %7468 = vmatprep.subr.bf16.mxu0 (!%p7412_p4), %v7467_v34 }
 0x9ab   : > { %v8196_v39 = vpop.eup %8195 }
 0x9ac   : > { %v6513_v0 = vmul.f32 %v8196_v39, %v8194_v3  ;;  %7470 = vmatpush3.bf16.msra.mxu0 (!%p7412_p4), %v7469_v49 }
 0x9ad   : > { %7472 = vmatprep.subr.bf16.mxu0 (!%p7412_p4), %v7471_v8 }
 0x9ae   : > { %6515 = vst [vmem:[#allocation2 + $0x8] sm:$0xff] %v6513_v0 }
 0x9b0   : > { %7474 = vmatpush3.bf16.msra.mxu0 %v7473_v61 }
 0x9b1   : > { %7476 = vmatprep.subr.bf16.mxu0 %v7475_v35 }
 0x9b4   : > { %7478 = vmatpush3.bf16.msra.mxu0 %v7477_v20 }
 0x9b5   : > { %7480 = vmatprep.subr.bf16.mxu0 %v7479_v21 }
 0x9b8   : > { %7482 = vmatpush3.bf16.msra.mxu0 %v7481_v17 }
 0x9b9   : > { %7484 = vmatprep.subr.bf16.mxu0 %v7483_v2 }
 0x9bc   : > { %7486 = vmatpush3.bf16.msra.mxu0 %v7485_v59 }
 0x9bf   : > { %6628 = vmatmul.mubr.f32.vlgmr.msra.gmra.mrb[0].mxu0 %v6522_v38 }
 0xa92   : > { %v7452_v36 = vpop.f32.mrb[0].mxu0 }
 0xa93   : > { %v7453_v4 = vpop.f32.mrb[1].mxu0 }
 0xa94   : > { %v7454_v30 = vadd.f32 %v7453_v4, %v7452_v36 }
 0xa96   : > { %v6630_v23 = vadd.f32 %v7454_v30, %v7413_v32 }
 0xa98   : > { %6634 = vst.msk [vmem:[%s10700_s7] sm:$0xff] %vm6633_vm0, %v6630_v23 }
 0xa99 PF: > { %s10908_s27 = sld [smem:[#allocation17_spill]]  ;;  %s10909_s30 = sld [smem:[#allocation16_spill]] }
 0xa9a   : > { %s10910_s26 = sld [smem:[#allocation18_spill]]  ;;  %s10911_s24 = smov %s8383_s25 }
 0xa9f   : > { %p23_p3 = scmp.ge.s32.totalorder %s10908_s27, 22   ;;  %s10912_s25 = smov %s10909_s30 }
 0xaa1   :  { %25 = sbr.rel (!%p23_p3) target bundleno = 10 (0xa), region = 133 }
 0xaa8   :  { %6646 = vsyncpa [#allocation5], 1 }
 0xaa9   :  { %6648 = vsyncpa [#allocation5 + $0x1], 1 }
 0xaaa   :  { %6649 = vsyncpa [#allocation7], 1 }
 0xaab   :  { %6651 = vsyncpa [#allocation7 + $0x1], 1 }
 0xaac   :  { %6652 = vsyncpa [#allocation10], 1 }
 0xaad   :  { %6654 = vsyncpa [#allocation10 + $0x1], 1 }

</bundles_post_ra>
